<compile_context>
chip_gen: v6e
topology: v6e:2x2x1
jax: 0.10.0
libtpu: 0.0.40
codegen_flags: <defaults>
</compile_context>

<pallas_src>
import math
from functools import partial

import jax
import jax.numpy as jnp
from jax import lax
from jax.experimental import pallas as pl
from jax.experimental.pallas import tpu as pltpu


# Worst-case SparseConv3d(k=3, s=2) fan-out is 8 output voxels per input
# voxel; real point clouds stay well under ~1.2x.  The exact per-level active
# count is returned so callers can detect truncation if they lower this.
SPCONV_CAP_FACTOR = 4


def _round_up(x, m):
    return ((x + m - 1) // m) * m


# ----------------------------------------------------------------------------
# Pallas kernel: fused (tm, K)bf16 @ (K, cout)bf16 -> f32 acc, +bias (BN scale
# pre-folded into the weights), ReLU, active-row mask, cast to bf16.
# One kernel invocation per (SubM/Sparse)Conv3d + BN + ReLU block.
# ----------------------------------------------------------------------------
def _gemm_bias_relu_kernel(x_ref, w_ref, bias_ref, valid_ref, o_ref):
    acc = jnp.dot(x_ref[...], w_ref[...], preferred_element_type=jnp.float32)
    y = jnp.maximum(acc + bias_ref[...], 0.0)
    # valid_ref is (tm, 1): zero out padded / inactive rows in-kernel
    # (free VPU work, avoids a separate HBM masking pass).
    o_ref[...] = (y * valid_ref[...]).astype(o_ref.dtype)


def _choose_tm(m):
    """Largest row tile (<=1024) dividing m; prefer an even step count so the
    two v7x TensorCores split the 'parallel' grid axis evenly."""
    fallback = None
    for tm in (1024, 512, 256, 128):
        if m % tm == 0:
            steps = m // tm
            if steps >= 2 and steps % 2 == 0:
                return tm
            if fallback is None and steps >= 2:
                fallback = tm
    if fallback is not None:
        return fallback
    return min(m, 128)


def fused_gemm_bn_relu(cols, w, bias, valid, out_dtype=jnp.bfloat16):
    """cols: (M, K) bf16 active-row im2col; w: (K, cout) bf16 (BN scale folded
    in); bias: (1, cout) f32; valid: (M, 1) f32.  M is a multiple of 128; K and
    cout are the true (unpadded) sizes and equal the full array extents, which
    satisfies the block-shape rule without any padding."""
    m, k = cols.shape
    cout = w.shape[1]
    assert m % 128 == 0 and k == w.shape[0]
    tm = _choose_tm(m)
    assert m % tm == 0
    return pl.pallas_call(
        _gemm_bias_relu_kernel,
        out_shape=jax.ShapeDtypeStruct((m, cout), out_dtype),
        grid=(m // tm,),
        in_specs=[
            pl.BlockSpec((tm, k), lambda i: (i, 0)),
            pl.BlockSpec((k, cout), lambda i: (0, 0)),
            pl.BlockSpec((1, cout), lambda i: (0, 0)),
            pl.BlockSpec((tm, 1), lambda i: (i, 0)),
        ],
        out_specs=pl.BlockSpec((tm, cout), lambda i: (i, 0)),
        compiler_params=pltpu.CompilerParams(
            dimension_semantics=("parallel",),
            # Largest double-buffered working set (tm=1024, K=1728 bf16 cols +
            # weights + compact bf16 output) is < 9 MiB; well under the default
            # scoped VMEM (16 MiB on v5e, 32 MiB on v6e/v7x) and v7x's 64 MiB
            # physical VMEM.  The explicit 32 MiB limit just leaves headroom.
            vmem_limit_bytes=32 * 1024 * 1024,
        ),
    )(cols, w, bias, valid)


# ----------------------------------------------------------------------------
# Sparse "rulebook" plumbing (plain JAX, runs once per level / indice_key).
# Sorted flat codes + binary search replace the dense (B,D,H,W) row-id grid.
# ----------------------------------------------------------------------------
def _flat_code(b, z, y, x, shape):
    D, H, W = shape
    return ((b * D + z) * H + y) * W + x


def _sort_codes(coords, valid, batch_size, shape):
    """Sorted flat codes of the active voxels + permutation back to row ids.
    NOTE: flat codes are int32; for grids with > 2**31 cells use int64 or
    per-batch codes."""
    D, H, W = shape
    sent = batch_size * D * H * W
    code = _flat_code(coords[:, 0], coords[:, 1], coords[:, 2], coords[:, 3],
                      shape)
    code = jnp.where(valid > 0, code, sent).astype(jnp.int32)
    order = jnp.argsort(code).astype(jnp.int32)
    return code[order], order


def _build_nbr(coords_out, valid_out, sorted_code, order, in_shape, ksize,
               stride, pad, miss):
    """Neighbor table (cap_out, kvol): input row index per kernel tap; `miss`
    for empty / out-of-bounds taps and for invalid output rows.  Lookup is a
    single vectorized binary search over the compact sorted code list."""
    D, H, W = in_shape
    kd, kh, kw = ksize
    sd, sh, sw = stride
    pd, ph, pw = pad
    b = coords_out[:, 0]
    z, y, x = coords_out[:, 1], coords_out[:, 2], coords_out[:, 3]
    qcodes, inb = [], []
    for i in range(kd):
        for j in range(kh):
            for k in range(kw):
                iz = z * sd - pd + i
                iy = y * sh - ph + j
                ix = x * sw - pw + k
                ok = ((iz >= 0) & (iz < D) & (iy >= 0) & (iy < H)
                      & (ix >= 0) & (ix < W))
                qcodes.append(_flat_code(b,
                                         jnp.clip(iz, 0, D - 1),
                                         jnp.clip(iy, 0, H - 1),
                                         jnp.clip(ix, 0, W - 1), in_shape))
                inb.append(ok)
    q = jnp.stack(qcodes, axis=1).astype(jnp.int32)        # (cap_out, kvol)
    inb = jnp.stack(inb, axis=1)
    pos = jnp.searchsorted(sorted_code, q.reshape(-1)).reshape(q.shape)
    pos = jnp.minimum(pos, sorted_code.shape[0] - 1)
    hit = sorted_code[pos] == q
    row = order[pos]
    keep = inb & hit & (valid_out[:, None] > 0)
    return jnp.where(keep, row, miss).astype(jnp.int32)


def _axis_candidates(v, k, s, p, n_out):
    """Output positions along one axis whose receptive field contains v."""
    ncand = (k - 1) // s + 1
    o_min = -((-(v + p - k + 1)) // s)          # ceil((v + p - k + 1) / s)
    o_max = (v + p) // s
    outs, oks = [], []
    for t in range(ncand):
        o = o_min + t
        oks.append((o >= 0) & (o < n_out) & (o <= o_max))
        outs.append(o)
    return jnp.stack(outs, 1), jnp.stack(oks, 1)


def _downsample_active_set(coords_in, valid_in, batch_size, ksize, stride, pad,
                           out_shape, cap_out):
    """Unique output-active coords for a SparseConv3d (candidate enumeration +
    sort-dedupe).  Also returns the exact active count (truncation guard)."""
    Do, Ho, Wo = out_shape
    b = coords_in[:, 0]
    oz, vz = _axis_candidates(coords_in[:, 1], ksize[0], stride[0], pad[0], Do)
    oy, vy = _axis_candidates(coords_in[:, 2], ksize[1], stride[1], pad[1], Ho)
    ox, vx = _axis_candidates(coords_in[:, 3], ksize[2], stride[2], pad[2], Wo)
    sent = batch_size * Do * Ho * Wo            # sentinel flat code (int32)
    OZ, VZ = oz[:, :, None, None], vz[:, :, None, None]
    OY, VY = oy[:, None, :, None], vy[:, None, :, None]
    OX, VX = ox[:, None, None, :], vx[:, None, None, :]
    BB = b[:, None, None, None]
    ok = VZ & VY & VX & (valid_in > 0)[:, None, None, None]
    code = ((BB * Do + OZ) * Ho + OY) * Wo + OX
    code = jnp.where(ok, code, sent).reshape(-1).astype(jnp.int32)
    code = jnp.sort(code)
    dup = jnp.concatenate([jnp.zeros((1,), bool), code[1:] == code[:-1]])
    code = jnp.where(dup, sent, code)
    num_active = jnp.sum(code < sent).astype(jnp.int32)
    code = jnp.sort(code)
    if code.shape[0] < cap_out:
        code = jnp.concatenate(
            [code, jnp.full((cap_out - code.shape[0],), sent, code.dtype)])
    code = code[:cap_out]
    valid_out = (code < sent).astype(jnp.float32)
    c = jnp.where(code < sent, code, 0)
    bo = c // (Do * Ho * Wo)
    r = c % (Do * Ho * Wo)
    zo = r // (Ho * Wo)
    r = r % (Ho * Wo)
    yo = r // Wo
    xo = r % Wo
    coords_out = jnp.stack([bo, zo, yo, xo], axis=1).astype(jnp.int32)
    return coords_out, valid_out, num_active


def _make_level(feats, coords, valid, shape, batch_size, num_active, *,
                subm_nbr=True):
    cap = coords.shape[0]
    sorted_code, order = _sort_codes(coords, valid, batch_size, shape)
    lvl = dict(feats=feats, coords=coords, valid=valid, shape=shape, cap=cap,
               num_active=num_active, sorted_code=sorted_code, order=order,
               subm_nbr=None)
    if subm_nbr:
        # Shared rulebook for all SubMConv3d(k=3, pad=1) at this level
        # (mirrors spconv indice_key sharing).
        lvl["subm_nbr"] = _build_nbr(coords, valid, sorted_code, order, shape,
                                     (3, 3, 3), (1, 1, 1), (1, 1, 1), cap)
    return lvl


def _gather_cols(feats, nbr):
    """Active-row im2col at true width: (cap_out, kvol * c) bf16.
    # TODO(synk): fuse this gather into the Pallas kernel once Mosaic exposes
    # a large-table row gather; until then XLA materializes cols once in HBM."""
    cap_out, kvol = nbr.shape
    c = feats.shape[1]
    f_ext = jnp.concatenate([feats, jnp.zeros((1, c), feats.dtype)], axis=0)
    return jnp.take(f_ext, nbr, axis=0).reshape(cap_out, kvol * c)


def _subm_block(level, p):
    cols = _gather_cols(level["feats"], level["subm_nbr"])
    out = fused_gemm_bn_relu(cols, p["w"], p["bias"], level["valid"][:, None])
    new = dict(level)
    new["feats"] = out
    return new


def _out_spatial_shape(in_shape, ksize, stride, pad):
    return tuple((d + 2 * pp - kk) // ss + 1
                 for d, kk, ss, pp in zip(in_shape, ksize, stride, pad))


def _spconv_block(level, p, ksize, stride, pad, batch_size, *,
                  subm_nbr_out=True):
    out_shape = _out_spatial_shape(level["shape"], ksize, stride, pad)
    ncand = 1
    for kk, ss in zip(ksize, stride):
        ncand *= (kk - 1) // ss + 1
    total_out = batch_size * out_shape[0] * out_shape[1] * out_shape[2]
    cap_out = _round_up(
        min(level["cap"] * ncand, total_out,
            level["cap"] * SPCONV_CAP_FACTOR), 128)
    coords_o, valid_o, num_act = _downsample_active_set(
        level["coords"], level["valid"], batch_size, ksize, stride, pad,
        out_shape, cap_out)
    nbr = _build_nbr(coords_o, valid_o, level["sorted_code"], level["order"],
                     level["shape"], ksize, stride, pad, level["cap"])
    cols = _gather_cols(level["feats"], nbr)
    out = fused_gemm_bn_relu(cols, p["w"], p["bias"], valid_o[:, None])
    return _make_level(out, coords_o, valid_o, out_shape, batch_size, num_act,
                       subm_nbr=subm_nbr_out)


# ----------------------------------------------------------------------------
# Parameters: conv weight with eval-mode BN scale folded in, plus bias.
# ----------------------------------------------------------------------------
def init_conv_bn(key, ksize, cin, cout, eps=1e-3):
    kd, kh, kw = ksize
    kvol = kd * kh * kw
    k_real = kvol * cin
    w = jax.random.normal(key, (kvol, cin, cout), jnp.float32)
    w = w * (1.0 / math.sqrt(k_real))
    gamma = jnp.ones((cout,), jnp.float32)
    beta = jnp.zeros((cout,), jnp.float32)
    run_mean = jnp.zeros((cout,), jnp.float32)
    run_var = jnp.ones((cout,), jnp.float32)
    scale = gamma / jnp.sqrt(run_var + eps)
    bias = beta - run_mean * scale
    w_folded = (w.reshape(k_real, cout) * scale[None, :]).astype(jnp.bfloat16)
    return dict(w=w_folded, bias=bias[None, :])


def init_params(key, input_channels):
    keys = jax.random.split(key, 12)
    k = iter(keys)
    p = {}
    p["conv_input"] = init_conv_bn(next(k), (3, 3, 3), input_channels, 16)
    p["conv1_0"]    = init_conv_bn(next(k), (3, 3, 3), 16, 16)
    p["conv2_0"]    = init_conv_bn(next(k), (3, 3, 3), 16, 32)
    p["conv2_1"]    = init_conv_bn(next(k), (3, 3, 3), 32, 32)
    p["conv2_2"]    = init_conv_bn(next(k), (3, 3, 3), 32, 32)
    p["conv3_0"]    = init_conv_bn(next(k), (3, 3, 3), 32, 64)
    p["conv3_1"]    = init_conv_bn(next(k), (3, 3, 3), 64, 64)
    p["conv3_2"]    = init_conv_bn(next(k), (3, 3, 3), 64, 64)
    p["conv4_0"]    = init_conv_bn(next(k), (3, 3, 3), 64, 64)
    p["conv4_1"]    = init_conv_bn(next(k), (3, 3, 3), 64, 64)
    p["conv4_2"]    = init_conv_bn(next(k), (3, 3, 3), 64, 64)
    p["conv_out"]   = init_conv_bn(next(k), (3, 1, 1), 64, 128)
    return p


# ----------------------------------------------------------------------------
# VoxelBackBone8x forward (non-spherical path, last_pad = 0).
# Returns SPARSE tensors per level (features / indices / valid / num_voxels).
# ----------------------------------------------------------------------------
@partial(jax.jit, static_argnames=("batch_size", "sparse_shape"))
def _forward_jit(voxel_features, voxel_coords, batch_size, sparse_shape,
                 params):
    B = batch_size
    n, cin = voxel_features.shape
    cap1 = _round_up(max(n, 128), 128)
    feats1 = jnp.zeros((cap1, cin), jnp.bfloat16).at[:n].set(
        voxel_features.astype(jnp.bfloat16))
    coords1 = jnp.zeros((cap1, 4), jnp.int32).at[:n].set(
        voxel_coords.astype(jnp.int32))
    valid1 = jnp.zeros((cap1,), jnp.float32).at[:n].set(1.0)
    lvl1 = _make_level(feats1, coords1, valid1, tuple(sparse_shape), B,
                       jnp.asarray(n, jnp.int32))

    # conv_input + conv1: SubMConv3d share indice_key 'subm1' -> shared rulebook
    x = _subm_block(lvl1, params["conv_input"])
    x_conv1 = _subm_block(x, params["conv1_0"])

    # conv2: SparseConv(16->32, s=2, p=1) + 2x SubM(32)   ('subm2')
    x = _spconv_block(x_conv1, params["conv2_0"], (3, 3, 3), (2, 2, 2),
                      (1, 1, 1), B)
    x = _subm_block(x, params["conv2_1"])
    x_conv2 = _subm_block(x, params["conv2_2"])

    # conv3: SparseConv(32->64, s=2, p=1) + 2x SubM(64)   ('subm3')
    x = _spconv_block(x_conv2, params["conv3_0"], (3, 3, 3), (2, 2, 2),
                      (1, 1, 1), B)
    x = _subm_block(x, params["conv3_1"])
    x_conv3 = _subm_block(x, params["conv3_2"])

    # conv4: SparseConv(64->64, s=2, p=(0,1,1)) + 2x SubM(64)   ('subm4')
    x = _spconv_block(x_conv3, params["conv4_0"], (3, 3, 3), (2, 2, 2),
                      (0, 1, 1), B)
    x = _subm_block(x, params["conv4_1"])
    x_conv4 = _subm_block(x, params["conv4_2"])

    # conv_out: SparseConv(64->128, k=(3,1,1), s=(2,1,1), p=0)
    out_lvl = _spconv_block(x_conv4, params["conv_out"], (3, 1, 1), (2, 1, 1),
                            (0, 0, 0), B, subm_nbr_out=False)

    def sparse(level):
        return dict(features=level["feats"], indices=level["coords"],
                    valid=level["valid"], num_voxels=level["num_active"])

    return {
        "encoded_spconv_tensor": sparse(out_lvl),
        "multi_scale_3d_features": {
            "x_conv1": sparse(x_conv1), "x_conv2": sparse(x_conv2),
            "x_conv3": sparse(x_conv3), "x_conv4": sparse(x_conv4)},
    }


def voxel_backbone_8x_forward(voxel_features, voxel_coords, batch_size,
                              sparse_shape, params):
    sparse_shape = tuple(int(s) for s in sparse_shape)
    out = _forward_jit(voxel_features, voxel_coords, batch_size, sparse_shape,
                       params)
    # Attach static metadata (spatial shapes / strides), mirroring spconv.
    s1 = sparse_shape
    s2 = _out_spatial_shape(s1, (3, 3, 3), (2, 2, 2), (1, 1, 1))
    s3 = _out_spatial_shape(s2, (3, 3, 3), (2, 2, 2), (1, 1, 1))
    s4 = _out_spatial_shape(s3, (3, 3, 3), (2, 2, 2), (0, 1, 1))
    so = _out_spatial_shape(s4, (3, 1, 1), (2, 1, 1), (0, 0, 0))
    out["encoded_spconv_tensor"]["spatial_shape"] = so
    out["encoded_spconv_tensor_stride"] = 8
    shapes = dict(x_conv1=s1, x_conv2=s2, x_conv3=s3, x_conv4=s4)
    for name, lvl in out["multi_scale_3d_features"].items():
        lvl["spatial_shape"] = shapes[name]
    out["multi_scale_3d_strides"] = dict(x_conv1=1, x_conv2=2, x_conv3=4,
                                         x_conv4=8)
    return out


# ----------------------------------------------------------------------------
# Dense reference (plain JAX, f32 conv) and densify helper, used ONLY for the
# self-check in __main__ (the jitted forward path stays fully sparse).
# ----------------------------------------------------------------------------
def _densify(features, indices, valid, spatial_shape, batch_size):
    D, H, W = spatial_shape
    c = features.shape[1]
    f = features.astype(jnp.float32) * valid[:, None]
    b = jnp.where(valid > 0, indices[:, 0], batch_size)   # OOB batch -> dropped
    dense = jnp.zeros((batch_size, D, H, W, c), jnp.float32)
    dense = dense.at[b, indices[:, 1], indices[:, 2], indices[:, 3]].set(
        f, mode="drop")
    mask = jnp.zeros((batch_size, D, H, W), jnp.float32)
    mask = mask.at[b, indices[:, 1], indices[:, 2], indices[:, 3]].set(
        1.0, mode="drop")
    return dense, mask


def _ref_block(x, mask, p, ksize, stride, pad, cin, cout, subm):
    kd, kh, kw = ksize
    w = p["w"].astype(jnp.float32).reshape(kd, kh, kw, cin, cout)
    bias = p["bias"][0]
    y = lax.conv_general_dilated(
        x, w, window_strides=stride,
        padding=[(pad[0], pad[0]), (pad[1], pad[1]), (pad[2], pad[2])],
        dimension_numbers=("NDHWC", "DHWIO", "NDHWC"))
    y = jnp.maximum(y + bias, 0.0)
    if subm:
        new_mask = mask
    else:
        new_mask = lax.reduce_window(
            mask, 0.0, lax.max, (1,) + tuple(ksize), (1,) + tuple(stride),
            [(0, 0)] + [(q, q) for q in pad])
        new_mask = (new_mask > 0).astype(jnp.float32)
    y = (y * new_mask[..., None]).astype(jnp.bfloat16).astype(jnp.float32)
    return y, new_mask


def dense_reference_forward(voxel_features, voxel_coords, batch_size,
                            sparse_shape, params):
    D, H, W = sparse_shape
    cin = voxel_features.shape[1]
    b, z, y, x = (voxel_coords[:, i] for i in range(4))
    x0 = jnp.zeros((batch_size, D, H, W, cin), jnp.float32)
    x0 = x0.at[b, z, y, x].set(
        voxel_features.astype(jnp.bfloat16).astype(jnp.float32))
    mask = jnp.zeros((batch_size, D, H, W), jnp.float32).at[b, z, y, x].set(1.0)

    xx, m = _ref_block(x0, mask, params["conv_input"], (3, 3, 3), (1, 1, 1), (1, 1, 1), cin, 16, True)
    x1, m1 = _ref_block(xx, m, params["conv1_0"], (3, 3, 3), (1, 1, 1), (1, 1, 1), 16, 16, True)
    xx, m = _ref_block(x1, m1, params["conv2_0"], (3, 3, 3), (2, 2, 2), (1, 1, 1), 16, 32, False)
    xx, m = _ref_block(xx, m, params["conv2_1"], (3, 3, 3), (1, 1, 1), (1, 1, 1), 32, 32, True)
    x2, m2 = _ref_block(xx, m, params["conv2_2"], (3, 3, 3), (1, 1, 1), (1, 1, 1), 32, 32, True)
    xx, m = _ref_block(x2, m2, params["conv3_0"], (3, 3, 3), (2, 2, 2), (1, 1, 1), 32, 64, False)
    xx, m = _ref_block(xx, m, params["conv3_1"], (3, 3, 3), (1, 1, 1), (1, 1, 1), 64, 64, True)
    x3, m3 = _ref_block(xx, m, params["conv3_2"], (3, 3, 3), (1, 1, 1), (1, 1, 1), 64, 64, True)
    xx, m = _ref_block(x3, m3, params["conv4_0"], (3, 3, 3), (2, 2, 2), (0, 1, 1), 64, 64, False)
    xx, m = _ref_block(xx, m, params["conv4_1"], (3, 3, 3), (1, 1, 1), (1, 1, 1), 64, 64, True)
    x4, m4 = _ref_block(xx, m, params["conv4_2"], (3, 3, 3), (1, 1, 1), (1, 1, 1), 64, 64, True)
    enc, me = _ref_block(x4, m4, params["conv_out"], (3, 1, 1), (2, 1, 1), (0, 0, 0), 64, 128, False)
    return dict(enc=enc, enc_mask=me, x_conv1=x1, x_conv2=x2, x_conv3=x3,
                x_conv4=x4, m1=m1, m2=m2, m3=m3, m4=m4)


# ----------------------------------------------------------------------------
if __name__ == "__main__":
    key = jax.random.PRNGKey(0)
    k_feat, k_idx, k_param = jax.random.split(key, 3)

    # grid_size = [x=16, y=16, z=24]  ->  sparse_shape = [z+1, y, x] = [25,16,16]
    grid_size = (16, 16, 24)
    sparse_shape = (grid_size[2] + 1, grid_size[1], grid_size[0])
    batch_size = 2
    input_channels = 4
    num_voxels = 256

    D, H, W = sparse_shape
    total_cells = batch_size * D * H * W
    flat_idx = jax.random.choice(k_idx, total_cells, shape=(num_voxels,),
                                 replace=False)
    b = flat_idx // (D * H * W)
    rem = flat_idx % (D * H * W)
    z = rem // (H * W)
    rem = rem % (H * W)
    y = rem // W
    x = rem % W
    voxel_coords = jnp.stack([b, z, y, x], axis=1).astype(jnp.int32)   # (N, 4)
    voxel_features = jax.random.normal(
        k_feat, (num_voxels, input_channels), jnp.float32)             # (N, C)

    params = init_params(k_param, input_channels)

    out_dict = voxel_backbone_8x_forward(
        voxel_features, voxel_coords, batch_size=batch_size,
        sparse_shape=sparse_shape, params=params)

    enc = out_dict["encoded_spconv_tensor"]
    jax.block_until_ready(enc["features"])
    for lvl in out_dict["multi_scale_3d_features"].values():
        jax.block_until_ready(lvl["features"])

    assert enc["features"].shape[1] == 128
    assert bool(jnp.all(jnp.isfinite(enc["features"].astype(jnp.float32))))

    # Truncation guard: the exact active counts must fit the level capacities.
    assert int(enc["num_voxels"]) <= enc["features"].shape[0]
    for name, lvl in out_dict["multi_scale_3d_features"].items():
        assert int(lvl["num_voxels"]) <= lvl["features"].shape[0], name

    # ---- self-check against a dense-conv reference of the same semantics ----
    ref = dense_reference_forward(voxel_features, voxel_coords, batch_size,
                                  sparse_shape, params)

    def dens(lvl):
        return _densify(lvl["features"], lvl["indices"], lvl["valid"],
                        lvl["spatial_shape"], batch_size)

    enc_dense, enc_mask = dens(enc)
    d1, m1 = dens(out_dict["multi_scale_3d_features"]["x_conv1"])
    d2, m2 = dens(out_dict["multi_scale_3d_features"]["x_conv2"])
    d3, m3 = dens(out_dict["multi_scale_3d_features"]["x_conv3"])
    d4, m4 = dens(out_dict["multi_scale_3d_features"]["x_conv4"])

    assert enc_dense.shape == (batch_size, 1, 2, 2, 128), enc_dense.shape

    def rel_err(a, bb):
        return float(jnp.max(jnp.abs(a - bb)) / (jnp.max(jnp.abs(bb)) + 1e-6))

    assert bool(jnp.array_equal(enc_mask, ref["enc_mask"]))
    assert bool(jnp.array_equal(m1, ref["m1"]))
    assert bool(jnp.array_equal(m2, ref["m2"]))
    assert bool(jnp.array_equal(m3, ref["m3"]))
    assert bool(jnp.array_equal(m4, ref["m4"]))

    assert rel_err(d1, ref["x_conv1"]) < 5e-2
    assert rel_err(d2, ref["x_conv2"]) < 5e-2
    assert rel_err(d3, ref["x_conv3"]) < 5e-2
    assert rel_err(d4, ref["x_conv4"]) < 5e-2
    assert rel_err(enc_dense, ref["enc"]) < 5e-2

    print("KERNEL_OK")
</pallas_src>

<mosaic_0001>
module attributes {stable_mosaic.version = 11 : i64} {
  func.func @_gemm_bias_relu_kernel(%arg0: i32, %arg1: memref<128x108xbf16, #tpu.memory_space<vmem>>, %arg2: memref<108x16xbf16, #tpu.memory_space<vmem>>, %arg3: memref<1x16xf32, #tpu.memory_space<vmem>>, %arg4: memref<128x1xf32, #tpu.memory_space<vmem>>, %arg5: memref<128x16xbf16, #tpu.memory_space<vmem>>) attributes {dimension_semantics = [#tpu.dimension_semantics<parallel>], iteration_bounds = array<i64: 2>, scalar_prefetch = 0 : i64, scratch_operands = 0 : i64, tpu.core_type = #tpu.core_type<tc>, window_params = [{transform_indices = @transform_0, window_bounds = array<i64: 128, 108>}, {pipeline_mode = #tpu.pipeline_mode<synchronous>, transform_indices = @transform_1, window_bounds = array<i64: 108, 16>}, {pipeline_mode = #tpu.pipeline_mode<synchronous>, transform_indices = @transform_2, window_bounds = array<i64: 1, 16>}, {transform_indices = @transform_3, window_bounds = array<i64: 128, 1>}, {transform_indices = @transform_4, window_bounds = array<i64: 128, 16>}]} {
    %c0 = arith.constant 0 : index
    %c0_0 = arith.constant 0 : index
    %0 = vector.load %arg1[%c0, %c0_0] : memref<128x108xbf16, #tpu.memory_space<vmem>>, vector<128x108xbf16>
    %c0_1 = arith.constant 0 : index
    %c0_2 = arith.constant 0 : index
    %1 = vector.load %arg2[%c0_1, %c0_2] : memref<108x16xbf16, #tpu.memory_space<vmem>>, vector<108x16xbf16>
    %cst = arith.constant dense<0.000000e+00> : vector<128x16xf32>
    %2 = tpu.matmul %0, %1, %cst {dimension_numbers = #tpu.dot_dimension_numbers<[1], [0], [0], [1], [0, 0, 1, 1], [], []>} : vector<128x108xbf16>, vector<108x16xbf16>, vector<128x16xf32> -> vector<128x16xf32>
    %c0_3 = arith.constant 0 : index
    %c0_4 = arith.constant 0 : index
    %3 = vector.load %arg3[%c0_3, %c0_4] : memref<1x16xf32, #tpu.memory_space<vmem>>, vector<1x16xf32>
    %4 = vector.broadcast %3 : vector<1x16xf32> to vector<128x16xf32>
    %5 = arith.addf %2, %4 : vector<128x16xf32>
    %cst_5 = arith.constant 0.000000e+00 : f32
    %6 = vector.broadcast %cst_5 : f32 to vector<128x16xf32>
    %7 = arith.maximumf %5, %6 : vector<128x16xf32>
    %c0_6 = arith.constant 0 : index
    %c0_7 = arith.constant 0 : index
    %8 = vector.load %arg4[%c0_6, %c0_7] : memref<128x1xf32, #tpu.memory_space<vmem>>, vector<128x1xf32>
    %9 = vector.broadcast %8 : vector<128x1xf32> to vector<128x16xf32>
    %10 = arith.mulf %7, %9 : vector<128x16xf32>
    %11 = arith.truncf %10 : vector<128x16xf32> to vector<128x16xbf16>
    %c0_8 = arith.constant 0 : index
    %c0_9 = arith.constant 0 : index
    %12 = vector.load %arg5[%c0_8, %c0_9] : memref<128x16xbf16, #tpu.memory_space<vmem>>, vector<128x16xbf16>
    tpu.vector_store %arg5[%c0_8, %c0_9], %11 {strides = array<i32>} : memref<128x16xbf16, #tpu.memory_space<vmem>>, vector<128x16xbf16>,
    return
  }
  func.func @transform_0(%arg0: i32) -> (i32, i32) {
    %c0_i32 = arith.constant 0 : i32
    %c0_i32_0 = arith.constant 0 : i32
    return %arg0, %c0_i32 : i32, i32
  }
  func.func @transform_1(%arg0: i32) -> (i32, i32) {
    %c0_i32 = arith.constant 0 : i32
    %c0_i32_0 = arith.constant 0 : i32
    %c0_i32_1 = arith.constant 0 : i32
    return %c0_i32, %c0_i32_0 : i32, i32
  }
  func.func @transform_2(%arg0: i32) -> (i32, i32) {
    %c0_i32 = arith.constant 0 : i32
    %c0_i32_0 = arith.constant 0 : i32
    %c0_i32_1 = arith.constant 0 : i32
    return %c0_i32, %c0_i32_0 : i32, i32
  }
  func.func @transform_3(%arg0: i32) -> (i32, i32) {
    %c0_i32 = arith.constant 0 : i32
    %c0_i32_0 = arith.constant 0 : i32
    return %arg0, %c0_i32 : i32, i32
  }
  func.func @transform_4(%arg0: i32) -> (i32, i32) {
    %c0_i32 = arith.constant 0 : i32
    %c0_i32_0 = arith.constant 0 : i32
    return %arg0, %c0_i32 : i32, i32
  }
}

module attributes {stable_mosaic.version = 11 : i64} {
  func.func @_gemm_bias_relu_kernel(%arg0: i32, %arg1: memref<128x432xbf16, #tpu.memory_space<vmem>>, %arg2: memref<432x16xbf16, #tpu.memory_space<vmem>>, %arg3: memref<1x16xf32, #tpu.memory_space<vmem>>, %arg4: memref<128x1xf32, #tpu.memory_space<vmem>>, %arg5: memref<128x16xbf16, #tpu.memory_space<vmem>>) attributes {dimension_semantics = [#tpu.dimension_semantics<parallel>], iteration_bounds = array<i64: 2>, scalar_prefetch = 0 : i64, scratch_operands = 0 : i64, tpu.core_type = #tpu.core_type<tc>, window_params = [{transform_indices = @transform_0, window_bounds = array<i64: 128, 432>}, {pipeline_mode = #tpu.pipeline_mode<synchronous>, transform_indices = @transform_1, window_bounds = array<i64: 432, 16>}, {pipeline_mode = #tpu.pipeline_mode<synchronous>, transform_indices = @transform_2, window_bounds = array<i64: 1, 16>}, {transform_indices = @transform_3, window_bounds = array<i64: 128, 1>}, {transform_indices = @transform_4, window_bounds = array<i64: 128, 16>}]} {
    %c0 = arith.constant 0 : index
    %c0_0 = arith.constant 0 : index
    %0 = vector.load %arg1[%c0, %c0_0] : memref<128x432xbf16, #tpu.memory_space<vmem>>, vector<128x432xbf16>
    %c0_1 = arith.constant 0 : index
    %c0_2 = arith.constant 0 : index
    %1 = vector.load %arg2[%c0_1, %c0_2] : memref<432x16xbf16, #tpu.memory_space<vmem>>, vector<432x16xbf16>
    %cst = arith.constant dense<0.000000e+00> : vector<128x16xf32>
    %2 = tpu.matmul %0, %1, %cst {dimension_numbers = #tpu.dot_dimension_numbers<[1], [0], [0], [1], [0, 0, 1, 1], [], []>} : vector<128x432xbf16>, vector<432x16xbf16>, vector<128x16xf32> -> vector<128x16xf32>
    %c0_3 = arith.constant 0 : index
    %c0_4 = arith.constant 0 : index
    %3 = vector.load %arg3[%c0_3, %c0_4] : memref<1x16xf32, #tpu.memory_space<vmem>>, vector<1x16xf32>
    %4 = vector.broadcast %3 : vector<1x16xf32> to vector<128x16xf32>
    %5 = arith.addf %2, %4 : vector<128x16xf32>
    %cst_5 = arith.constant 0.000000e+00 : f32
    %6 = vector.broadcast %cst_5 : f32 to vector<128x16xf32>
    %7 = arith.maximumf %5, %6 : vector<128x16xf32>
    %c0_6 = arith.constant 0 : index
    %c0_7 = arith.constant 0 : index
    %8 = vector.load %arg4[%c0_6, %c0_7] : memref<128x1xf32, #tpu.memory_space<vmem>>, vector<128x1xf32>
    %9 = vector.broadcast %8 : vector<128x1xf32> to vector<128x16xf32>
    %10 = arith.mulf %7, %9 : vector<128x16xf32>
    %11 = arith.truncf %10 : vector<128x16xf32> to vector<128x16xbf16>
    %c0_8 = arith.constant 0 : index
    %c0_9 = arith.constant 0 : index
    %12 = vector.load %arg5[%c0_8, %c0_9] : memref<128x16xbf16, #tpu.memory_space<vmem>>, vector<128x16xbf16>
    tpu.vector_store %arg5[%c0_8, %c0_9], %11 {strides = array<i32>} : memref<128x16xbf16, #tpu.memory_space<vmem>>, vector<128x16xbf16>,
    return
  }
  func.func @transform_0(%arg0: i32) -> (i32, i32) {
    %c0_i32 = arith.constant 0 : i32
    %c0_i32_0 = arith.constant 0 : i32
    return %arg0, %c0_i32 : i32, i32
  }
  func.func @transform_1(%arg0: i32) -> (i32, i32) {
    %c0_i32 = arith.constant 0 : i32
    %c0_i32_0 = arith.constant 0 : i32
    %c0_i32_1 = arith.constant 0 : i32
    return %c0_i32, %c0_i32_0 : i32, i32
  }
  func.func @transform_2(%arg0: i32) -> (i32, i32) {
    %c0_i32 = arith.constant 0 : i32
    %c0_i32_0 = arith.constant 0 : i32
    %c0_i32_1 = arith.constant 0 : i32
    return %c0_i32, %c0_i32_0 : i32, i32
  }
  func.func @transform_3(%arg0: i32) -> (i32, i32) {
    %c0_i32 = arith.constant 0 : i32
    %c0_i32_0 = arith.constant 0 : i32
    return %arg0, %c0_i32 : i32, i32
  }
  func.func @transform_4(%arg0: i32) -> (i32, i32) {
    %c0_i32 = arith.constant 0 : i32
    %c0_i32_0 = arith.constant 0 : i32
    return %arg0, %c0_i32 : i32, i32
  }
}

module attributes {stable_mosaic.version = 11 : i64} {
  func.func @_gemm_bias_relu_kernel(%arg0: i32, %arg1: memref<512x432xbf16, #tpu.memory_space<vmem>>, %arg2: memref<432x32xbf16, #tpu.memory_space<vmem>>, %arg3: memref<1x32xf32, #tpu.memory_space<vmem>>, %arg4: memref<512x1xf32, #tpu.memory_space<vmem>>, %arg5: memref<512x32xbf16, #tpu.memory_space<vmem>>) attributes {dimension_semantics = [#tpu.dimension_semantics<parallel>], iteration_bounds = array<i64: 2>, scalar_prefetch = 0 : i64, scratch_operands = 0 : i64, tpu.core_type = #tpu.core_type<tc>, window_params = [{transform_indices = @transform_0, window_bounds = array<i64: 512, 432>}, {pipeline_mode = #tpu.pipeline_mode<synchronous>, transform_indices = @transform_1, window_bounds = array<i64: 432, 32>}, {pipeline_mode = #tpu.pipeline_mode<synchronous>, transform_indices = @transform_2, window_bounds = array<i64: 1, 32>}, {transform_indices = @transform_3, window_bounds = array<i64: 512, 1>}, {transform_indices = @transform_4, window_bounds = array<i64: 512, 32>}]} {
    %c0 = arith.constant 0 : index
    %c0_0 = arith.constant 0 : index
    %0 = vector.load %arg1[%c0, %c0_0] : memref<512x432xbf16, #tpu.memory_space<vmem>>, vector<512x432xbf16>
    %c0_1 = arith.constant 0 : index
    %c0_2 = arith.constant 0 : index
    %1 = vector.load %arg2[%c0_1, %c0_2] : memref<432x32xbf16, #tpu.memory_space<vmem>>, vector<432x32xbf16>
    %cst = arith.constant dense<0.000000e+00> : vector<512x32xf32>
    %2 = tpu.matmul %0, %1, %cst {dimension_numbers = #tpu.dot_dimension_numbers<[1], [0], [0], [1], [0, 0, 1, 1], [], []>} : vector<512x432xbf16>, vector<432x32xbf16>, vector<512x32xf32> -> vector<512x32xf32>
    %c0_3 = arith.constant 0 : index
    %c0_4 = arith.constant 0 : index
    %3 = vector.load %arg3[%c0_3, %c0_4] : memref<1x32xf32, #tpu.memory_space<vmem>>, vector<1x32xf32>
    %4 = vector.broadcast %3 : vector<1x32xf32> to vector<512x32xf32>
    %5 = arith.addf %2, %4 : vector<512x32xf32>
    %cst_5 = arith.constant 0.000000e+00 : f32
    %6 = vector.broadcast %cst_5 : f32 to vector<512x32xf32>
    %7 = arith.maximumf %5, %6 : vector<512x32xf32>
    %c0_6 = arith.constant 0 : index
    %c0_7 = arith.constant 0 : index
    %8 = vector.load %arg4[%c0_6, %c0_7] : memref<512x1xf32, #tpu.memory_space<vmem>>, vector<512x1xf32>
    %9 = vector.broadcast %8 : vector<512x1xf32> to vector<512x32xf32>
    %10 = arith.mulf %7, %9 : vector<512x32xf32>
    %11 = arith.truncf %10 : vector<512x32xf32> to vector<512x32xbf16>
    %c0_8 = arith.constant 0 : index
    %c0_9 = arith.constant 0 : index
    %12 = vector.load %arg5[%c0_8, %c0_9] : memref<512x32xbf16, #tpu.memory_space<vmem>>, vector<512x32xbf16>
    tpu.vector_store %arg5[%c0_8, %c0_9], %11 {strides = array<i32>} : memref<512x32xbf16, #tpu.memory_space<vmem>>, vector<512x32xbf16>,
    return
  }
  func.func @transform_0(%arg0: i32) -> (i32, i32) {
    %c0_i32 = arith.constant 0 : i32
    %c0_i32_0 = arith.constant 0 : i32
    return %arg0, %c0_i32 : i32, i32
  }
  func.func @transform_1(%arg0: i32) -> (i32, i32) {
    %c0_i32 = arith.constant 0 : i32
    %c0_i32_0 = arith.constant 0 : i32
    %c0_i32_1 = arith.constant 0 : i32
    return %c0_i32, %c0_i32_0 : i32, i32
  }
  func.func @transform_2(%arg0: i32) -> (i32, i32) {
    %c0_i32 = arith.constant 0 : i32
    %c0_i32_0 = arith.constant 0 : i32
    %c0_i32_1 = arith.constant 0 : i32
    return %c0_i32, %c0_i32_0 : i32, i32
  }
  func.func @transform_3(%arg0: i32) -> (i32, i32) {
    %c0_i32 = arith.constant 0 : i32
    %c0_i32_0 = arith.constant 0 : i32
    return %arg0, %c0_i32 : i32, i32
  }
  func.func @transform_4(%arg0: i32) -> (i32, i32) {
    %c0_i32 = arith.constant 0 : i32
    %c0_i32_0 = arith.constant 0 : i32
    return %arg0, %c0_i32 : i32, i32
  }
}

module attributes {stable_mosaic.version = 11 : i64} {
  func.func @_gemm_bias_relu_kernel(%arg0: i32, %arg1: memref<512x864xbf16, #tpu.memory_space<vmem>>, %arg2: memref<864x32xbf16, #tpu.memory_space<vmem>>, %arg3: memref<1x32xf32, #tpu.memory_space<vmem>>, %arg4: memref<512x1xf32, #tpu.memory_space<vmem>>, %arg5: memref<512x32xbf16, #tpu.memory_space<vmem>>) attributes {dimension_semantics = [#tpu.dimension_semantics<parallel>], iteration_bounds = array<i64: 2>, scalar_prefetch = 0 : i64, scratch_operands = 0 : i64, tpu.core_type = #tpu.core_type<tc>, window_params = [{transform_indices = @transform_0, window_bounds = array<i64: 512, 864>}, {pipeline_mode = #tpu.pipeline_mode<synchronous>, transform_indices = @transform_1, window_bounds = array<i64: 864, 32>}, {pipeline_mode = #tpu.pipeline_mode<synchronous>, transform_indices = @transform_2, window_bounds = array<i64: 1, 32>}, {transform_indices = @transform_3, window_bounds = array<i64: 512, 1>}, {transform_indices = @transform_4, window_bounds = array<i64: 512, 32>}]} {
    %c0 = arith.constant 0 : index
    %c0_0 = arith.constant 0 : index
    %0 = vector.load %arg1[%c0, %c0_0] : memref<512x864xbf16, #tpu.memory_space<vmem>>, vector<512x864xbf16>
    %c0_1 = arith.constant 0 : index
    %c0_2 = arith.constant 0 : index
    %1 = vector.load %arg2[%c0_1, %c0_2] : memref<864x32xbf16, #tpu.memory_space<vmem>>, vector<864x32xbf16>
    %cst = arith.constant dense<0.000000e+00> : vector<512x32xf32>
    %2 = tpu.matmul %0, %1, %cst {dimension_numbers = #tpu.dot_dimension_numbers<[1], [0], [0], [1], [0, 0, 1, 1], [], []>} : vector<512x864xbf16>, vector<864x32xbf16>, vector<512x32xf32> -> vector<512x32xf32>
    %c0_3 = arith.constant 0 : index
    %c0_4 = arith.constant 0 : index
    %3 = vector.load %arg3[%c0_3, %c0_4] : memref<1x32xf32, #tpu.memory_space<vmem>>, vector<1x32xf32>
    %4 = vector.broadcast %3 : vector<1x32xf32> to vector<512x32xf32>
    %5 = arith.addf %2, %4 : vector<512x32xf32>
    %cst_5 = arith.constant 0.000000e+00 : f32
    %6 = vector.broadcast %cst_5 : f32 to vector<512x32xf32>
    %7 = arith.maximumf %5, %6 : vector<512x32xf32>
    %c0_6 = arith.constant 0 : index
    %c0_7 = arith.constant 0 : index
    %8 = vector.load %arg4[%c0_6, %c0_7] : memref<512x1xf32, #tpu.memory_space<vmem>>, vector<512x1xf32>
    %9 = vector.broadcast %8 : vector<512x1xf32> to vector<512x32xf32>
    %10 = arith.mulf %7, %9 : vector<512x32xf32>
    %11 = arith.truncf %10 : vector<512x32xf32> to vector<512x32xbf16>
    %c0_8 = arith.constant 0 : index
    %c0_9 = arith.constant 0 : index
    %12 = vector.load %arg5[%c0_8, %c0_9] : memref<512x32xbf16, #tpu.memory_space<vmem>>, vector<512x32xbf16>
    tpu.vector_store %arg5[%c0_8, %c0_9], %11 {strides = array<i32>} : memref<512x32xbf16, #tpu.memory_space<vmem>>, vector<512x32xbf16>,
    return
  }
  func.func @transform_0(%arg0: i32) -> (i32, i32) {
    %c0_i32 = arith.constant 0 : i32
    %c0_i32_0 = arith.constant 0 : i32
    return %arg0, %c0_i32 : i32, i32
  }
  func.func @transform_1(%arg0: i32) -> (i32, i32) {
    %c0_i32 = arith.constant 0 : i32
    %c0_i32_0 = arith.constant 0 : i32
    %c0_i32_1 = arith.constant 0 : i32
    return %c0_i32, %c0_i32_0 : i32, i32
  }
  func.func @transform_2(%arg0: i32) -> (i32, i32) {
    %c0_i32 = arith.constant 0 : i32
    %c0_i32_0 = arith.constant 0 : i32
    %c0_i32_1 = arith.constant 0 : i32
    return %c0_i32, %c0_i32_0 : i32, i32
  }
  func.func @transform_3(%arg0: i32) -> (i32, i32) {
    %c0_i32 = arith.constant 0 : i32
    %c0_i32_0 = arith.constant 0 : i32
    return %arg0, %c0_i32 : i32, i32
  }
  func.func @transform_4(%arg0: i32) -> (i32, i32) {
    %c0_i32 = arith.constant 0 : i32
    %c0_i32_0 = arith.constant 0 : i32
    return %arg0, %c0_i32 : i32, i32
  }
}

module attributes {stable_mosaic.version = 11 : i64} {
  func.func @_gemm_bias_relu_kernel(%arg0: i32, %arg1: memref<128x864xbf16, #tpu.memory_space<vmem>>, %arg2: memref<864x64xbf16, #tpu.memory_space<vmem>>, %arg3: memref<1x64xf32, #tpu.memory_space<vmem>>, %arg4: memref<128x1xf32, #tpu.memory_space<vmem>>, %arg5: memref<128x64xbf16, #tpu.memory_space<vmem>>) attributes {dimension_semantics = [#tpu.dimension_semantics<parallel>], iteration_bounds = array<i64: 2>, scalar_prefetch = 0 : i64, scratch_operands = 0 : i64, tpu.core_type = #tpu.core_type<tc>, window_params = [{transform_indices = @transform_0, window_bounds = array<i64: 128, 864>}, {pipeline_mode = #tpu.pipeline_mode<synchronous>, transform_indices = @transform_1, window_bounds = array<i64: 864, 64>}, {pipeline_mode = #tpu.pipeline_mode<synchronous>, transform_indices = @transform_2, window_bounds = array<i64: 1, 64>}, {transform_indices = @transform_3, window_bounds = array<i64: 128, 1>}, {transform_indices = @transform_4, window_bounds = array<i64: 128, 64>}]} {
    %c0 = arith.constant 0 : index
    %c0_0 = arith.constant 0 : index
    %0 = vector.load %arg1[%c0, %c0_0] : memref<128x864xbf16, #tpu.memory_space<vmem>>, vector<128x864xbf16>
    %c0_1 = arith.constant 0 : index
    %c0_2 = arith.constant 0 : index
    %1 = vector.load %arg2[%c0_1, %c0_2] : memref<864x64xbf16, #tpu.memory_space<vmem>>, vector<864x64xbf16>
    %cst = arith.constant dense<0.000000e+00> : vector<128x64xf32>
    %2 = tpu.matmul %0, %1, %cst {dimension_numbers = #tpu.dot_dimension_numbers<[1], [0], [0], [1], [0, 0, 1, 1], [], []>} : vector<128x864xbf16>, vector<864x64xbf16>, vector<128x64xf32> -> vector<128x64xf32>
    %c0_3 = arith.constant 0 : index
    %c0_4 = arith.constant 0 : index
    %3 = vector.load %arg3[%c0_3, %c0_4] : memref<1x64xf32, #tpu.memory_space<vmem>>, vector<1x64xf32>
    %4 = vector.broadcast %3 : vector<1x64xf32> to vector<128x64xf32>
    %5 = arith.addf %2, %4 : vector<128x64xf32>
    %cst_5 = arith.constant 0.000000e+00 : f32
    %6 = vector.broadcast %cst_5 : f32 to vector<128x64xf32>
    %7 = arith.maximumf %5, %6 : vector<128x64xf32>
    %c0_6 = arith.constant 0 : index
    %c0_7 = arith.constant 0 : index
    %8 = vector.load %arg4[%c0_6, %c0_7] : memref<128x1xf32, #tpu.memory_space<vmem>>, vector<128x1xf32>
    %9 = vector.broadcast %8 : vector<128x1xf32> to vector<128x64xf32>
    %10 = arith.mulf %7, %9 : vector<128x64xf32>
    %11 = arith.truncf %10 : vector<128x64xf32> to vector<128x64xbf16>
    %c0_8 = arith.constant 0 : index
    %c0_9 = arith.constant 0 : index
    %12 = vector.load %arg5[%c0_8, %c0_9] : memref<128x64xbf16, #tpu.memory_space<vmem>>, vector<128x64xbf16>
    tpu.vector_store %arg5[%c0_8, %c0_9], %11 {strides = array<i32>} : memref<128x64xbf16, #tpu.memory_space<vmem>>, vector<128x64xbf16>,
    return
  }
  func.func @transform_0(%arg0: i32) -> (i32, i32) {
    %c0_i32 = arith.constant 0 : i32
    %c0_i32_0 = arith.constant 0 : i32
    return %arg0, %c0_i32 : i32, i32
  }
  func.func @transform_1(%arg0: i32) -> (i32, i32) {
    %c0_i32 = arith.constant 0 : i32
    %c0_i32_0 = arith.constant 0 : i32
    %c0_i32_1 = arith.constant 0 : i32
    return %c0_i32, %c0_i32_0 : i32, i32
  }
  func.func @transform_2(%arg0: i32) -> (i32, i32) {
    %c0_i32 = arith.constant 0 : i32
    %c0_i32_0 = arith.constant 0 : i32
    %c0_i32_1 = arith.constant 0 : i32
    return %c0_i32, %c0_i32_0 : i32, i32
  }
  func.func @transform_3(%arg0: i32) -> (i32, i32) {
    %c0_i32 = arith.constant 0 : i32
    %c0_i32_0 = arith.constant 0 : i32
    return %arg0, %c0_i32 : i32, i32
  }
  func.func @transform_4(%arg0: i32) -> (i32, i32) {
    %c0_i32 = arith.constant 0 : i32
    %c0_i32_0 = arith.constant 0 : i32
    return %arg0, %c0_i32 : i32, i32
  }
}

module attributes {stable_mosaic.version = 11 : i64} {
  func.func @_gemm_bias_relu_kernel(%arg0: i32, %arg1: memref<128x1728xbf16, #tpu.memory_space<vmem>>, %arg2: memref<1728x64xbf16, #tpu.memory_space<vmem>>, %arg3: memref<1x64xf32, #tpu.memory_space<vmem>>, %arg4: memref<128x1xf32, #tpu.memory_space<vmem>>, %arg5: memref<128x64xbf16, #tpu.memory_space<vmem>>) attributes {dimension_semantics = [#tpu.dimension_semantics<parallel>], iteration_bounds = array<i64: 2>, scalar_prefetch = 0 : i64, scratch_operands = 0 : i64, tpu.core_type = #tpu.core_type<tc>, window_params = [{transform_indices = @transform_0, window_bounds = array<i64: 128, 1728>}, {pipeline_mode = #tpu.pipeline_mode<synchronous>, transform_indices = @transform_1, window_bounds = array<i64: 1728, 64>}, {pipeline_mode = #tpu.pipeline_mode<synchronous>, transform_indices = @transform_2, window_bounds = array<i64: 1, 64>}, {transform_indices = @transform_3, window_bounds = array<i64: 128, 1>}, {transform_indices = @transform_4, window_bounds = array<i64: 128, 64>}]} {
    %c0 = arith.constant 0 : index
    %c0_0 = arith.constant 0 : index
    %0 = vector.load %arg1[%c0, %c0_0] : memref<128x1728xbf16, #tpu.memory_space<vmem>>, vector<128x1728xbf16>
    %c0_1 = arith.constant 0 : index
    %c0_2 = arith.constant 0 : index
    %1 = vector.load %arg2[%c0_1, %c0_2] : memref<1728x64xbf16, #tpu.memory_space<vmem>>, vector<1728x64xbf16>
    %cst = arith.constant dense<0.000000e+00> : vector<128x64xf32>
    %2 = tpu.matmul %0, %1, %cst {dimension_numbers = #tpu.dot_dimension_numbers<[1], [0], [0], [1], [0, 0, 1, 1], [], []>} : vector<128x1728xbf16>, vector<1728x64xbf16>, vector<128x64xf32> -> vector<128x64xf32>
    %c0_3 = arith.constant 0 : index
    %c0_4 = arith.constant 0 : index
    %3 = vector.load %arg3[%c0_3, %c0_4] : memref<1x64xf32, #tpu.memory_space<vmem>>, vector<1x64xf32>
    %4 = vector.broadcast %3 : vector<1x64xf32> to vector<128x64xf32>
    %5 = arith.addf %2, %4 : vector<128x64xf32>
    %cst_5 = arith.constant 0.000000e+00 : f32
    %6 = vector.broadcast %cst_5 : f32 to vector<128x64xf32>
    %7 = arith.maximumf %5, %6 : vector<128x64xf32>
    %c0_6 = arith.constant 0 : index
    %c0_7 = arith.constant 0 : index
    %8 = vector.load %arg4[%c0_6, %c0_7] : memref<128x1xf32, #tpu.memory_space<vmem>>, vector<128x1xf32>
    %9 = vector.broadcast %8 : vector<128x1xf32> to vector<128x64xf32>
    %10 = arith.mulf %7, %9 : vector<128x64xf32>
    %11 = arith.truncf %10 : vector<128x64xf32> to vector<128x64xbf16>
    %c0_8 = arith.constant 0 : index
    %c0_9 = arith.constant 0 : index
    %12 = vector.load %arg5[%c0_8, %c0_9] : memref<128x64xbf16, #tpu.memory_space<vmem>>, vector<128x64xbf16>
    tpu.vector_store %arg5[%c0_8, %c0_9], %11 {strides = array<i32>} : memref<128x64xbf16, #tpu.memory_space<vmem>>, vector<128x64xbf16>,
    return
  }
  func.func @transform_0(%arg0: i32) -> (i32, i32) {
    %c0_i32 = arith.constant 0 : i32
    %c0_i32_0 = arith.constant 0 : i32
    return %arg0, %c0_i32 : i32, i32
  }
  func.func @transform_1(%arg0: i32) -> (i32, i32) {
    %c0_i32 = arith.constant 0 : i32
    %c0_i32_0 = arith.constant 0 : i32
    %c0_i32_1 = arith.constant 0 : i32
    return %c0_i32, %c0_i32_0 : i32, i32
  }
  func.func @transform_2(%arg0: i32) -> (i32, i32) {
    %c0_i32 = arith.constant 0 : i32
    %c0_i32_0 = arith.constant 0 : i32
    %c0_i32_1 = arith.constant 0 : i32
    return %c0_i32, %c0_i32_0 : i32, i32
  }
  func.func @transform_3(%arg0: i32) -> (i32, i32) {
    %c0_i32 = arith.constant 0 : i32
    %c0_i32_0 = arith.constant 0 : i32
    return %arg0, %c0_i32 : i32, i32
  }
  func.func @transform_4(%arg0: i32) -> (i32, i32) {
    %c0_i32 = arith.constant 0 : i32
    %c0_i32_0 = arith.constant 0 : i32
    return %arg0, %c0_i32 : i32, i32
  }
}

module attributes {stable_mosaic.version = 11 : i64} {
  func.func @_gemm_bias_relu_kernel(%arg0: i32, %arg1: memref<128x1728xbf16, #tpu.memory_space<vmem>>, %arg2: memref<1728x64xbf16, #tpu.memory_space<vmem>>, %arg3: memref<1x64xf32, #tpu.memory_space<vmem>>, %arg4: memref<128x1xf32, #tpu.memory_space<vmem>>, %arg5: memref<128x64xbf16, #tpu.memory_space<vmem>>) attributes {dimension_semantics = [#tpu.dimension_semantics<parallel>], iteration_bounds = array<i64: 1>, scalar_prefetch = 0 : i64, scratch_operands = 0 : i64, tpu.core_type = #tpu.core_type<tc>, window_params = [{transform_indices = @transform_0, window_bounds = array<i64: 128, 1728>}, {pipeline_mode = #tpu.pipeline_mode<synchronous>, transform_indices = @transform_1, window_bounds = array<i64: 1728, 64>}, {pipeline_mode = #tpu.pipeline_mode<synchronous>, transform_indices = @transform_2, window_bounds = array<i64: 1, 64>}, {transform_indices = @transform_3, window_bounds = array<i64: 128, 1>}, {transform_indices = @transform_4, window_bounds = array<i64: 128, 64>}]} {
    %c0 = arith.constant 0 : index
    %c0_0 = arith.constant 0 : index
    %0 = vector.load %arg1[%c0, %c0_0] : memref<128x1728xbf16, #tpu.memory_space<vmem>>, vector<128x1728xbf16>
    %c0_1 = arith.constant 0 : index
    %c0_2 = arith.constant 0 : index
    %1 = vector.load %arg2[%c0_1, %c0_2] : memref<1728x64xbf16, #tpu.memory_space<vmem>>, vector<1728x64xbf16>
    %cst = arith.constant dense<0.000000e+00> : vector<128x64xf32>
    %2 = tpu.matmul %0, %1, %cst {dimension_numbers = #tpu.dot_dimension_numbers<[1], [0], [0], [1], [0, 0, 1, 1], [], []>} : vector<128x1728xbf16>, vector<1728x64xbf16>, vector<128x64xf32> -> vector<128x64xf32>
    %c0_3 = arith.constant 0 : index
    %c0_4 = arith.constant 0 : index
    %3 = vector.load %arg3[%c0_3, %c0_4] : memref<1x64xf32, #tpu.memory_space<vmem>>, vector<1x64xf32>
    %4 = vector.broadcast %3 : vector<1x64xf32> to vector<128x64xf32>
    %5 = arith.addf %2, %4 : vector<128x64xf32>
    %cst_5 = arith.constant 0.000000e+00 : f32
    %6 = vector.broadcast %cst_5 : f32 to vector<128x64xf32>
    %7 = arith.maximumf %5, %6 : vector<128x64xf32>
    %c0_6 = arith.constant 0 : index
    %c0_7 = arith.constant 0 : index
    %8 = vector.load %arg4[%c0_6, %c0_7] : memref<128x1xf32, #tpu.memory_space<vmem>>, vector<128x1xf32>
    %9 = vector.broadcast %8 : vector<128x1xf32> to vector<128x64xf32>
    %10 = arith.mulf %7, %9 : vector<128x64xf32>
    %11 = arith.truncf %10 : vector<128x64xf32> to vector<128x64xbf16>
    %c0_8 = arith.constant 0 : index
    %c0_9 = arith.constant 0 : index
    %12 = vector.load %arg5[%c0_8, %c0_9] : memref<128x64xbf16, #tpu.memory_space<vmem>>, vector<128x64xbf16>
    tpu.vector_store %arg5[%c0_8, %c0_9], %11 {strides = array<i32>} : memref<128x64xbf16, #tpu.memory_space<vmem>>, vector<128x64xbf16>,
    return
  }
  func.func @transform_0(%arg0: i32) -> (i32, i32) {
    %c0_i32 = arith.constant 0 : i32
    %c0_i32_0 = arith.constant 0 : i32
    return %arg0, %c0_i32 : i32, i32
  }
  func.func @transform_1(%arg0: i32) -> (i32, i32) {
    %c0_i32 = arith.constant 0 : i32
    %c0_i32_0 = arith.constant 0 : i32
    %c0_i32_1 = arith.constant 0 : i32
    return %c0_i32, %c0_i32_0 : i32, i32
  }
  func.func @transform_2(%arg0: i32) -> (i32, i32) {
    %c0_i32 = arith.constant 0 : i32
    %c0_i32_0 = arith.constant 0 : i32
    %c0_i32_1 = arith.constant 0 : i32
    return %c0_i32, %c0_i32_0 : i32, i32
  }
  func.func @transform_3(%arg0: i32) -> (i32, i32) {
    %c0_i32 = arith.constant 0 : i32
    %c0_i32_0 = arith.constant 0 : i32
    return %arg0, %c0_i32 : i32, i32
  }
  func.func @transform_4(%arg0: i32) -> (i32, i32) {
    %c0_i32 = arith.constant 0 : i32
    %c0_i32_0 = arith.constant 0 : i32
    return %arg0, %c0_i32 : i32, i32
  }
}

module attributes {stable_mosaic.version = 11 : i64} {
  func.func @_gemm_bias_relu_kernel(%arg0: i32, %arg1: memref<128x192xbf16, #tpu.memory_space<vmem>>, %arg2: memref<192x128xbf16, #tpu.memory_space<vmem>>, %arg3: memref<1x128xf32, #tpu.memory_space<vmem>>, %arg4: memref<128x1xf32, #tpu.memory_space<vmem>>, %arg5: memref<128x128xbf16, #tpu.memory_space<vmem>>) attributes {dimension_semantics = [#tpu.dimension_semantics<parallel>], iteration_bounds = array<i64: 1>, scalar_prefetch = 0 : i64, scratch_operands = 0 : i64, tpu.core_type = #tpu.core_type<tc>, window_params = [{transform_indices = @transform_0, window_bounds = array<i64: 128, 192>}, {pipeline_mode = #tpu.pipeline_mode<synchronous>, transform_indices = @transform_1, window_bounds = array<i64: 192, 128>}, {pipeline_mode = #tpu.pipeline_mode<synchronous>, transform_indices = @transform_2, window_bounds = array<i64: 1, 128>}, {transform_indices = @transform_3, window_bounds = array<i64: 128, 1>}, {transform_indices = @transform_4, window_bounds = array<i64: 128, 128>}]} {
    %c0 = arith.constant 0 : index
    %c0_0 = arith.constant 0 : index
    %0 = vector.load %arg1[%c0, %c0_0] : memref<128x192xbf16, #tpu.memory_space<vmem>>, vector<128x192xbf16>
    %c0_1 = arith.constant 0 : index
    %c0_2 = arith.constant 0 : index
    %1 = vector.load %arg2[%c0_1, %c0_2] : memref<192x128xbf16, #tpu.memory_space<vmem>>, vector<192x128xbf16>
    %cst = arith.constant dense<0.000000e+00> : vector<128x128xf32>
    %2 = tpu.matmul %0, %1, %cst {dimension_numbers = #tpu.dot_dimension_numbers<[1], [0], [0], [1], [0, 0, 1, 1], [], []>} : vector<128x192xbf16>, vector<192x128xbf16>, vector<128x128xf32> -> vector<128x128xf32>
    %c0_3 = arith.constant 0 : index
    %c0_4 = arith.constant 0 : index
    %3 = vector.load %arg3[%c0_3, %c0_4] : memref<1x128xf32, #tpu.memory_space<vmem>>, vector<1x128xf32>
    %4 = vector.broadcast %3 : vector<1x128xf32> to vector<128x128xf32>
    %5 = arith.addf %2, %4 : vector<128x128xf32>
    %cst_5 = arith.constant 0.000000e+00 : f32
    %6 = vector.broadcast %cst_5 : f32 to vector<128x128xf32>
    %7 = arith.maximumf %5, %6 : vector<128x128xf32>
    %c0_6 = arith.constant 0 : index
    %c0_7 = arith.constant 0 : index
    %8 = vector.load %arg4[%c0_6, %c0_7] : memref<128x1xf32, #tpu.memory_space<vmem>>, vector<128x1xf32>
    %9 = vector.broadcast %8 : vector<128x1xf32> to vector<128x128xf32>
    %10 = arith.mulf %7, %9 : vector<128x128xf32>
    %11 = arith.truncf %10 : vector<128x128xf32> to vector<128x128xbf16>
    %c0_8 = arith.constant 0 : index
    %c0_9 = arith.constant 0 : index
    %12 = vector.load %arg5[%c0_8, %c0_9] : memref<128x128xbf16, #tpu.memory_space<vmem>>, vector<128x128xbf16>
    tpu.vector_store %arg5[%c0_8, %c0_9], %11 {strides = array<i32>} : memref<128x128xbf16, #tpu.memory_space<vmem>>, vector<128x128xbf16>,
    return
  }
  func.func @transform_0(%arg0: i32) -> (i32, i32) {
    %c0_i32 = arith.constant 0 : i32
    %c0_i32_0 = arith.constant 0 : i32
    return %arg0, %c0_i32 : i32, i32
  }
  func.func @transform_1(%arg0: i32) -> (i32, i32) {
    %c0_i32 = arith.constant 0 : i32
    %c0_i32_0 = arith.constant 0 : i32
    %c0_i32_1 = arith.constant 0 : i32
    return %c0_i32, %c0_i32_0 : i32, i32
  }
  func.func @transform_2(%arg0: i32) -> (i32, i32) {
    %c0_i32 = arith.constant 0 : i32
    %c0_i32_0 = arith.constant 0 : i32
    %c0_i32_1 = arith.constant 0 : i32
    return %c0_i32, %c0_i32_0 : i32, i32
  }
  func.func @transform_3(%arg0: i32) -> (i32, i32) {
    %c0_i32 = arith.constant 0 : i32
    %c0_i32_0 = arith.constant 0 : i32
    return %arg0, %c0_i32 : i32, i32
  }
  func.func @transform_4(%arg0: i32) -> (i32, i32) {
    %c0_i32 = arith.constant 0 : i32
    %c0_i32_0 = arith.constant 0 : i32
    return %arg0, %c0_i32 : i32, i32
  }
}

</mosaic_0001>

<bundles_post_ra>
// kernel: custom-call
= control target key start
LH: loop header
LB: loop body
LE: loop exit
PB: predicated region body
PF: predicated region fallthrough
CT: control target
= control target key end

     0   :  { %s6_s0 = inlined_call_operand.vmem [shape: u32[6912], index: 0, kind: output, shape index: {}]  }

// kernel: _forward_jit.12
= control target key start
LH: loop header
LB: loop body
LE: loop exit
PB: predicated region body
PF: predicated region fallthrough
CT: control target
= control target key end

     0   :  { %s935_s15 = smov 0   ;;  %s1090_s0 = inlined_call_operand.vmem [shape: bf16[256,108], index: 0, kind: input, shape index: {}]   ;;  %s1091_s1 = inlined_call_operand.vmem [shape: bf16[108,16], index: 1, kind: input, shape index: {}]   ;;  %s1092_s2 = inlined_call_operand.vmem [shape: f32[1,16], index: 2, kind: input, shape index: {}]   ;;  %s1093_s3 = inlined_call_operand.vmem [shape: f32[256,1], index: 3, kind: input, shape index: {}]   ;;  %s1094_s4 = inlined_call_operand.vmem [shape: bf16[256,16], index: 4, kind: output, shape index: {}]  }
   0x1 LB: > { %s745_s16 = sadd.s32 4294967295, %s907_s15   ;;  %p749_p0 = scmp.ge.s32.totalorder %s907_s15, 1  ;;  %s907_s15 = sphi %s935_s15, %s14_s15  }
   0x2   : > { %p174_p1 = scmp.lt.s32.totalorder %s907_s15, 3 }
   0x4   : > { %p175_p2 = pnand %p749_p0, %p174_p1 }
   0x5   : > { %s750_s21 = sshll.u32 (!%p175_p2), %s745_s16, 4 }
   0x6   : > { %178 = sbr.rel (%p175_p2) target bundleno = 258 (0x102), region = 36  ;;  %p206_p3 = scmp.lt.s32.totalorder (!%p175_p2), %s750_s21, 31 }
   0xb   : > { %v886_v0 = vld [vmem:[%s1091_s1 + $0x30] sm:$0x3f]   ;;  %vm367_vm0 = vcmask 1045504   ;;  %v887_v1 = vld [vmem:[%s1091_s1 + $0x28] sm:$0xff]   ;;  %v888_v3 = vld [vmem:[%s1091_s1 + $0x20] sm:$0xff]   ;;  %s1096_s21 = smov (!%p206_p3, %s750_s21), 31 }
   0xc   : > { %873 = vmatprep.subr.msk.bf16.mxu0 %vm367_vm0, %v886_v0  ;;  %874 = vmatprep.subr.msk.bf16.mxu1 %vm367_vm0, %v886_v0  ;;  %v369_v2 = vsel %vm367_vm0, %v886_v0, 0  ;;  %v889_v4 = vld [vmem:[%s1091_s1 + $0x18] sm:$0xff]   ;;  %s751_s26 = sshll.u32 %s1096_s21, 2  ;;  %v909_v5 = vmov 0   ;;  %vm342_vm1 = vcmask 883712   ;;  %v890_v8 = vld [vmem:[%s1091_s1 + $0x10] sm:$0xff]  }
   0xd   : > { %830 = vmatpush3.bf16.msra.mxu0 %v369_v2  ;;  %866 = vmatpush3.bf16.msra.mxu1 %v369_v2  ;;  %s963_s29 = scalar_lea.vmem %s1090_s0, %s751_s26  ;;  %s753_s6 = sshll.u32 %s1096_s21, 3  ;;  %v891_v9 = vld [vmem:[%s1091_s1 + $0x8] sm:$0xff]   ;;  %v892_v12 = vld [vmem:[%s1091_s1] sm:$0xff]   ;;  %vm660_vm2 = vcmask 125952  }
   0xe   : > { %831 = vmatprep.subr.bf16.mxu0 %v887_v1  ;;  %860 = vmatprep.subr.bf16.mxu1 %v887_v1  ;;  %v893_v6 = vld [vmem:[%s963_s29] sm:$0xff]   ;;  %s976_s9 = scalar_lea.vmem %s1093_s3, %s753_s6  ;;  %v895_v15 = vld [vmem:[%s963_s29 + $0x8] sm:$0xff]   ;;  %v897_v19 = vld [vmem:[%s963_s29 + $0x10] sm:$0xff]   ;;  %s1036_s19 = scalar_lea.vmem %s1094_s4, %s751_s26 }
   0xf   : > { %885 = vset.pattern.permute.xlu1 %v909_v5  ;;  %884 = vset.pattern.permute.xlu0 %v909_v5  ;;  %v894_v7 = vld [vmem:[%s963_s29 + $0x20] sm:$0xff]   ;;  %v486_v10 = vld [vmem:[%s976_s9 + $0x10] sm:$0xff]  ;;  %v487_v13 = vld [vmem:[%s976_s9 + $0x18] sm:$0xff] }
  0x10   : > { %843 = vmatprep.mubr.msk.bf16.mxu0 %vm342_vm1, %v893_v6  ;;  %851 = vmatprep.mubr.msk.bf16.mxu1 %vm342_vm1, %v894_v7  ;;  %v484_v11 = vld [vmem:[%s976_s9] sm:$0xff]  ;;  %v485_v14 = vld [vmem:[%s976_s9 + $0x8] sm:$0xff]  ;;  %v898_v20 = vld [vmem:[%s963_s29 + $0x30] sm:$0xff]  }
  0x11   : > { %832 = vmatpush3.bf16.msra.mxu0 %v887_v1  ;;  %867 = vmatpush3.bf16.msra.mxu1 %v887_v1  ;;  %v896_v16 = vld [vmem:[%s963_s29 + $0x28] sm:$0xff]   ;;  %v488_v18 = vld [vmem:[%s976_s9 + $0x20] sm:$0xff]  ;;  %v491_v21 = vld [vmem:[%s976_s9 + $0x38] sm:$0xff] }
  0x12   : > { %833 = vmatprep.subr.bf16.mxu0 %v888_v3  ;;  %861 = vmatprep.subr.bf16.mxu1 %v888_v3  ;;  %v489_v17 = vld [vmem:[%s976_s9 + $0x28] sm:$0xff]  ;;  %v490_v22 = vld [vmem:[%s976_s9 + $0x30] sm:$0xff]  ;;  %v899_v23 = vld [vmem:[%s963_s29 + $0x18] sm:$0xff]  }
  0x13   : > { %512 = vperm.xlu1 %885, %v486_v10   ;;  %502 = vperm.xlu0 %884, %v484_v11   ;;  %v900_v24 = vld [vmem:[%s963_s29 + $0x38] sm:$0xff]   ;;  %v493_v25 = vld [vmem:[%s976_s9 + $0x48] sm:$0xff]  ;;  %v492_v26 = vld [vmem:[%s976_s9 + $0x40] sm:$0xff] }
  0x14   : > { %v495_v27 = vld [vmem:[%s976_s9 + $0x58] sm:$0xff]  ;;  %v494_v28 = vld [vmem:[%s976_s9 + $0x50] sm:$0xff]  ;;  %v497_v29 = vld [vmem:[%s976_s9 + $0x68] sm:$0xff] }
  0x15   : > { %834 = vmatpush3.bf16.msra.mxu0 %v888_v3  ;;  %868 = vmatpush3.bf16.msra.mxu1 %v888_v3  ;;  %v496_v30 = vld [vmem:[%s976_s9 + $0x60] sm:$0xff]  ;;  %v499_v31 = vld [vmem:[%s976_s9 + $0x78] sm:$0xff]  ;;  %v498_v32 = vld [vmem:[%s976_s9 + $0x70] sm:$0xff] }
  0x16   : > { %835 = vmatprep.subr.bf16.mxu0 %v889_v4  ;;  %862 = vmatprep.subr.bf16.mxu1 %v889_v4  ;;  %v1025_v42 = vld [vmem:[%s1092_s2] ss:$0 sm:$0xff] }
  0x17   : > { %517 = vperm.xlu1 %885, %v487_v13   ;;  %507 = vperm.xlu0 %884, %v485_v14  }
  0x19   : > { %836 = vmatpush3.bf16.msra.mxu0 %v889_v4  ;;  %869 = vmatpush3.bf16.msra.mxu1 %v889_v4 }
  0x1a   : > { %837 = vmatprep.subr.bf16.mxu0 %v890_v8  ;;  %863 = vmatprep.subr.bf16.mxu1 %v890_v8 }
  0x1b   : > { %527 = vperm.xlu1 %885, %v489_v17   ;;  %522 = vperm.xlu0 %884, %v488_v18  }
  0x1d   : > { %838 = vmatpush3.bf16.msra.mxu0 %v890_v8  ;;  %870 = vmatpush3.bf16.msra.mxu1 %v890_v8 }
  0x1e   : > { %839 = vmatprep.subr.bf16.mxu0 %v891_v9  ;;  %864 = vmatprep.subr.bf16.mxu1 %v891_v9 }
  0x1f   : > { %537 = vperm.xlu1 %885, %v491_v21   ;;  %532 = vperm.xlu0 %884, %v490_v22  }
  0x21   : > { %840 = vmatpush3.bf16.msra.mxu0 %v891_v9  ;;  %871 = vmatpush3.bf16.msra.mxu1 %v891_v9 }
  0x22   : > { %841 = vmatprep.subr.bf16.mxu0 %v892_v12  ;;  %865 = vmatprep.subr.bf16.mxu1 %v892_v12 }
  0x23   : > { %547 = vperm.xlu1 %885, %v493_v25   ;;  %542 = vperm.xlu0 %884, %v492_v26  }
  0x25   : > { %842 = vmatpush3.bf16.msra.mxu0 %v892_v12  ;;  %872 = vmatpush3.bf16.msra.mxu1 %v892_v12 }
  0x27   : > { %557 = vperm.xlu1 %885, %v495_v27   ;;  %552 = vperm.xlu0 %884, %v494_v28  }
  0x28   : > { %844 = vmatmul.mubr.msk.bf16.vlgmr.msra.gmra.mxu0 %vm342_vm1, %v895_v15  ;;  %852 = vmatmul.mubr.msk.bf16.vlgmr.msra.gmra.mxu1 %vm342_vm1, %v896_v16 }
  0x29   : > { %847 = vmatprep.mubr.msk.bf16.mxu0 %vm342_vm1, %v897_v19  ;;  %855 = vmatprep.mubr.msk.bf16.mxu1 %vm342_vm1, %v898_v20 }
  0x2b   : > { %567 = vperm.xlu1 %885, %v497_v29   ;;  %562 = vperm.xlu0 %884, %v496_v30  }
  0x2f   : > { %577 = vperm.xlu1 %885, %v499_v31   ;;  %572 = vperm.xlu0 %884, %v498_v32  }
  0x30   : > { %848 = vmatmul.mubr.msk.bf16.gmra.mxu0 %vm342_vm1, %v899_v23  ;;  %856 = vmatmul.mubr.msk.bf16.gmra.mxu1 %vm342_vm1, %v900_v24 }
  0x8e   : > { %v503_v33 = vpop.permute.xlu0 %502  ;;  %v513_v34 = vpop.permute.xlu1 %512 }
  0x92   : > { %v1012_v35 = vpop.permute.xlu0 %507  ;;  %v518_v36 = vpop.permute.xlu1 %517 }
  0x96   : > { %v1014_v37 = vpop.permute.xlu0 %522  ;;  %v1016_v38 = vpop.permute.xlu1 %527 }
  0x9a   : > { %v1018_v39 = vpop.permute.xlu0 %532  ;;  %v1020_v40 = vpop.permute.xlu1 %537 }
  0x9e   : > { %v543_v41 = vpop.permute.xlu0 %542  ;;  %v548_v43 = vpop.permute.xlu1 %547 }
  0xa2   : > { %v553_v44 = vpop.permute.xlu0 %552  ;;  %v558_v57 = vpop.permute.xlu1 %557 }
  0xa6   : > { %v563_v58 = vpop.permute.xlu0 %562  ;;  %v568_v23 = vpop.permute.xlu1 %567 }
  0xaa   : > { %v573_v24 = vpop.permute.xlu0 %572 }
  0xe8   : > { %v845_v45 = vpop.f32.mrf.mxu0  ;;  %v853_v46 = vpop.f32.mrf.mxu1 }
  0xe9   : > { %v414_v47 = vadd.f32 %v845_v45, %v1025_v42  ;;  %v446_v48 = vadd.f32 %v853_v46, %v1025_v42 }
  0xea   : > { %v405_v49 = vpop.f32.mrf.mxu0  ;;  %v437_v50 = vpop.f32.mrf.mxu1 }
  0xeb   : > { %v470_v51 = vmax.f32 %v414_v47, 0.0  ;;  %v478_v52 = vmax.f32 %v446_v48, 0.0  ;;  %v406_v53 = vadd.f32 %v1025_v42, %v405_v49  ;;  %v438_v54 = vadd.f32 %v1025_v42, %v437_v50 }
  0xec   : > { %v846_v55 = vpop.f32.mrf.mxu0  ;;  %v854_v56 = vpop.f32.mrf.mxu1 }
  0xed   : > { %v582_v59 = vmul.f32 %v513_v34, %v470_v51  ;;  %v590_v60 = vmul.f32 %v553_v44, %v478_v52  ;;  %v468_v61 = vmax.f32 %v406_v53, 0.0  ;;  %v476_v62 = vmax.f32 %v438_v54, 0.0 }
  0xee   : > { %v417_v63 = vadd.f32 %v846_v55, %v1025_v42  ;;  %v449_v0 = vadd.f32 %v854_v56, %v1025_v42  ;;  %v408_v1 = vpop.f32.mrf.mxu0  ;;  %v440_v2 = vpop.f32.mrf.mxu1 }
  0xef   : > { %v800_v3 = vpack.c.bf16 %v582_v59, %v582_v59  ;;  %v808_v4 = vpack.c.bf16 %v590_v60, %v590_v60  ;;  %v580_v5 = vmul.f32 %v503_v33, %v468_v61  ;;  %v588_v6 = vmul.f32 %v543_v41, %v476_v62 }
  0xf0   : > { %v471_v7 = vmax.f32 %v417_v63, 0.0  ;;  %v479_v8 = vmax.f32 %v449_v0, 0.0  ;;  %v409_v9 = vadd.f32 %v1025_v42, %v408_v1  ;;  %v441_v10 = vadd.f32 %v1025_v42, %v440_v2  ;;  %v849_v11 = vpop.f32.mrf.mxu0  ;;  %v857_v12 = vpop.f32.mrf.mxu1 }
  0xf1   : > { %663 = vst.msk [vmem:[%s1036_s19 + $0x8] sm:$0xf] %vm660_vm2, %v800_v3  ;;  %671 = vst.msk [vmem:[%s1036_s19 + $0x28] sm:$0xf] %vm660_vm2, %v808_v4  ;;  %v798_v13 = vpack.c.bf16 %v580_v5, %v580_v5  ;;  %v806_v14 = vpack.c.bf16 %v588_v6, %v588_v6  ;;  %v430_v15 = vadd.f32 %v849_v11, %v1025_v42 }
  0xf2   : > { %v462_v16 = vadd.f32 %v857_v12, %v1025_v42  ;;  %v583_v17 = vmul.f32 %v518_v36, %v471_v7  ;;  %v591_v18 = vmul.f32 %v558_v57, %v479_v8  ;;  %v469_v19 = vmax.f32 %v409_v9, 0.0  ;;  %v421_v21 = vpop.f32.mrf.mxu0  ;;  %v453_v22 = vpop.f32.mrf.mxu1 }
  0xf3   : > { %v477_v20 = vmax.f32 %v441_v10, 0.0  ;;  %661 = vst.msk [vmem:[%s1036_s19] sm:$0xf] %vm660_vm2, %v798_v13  ;;  %669 = vst.msk [vmem:[%s1036_s19 + $0x20] sm:$0xf] %vm660_vm2, %v806_v14  ;;  %v474_v25 = vmax.f32 %v430_v15, 0.0  ;;  %v422_v27 = vadd.f32 %v1025_v42, %v421_v21  ;;  %v454_v28 = vadd.f32 %v1025_v42, %v453_v22  ;;  %v578_v57 = vpop.permute.xlu1 %577 }
  0xf4   : > { %v482_v26 = vmax.f32 %v462_v16, 0.0  ;;  %v801_v29 = vpack.c.bf16 %v583_v17, %v583_v17  ;;  %v809_v30 = vpack.c.bf16 %v591_v18, %v591_v18  ;;  %v581_v31 = vmul.f32 %v1012_v35, %v469_v19  ;;  %v850_v33 = vpop.f32.mrf.mxu0  ;;  %v858_v34 = vpop.f32.mrf.mxu1 }
  0xf5   : > { %v589_v32 = vmul.f32 %v548_v43, %v477_v20  ;;  %v586_v36 = vmul.f32 %v1018_v39, %v474_v25  ;;  %v472_v44 = vmax.f32 %v422_v27, 0.0  ;;  %v480_v45 = vmax.f32 %v454_v28, 0.0 }
  0xf6   : > { %v594_v41 = vmul.f32 %v573_v24, %v482_v26  ;;  %664 = vst.msk [vmem:[%s1036_s19 + $0xc] sm:$0xf] %vm660_vm2, %v801_v29  ;;  %672 = vst.msk [vmem:[%s1036_s19 + $0x2c] sm:$0xf] %vm660_vm2, %v809_v30  ;;  %v799_v46 = vpack.c.bf16 %v581_v31, %v581_v31  ;;  %v433_v48 = vadd.f32 %v850_v33, %v1025_v42  ;;  %v424_v43 = vpop.f32.mrf.mxu0  ;;  %v456_v49 = vpop.f32.mrf.mxu1 }
  0xf7   : > { %v807_v47 = vpack.c.bf16 %v589_v32, %v589_v32  ;;  %v465_v35 = vadd.f32 %v858_v34, %v1025_v42  ;;  %v804_v39 = vpack.c.bf16 %v586_v36, %v586_v36  ;;  %v584_v51 = vmul.f32 %v1014_v37, %v472_v44 }
  0xf8   : > { %v812_v50 = vpack.c.bf16 %v594_v41, %v594_v41  ;;  %v592_v52 = vmul.f32 %v563_v58, %v480_v45  ;;  %662 = vst.msk [vmem:[%s1036_s19 + $0x4] sm:$0xf] %vm660_vm2, %v799_v46  ;;  %v475_v53 = vmax.f32 %v433_v48, 0.0  ;;  %v425_v55 = vadd.f32 %v1025_v42, %v424_v43 }
  0xf9   : > { %670 = vst.msk [vmem:[%s1036_s19 + $0x24] sm:$0xf] %vm660_vm2, %v807_v47  ;;  %v483_v54 = vmax.f32 %v465_v35, 0.0  ;;  %v457_v56 = vadd.f32 %v1025_v42, %v456_v49  ;;  %667 = vst.msk [vmem:[%s1036_s19 + $0x18] sm:$0xf] %vm660_vm2, %v804_v39  ;;  %v802_v37 = vpack.c.bf16 %v584_v51, %v584_v51 }
  0xfa   : > { %675 = vst.msk [vmem:[%s1036_s19 + $0x38] sm:$0xf] %vm660_vm2, %v812_v50  ;;  %v810_v58 = vpack.c.bf16 %v592_v52, %v592_v52  ;;  %v587_v59 = vmul.f32 %v1020_v40, %v475_v53  ;;  %v473_v61 = vmax.f32 %v425_v55, 0.0 }
  0xfb   : > { %v595_v60 = vmul.f32 %v578_v57, %v483_v54  ;;  %v481_v62 = vmax.f32 %v457_v56, 0.0  ;;  %665 = vst.msk [vmem:[%s1036_s19 + $0x10] sm:$0xf] %vm660_vm2, %v802_v37 }
  0xfc   : > { %673 = vst.msk [vmem:[%s1036_s19 + $0x30] sm:$0xf] %vm660_vm2, %v810_v58  ;;  %v805_v42 = vpack.c.bf16 %v587_v59, %v587_v59  ;;  %v585_v0 = vmul.f32 %v1016_v38, %v473_v61 }
  0xfd   : > { %v813_v63 = vpack.c.bf16 %v595_v60, %v595_v60  ;;  %v593_v1 = vmul.f32 %v568_v23, %v481_v62 }
  0xfe   : > { %668 = vst.msk [vmem:[%s1036_s19 + $0x1c] sm:$0xf] %vm660_vm2, %v805_v42  ;;  %v803_v2 = vpack.c.bf16 %v585_v0, %v585_v0 }
  0xff   : > { %676 = vst.msk [vmem:[%s1036_s19 + $0x3c] sm:$0xf] %vm660_vm2, %v813_v63  ;;  %v811_v3 = vpack.c.bf16 %v593_v1, %v593_v1 }
 0x100   : > { %666 = vst.msk [vmem:[%s1036_s19 + $0x14] sm:$0xf] %vm660_vm2, %v803_v2 }
 0x101   : > { %674 = vst.msk [vmem:[%s1036_s19 + $0x34] sm:$0xf] %vm660_vm2, %v811_v3 }
 0x102 PF: > { %s14_s15 = sadd.s32 1, %s907_s15  }
 0x103   : > { %p11_p4 = scmp.ge.s32.totalorder %s14_s15, 4  }
 0x105   :  { %13 = sbr.rel (!%p11_p4) target bundleno = 1 (0x1), region = 69 }

// kernel: custom-call.2
= control target key start
LH: loop header
LB: loop body
LE: loop exit
PB: predicated region body
PF: predicated region fallthrough
CT: control target
= control target key end

     0   :  { %s6_s0 = inlined_call_operand.vmem [shape: u32[27648], index: 0, kind: output, shape index: {}]  }

// kernel: _forward_jit.13
= control target key start
LH: loop header
LB: loop body
LE: loop exit
PB: predicated region body
PF: predicated region fallthrough
CT: control target
= control target key end

     0   :  { %s1429_s15 = smov 0   ;;  %s1663_s0 = inlined_call_operand.vmem [shape: bf16[256,432], index: 0, kind: input, shape index: {}]   ;;  %s1664_s1 = inlined_call_operand.vmem [shape: bf16[432,16], index: 1, kind: input, shape index: {}]   ;;  %s1665_s2 = inlined_call_operand.vmem [shape: f32[1,16], index: 2, kind: input, shape index: {}]   ;;  %s1666_s3 = inlined_call_operand.vmem [shape: f32[256,1], index: 3, kind: input, shape index: {}]   ;;  %s1667_s4 = inlined_call_operand.vmem [shape: bf16[256,16], index: 4, kind: output, shape index: {}]  }
   0x1 LB: > { %s1130_s16 = sadd.s32 4294967295, %s1401_s15   ;;  %p1134_p0 = scmp.ge.s32.totalorder %s1401_s15, 1  ;;  %s1401_s15 = sphi %s1429_s15, %s14_s15  }
   0x2   : > { %p175_p1 = scmp.lt.s32.totalorder %s1401_s15, 3 }
   0x4   : > { %p176_p2 = pnand %p1134_p0, %p175_p1 }
   0x5   : > { %s1135_s9 = sshll.u32 (!%p176_p2), %s1130_s16, 4 }
   0x6   : > { %179 = sbr.rel (%p176_p2) target bundleno = 319 (0x13f), region = 36  ;;  %p208_p3 = scmp.lt.s32.totalorder (!%p176_p2), %s1135_s9, 31 }
   0xb   : > { %v1320_v0 = vld [vmem:[%s1664_s1 + $0x78] sm:$0xff]   ;;  %v1403_v1 = vmov 0   ;;  %v1323_v4 = vld [vmem:[%s1664_s1 + $0x70] sm:$0xff]   ;;  %v1326_v7 = vld [vmem:[%s1664_s1 + $0x68] sm:$0xff]   ;;  %s1669_s9 = smov (!%p208_p3, %s1135_s9), 31  ;;  %vm634_vm0 = vcmask 392192  }
   0xc   : > { %756 = vmatprep.subr.bf16.mxu1 %v1403_v1  ;;  %v1321_v2 = vld [vmem:[%s1664_s1 + $0xb8] sm:$0xff]   ;;  %1318 = vset.pattern.permute.xlu0 %v1403_v1  ;;  %v1324_v5 = vld [vmem:[%s1664_s1 + $0xb0] sm:$0xff]   ;;  %v1327_v8 = vld [vmem:[%s1664_s1 + $0xa8] sm:$0xff]   ;;  %s1228_s27 = sshll.u32 %s1669_s9, 4  ;;  %s1141_s7 = sshll.u32 %s1669_s9, 2  ;;  %vm1045_vm1 = vcmask 125952  }
   0xd   : > { %1245 = vmatprep.subr.bf16.mxu0 %v1320_v0  ;;  %v1322_v3 = vld [vmem:[%s1664_s1 + $0x38] sm:$0xff]   ;;  %1319 = vset.pattern.permute.xlu1 %v1403_v1  ;;  %v1325_v6 = vld [vmem:[%s1664_s1 + $0x30] sm:$0xff]   ;;  %v1328_v9 = vld [vmem:[%s1664_s1 + $0x28] sm:$0xff]   ;;  %s1511_s11 = scalar_lea.vmem %s1663_s0, %s1228_s27  ;;  %s1139_s27 = sshll.u32 %s1669_s9, 3 }
   0xe   : > { %757 = vmatpush1.bf16.msra.mxu1 %v1321_v2  ;;  %1246 = vmatpush3.bf16.msra.mxu0 %v1322_v3  ;;  %v1329_v10 = vld [vmem:[%s1664_s1 + $0x60] sm:$0xff]   ;;  %v1332_v13 = vld [vmem:[%s1664_s1 + $0x58] sm:$0xff]   ;;  %v1335_v16 = vld [vmem:[%s1664_s1 + $0x50] sm:$0xff]   ;;  %s1552_s30 = scalar_lea.vmem %s1666_s3, %s1139_s27 }
   0xf   : > { %758 = vmatprep.subr.bf16.mxu1 %v1403_v1  ;;  %1247 = vmatprep.subr.bf16.mxu0 %v1323_v4  ;;  %v1330_v11 = vld [vmem:[%s1664_s1 + $0xa0] sm:$0xff]   ;;  %v1333_v14 = vld [vmem:[%s1664_s1 + $0x98] sm:$0xff]   ;;  %v1336_v17 = vld [vmem:[%s1664_s1 + $0x90] sm:$0xff]  }
  0x10   : > { %v1331_v12 = vld [vmem:[%s1664_s1 + $0x20] sm:$0xff]   ;;  %v1334_v15 = vld [vmem:[%s1664_s1 + $0x18] sm:$0xff]   ;;  %v1337_v18 = vld [vmem:[%s1664_s1 + $0x10] sm:$0xff]  }
  0x11   : > { %v1338_v19 = vld [vmem:[%s1664_s1 + $0x48] sm:$0xff]   ;;  %v1341_v22 = vld [vmem:[%s1664_s1 + $0x40] sm:$0xff]   ;;  %v1347_v28 = vld [vmem:[%s1664_s1 + $0xd0] sm:$0xff]  }
  0x12   : > { %759 = vmatpush1.bf16.msra.mxu1 %v1324_v5  ;;  %1248 = vmatpush3.bf16.msra.mxu0 %v1325_v6  ;;  %v1339_v20 = vld [vmem:[%s1664_s1 + $0x88] sm:$0xff]   ;;  %v1346_v23 = vld [vmem:[%s1511_s11 + $0x4] ss:$16 sps:$4 sm:$0xff]   ;;  %v1344_v26 = vld [vmem:[%s1511_s11] ss:$16 sps:$4 sm:$0xff]  }
  0x13   : > { %760 = vmatprep.subr.bf16.mxu1 %v1403_v1  ;;  %1249 = vmatprep.subr.bf16.mxu0 %v1326_v7  ;;  %v1340_v21 = vld [vmem:[%s1664_s1 + $0x8] sm:$0xff]   ;;  %v1342_v24 = vld [vmem:[%s1664_s1 + $0x80] sm:$0xff]   ;;  %v871_v39 = vld [vmem:[%s1552_s30 + $0x10] sm:$0xff] }
  0x14   : > { %691 = vmatprep.mubr.bf16.mxu0 %v1346_v23  ;;  %v1343_v25 = vld [vmem:[%s1664_s1] sm:$0xff]   ;;  %v1355_v27 = vld [vmem:[%s1511_s11 + $0xc] ss:$16 sps:$4 sm:$0xff]   ;;  %v1353_v34 = vld [vmem:[%s1511_s11 + $0x8] ss:$16 sps:$4 sm:$0xff]   ;;  %897 = vperm.xlu1 %1319, %v871_v39  }
  0x15   : > { %v1349_v29 = vld [vmem:[%s1511_s11 + $0x24] ss:$16 sps:$4 sm:$0xff]   ;;  %1202 = vmatprep.mubr.msk.bf16.mxu1 %vm634_vm0, %v1355_v27  ;;  %v1348_v30 = vld [vmem:[%s1664_s1 + $0xc8] sm:$0xff]   ;;  %v1351_v31 = vld [vmem:[%s1511_s11 + $0x20] ss:$16 sps:$4 sm:$0xff]  }
  0x16   : > { %761 = vmatpush1.bf16.msra.mxu1 %v1327_v8  ;;  %1250 = vmatpush3.bf16.msra.mxu0 %v1328_v9  ;;  %v1352_v32 = vld [vmem:[%s1664_s1 + $0xc0] sm:$0xff]   ;;  %v1359_v35 = vld [vmem:[%s1511_s11 + $0x2c] ss:$16 sps:$4 sm:$0xff]   ;;  %v1361_v40 = vld [vmem:[%s1511_s11 + $0x28] ss:$16 sps:$4 sm:$0xff]  }
  0x17   : > { %762 = vmatprep.subr.bf16.mxu1 %v1403_v1  ;;  %1251 = vmatprep.subr.bf16.mxu0 %v1329_v10  ;;  %v1356_v33 = vld [vmem:[%s1511_s11 + $0x44] ss:$16 sps:$4 sm:$0xff]   ;;  %v1358_v36 = vld [vmem:[%s1511_s11 + $0x40] ss:$16 sps:$4 sm:$0xff]   ;;  %v870_v41 = vld [vmem:[%s1552_s30 + $0x8] sm:$0xff] }
  0x18   : > { %v1362_v37 = vld [vmem:[%s1511_s11 + $0x64] ss:$16 sps:$4 sm:$0xff]   ;;  %v872_v42 = vld [vmem:[%s1552_s30 + $0x18] sm:$0xff]  ;;  %v874_v44 = vld [vmem:[%s1552_s30 + $0x28] sm:$0xff] }
  0x19   : > { %v869_v38 = vld [vmem:[%s1552_s30] sm:$0xff]  ;;  %v1365_v43 = vld [vmem:[%s1511_s11 + $0x4c] ss:$16 sps:$4 sm:$0xff]   ;;  %902 = vperm.xlu1 %1319, %v872_v42   ;;  %v1367_v48 = vld [vmem:[%s1511_s11 + $0x48] ss:$16 sps:$4 sm:$0xff]  }
  0x1a   : > { %763 = vmatpush1.bf16.msra.mxu1 %v1330_v11  ;;  %1252 = vmatpush3.bf16.msra.mxu0 %v1331_v12  ;;  %v873_v45 = vld [vmem:[%s1552_s30 + $0x20] sm:$0xff]  ;;  %v876_v49 = vld [vmem:[%s1552_s30 + $0x38] sm:$0xff]  ;;  %v875_v50 = vld [vmem:[%s1552_s30 + $0x30] sm:$0xff] }
  0x1b   : > { %764 = vmatprep.subr.bf16.mxu1 %v1403_v1  ;;  %1253 = vmatprep.subr.bf16.mxu0 %v1332_v13  ;;  %v1364_v46 = vld [vmem:[%s1511_s11 + $0x60] ss:$16 sps:$4 sm:$0xff]   ;;  %v1368_v47 = vld [vmem:[%s1511_s11 + $0x84] ss:$16 sps:$4 sm:$0xff]   ;;  %v1371_v51 = vld [vmem:[%s1511_s11 + $0x6c] ss:$16 sps:$4 sm:$0xff]  }
  0x1c   : > { %887 = vperm.xlu0 %1318, %v869_v38   ;;  %v878_v52 = vld [vmem:[%s1552_s30 + $0x48] sm:$0xff]  ;;  %v877_v53 = vld [vmem:[%s1552_s30 + $0x40] sm:$0xff]  ;;  %v880_v57 = vld [vmem:[%s1552_s30 + $0x58] sm:$0xff] }
  0x1d   : > { %912 = vperm.xlu1 %1319, %v874_v44   ;;  %v1370_v54 = vld [vmem:[%s1511_s11 + $0x80] ss:$16 sps:$4 sm:$0xff]   ;;  %v1374_v55 = vld [vmem:[%s1511_s11 + $0xa4] ss:$16 sps:$4 sm:$0xff]   ;;  %v1373_v56 = vld [vmem:[%s1511_s11 + $0x68] ss:$16 sps:$4 sm:$0xff]  }
  0x1e   : > { %765 = vmatpush1.bf16.msra.mxu1 %v1333_v14  ;;  %1254 = vmatpush3.bf16.msra.mxu0 %v1334_v15  ;;  %v879_v58 = vld [vmem:[%s1552_s30 + $0x50] sm:$0xff]  ;;  %v1377_v59 = vld [vmem:[%s1511_s11 + $0x8c] ss:$16 sps:$4 sm:$0xff]   ;;  %v881_v61 = vld [vmem:[%s1552_s30 + $0x60] sm:$0xff] }
  0x1f   : > { %766 = vmatprep.subr.bf16.mxu1 %v1403_v1  ;;  %1255 = vmatprep.subr.bf16.mxu0 %v1335_v16  ;;  %v882_v60 = vld [vmem:[%s1552_s30 + $0x68] sm:$0xff]  ;;  %v1376_v62 = vld [vmem:[%s1511_s11 + $0xa0] ss:$16 sps:$4 sm:$0xff]   ;;  %v1380_v63 = vld [vmem:[%s1511_s11 + $0xc4] ss:$16 sps:$4 sm:$0xff]  }
  0x20   : > { %892 = vperm.xlu0 %1318, %v870_v41   ;;  %v1379_v0 = vld [vmem:[%s1511_s11 + $0x88] ss:$16 sps:$4 sm:$0xff]   ;;  %v883_v2 = vld [vmem:[%s1552_s30 + $0x70] sm:$0xff]  ;;  %v1383_v3 = vld [vmem:[%s1511_s11 + $0xac] ss:$16 sps:$4 sm:$0xff]  }
  0x21   : > { %922 = vperm.xlu1 %1319, %v876_v49   ;;  %v1382_v4 = vld [vmem:[%s1511_s11 + $0xc0] ss:$16 sps:$4 sm:$0xff]   ;;  %v1386_v5 = vld [vmem:[%s1511_s11 + $0xe4] ss:$16 sps:$4 sm:$0xff]   ;;  %v1385_v6 = vld [vmem:[%s1511_s11 + $0xa8] ss:$16 sps:$4 sm:$0xff]  }
  0x22   : > { %767 = vmatpush1.bf16.msra.mxu1 %v1336_v17  ;;  %1256 = vmatpush3.bf16.msra.mxu0 %v1337_v18  ;;  %v1389_v7 = vld [vmem:[%s1511_s11 + $0xcc] ss:$16 sps:$4 sm:$0xff]   ;;  %v1388_v8 = vld [vmem:[%s1511_s11 + $0xe0] ss:$16 sps:$4 sm:$0xff]   ;;  %v1391_v9 = vld [vmem:[%s1511_s11 + $0xc8] ss:$16 sps:$4 sm:$0xff]  }
  0x23   : > { %768 = vmatprep.subr.bf16.mxu1 %v1403_v1  ;;  %1257 = vmatprep.subr.bf16.mxu0 %v1338_v19  ;;  %v1392_v10 = vld [vmem:[%s1511_s11 + $0xec] ss:$16 sps:$4 sm:$0xff]   ;;  %v1394_v11 = vld [vmem:[%s1511_s11 + $0xe8] ss:$16 sps:$4 sm:$0xff]   ;;  %v1604_v17 = vld [vmem:[%s1665_s2] ss:$0 sm:$0xff]  ;;  %s1612_s11 = scalar_lea.vmem %s1667_s4, %s1141_s7 }
  0x24   : > { %907 = vperm.xlu0 %1318, %v873_v45  }
  0x25   : > { %932 = vperm.xlu1 %1319, %v878_v52  }
  0x26   : > { %769 = vmatpush1.bf16.msra.mxu1 %v1339_v20  ;;  %1258 = vmatpush3.bf16.msra.mxu0 %v1340_v21 }
  0x27   : > { %770 = vmatprep.subr.bf16.mxu1 %v1403_v1  ;;  %1259 = vmatprep.subr.bf16.mxu0 %v1341_v22 }
  0x28   : > { %917 = vperm.xlu0 %1318, %v875_v50  }
  0x29   : > { %942 = vperm.xlu1 %1319, %v880_v57  }
  0x2a   : > { %771 = vmatpush1.bf16.msra.mxu1 %v1342_v24  ;;  %1260 = vmatpush3.bf16.msra.mxu0 %v1343_v25 }
  0x2b   : > { %782 = vmatprep.subr.bf16.mxu1 %v1403_v1 }
  0x2c   : > { %927 = vperm.xlu0 %1318, %v877_v53  }
  0x2d   : > { %692 = vmatmul.mubr.bf16.vlgmr.msra.gmra.mxu0 %v1344_v26  ;;  %952 = vperm.xlu1 %1319, %v882_v60  }
  0x2e   : > { %783 = vmatpush2.bf16.msra.mxu1 %v1347_v28  ;;  %699 = vmatprep.mubr.bf16.mxu0 %v1349_v29 }
  0x2f   : > { %784 = vmatprep.subr.bf16.mxu1 %v1403_v1 }
  0x30   : > { %937 = vperm.xlu0 %1318, %v879_v58  }
  0x32   : > { %785 = vmatpush2.bf16.msra.mxu1 %v1348_v30 }
  0x33   : > { %786 = vmatprep.subr.bf16.mxu1 %v1403_v1  ;;  %v884_v1 = vld [vmem:[%s1552_s30 + $0x78] sm:$0xff] }
  0x34   : > { %947 = vperm.xlu0 %1318, %v881_v61   ;;  %962 = vperm.xlu1 %1319, %v884_v1  }
  0x35   : > { %700 = vmatmul.mubr.bf16.gmra.mxu0 %v1351_v31 }
  0x36   : > { %787 = vmatpush2.bf16.msra.mxu1 %v1352_v32  ;;  %707 = vmatprep.mubr.bf16.mxu0 %v1356_v33 }
  0x38   : > { %957 = vperm.xlu0 %1318, %v883_v2  }
  0x39   : > { %789 = vmatmul.mubr.bf16.vlgmr.msra.gmra.mxu1 %v1353_v34 }
  0x3a   : > { %1203 = vmatprep.mubr.msk.bf16.mxu1 %vm634_vm0, %v1359_v35 }
  0x3d   : > { %708 = vmatmul.mubr.bf16.gmra.mxu0 %v1358_v36 }
  0x3e   : > { %715 = vmatprep.mubr.bf16.mxu0 %v1362_v37 }
  0x41   : > { %797 = vmatmul.mubr.bf16.gmra.mxu1 %v1361_v40 }
  0x42   : > { %1204 = vmatprep.mubr.msk.bf16.mxu1 %vm634_vm0, %v1365_v43 }
  0x45   : > { %716 = vmatmul.mubr.bf16.gmra.mxu0 %v1364_v46 }
  0x46   : > { %723 = vmatprep.mubr.bf16.mxu0 %v1368_v47 }
  0x49   : > { %805 = vmatmul.mubr.bf16.gmra.mxu1 %v1367_v48 }
  0x4a   : > { %1205 = vmatprep.mubr.msk.bf16.mxu1 %vm634_vm0, %v1371_v51 }
  0x4d   : > { %724 = vmatmul.mubr.bf16.gmra.mxu0 %v1370_v54 }
  0x4e   : > { %731 = vmatprep.mubr.bf16.mxu0 %v1374_v55 }
  0x51   : > { %813 = vmatmul.mubr.bf16.gmra.mxu1 %v1373_v56 }
  0x52   : > { %1206 = vmatprep.mubr.msk.bf16.mxu1 %vm634_vm0, %v1377_v59 }
  0x55   : > { %732 = vmatmul.mubr.bf16.gmra.mxu0 %v1376_v62 }
  0x56   : > { %739 = vmatprep.mubr.bf16.mxu0 %v1380_v63 }
  0x59   : > { %821 = vmatmul.mubr.bf16.gmra.mxu1 %v1379_v0 }
  0x5a   : > { %1207 = vmatprep.mubr.msk.bf16.mxu1 %vm634_vm0, %v1383_v3 }
  0x5d   : > { %740 = vmatmul.mubr.bf16.gmra.mxu0 %v1382_v4 }
  0x5e   : > { %747 = vmatprep.mubr.bf16.mxu0 %v1386_v5 }
  0x61   : > { %829 = vmatmul.mubr.bf16.gmra.mxu1 %v1385_v6 }
  0x62   : > { %1208 = vmatprep.mubr.msk.bf16.mxu1 %vm634_vm0, %v1389_v7 }
  0x65   : > { %748 = vmatmul.mubr.bf16.gmra.mxu0 %v1388_v8 }
  0x69   : > { %837 = vmatmul.mubr.bf16.gmra.mxu1 %v1391_v9 }
  0x6a   : > { %1209 = vmatprep.mubr.msk.bf16.mxu1 %vm634_vm0, %v1392_v10 }
  0x71   : > { %845 = vmatmul.mubr.bf16.gmra.mxu1 %v1394_v11 }
  0x8f   : > { %v898_v46 = vpop.permute.xlu1 %897 }
  0x94   : > { %v903_v63 = vpop.permute.xlu1 %902 }
  0x97   : > { %v888_v23 = vpop.permute.xlu0 %887 }
  0x9b   : > { %v893_v36 = vpop.permute.xlu0 %892 }
  0x9f   : > { %v908_v10 = vpop.permute.xlu0 %907 }
  0xed   : > { %v1261_v12 = vpop.f32.mrf.mxu0 }
  0xef   : > { %v1262_v13 = vpop.f32.mrf.mxu0 }
  0xf0   : > { %v1263_v15 = vadd.f32 %v1262_v13, %v1261_v12 }
  0xf1   : > { %v1264_v14 = vpop.f32.mrf.mxu0 }
  0xf2   : > { %v694_v21 = vadd.f32 %v1263_v15, %v1604_v17 }
  0xf3   : > { %v1265_v16 = vpop.f32.mrf.mxu0 }
  0xf4   : > { %v1266_v19 = vadd.f32 %v1265_v16, %v1264_v14 }
  0xf5   : > { %v1267_v18 = vpop.f32.mrf.mxu0 }
  0xf6   : > { %v697_v30 = vadd.f32 %v1266_v19, %v1604_v17 }
  0xf7   : > { %v1268_v20 = vpop.f32.mrf.mxu0 }
  0xf8   : > { %v1269_v27 = vadd.f32 %v1268_v20, %v1267_v18 }
  0xf9   : > { %v790_v22 = vpop.f32.mrf.mxu1  ;;  %v1270_v25 = vpop.f32.mrf.mxu0 }
  0xfa   : > { %v791_v24 = vadd.f32 %v790_v22, %v694_v21  ;;  %v702_v41 = vadd.f32 %v1269_v27, %v1604_v17  ;;  %v913_v22 = vpop.permute.xlu1 %912 }
  0xfb   : > { %v792_v26 = vpop.f32.mrf.mxu1  ;;  %v1271_v29 = vpop.f32.mrf.mxu0 }
  0xfc   : > { %v853_v28 = vmax.f32 %v791_v24, 0.0  ;;  %v1272_v37 = vadd.f32 %v1271_v29, %v1270_v25 }
  0xfd   : > { %v793_v31 = vpop.f32.mrf.mxu1  ;;  %v1273_v34 = vpop.f32.mrf.mxu0 }
  0xfe   : > { %v965_v32 = vmul.f32 %v888_v23, %v853_v28  ;;  %v794_v33 = vadd.f32 %v793_v31, %v697_v30  ;;  %v705_v52 = vadd.f32 %v1272_v37, %v1604_v17 }
  0xff   : > { %v795_v35 = vpop.f32.mrf.mxu1  ;;  %v1274_v40 = vpop.f32.mrf.mxu0 }
 0x100   : > { %v1229_v38 = vpack.c.bf16 %v965_v32, %v965_v32  ;;  %v854_v39 = vmax.f32 %v794_v33, 0.0  ;;  %v1275_v48 = vadd.f32 %v1274_v40, %v1273_v34  ;;  %v918_v33 = vpop.permute.xlu0 %917 }
 0x101   : > { %v798_v42 = vpop.f32.mrf.mxu1  ;;  %v1276_v45 = vpop.f32.mrf.mxu0 }
 0x102   : > { %1046 = vst.msk [vmem:[%s1612_s11] sm:$0xf] %vm1045_vm1, %v1229_v38  ;;  %v966_v43 = vmul.f32 %v893_v36, %v854_v39  ;;  %v799_v44 = vadd.f32 %v798_v42, %v702_v41  ;;  %v710_v62 = vadd.f32 %v1275_v48, %v1604_v17 }
 0x103   : > { %v800_v47 = vpop.f32.mrf.mxu1  ;;  %v1277_v51 = vpop.f32.mrf.mxu0 }
 0x104   : > { %v1230_v49 = vpack.c.bf16 %v966_v43, %v966_v43  ;;  %v855_v50 = vmax.f32 %v799_v44, 0.0  ;;  %v1278_v59 = vadd.f32 %v1277_v51, %v1276_v45  ;;  %v923_v44 = vpop.permute.xlu1 %922 }
 0x105   : > { %v801_v53 = vpop.f32.mrf.mxu1  ;;  %v1279_v56 = vpop.f32.mrf.mxu0 }
 0x106   : > { %1047 = vst.msk [vmem:[%s1612_s11 + $0x4] sm:$0xf] %vm1045_vm1, %v1230_v49  ;;  %v967_v54 = vmul.f32 %v898_v46, %v855_v50  ;;  %v802_v55 = vadd.f32 %v801_v53, %v705_v52  ;;  %v713_v9 = vadd.f32 %v1278_v59, %v1604_v17 }
 0x107   : > { %v803_v57 = vpop.f32.mrf.mxu1  ;;  %v1280_v61 = vpop.f32.mrf.mxu0 }
 0x108   : > { %v1231_v58 = vpack.c.bf16 %v967_v54, %v967_v54  ;;  %v856_v60 = vmax.f32 %v802_v55, 0.0  ;;  %v1281_v6 = vadd.f32 %v1280_v61, %v1279_v56  ;;  %v928_v55 = vpop.permute.xlu0 %927 }
 0x109   : > { %v806_v0 = vpop.f32.mrf.mxu1  ;;  %v1282_v3 = vpop.f32.mrf.mxu0 }
 0x10a   : > { %1048 = vst.msk [vmem:[%s1612_s11 + $0x8] sm:$0xf] %vm1045_vm1, %v1231_v58  ;;  %v968_v1 = vmul.f32 %v903_v63, %v856_v60  ;;  %v807_v2 = vadd.f32 %v806_v0, %v710_v62  ;;  %v718_v21 = vadd.f32 %v1281_v6, %v1604_v17 }
 0x10b   : > { %v808_v4 = vpop.f32.mrf.mxu1  ;;  %v1283_v8 = vpop.f32.mrf.mxu0 }
 0x10c   : > { %v1232_v5 = vpack.c.bf16 %v968_v1, %v968_v1  ;;  %v857_v7 = vmax.f32 %v807_v2, 0.0  ;;  %v1284_v18 = vadd.f32 %v1283_v8, %v1282_v3  ;;  %v933_v2 = vpop.permute.xlu1 %932 }
 0x10d   : > { %v809_v11 = vpop.f32.mrf.mxu1  ;;  %v1285_v14 = vpop.f32.mrf.mxu0 }
 0x10e   : > { %1049 = vst.msk [vmem:[%s1612_s11 + $0xc] sm:$0xf] %vm1045_vm1, %v1232_v5  ;;  %v969_v12 = vmul.f32 %v908_v10, %v857_v7  ;;  %v810_v13 = vadd.f32 %v809_v11, %v713_v9  ;;  %v721_v32 = vadd.f32 %v1284_v18, %v1604_v17 }
 0x10f   : > { %v811_v15 = vpop.f32.mrf.mxu1  ;;  %v1286_v20 = vpop.f32.mrf.mxu0 }
 0x110   : > { %v1233_v16 = vpack.c.bf16 %v969_v12, %v969_v12  ;;  %v858_v19 = vmax.f32 %v810_v13, 0.0  ;;  %v1287_v29 = vadd.f32 %v1286_v20, %v1285_v14  ;;  %v938_v13 = vpop.permute.xlu0 %937 }
 0x111   : > { %v814_v23 = vpop.f32.mrf.mxu1  ;;  %v1288_v26 = vpop.f32.mrf.mxu0 }
 0x112   : > { %1050 = vst.msk [vmem:[%s1612_s11 + $0x10] sm:$0xf] %vm1045_vm1, %v1233_v16  ;;  %v970_v24 = vmul.f32 %v913_v22, %v858_v19  ;;  %v815_v25 = vadd.f32 %v814_v23, %v718_v21  ;;  %v726_v43 = vadd.f32 %v1287_v29, %v1604_v17 }
 0x113   : > { %v816_v27 = vpop.f32.mrf.mxu1  ;;  %v1289_v31 = vpop.f32.mrf.mxu0 }
 0x114   : > { %v1234_v28 = vpack.c.bf16 %v970_v24, %v970_v24  ;;  %v859_v30 = vmax.f32 %v815_v25, 0.0  ;;  %v1290_v40 = vadd.f32 %v1289_v31, %v1288_v26  ;;  %v943_v25 = vpop.permute.xlu1 %942  ;;  %v948_v31 = vpop.permute.xlu0 %947 }
 0x115   : > { %v817_v34 = vpop.f32.mrf.mxu1  ;;  %v1291_v37 = vpop.f32.mrf.mxu0 }
 0x116   : > { %1051 = vst.msk [vmem:[%s1612_s11 + $0x14] sm:$0xf] %vm1045_vm1, %v1234_v28  ;;  %v971_v35 = vmul.f32 %v918_v33, %v859_v30  ;;  %v818_v36 = vadd.f32 %v817_v34, %v721_v32  ;;  %v729_v54 = vadd.f32 %v1290_v40, %v1604_v17 }
 0x117   : > { %v819_v38 = vpop.f32.mrf.mxu1  ;;  %v1292_v42 = vpop.f32.mrf.mxu0 }
 0x118   : > { %v1235_v39 = vpack.c.bf16 %v971_v35, %v971_v35  ;;  %v860_v41 = vmax.f32 %v818_v36, 0.0  ;;  %v1293_v51 = vadd.f32 %v1292_v42, %v1291_v37 }
 0x119   : > { %v822_v45 = vpop.f32.mrf.mxu1  ;;  %v1294_v48 = vpop.f32.mrf.mxu0 }
 0x11a   : > { %1052 = vst.msk [vmem:[%s1612_s11 + $0x18] sm:$0xf] %vm1045_vm1, %v1235_v39  ;;  %v972_v46 = vmul.f32 %v923_v44, %v860_v41  ;;  %v823_v47 = vadd.f32 %v822_v45, %v726_v43  ;;  %v734_v1 = vadd.f32 %v1293_v51, %v1604_v17  ;;  %v953_v45 = vpop.permute.xlu1 %952 }
 0x11b   : > { %v824_v49 = vpop.f32.mrf.mxu1  ;;  %v1295_v53 = vpop.f32.mrf.mxu0 }
 0x11c   : > { %v1236_v50 = vpack.c.bf16 %v972_v46, %v972_v46  ;;  %v861_v52 = vmax.f32 %v823_v47, 0.0  ;;  %v1296_v62 = vadd.f32 %v1295_v53, %v1294_v48  ;;  %v958_v53 = vpop.permute.xlu0 %957 }
 0x11d   : > { %v825_v56 = vpop.f32.mrf.mxu1  ;;  %v1297_v59 = vpop.f32.mrf.mxu0 }
 0x11e   : > { %1053 = vst.msk [vmem:[%s1612_s11 + $0x1c] sm:$0xf] %vm1045_vm1, %v1236_v50  ;;  %v973_v57 = vmul.f32 %v928_v55, %v861_v52  ;;  %v826_v58 = vadd.f32 %v825_v56, %v729_v54  ;;  %v737_v12 = vadd.f32 %v1296_v62, %v1604_v17 }
 0x11f   : > { %v827_v60 = vpop.f32.mrf.mxu1  ;;  %v1298_v0 = vpop.f32.mrf.mxu0 }
 0x120   : > { %v1237_v61 = vpack.c.bf16 %v973_v57, %v973_v57  ;;  %v862_v63 = vmax.f32 %v826_v58, 0.0  ;;  %v1299_v9 = vadd.f32 %v1298_v0, %v1297_v59  ;;  %v963_v60 = vpop.permute.xlu1 %962 }
 0x121   : > { %v830_v3 = vpop.f32.mrf.mxu1  ;;  %v1300_v6 = vpop.f32.mrf.mxu0 }
 0x122   : > { %1054 = vst.msk [vmem:[%s1612_s11 + $0x20] sm:$0xf] %vm1045_vm1, %v1237_v61  ;;  %v974_v4 = vmul.f32 %v933_v2, %v862_v63  ;;  %v831_v5 = vadd.f32 %v830_v3, %v734_v1  ;;  %v742_v24 = vadd.f32 %v1299_v9, %v1604_v17 }
 0x123   : > { %v832_v7 = vpop.f32.mrf.mxu1  ;;  %v1301_v11 = vpop.f32.mrf.mxu0 }
 0x124   : > { %v1238_v8 = vpack.c.bf16 %v974_v4, %v974_v4  ;;  %v863_v10 = vmax.f32 %v831_v5, 0.0  ;;  %v1302_v21 = vadd.f32 %v1301_v11, %v1300_v6 }
 0x125   : > { %v833_v14 = vpop.f32.mrf.mxu1  ;;  %v1303_v18 = vpop.f32.mrf.mxu0 }
 0x126   : > { %1055 = vst.msk [vmem:[%s1612_s11 + $0x24] sm:$0xf] %vm1045_vm1, %v1238_v8  ;;  %v975_v15 = vmul.f32 %v938_v13, %v863_v10  ;;  %v834_v16 = vadd.f32 %v833_v14, %v737_v12  ;;  %v745_v35 = vadd.f32 %v1302_v21, %v1604_v17 }
 0x127   : > { %v835_v19 = vpop.f32.mrf.mxu1  ;;  %v1304_v23 = vpop.f32.mrf.mxu0 }
 0x128   : > { %v1239_v20 = vpack.c.bf16 %v975_v15, %v975_v15  ;;  %v864_v22 = vmax.f32 %v834_v16, 0.0  ;;  %v1305_v33 = vadd.f32 %v1304_v23, %v1303_v18 }
 0x129   : > { %v838_v26 = vpop.f32.mrf.mxu1  ;;  %v1306_v29 = vpop.f32.mrf.mxu0 }
 0x12a   : > { %1056 = vst.msk [vmem:[%s1612_s11 + $0x28] sm:$0xf] %vm1045_vm1, %v1239_v20  ;;  %v976_v27 = vmul.f32 %v943_v25, %v864_v22  ;;  %v839_v28 = vadd.f32 %v838_v26, %v742_v24  ;;  %v750_v44 = vadd.f32 %v1305_v33, %v1604_v17 }
 0x12b   : > { %v840_v30 = vpop.f32.mrf.mxu1  ;;  %v1307_v36 = vpop.f32.mrf.mxu0 }
 0x12c   : > { %v1240_v32 = vpack.c.bf16 %v976_v27, %v976_v27  ;;  %v865_v34 = vmax.f32 %v839_v28, 0.0  ;;  %v1308_v42 = vadd.f32 %v1307_v36, %v1306_v29 }
 0x12d   : > { %v841_v37 = vpop.f32.mrf.mxu1 }
 0x12e   : > { %1057 = vst.msk [vmem:[%s1612_s11 + $0x2c] sm:$0xf] %vm1045_vm1, %v1240_v32  ;;  %v977_v38 = vmul.f32 %v948_v31, %v865_v34  ;;  %v842_v39 = vadd.f32 %v841_v37, %v745_v35  ;;  %v753_v52 = vadd.f32 %v1308_v42, %v1604_v17 }
 0x12f   : > { %v843_v40 = vpop.f32.mrf.mxu1 }
 0x130   : > { %v1241_v41 = vpack.c.bf16 %v977_v38, %v977_v38  ;;  %v866_v43 = vmax.f32 %v842_v39, 0.0 }
 0x131   : > { %v846_v46 = vpop.f32.mrf.mxu1 }
 0x132   : > { %1058 = vst.msk [vmem:[%s1612_s11 + $0x30] sm:$0xf] %vm1045_vm1, %v1241_v41  ;;  %v978_v47 = vmul.f32 %v953_v45, %v866_v43  ;;  %v847_v48 = vadd.f32 %v846_v46, %v750_v44 }
 0x133   : > { %v848_v49 = vpop.f32.mrf.mxu1 }
 0x134   : > { %v1242_v50 = vpack.c.bf16 %v978_v47, %v978_v47  ;;  %v867_v51 = vmax.f32 %v847_v48, 0.0 }
 0x135   : > { %v849_v54 = vpop.f32.mrf.mxu1 }
 0x136   : > { %1059 = vst.msk [vmem:[%s1612_s11 + $0x34] sm:$0xf] %vm1045_vm1, %v1242_v50  ;;  %v979_v55 = vmul.f32 %v958_v53, %v867_v51  ;;  %v850_v56 = vadd.f32 %v849_v54, %v753_v52 }
 0x137   : > { %v851_v57 = vpop.f32.mrf.mxu1 }
 0x138   : > { %v1243_v58 = vpack.c.bf16 %v979_v55, %v979_v55  ;;  %v868_v59 = vmax.f32 %v850_v56, 0.0 }
 0x13a   : > { %1060 = vst.msk [vmem:[%s1612_s11 + $0x38] sm:$0xf] %vm1045_vm1, %v1243_v58  ;;  %v980_v61 = vmul.f32 %v963_v60, %v868_v59 }
 0x13c   : > { %v1244_v62 = vpack.c.bf16 %v980_v61, %v980_v61 }
 0x13e   : > { %1061 = vst.msk [vmem:[%s1612_s11 + $0x3c] sm:$0xf] %vm1045_vm1, %v1244_v62 }
 0x13f PF: > { %s14_s15 = sadd.s32 1, %s1401_s15  }
 0x140   : > { %p11_p4 = scmp.ge.s32.totalorder %s14_s15, 4  }
 0x142   :  { %13 = sbr.rel (!%p11_p4) target bundleno = 1 (0x1), region = 69 }

// kernel: _forward_jit.14
= control target key start
LH: loop header
LB: loop body
LE: loop exit
PB: predicated region body
PF: predicated region fallthrough
CT: control target
= control target key end

     0   :  { %s3352_s15 = smov 0   ;;  %s3955_s0 = inlined_call_operand.vmem [shape: bf16[1024,432], index: 0, kind: input, shape index: {}]   ;;  %s3956_s1 = inlined_call_operand.vmem [shape: bf16[432,32], index: 1, kind: input, shape index: {}]   ;;  %s3957_s2 = inlined_call_operand.vmem [shape: f32[1,32], index: 2, kind: input, shape index: {}]   ;;  %s3958_s3 = inlined_call_operand.vmem [shape: f32[1024,1], index: 3, kind: input, shape index: {}]   ;;  %s3959_s4 = inlined_call_operand.vmem [shape: bf16[1024,32], index: 4, kind: output, shape index: {}]  }
   0x1 LB: > { %s2762_s16 = sadd.s32 4294967295, %s3324_s15   ;;  %p2766_p0 = scmp.ge.s32.totalorder %s3324_s15, 1  ;;  %s3324_s15 = sphi %s3352_s15, %s14_s15  }
   0x2   : > { %p175_p1 = scmp.lt.s32.totalorder %s3324_s15, 3 }
   0x4   : > { %p176_p2 = pnand %p2766_p0, %p175_p1 }
   0x5   : > { %s2767_s29 = sshll.u32 (!%p176_p2), %s2762_s16, 6 }
   0x6   : > { %179 = sbr.rel (%p176_p2) target bundleno = 532 (0x214), region = 36  ;;  %p208_p3 = scmp.lt.s32.totalorder (!%p176_p2), %s2767_s29, 127 }
   0xb   : > { %v3104_v0 = vld [vmem:[%s3956_s1 + $0x38] sm:$0xff]   ;;  %v3326_v1 = vmov 0   ;;  %v3105_v2 = vld [vmem:[%s3956_s1 + $0x30] sm:$0xff]   ;;  %v3106_v4 = vld [vmem:[%s3956_s1 + $0x28] sm:$0xff]   ;;  %s3961_s29 = smov (!%p208_p3, %s2767_s29), 127  ;;  %vm1186_vm0 = vcmask 392192  }
   0xc   : > { %1283 = vmatprep.subr.bf16.mxu0 %v3326_v1  ;;  %1572 = vmatprep.subr.bf16.mxu1 %v3326_v1  ;;  %v3109_v3 = vld [vmem:[%s3956_s1 + $0xb8] sm:$0xff]   ;;  %v3111_v5 = vld [vmem:[%s3956_s1 + $0xb0] sm:$0xff]   ;;  %v3107_v6 = vld [vmem:[%s3956_s1 + $0x20] sm:$0xff]   ;;  %s3028_s14 = sshll.u32 %s3961_s29, 4  ;;  %s2771_s21 = sshll.u32 %s3961_s29, 3  ;;  %vm2629_vm1 = vcmask 257024  }
   0xd   : > { %1284 = vmatpush1.bf16.msra.mxu0 %v3104_v0  ;;  %3102 = vset.pattern.permute.xlu0 %v3326_v1  ;;  %v3113_v7 = vld [vmem:[%s3956_s1 + $0xa8] sm:$0xff]   ;;  %v3108_v8 = vld [vmem:[%s3956_s1 + $0x18] sm:$0xff]   ;;  %v3115_v9 = vld [vmem:[%s3956_s1 + $0xa0] sm:$0xff]   ;;  %s3420_s22 = scalar_lea.vmem %s3955_s0, %s3028_s14  ;;  %s3478_s27 = scalar_lea.vmem %s3958_s3, %s2771_s21 }
   0xe   : > { %1285 = vmatprep.subr.bf16.mxu0 %v3326_v1  ;;  %3103 = vset.pattern.permute.xlu1 %v3326_v1  ;;  %v3110_v10 = vld [vmem:[%s3956_s1 + $0x10] sm:$0xff]   ;;  %v3117_v11 = vld [vmem:[%s3956_s1 + $0x98] sm:$0xff]   ;;  %v3112_v12 = vld [vmem:[%s3956_s1 + $0x8] sm:$0xff]   ;;  %s2773_s9 = sshll.u32 %s3961_s29, 2 }
   0xf   : > { %1573 = vmatpush1.bf16.msra.mxu1 %v3109_v3  ;;  %v3119_v13 = vld [vmem:[%s3956_s1 + $0x90] sm:$0xff]   ;;  %v3114_v14 = vld [vmem:[%s3956_s1] sm:$0xff]   ;;  %v3121_v15 = vld [vmem:[%s3956_s1 + $0x88] sm:$0xff]   ;;  %s3704_s12 = scalar_lea.vmem %s3959_s4, %s2773_s9 }
  0x10   : > { %1574 = vmatprep.subr.bf16.mxu1 %v3326_v1  ;;  %v3132_v16 = vld [vmem:[%s3420_s22 + $0xc] ss:$16 sps:$4 sm:$0xff]   ;;  %v3136_v17 = vld [vmem:[%s3420_s22 + $0x4] ss:$16 sps:$4 sm:$0xff]   ;;  %v3130_v27 = vld [vmem:[%s3420_s22 + $0x8] ss:$16 sps:$4 sm:$0xff]  }
  0x11   : > { %1286 = vmatpush1.bf16.msra.mxu0 %v3105_v2  ;;  %2930 = vmatprep.mubr.msk.bf16.mxu1 %vm1186_vm0, %v3132_v16  ;;  %v3116_v18 = vld [vmem:[%s3956_s1 + $0x78] sm:$0xff]   ;;  %v3123_v19 = vld [vmem:[%s3956_s1 + $0x80] sm:$0xff]   ;;  %v3118_v20 = vld [vmem:[%s3956_s1 + $0x70] sm:$0xff]  }
  0x12   : > { %1287 = vmatprep.subr.bf16.mxu0 %v3326_v1  ;;  %1315 = vmatprep.mubr.bf16.mxu0 %v3136_v17  ;;  %v3125_v21 = vld [vmem:[%s3956_s1 + $0xd0] sm:$0xff]   ;;  %v3120_v22 = vld [vmem:[%s3956_s1 + $0x68] sm:$0xff]   ;;  %v3122_v24 = vld [vmem:[%s3956_s1 + $0x60] sm:$0xff]  }
  0x13   : > { %1575 = vmatpush1.bf16.msra.mxu1 %v3111_v5  ;;  %v3127_v23 = vld [vmem:[%s3956_s1 + $0xc8] sm:$0xff]   ;;  %v3129_v25 = vld [vmem:[%s3956_s1 + $0xc0] sm:$0xff]   ;;  %v3124_v26 = vld [vmem:[%s3956_s1 + $0x58] sm:$0xff]  }
  0x14   : > { %1576 = vmatprep.subr.bf16.mxu1 %v3326_v1  ;;  %v3137_v28 = vld [vmem:[%s3420_s22 + $0x2c] ss:$16 sps:$4 sm:$0xff]   ;;  %v3126_v29 = vld [vmem:[%s3956_s1 + $0x50] sm:$0xff]   ;;  %v1925_v31 = vld [vmem:[%s3478_s27] sm:$0xff] }
  0x15   : > { %1288 = vmatpush1.bf16.msra.mxu0 %v3106_v4  ;;  %v3128_v30 = vld [vmem:[%s3956_s1 + $0x48] sm:$0xff]   ;;  %1991 = vperm.xlu0 %3102, %v1925_v31   ;;  %v1927_v34 = vld [vmem:[%s3478_s27 + $0x10] sm:$0xff]  ;;  %v1928_v36 = vld [vmem:[%s3478_s27 + $0x18] sm:$0xff] }
  0x16   : > { %1289 = vmatprep.subr.bf16.mxu0 %v3326_v1  ;;  %v3139_v32 = vld [vmem:[%s3420_s22 + $0x28] ss:$16 sps:$4 sm:$0xff]   ;;  %v3143_v33 = vld [vmem:[%s3420_s22 + $0x4c] ss:$16 sps:$4 sm:$0xff]   ;;  %2001 = vperm.xlu1 %3103, %v1927_v34   ;;  %v3133_v37 = vld [vmem:[%s3956_s1 + $0x40] sm:$0xff]  }
  0x17   : > { %1577 = vmatpush1.bf16.msra.mxu1 %v3113_v7  ;;  %v1926_v35 = vld [vmem:[%s3478_s27 + $0x8] sm:$0xff]  ;;  %v3134_v38 = vld [vmem:[%s3420_s22] ss:$16 sps:$4 sm:$0xff]   ;;  %v3140_v41 = vld [vmem:[%s3420_s22 + $0x24] ss:$16 sps:$4 sm:$0xff]  }
  0x18   : > { %1578 = vmatprep.subr.bf16.mxu1 %v3326_v1  ;;  %v1930_v39 = vld [vmem:[%s3478_s27 + $0x28] sm:$0xff]  ;;  %v1929_v40 = vld [vmem:[%s3478_s27 + $0x20] sm:$0xff]  ;;  %v1932_v44 = vld [vmem:[%s3478_s27 + $0x38] sm:$0xff] }
  0x19   : > { %1290 = vmatpush1.bf16.msra.mxu0 %v3107_v6  ;;  %1996 = vperm.xlu0 %3102, %v1926_v35   ;;  %v3145_v42 = vld [vmem:[%s3420_s22 + $0x48] ss:$16 sps:$4 sm:$0xff]   ;;  %v3149_v43 = vld [vmem:[%s3420_s22 + $0x6c] ss:$16 sps:$4 sm:$0xff]   ;;  %v1931_v45 = vld [vmem:[%s3478_s27 + $0x30] sm:$0xff] }
  0x1a   : > { %1291 = vmatprep.subr.bf16.mxu0 %v3326_v1  ;;  %2006 = vperm.xlu1 %3103, %v1928_v36   ;;  %v3142_v46 = vld [vmem:[%s3420_s22 + $0x20] ss:$16 sps:$4 sm:$0xff]   ;;  %v1934_v47 = vld [vmem:[%s3478_s27 + $0x48] sm:$0xff]  ;;  %v3146_v49 = vld [vmem:[%s3420_s22 + $0x44] ss:$16 sps:$4 sm:$0xff]  }
  0x1b   : > { %1579 = vmatpush1.bf16.msra.mxu1 %v3115_v9  ;;  %v1933_v48 = vld [vmem:[%s3478_s27 + $0x40] sm:$0xff]  ;;  %v3151_v50 = vld [vmem:[%s3420_s22 + $0x68] ss:$16 sps:$4 sm:$0xff]   ;;  %v3155_v51 = vld [vmem:[%s3420_s22 + $0x8c] ss:$16 sps:$4 sm:$0xff]  }
  0x1c   : > { %1580 = vmatprep.subr.bf16.mxu1 %v3326_v1  ;;  %v1936_v52 = vld [vmem:[%s3478_s27 + $0x58] sm:$0xff]  ;;  %v1935_v53 = vld [vmem:[%s3478_s27 + $0x50] sm:$0xff]  ;;  %v1938_v55 = vld [vmem:[%s3478_s27 + $0x68] sm:$0xff] }
  0x1d   : > { %1292 = vmatpush1.bf16.msra.mxu0 %v3108_v8  ;;  %2011 = vperm.xlu0 %3102, %v1929_v40   ;;  %v3148_v54 = vld [vmem:[%s3420_s22 + $0x40] ss:$16 sps:$4 sm:$0xff]   ;;  %v3152_v57 = vld [vmem:[%s3420_s22 + $0x64] ss:$16 sps:$4 sm:$0xff]   ;;  %v3157_v58 = vld [vmem:[%s3420_s22 + $0x88] ss:$16 sps:$4 sm:$0xff]  }
  0x1e   : > { %1293 = vmatprep.subr.bf16.mxu0 %v3326_v1  ;;  %2016 = vperm.xlu1 %3103, %v1930_v39   ;;  %v1937_v56 = vld [vmem:[%s3478_s27 + $0x60] sm:$0xff]  ;;  %v3161_v59 = vld [vmem:[%s3420_s22 + $0xac] ss:$16 sps:$4 sm:$0xff]   ;;  %v1939_v61 = vld [vmem:[%s3478_s27 + $0x70] sm:$0xff] }
  0x1f   : > { %1581 = vmatpush1.bf16.msra.mxu1 %v3117_v11  ;;  %v1940_v60 = vld [vmem:[%s3478_s27 + $0x78] sm:$0xff]  ;;  %v3154_v62 = vld [vmem:[%s3420_s22 + $0x60] ss:$16 sps:$4 sm:$0xff]   ;;  %v1942_v63 = vld [vmem:[%s3478_s27 + $0x88] sm:$0xff] }
  0x20   : > { %1582 = vmatprep.subr.bf16.mxu1 %v3326_v1  ;;  %v1941_v0 = vld [vmem:[%s3478_s27 + $0x80] sm:$0xff]  ;;  %v3163_v2 = vld [vmem:[%s3420_s22 + $0xa8] ss:$16 sps:$4 sm:$0xff]   ;;  %v3167_v3 = vld [vmem:[%s3420_s22 + $0xcc] ss:$16 sps:$4 sm:$0xff]  }
  0x21   : > { %1294 = vmatpush1.bf16.msra.mxu0 %v3110_v10  ;;  %2021 = vperm.xlu0 %3102, %v1931_v45   ;;  %v1944_v4 = vld [vmem:[%s3478_s27 + $0x98] sm:$0xff]  ;;  %v1943_v5 = vld [vmem:[%s3478_s27 + $0x90] sm:$0xff]  ;;  %v1946_v7 = vld [vmem:[%s3478_s27 + $0xa8] sm:$0xff] }
  0x22   : > { %1295 = vmatprep.subr.bf16.mxu0 %v3326_v1  ;;  %2026 = vperm.xlu1 %3103, %v1932_v44   ;;  %v3160_v6 = vld [vmem:[%s3420_s22 + $0x80] ss:$16 sps:$4 sm:$0xff]   ;;  %v3164_v9 = vld [vmem:[%s3420_s22 + $0xa4] ss:$16 sps:$4 sm:$0xff]   ;;  %v3169_v10 = vld [vmem:[%s3420_s22 + $0xc8] ss:$16 sps:$4 sm:$0xff]  }
  0x23   : > { %1583 = vmatpush1.bf16.msra.mxu1 %v3119_v13  ;;  %v1945_v8 = vld [vmem:[%s3478_s27 + $0xa0] sm:$0xff]  ;;  %v3173_v11 = vld [vmem:[%s3420_s22 + $0xec] ss:$16 sps:$4 sm:$0xff]   ;;  %v1947_v13 = vld [vmem:[%s3478_s27 + $0xb0] sm:$0xff] }
  0x24   : > { %1584 = vmatprep.subr.bf16.mxu1 %v3326_v1  ;;  %v3175_v16 = vld [vmem:[%s3420_s22 + $0xe8] ss:$16 sps:$4 sm:$0xff]   ;;  %v3191_v35 = vld [vmem:[%s3420_s22 + $0x14c] ss:$16 sps:$4 sm:$0xff]   ;;  %v1961_v40 = vld [vmem:[%s3478_s27 + $0x120] sm:$0xff] }
  0x25   : > { %1296 = vmatpush1.bf16.msra.mxu0 %v3112_v12  ;;  %2031 = vperm.xlu0 %3102, %v1933_v48   ;;  %v1948_v12 = vld [vmem:[%s3478_s27 + $0xb8] sm:$0xff]  ;;  %v1950_v17 = vld [vmem:[%s3478_s27 + $0xc8] sm:$0xff]  ;;  %v1963_v45 = vld [vmem:[%s3478_s27 + $0x130] sm:$0xff] }
  0x26   : > { %1297 = vmatprep.subr.bf16.mxu0 %v3326_v1  ;;  %2036 = vperm.xlu1 %3103, %v1934_v47   ;;  %v1958_v31 = vld [vmem:[%s3478_s27 + $0x108] sm:$0xff]  ;;  %v1960_v36 = vld [vmem:[%s3478_s27 + $0x118] sm:$0xff]  ;;  %v1965_v48 = vld [vmem:[%s3478_s27 + $0x140] sm:$0xff] }
  0x27   : > { %1585 = vmatpush1.bf16.msra.mxu1 %v3121_v15  ;;  %v3170_v15 = vld [vmem:[%s3420_s22 + $0xc4] ss:$16 sps:$4 sm:$0xff]   ;;  %v3187_v34 = vld [vmem:[%s3420_s22 + $0x128] ss:$16 sps:$4 sm:$0xff]  }
  0x28   : > { %1586 = vmatprep.subr.bf16.mxu1 %v3326_v1  ;;  %v1962_v39 = vld [vmem:[%s3478_s27 + $0x128] sm:$0xff]  ;;  %v1964_v44 = vld [vmem:[%s3478_s27 + $0x138] sm:$0xff] }
  0x29   : > { %1298 = vmatpush1.bf16.msra.mxu0 %v3114_v14  ;;  %2041 = vperm.xlu0 %3102, %v1935_v53   ;;  %v3166_v14 = vld [vmem:[%s3420_s22 + $0xa0] ss:$16 sps:$4 sm:$0xff]   ;;  %v1966_v47 = vld [vmem:[%s3478_s27 + $0x148] sm:$0xff] }
  0x2a   : > { %1299 = vmatprep.subr.bf16.mxu0 %v3326_v1  ;;  %2046 = vperm.xlu1 %3103, %v1936_v52   ;;  %v1968_v52 = vld [vmem:[%s3478_s27 + $0x158] sm:$0xff]  ;;  %v1967_v53 = vld [vmem:[%s3478_s27 + $0x150] sm:$0xff] }
  0x2b   : > { %1587 = vmatpush1.bf16.msra.mxu1 %v3123_v19  ;;  %v3179_v19 = vld [vmem:[%s3420_s22 + $0x10c] ss:$16 sps:$4 sm:$0xff]  }
  0x2c   : > { %1598 = vmatprep.subr.bf16.mxu1 %v3326_v1 }
  0x2d   : > { %1300 = vmatpush2.bf16.msra.mxu0 %v3116_v18  ;;  %2051 = vperm.xlu0 %3102, %v1937_v56   ;;  %v1949_v18 = vld [vmem:[%s3478_s27 + $0xc0] sm:$0xff] }
  0x2e   : > { %1301 = vmatprep.subr.bf16.mxu0 %v3326_v1  ;;  %2056 = vperm.xlu1 %3103, %v1938_v55   ;;  %v1970_v55 = vld [vmem:[%s3478_s27 + $0x168] sm:$0xff]  ;;  %v1969_v56 = vld [vmem:[%s3478_s27 + $0x160] sm:$0xff] }
  0x2f   : > { %1599 = vmatpush2.bf16.msra.mxu1 %v3125_v21  ;;  %v1951_v21 = vld [vmem:[%s3478_s27 + $0xd0] sm:$0xff] }
  0x30   : > { %1600 = vmatprep.subr.bf16.mxu1 %v3326_v1 }
  0x31   : > { %1302 = vmatpush2.bf16.msra.mxu0 %v3118_v20  ;;  %2061 = vperm.xlu0 %3102, %v1939_v61   ;;  %v1952_v20 = vld [vmem:[%s3478_s27 + $0xd8] sm:$0xff]  ;;  %v1971_v61 = vld [vmem:[%s3478_s27 + $0x170] sm:$0xff] }
  0x32   : > { %1303 = vmatprep.subr.bf16.mxu0 %v3326_v1  ;;  %2066 = vperm.xlu1 %3103, %v1940_v60   ;;  %v1972_v60 = vld [vmem:[%s3478_s27 + $0x178] sm:$0xff] }
  0x33   : > { %1601 = vmatpush2.bf16.msra.mxu1 %v3127_v23  ;;  %v1954_v23 = vld [vmem:[%s3478_s27 + $0xe8] sm:$0xff] }
  0x34   : > { %1602 = vmatprep.subr.bf16.mxu1 %v3326_v1 }
  0x35   : > { %1304 = vmatpush2.bf16.msra.mxu0 %v3120_v22  ;;  %2071 = vperm.xlu0 %3102, %v1941_v0   ;;  %v3172_v22 = vld [vmem:[%s3420_s22 + $0xc0] ss:$16 sps:$4 sm:$0xff]  }
  0x36   : > { %1305 = vmatprep.subr.bf16.mxu0 %v3326_v1  ;;  %2076 = vperm.xlu1 %3103, %v1942_v63   ;;  %v1974_v63 = vld [vmem:[%s3478_s27 + $0x188] sm:$0xff]  ;;  %v1973_v0 = vld [vmem:[%s3478_s27 + $0x180] sm:$0xff] }
  0x37   : > { %1603 = vmatpush2.bf16.msra.mxu1 %v3129_v25  ;;  %v3176_v25 = vld [vmem:[%s3420_s22 + $0xe4] ss:$16 sps:$4 sm:$0xff]  }
  0x39   : > { %1306 = vmatpush2.bf16.msra.mxu0 %v3122_v24  ;;  %2081 = vperm.xlu0 %3102, %v1943_v5   ;;  %v1953_v24 = vld [vmem:[%s3478_s27 + $0xe0] sm:$0xff]  ;;  %v1975_v5 = vld [vmem:[%s3478_s27 + $0x190] sm:$0xff] }
  0x3a   : > { %1307 = vmatprep.subr.bf16.mxu0 %v3326_v1  ;;  %1605 = vmatmul.mubr.bf16.vlgmr.msra.gmra.mxu1 %v3130_v27  ;;  %v3185_v27 = vld [vmem:[%s3420_s22 + $0x12c] ss:$16 sps:$4 sm:$0xff]  }
  0x3b   : > { %2931 = vmatprep.mubr.msk.bf16.mxu1 %vm1186_vm0, %v3137_v28  ;;  %2086 = vperm.xlu1 %3103, %v1944_v4   ;;  %v1956_v28 = vld [vmem:[%s3478_s27 + $0xf8] sm:$0xff] }
  0x3c   : > { %v1976_v4 = vld [vmem:[%s3478_s27 + $0x198] sm:$0xff] }
  0x3d   : > { %1308 = vmatpush2.bf16.msra.mxu0 %v3124_v26  ;;  %2091 = vperm.xlu0 %3102, %v1945_v8   ;;  %v3181_v26 = vld [vmem:[%s3420_s22 + $0x108] ss:$16 sps:$4 sm:$0xff]   ;;  %v1977_v8 = vld [vmem:[%s3478_s27 + $0x1a0] sm:$0xff] }
  0x3e   : > { %1309 = vmatprep.subr.bf16.mxu0 %v3326_v1 }
  0x3f   : > { %2096 = vperm.xlu1 %3103, %v1946_v7   ;;  %v1978_v7 = vld [vmem:[%s3478_s27 + $0x1a8] sm:$0xff] }
  0x41   : > { %1310 = vmatpush2.bf16.msra.mxu0 %v3126_v29  ;;  %2101 = vperm.xlu0 %3102, %v1947_v13   ;;  %v1955_v29 = vld [vmem:[%s3478_s27 + $0xf0] sm:$0xff] }
  0x42   : > { %1311 = vmatprep.subr.bf16.mxu0 %v3326_v1  ;;  %1613 = vmatmul.mubr.bf16.gmra.mxu1 %v3139_v32  ;;  %v1957_v32 = vld [vmem:[%s3478_s27 + $0x100] sm:$0xff]  ;;  %v1979_v13 = vld [vmem:[%s3478_s27 + $0x1b0] sm:$0xff] }
  0x43   : > { %2932 = vmatprep.mubr.msk.bf16.mxu1 %vm1186_vm0, %v3143_v33  ;;  %2106 = vperm.xlu1 %3103, %v1948_v12   ;;  %v3182_v33 = vld [vmem:[%s3420_s22 + $0x104] ss:$16 sps:$4 sm:$0xff]   ;;  %v1980_v12 = vld [vmem:[%s3478_s27 + $0x1b8] sm:$0xff] }
  0x45   : > { %1312 = vmatpush2.bf16.msra.mxu0 %v3128_v30  ;;  %2111 = vperm.xlu0 %3102, %v1949_v18   ;;  %v3178_v30 = vld [vmem:[%s3420_s22 + $0xe0] ss:$16 sps:$4 sm:$0xff]   ;;  %v3223_v18 = vld [vmem:[%s3420_s22 + $0x1e8] ss:$16 sps:$4 sm:$0xff]  }
  0x46   : > { %1313 = vmatprep.subr.bf16.mxu0 %v3326_v1  ;;  %v3158_v1 = vld [vmem:[%s3420_s22 + $0x84] ss:$16 sps:$4 sm:$0xff]  }
  0x47   : > { %2116 = vperm.xlu1 %3103, %v1950_v17   ;;  %v3218_v17 = vld [vmem:[%s3420_s22 + $0x1c4] ss:$16 sps:$4 sm:$0xff]  }
  0x49   : > { %1314 = vmatpush2.bf16.msra.mxu0 %v3133_v37  ;;  %2121 = vperm.xlu0 %3102, %v1951_v21   ;;  %v1959_v37 = vld [vmem:[%s3478_s27 + $0x110] sm:$0xff] }
  0x4a   : > { %1621 = vmatmul.mubr.bf16.gmra.mxu1 %v3145_v42  ;;  %v3193_v42 = vld [vmem:[%s3420_s22 + $0x148] ss:$16 sps:$4 sm:$0xff]   ;;  %v1983_v21 = vld [vmem:[%s3478_s27 + $0x1d0] sm:$0xff] }
  0x4b   : > { %2933 = vmatprep.mubr.msk.bf16.mxu1 %vm1186_vm0, %v3149_v43  ;;  %2126 = vperm.xlu1 %3103, %v1952_v20   ;;  %v3197_v43 = vld [vmem:[%s3420_s22 + $0x16c] ss:$16 sps:$4 sm:$0xff]  }
  0x4c   : > { %1316 = vmatmul.mubr.bf16.vlgmr.msra.gmra.mxu0 %v3134_v38  ;;  %v3184_v38 = vld [vmem:[%s3420_s22 + $0x100] ss:$16 sps:$4 sm:$0xff]   ;;  %v1984_v20 = vld [vmem:[%s3478_s27 + $0x1d8] sm:$0xff] }
  0x4d   : > { %1323 = vmatprep.mubr.bf16.mxu0 %v3140_v41  ;;  %2131 = vperm.xlu0 %3102, %v1953_v24   ;;  %v3188_v41 = vld [vmem:[%s3420_s22 + $0x124] ss:$16 sps:$4 sm:$0xff]  }
  0x4e   : > { %v1985_v24 = vld [vmem:[%s3478_s27 + $0x1e0] sm:$0xff] }
  0x4f   : > { %2136 = vperm.xlu1 %3103, %v1954_v23   ;;  %v1986_v23 = vld [vmem:[%s3478_s27 + $0x1e8] sm:$0xff] }
  0x51   : > { %2141 = vperm.xlu0 %3102, %v1955_v29   ;;  %v1987_v29 = vld [vmem:[%s3478_s27 + $0x1f0] sm:$0xff] }
  0x52   : > { %1629 = vmatmul.mubr.bf16.gmra.mxu1 %v3151_v50  ;;  %v3199_v50 = vld [vmem:[%s3420_s22 + $0x168] ss:$16 sps:$4 sm:$0xff]  }
  0x53   : > { %2934 = vmatprep.mubr.msk.bf16.mxu1 %vm1186_vm0, %v3155_v51  ;;  %2146 = vperm.xlu1 %3103, %v1956_v28   ;;  %v3203_v51 = vld [vmem:[%s3420_s22 + $0x18c] ss:$16 sps:$4 sm:$0xff]  }
  0x54   : > { %1324 = vmatmul.mubr.bf16.gmra.mxu0 %v3142_v46  ;;  %v3190_v46 = vld [vmem:[%s3420_s22 + $0x120] ss:$16 sps:$4 sm:$0xff]   ;;  %v1988_v28 = vld [vmem:[%s3478_s27 + $0x1f8] sm:$0xff] }
  0x55   : > { %1331 = vmatprep.mubr.bf16.mxu0 %v3146_v49  ;;  %2151 = vperm.xlu0 %3102, %v1957_v32   ;;  %v3194_v49 = vld [vmem:[%s3420_s22 + $0x144] ss:$16 sps:$4 sm:$0xff]   ;;  %v3235_v32 = vld [vmem:[%s3420_s22 + $0x228] ss:$16 sps:$4 sm:$0xff]  }
  0x57   : > { %2156 = vperm.xlu1 %3103, %v1958_v31   ;;  %v3230_v31 = vld [vmem:[%s3420_s22 + $0x204] ss:$16 sps:$4 sm:$0xff]  }
  0x59   : > { %2161 = vperm.xlu0 %3102, %v1959_v37   ;;  %v3245_v37 = vld [vmem:[%s3420_s22 + $0x26c] ss:$16 sps:$4 sm:$0xff]  }
  0x5a   : > { %1637 = vmatmul.mubr.bf16.gmra.mxu1 %v3157_v58  ;;  %v3205_v58 = vld [vmem:[%s3420_s22 + $0x188] ss:$16 sps:$4 sm:$0xff]  }
  0x5b   : > { %2935 = vmatprep.mubr.msk.bf16.mxu1 %vm1186_vm0, %v3161_v59  ;;  %2166 = vperm.xlu1 %3103, %v1960_v36   ;;  %v3209_v59 = vld [vmem:[%s3420_s22 + $0x1ac] ss:$16 sps:$4 sm:$0xff]   ;;  %v3241_v36 = vld [vmem:[%s3420_s22 + $0x248] ss:$16 sps:$4 sm:$0xff]  }
  0x5c   : > { %1332 = vmatmul.mubr.bf16.gmra.mxu0 %v3148_v54  ;;  %v3196_v54 = vld [vmem:[%s3420_s22 + $0x140] ss:$16 sps:$4 sm:$0xff]  }
  0x5d   : > { %1339 = vmatprep.mubr.bf16.mxu0 %v3152_v57  ;;  %2171 = vperm.xlu0 %3102, %v1961_v40   ;;  %v3200_v57 = vld [vmem:[%s3420_s22 + $0x164] ss:$16 sps:$4 sm:$0xff]   ;;  %v3247_v40 = vld [vmem:[%s3420_s22 + $0x268] ss:$16 sps:$4 sm:$0xff]  }
  0x5f   : > { %2176 = vperm.xlu1 %3103, %v1962_v39   ;;  %v3242_v39 = vld [vmem:[%s3420_s22 + $0x244] ss:$16 sps:$4 sm:$0xff]  }
  0x61   : > { %2181 = vperm.xlu0 %3102, %v1963_v45   ;;  %v3257_v45 = vld [vmem:[%s3420_s22 + $0x2ac] ss:$16 sps:$4 sm:$0xff]  }
  0x62   : > { %1645 = vmatmul.mubr.bf16.gmra.mxu1 %v3163_v2  ;;  %v3211_v2 = vld [vmem:[%s3420_s22 + $0x1a8] ss:$16 sps:$4 sm:$0xff]  }
  0x63   : > { %2936 = vmatprep.mubr.msk.bf16.mxu1 %vm1186_vm0, %v3167_v3  ;;  %2186 = vperm.xlu1 %3103, %v1964_v44   ;;  %v3215_v3 = vld [vmem:[%s3420_s22 + $0x1cc] ss:$16 sps:$4 sm:$0xff]   ;;  %v3253_v44 = vld [vmem:[%s3420_s22 + $0x288] ss:$16 sps:$4 sm:$0xff]  }
  0x64   : > { %1340 = vmatmul.mubr.bf16.gmra.mxu0 %v3154_v62  ;;  %v3202_v62 = vld [vmem:[%s3420_s22 + $0x160] ss:$16 sps:$4 sm:$0xff]  }
  0x65   : > { %1347 = vmatprep.mubr.bf16.mxu0 %v3158_v1  ;;  %2191 = vperm.xlu0 %3102, %v1965_v48   ;;  %v3206_v1 = vld [vmem:[%s3420_s22 + $0x184] ss:$16 sps:$4 sm:$0xff]   ;;  %v3259_v48 = vld [vmem:[%s3420_s22 + $0x2a8] ss:$16 sps:$4 sm:$0xff]  }
  0x67   : > { %2196 = vperm.xlu1 %3103, %v1966_v47   ;;  %v3254_v47 = vld [vmem:[%s3420_s22 + $0x284] ss:$16 sps:$4 sm:$0xff]  }
  0x69   : > { %2201 = vperm.xlu0 %3102, %v1967_v53   ;;  %v3269_v53 = vld [vmem:[%s3420_s22 + $0x2ec] ss:$16 sps:$4 sm:$0xff]  }
  0x6a   : > { %1653 = vmatmul.mubr.bf16.gmra.mxu1 %v3169_v10  ;;  %v3217_v10 = vld [vmem:[%s3420_s22 + $0x1c8] ss:$16 sps:$4 sm:$0xff]  }
  0x6b   : > { %2937 = vmatprep.mubr.msk.bf16.mxu1 %vm1186_vm0, %v3173_v11  ;;  %2206 = vperm.xlu1 %3103, %v1968_v52   ;;  %v3221_v11 = vld [vmem:[%s3420_s22 + $0x1ec] ss:$16 sps:$4 sm:$0xff]   ;;  %v3265_v52 = vld [vmem:[%s3420_s22 + $0x2c8] ss:$16 sps:$4 sm:$0xff]  }
  0x6c   : > { %1348 = vmatmul.mubr.bf16.gmra.mxu0 %v3160_v6  ;;  %v3208_v6 = vld [vmem:[%s3420_s22 + $0x180] ss:$16 sps:$4 sm:$0xff]  }
  0x6d   : > { %1355 = vmatprep.mubr.bf16.mxu0 %v3164_v9  ;;  %2211 = vperm.xlu0 %3102, %v1969_v56   ;;  %v3212_v9 = vld [vmem:[%s3420_s22 + $0x1a4] ss:$16 sps:$4 sm:$0xff]   ;;  %v3271_v56 = vld [vmem:[%s3420_s22 + $0x2e8] ss:$16 sps:$4 sm:$0xff]  }
  0x6f   : > { %2216 = vperm.xlu1 %3103, %v1970_v55   ;;  %v3266_v55 = vld [vmem:[%s3420_s22 + $0x2c4] ss:$16 sps:$4 sm:$0xff]  }
  0x71   : > { %2221 = vperm.xlu0 %3102, %v1971_v61   ;;  %v3281_v61 = vld [vmem:[%s3420_s22 + $0x32c] ss:$16 sps:$4 sm:$0xff]  }
  0x72   : > { %1661 = vmatmul.mubr.bf16.gmra.mxu1 %v3175_v16  ;;  %v1981_v16 = vld [vmem:[%s3478_s27 + $0x1c0] sm:$0xff] }
  0x73   : > { %2938 = vmatprep.mubr.msk.bf16.mxu1 %vm1186_vm0, %v3179_v19  ;;  %2226 = vperm.xlu1 %3103, %v1972_v60   ;;  %v3227_v19 = vld [vmem:[%s3420_s22 + $0x20c] ss:$16 sps:$4 sm:$0xff]   ;;  %v3277_v60 = vld [vmem:[%s3420_s22 + $0x308] ss:$16 sps:$4 sm:$0xff]  }
  0x74   : > { %1356 = vmatmul.mubr.bf16.gmra.mxu0 %v3166_v14  ;;  %v3214_v14 = vld [vmem:[%s3420_s22 + $0x1a0] ss:$16 sps:$4 sm:$0xff]  }
  0x75   : > { %1363 = vmatprep.mubr.bf16.mxu0 %v3170_v15  ;;  %2231 = vperm.xlu0 %3102, %v1973_v0   ;;  %v1982_v15 = vld [vmem:[%s3478_s27 + $0x1c8] sm:$0xff]  ;;  %v3274_v0 = vld [vmem:[%s3420_s22 + $0x2e0] ss:$16 sps:$4 sm:$0xff]  }
  0x77   : > { %2236 = vperm.xlu1 %3103, %v1974_v63  }
  0x79   : > { %2241 = vperm.xlu0 %3102, %v1975_v5  }
  0x7a   : > { %1669 = vmatmul.mubr.bf16.gmra.mxu1 %v3181_v26  ;;  %v3229_v26 = vld [vmem:[%s3420_s22 + $0x208] ss:$16 sps:$4 sm:$0xff]  }
  0x7b   : > { %2939 = vmatprep.mubr.msk.bf16.mxu1 %vm1186_vm0, %v3185_v27  ;;  %2246 = vperm.xlu1 %3103, %v1976_v4   ;;  %v3233_v27 = vld [vmem:[%s3420_s22 + $0x22c] ss:$16 sps:$4 sm:$0xff]  }
  0x7c   : > { %1364 = vmatmul.mubr.bf16.gmra.mxu0 %v3172_v22  ;;  %v3220_v22 = vld [vmem:[%s3420_s22 + $0x1c0] ss:$16 sps:$4 sm:$0xff]   ;;  %v3287_v4 = vld [vmem:[%s3420_s22 + $0x34c] ss:$16 sps:$4 sm:$0xff]  }
  0x7d   : > { %1371 = vmatprep.mubr.bf16.mxu0 %v3176_v25  ;;  %2251 = vperm.xlu0 %3102, %v1977_v8   ;;  %v3224_v25 = vld [vmem:[%s3420_s22 + $0x1e4] ss:$16 sps:$4 sm:$0xff]   ;;  %v3280_v8 = vld [vmem:[%s3420_s22 + $0x300] ss:$16 sps:$4 sm:$0xff]  }
  0x7f   : > { %2256 = vperm.xlu1 %3103, %v1978_v7  }
  0x81   : > { %2261 = vperm.xlu0 %3102, %v1979_v13   ;;  %v3293_v13 = vld [vmem:[%s3420_s22 + $0x36c] ss:$16 sps:$4 sm:$0xff]  }
  0x82   : > { %1677 = vmatmul.mubr.bf16.gmra.mxu1 %v3187_v34  ;;  %v3232_v34 = vld [vmem:[%s3420_s22 + $0x200] ss:$16 sps:$4 sm:$0xff]  }
  0x83   : > { %2940 = vmatprep.mubr.msk.bf16.mxu1 %vm1186_vm0, %v3191_v35  ;;  %2266 = vperm.xlu1 %3103, %v1980_v12   ;;  %v3236_v35 = vld [vmem:[%s3420_s22 + $0x224] ss:$16 sps:$4 sm:$0xff]   ;;  %v3685_v12 = vld [vmem:[%s3957_s2] ss:$0 sm:$0xff] }
  0x84   : > { %1372 = vmatmul.mubr.bf16.gmra.mxu0 %v3178_v30  ;;  %v3226_v30 = vld [vmem:[%s3420_s22 + $0x1e0] ss:$16 sps:$4 sm:$0xff]  }
  0x85   : > { %1379 = vmatprep.mubr.bf16.mxu0 %v3182_v33  ;;  %2271 = vperm.xlu0 %3102, %v1981_v16   ;;  %v3239_v33 = vld [vmem:[%s3420_s22 + $0x24c] ss:$16 sps:$4 sm:$0xff]  }
  0x87   : > { %2276 = vperm.xlu1 %3103, %v1982_v15  }
  0x89   : > { %2281 = vperm.xlu0 %3102, %v1983_v21   ;;  %v338_v21 = vld [vmem:[%s3420_s22 + $0x378] sm:$0xff] }
  0x8a   : > { %1685 = vmatmul.mubr.bf16.gmra.mxu1 %v3193_v42  ;;  %v3244_v42 = vld [vmem:[%s3420_s22 + $0x240] ss:$16 sps:$4 sm:$0xff]  }
  0x8b   : > { %2941 = vmatprep.mubr.msk.bf16.mxu1 %vm1186_vm0, %v3197_v43  ;;  %2286 = vperm.xlu1 %3103, %v1984_v20   ;;  %v3248_v43 = vld [vmem:[%s3420_s22 + $0x264] ss:$16 sps:$4 sm:$0xff]   ;;  %v336_v20 = vld [vmem:[%s3420_s22 + $0x368] sm:$0xff] }
  0x8c   : > { %1380 = vmatmul.mubr.bf16.gmra.mxu0 %v3184_v38  ;;  %v3238_v38 = vld [vmem:[%s3420_s22 + $0x220] ss:$16 sps:$4 sm:$0xff]  }
  0x8d   : > { %1387 = vmatprep.mubr.bf16.mxu0 %v3188_v41  ;;  %2291 = vperm.xlu0 %3102, %v1985_v24   ;;  %v3251_v41 = vld [vmem:[%s3420_s22 + $0x28c] ss:$16 sps:$4 sm:$0xff]  }
  0x8f   : > { %2296 = vperm.xlu1 %3103, %v1986_v23  }
  0x91   : > { %2301 = vperm.xlu0 %3102, %v1987_v29  }
  0x92   : > { %1693 = vmatmul.mubr.bf16.gmra.mxu1 %v3199_v50  ;;  %v3256_v50 = vld [vmem:[%s3420_s22 + $0x280] ss:$16 sps:$4 sm:$0xff]  }
  0x93   : > { %2942 = vmatprep.mubr.msk.bf16.mxu1 %vm1186_vm0, %v3203_v51  ;;  %2306 = vperm.xlu1 %3103, %v1988_v28   ;;  %v3260_v51 = vld [vmem:[%s3420_s22 + $0x2a4] ss:$16 sps:$4 sm:$0xff]  }
  0x94   : > { %1388 = vmatmul.mubr.bf16.gmra.mxu0 %v3190_v46  ;;  %v3250_v46 = vld [vmem:[%s3420_s22 + $0x260] ss:$16 sps:$4 sm:$0xff]   ;;  %v3290_v28 = vld [vmem:[%s3420_s22 + $0x344] ss:$16 sps:$4 sm:$0xff]  }
  0x95   : > { %1395 = vmatprep.mubr.bf16.mxu0 %v3194_v49  ;;  %v3263_v49 = vld [vmem:[%s3420_s22 + $0x2cc] ss:$16 sps:$4 sm:$0xff]  }
  0x9a   : > { %1701 = vmatmul.mubr.bf16.gmra.mxu1 %v3205_v58  ;;  %v3268_v58 = vld [vmem:[%s3420_s22 + $0x2c0] ss:$16 sps:$4 sm:$0xff]  }
  0x9b   : > { %2943 = vmatprep.mubr.msk.bf16.mxu1 %vm1186_vm0, %v3209_v59  ;;  %v3272_v59 = vld [vmem:[%s3420_s22 + $0x2e4] ss:$16 sps:$4 sm:$0xff]  }
  0x9c   : > { %1396 = vmatmul.mubr.bf16.gmra.mxu0 %v3196_v54  ;;  %v3262_v54 = vld [vmem:[%s3420_s22 + $0x2a0] ss:$16 sps:$4 sm:$0xff]  }
  0x9d   : > { %1403 = vmatprep.mubr.bf16.mxu0 %v3200_v57  ;;  %v3275_v57 = vld [vmem:[%s3420_s22 + $0x30c] ss:$16 sps:$4 sm:$0xff]  }
  0xa2   : > { %1709 = vmatmul.mubr.bf16.gmra.mxu1 %v3211_v2 }
  0xa3   : > { %2944 = vmatprep.mubr.msk.bf16.mxu1 %vm1186_vm0, %v3215_v3  ;;  %v3283_v3 = vld [vmem:[%s3420_s22 + $0x328] ss:$16 sps:$4 sm:$0xff]  }
  0xa4   : > { %1404 = vmatmul.mubr.bf16.gmra.mxu0 %v3202_v62 }
  0xa5   : > { %1411 = vmatprep.mubr.bf16.mxu0 %v3206_v1  ;;  %v3278_v1 = vld [vmem:[%s3420_s22 + $0x304] ss:$16 sps:$4 sm:$0xff]  }
  0xaa   : > { %1717 = vmatmul.mubr.bf16.gmra.mxu1 %v3217_v10 }
  0xab   : > { %2945 = vmatprep.mubr.msk.bf16.mxu1 %vm1186_vm0, %v3221_v11  ;;  %v3289_v11 = vld [vmem:[%s3420_s22 + $0x348] ss:$16 sps:$4 sm:$0xff]  }
  0xac   : > { %1412 = vmatmul.mubr.bf16.gmra.mxu0 %v3208_v6 }
  0xad   : > { %1419 = vmatprep.mubr.bf16.mxu0 %v3212_v9  ;;  %v3284_v9 = vld [vmem:[%s3420_s22 + $0x324] ss:$16 sps:$4 sm:$0xff]  }
  0xb2   : > { %1725 = vmatmul.mubr.bf16.gmra.mxu1 %v3223_v18 }
  0xb3   : > { %2946 = vmatprep.mubr.msk.bf16.mxu1 %vm1186_vm0, %v3227_v19  ;;  %v1992_v19 = vpop.permute.xlu0 %1991 }
  0xb4   : > { %1420 = vmatmul.mubr.bf16.gmra.mxu0 %v3214_v14 }
  0xb5   : > { %1427 = vmatprep.mubr.bf16.mxu0 %v3218_v17 }
  0xba   : > { %1733 = vmatmul.mubr.bf16.gmra.mxu1 %v3229_v26 }
  0xbb   : > { %2947 = vmatprep.mubr.msk.bf16.mxu1 %vm1186_vm0, %v3233_v27 }
  0xbc   : > { %1428 = vmatmul.mubr.bf16.gmra.mxu0 %v3220_v22 }
  0xbd   : > { %1435 = vmatprep.mubr.bf16.mxu0 %v3224_v25  ;;  %v3286_v25 = vld [vmem:[%s3420_s22 + $0x320] ss:$16 sps:$4 sm:$0xff]  }
  0xc2   : > { %1741 = vmatmul.mubr.bf16.gmra.mxu1 %v3235_v32  ;;  %v3297_v32 = vld [vmem:[%s3420_s22 + $0x38c] ss:$16 sps:$4 sm:$0xff]  }
  0xc3   : > { %2948 = vmatprep.mubr.msk.bf16.mxu1 %vm1186_vm0, %v3239_v33 }
  0xc4   : > { %1436 = vmatmul.mubr.bf16.gmra.mxu0 %v3226_v30  ;;  %v2885_v30 = vcombine.low %v336_v20, %v338_v21 }
  0xc5   : > { %1443 = vmatprep.mubr.bf16.mxu0 %v3230_v31 }
  0xca   : > { %1749 = vmatmul.mubr.bf16.gmra.mxu1 %v3241_v36 }
  0xcb   : > { %2949 = vmatprep.mubr.msk.bf16.mxu1 %vm1186_vm0, %v3245_v37  ;;  %v1997_v37 = vpop.permute.xlu0 %1996 }
  0xcc   : > { %1444 = vmatmul.mubr.bf16.gmra.mxu0 %v3232_v34 }
  0xcd   : > { %1451 = vmatprep.mubr.bf16.mxu0 %v3236_v35 }
  0xd2   : > { %1757 = vmatmul.mubr.bf16.gmra.mxu1 %v3247_v40 }
  0xd3   : > { %2950 = vmatprep.mubr.msk.bf16.mxu1 %vm1186_vm0, %v3251_v41 }
  0xd4   : > { %1452 = vmatmul.mubr.bf16.gmra.mxu0 %v3238_v38 }
  0xd5   : > { %1459 = vmatprep.mubr.bf16.mxu0 %v3242_v39 }
  0xda   : > { %1765 = vmatmul.mubr.bf16.gmra.mxu1 %v3253_v44  ;;  %v342_v44 = vld [vmem:[%s3420_s22 + $0x398] sm:$0xff] }
  0xdb   : > { %2951 = vmatprep.mubr.msk.bf16.mxu1 %vm1186_vm0, %v3257_v45 }
  0xdc   : > { %1460 = vmatmul.mubr.bf16.gmra.mxu0 %v3244_v42 }
  0xdd   : > { %1467 = vmatprep.mubr.bf16.mxu0 %v3248_v43  ;;  %v340_v43 = vld [vmem:[%s3420_s22 + $0x388] sm:$0xff] }
  0xe2   : > { %1773 = vmatmul.mubr.bf16.gmra.mxu1 %v3259_v48  ;;  %v2002_v48 = vpop.permute.xlu1 %2001 }
  0xe3   : > { %2952 = vmatprep.mubr.msk.bf16.mxu1 %vm1186_vm0, %v3263_v49 }
  0xe4   : > { %1468 = vmatmul.mubr.bf16.gmra.mxu0 %v3250_v46 }
  0xe5   : > { %1475 = vmatprep.mubr.bf16.mxu0 %v3254_v47 }
  0xea   : > { %1781 = vmatmul.mubr.bf16.gmra.mxu1 %v3265_v52 }
  0xeb   : > { %2953 = vmatprep.mubr.msk.bf16.mxu1 %vm1186_vm0, %v3269_v53 }
  0xec   : > { %1476 = vmatmul.mubr.bf16.gmra.mxu0 %v3256_v50  ;;  %v3292_v50 = vld [vmem:[%s3420_s22 + $0x340] ss:$16 sps:$4 sm:$0xff]  }
  0xed   : > { %1483 = vmatprep.mubr.bf16.mxu0 %v3260_v51 }
  0xf2   : > { %1789 = vmatmul.mubr.bf16.gmra.mxu1 %v3271_v56  ;;  %v2889_v56 = vcombine.low %v340_v43, %v342_v44 }
  0xf3   : > { %2954 = vmatprep.mubr.msk.bf16.mxu1 %vm1186_vm0, %v3275_v57 }
  0xf4   : > { %1484 = vmatmul.mubr.bf16.gmra.mxu0 %v3262_v54  ;;  %v3295_v54 = vld [vmem:[%s3420_s22 + $0x364] ss:$16 sps:$4 sm:$0xff]  }
  0xf5   : > { %1491 = vmatprep.mubr.bf16.mxu0 %v3266_v55 }
  0xfa   : > { %v1606_v62 = vpop.f32.mrf.mxu1  ;;  %1797 = vmatmul.mubr.bf16.gmra.mxu1 %v3277_v60 }
  0xfb   : > { %2955 = vmatprep.mubr.msk.bf16.mxu1 %vm1186_vm0, %v3281_v61 }
  0xfc   : > { %1492 = vmatmul.mubr.bf16.gmra.mxu0 %v3268_v58  ;;  %v1608_v63 = vpop.f32.mrf.mxu1  ;;  %v3302_v58 = vld [vmem:[%s3420_s22 + $0x3ac] ss:$16 sps:$4 sm:$0xff]  }
  0xfd   : > { %1499 = vmatprep.mubr.bf16.mxu0 %v3272_v59 }
  0xfe   : > { %v1609_v2 = vpop.f32.mrf.mxu1 }
 0x100   : > { %v1611_v5 = vpop.f32.mrf.mxu1 }
 0x101   : > { %v2007_v5 = vpop.permute.xlu1 %2006 }
 0x102   : > { %v1614_v6 = vpop.f32.mrf.mxu1  ;;  %1805 = vmatmul.mubr.bf16.gmra.mxu1 %v3283_v3  ;;  %v337_v3 = vld [vmem:[%s3420_s22 + $0x370] sm:$0xff] }
 0x103   : > { %2956 = vmatprep.mubr.msk.bf16.mxu1 %vm1186_vm0, %v3287_v4 }
 0x104   : > { %1500 = vmatmul.mubr.bf16.gmra.mxu0 %v3274_v0  ;;  %v1616_v7 = vpop.f32.mrf.mxu1 }
 0x105   : > { %1507 = vmatprep.mubr.bf16.mxu0 %v3278_v1  ;;  %v344_v7 = vld [vmem:[%s3420_s22 + $0x3a8] sm:$0xff] }
 0x106   : > { %v3679_v10 = vpop.f32.mrf.mxu1 }
 0x108   : > { %v1619_v14 = vpop.f32.mrf.mxu1 }
 0x10a   : > { %v3689_v17 = vpop.f32.mrf.mxu1  ;;  %1813 = vmatmul.mubr.bf16.gmra.mxu1 %v3289_v11 }
 0x10b   : > { %2957 = vmatprep.mubr.msk.bf16.mxu1 %vm1186_vm0, %v3293_v13 }
 0x10c   : > { %v1317_v15 = vpop.f32.mrf.mxu0  ;;  %1508 = vmatmul.mubr.bf16.gmra.mxu0 %v3280_v8  ;;  %v1624_v23 = vpop.f32.mrf.mxu1  ;;  %v346_v8 = vld [vmem:[%s3420_s22 + $0x3b8] sm:$0xff] }
 0x10d   : > { %v1318_v16 = vadd.f32 %v3685_v12, %v1317_v15  ;;  %1515 = vmatprep.mubr.bf16.mxu0 %v3284_v9  ;;  %v2893_v21 = vcombine.low %v344_v7, %v346_v8  ;;  %v3311_v7 = vld [vmem:[%s3420_s22 + $0x3c4] ss:$16 sps:$4 sm:$0xff]  }
 0x10e   : > { %v1319_v18 = vpop.f32.mrf.mxu0  ;;  %v3698_v29 = vpop.f32.mrf.mxu1 }
 0x10f   : > { %v1607_v22 = vadd.f32 %v1606_v62, %v1318_v16 }
 0x110   : > { %v1320_v24 = vpop.f32.mrf.mxu0  ;;  %v1627_v35 = vpop.f32.mrf.mxu1 }
 0x111   : > { %v1321_v26 = vadd.f32 %v3685_v12, %v1320_v24  ;;  %v1861_v27 = vmax.f32 %v1607_v22, 0.0  ;;  %v2012_v22 = vpop.permute.xlu0 %2011  ;;  %v3307_v24 = vld [vmem:[%s3420_s22 + $0x3cc] ss:$16 sps:$4 sm:$0xff]  }
 0x112   : > { %v1322_v31 = vpop.f32.mrf.mxu0  ;;  %v3707_v41 = vpop.f32.mrf.mxu1  ;;  %1821 = vmatmul.mubr.bf16.gmra.mxu1 %v2885_v30  ;;  %v348_v35 = vld [vmem:[%s3420_s22 + $0x3c8] sm:$0xff] }
 0x113   : > { %v1610_v33 = vadd.f32 %v1609_v2, %v1321_v26  ;;  %v2309_v34 = vmul.f32 %v1992_v19, %v1861_v27  ;;  %2958 = vmatprep.mubr.msk.bf16.mxu1 %vm1186_vm0, %v3297_v32  ;;  %v335_v2 = vld [vmem:[%s3420_s22 + $0x360] sm:$0xff] }
 0x114   : > { %v1325_v36 = vpop.f32.mrf.mxu0  ;;  %1516 = vmatmul.mubr.bf16.gmra.mxu0 %v3286_v25  ;;  %v1632_v47 = vpop.f32.mrf.mxu1  ;;  %v2883_v14 = vcombine.low %v335_v2, %v337_v3  ;;  %v3301_v19 = vld [vmem:[%s3420_s22 + $0x384] ss:$16 sps:$4 sm:$0xff]   ;;  %v3304_v2 = vld [vmem:[%s3420_s22 + $0x3a0] ss:$16 sps:$4 sm:$0xff]  }
 0x115   : > { %v3029_v38 = vpack.c.bf16 %v2309_v34, %v2309_v34  ;;  %v1326_v39 = vadd.f32 %v3685_v12, %v1325_v36  ;;  %v1862_v40 = vmax.f32 %v1610_v33, 0.0  ;;  %1523 = vmatprep.mubr.bf16.mxu0 %v3290_v28  ;;  %v2017_v33 = vpop.permute.xlu1 %2016  ;;  %v350_v36 = vld [vmem:[%s3420_s22 + $0x3d8] sm:$0xff] }
 0x116   : > { %v1327_v42 = vpop.f32.mrf.mxu0  ;;  %v3717_v55 = vpop.f32.mrf.mxu1  ;;  %v2897_v47 = vcombine.low %v348_v35, %v350_v36 }
 0x117   : > { %2630 = vst.msk [vmem:[%s3704_s12] sm:$0xf] %vm2629_vm1, %v3029_v38  ;;  %v1615_v45 = vadd.f32 %v1614_v6, %v1326_v39  ;;  %v2310_v46 = vmul.f32 %v1997_v37, %v1862_v40  ;;  %v3299_v40 = vld [vmem:[%s3420_s22 + $0x380] ss:$16 sps:$4 sm:$0xff]  }
 0x118   : > { %v1328_v49 = vpop.f32.mrf.mxu0  ;;  %v1635_v61 = vpop.f32.mrf.mxu1 }
 0x119   : > { %v1863_v51 = vmax.f32 %v1615_v45, 0.0  ;;  %v3030_v52 = vpack.c.bf16 %v2310_v46, %v2310_v46  ;;  %v1329_v53 = vadd.f32 %v3685_v12, %v1328_v49  ;;  %v3306_v45 = vld [vmem:[%s3420_s22 + $0x3a4] ss:$16 sps:$4 sm:$0xff]   ;;  %v352_v61 = vld [vmem:[%s3420_s22 + $0x3e8] sm:$0xff] }
 0x11a   : > { %v1330_v57 = vpop.f32.mrf.mxu0  ;;  %v3726_v4 = vpop.f32.mrf.mxu1  ;;  %1829 = vmatmul.mubr.bf16.gmra.mxu1 %v2889_v56 }
 0x11b   : > { %v2311_v59 = vmul.f32 %v2002_v48, %v1863_v51  ;;  %2631 = vst.msk [vmem:[%s3704_s12 + $0x4] sm:$0xf] %vm2629_vm1, %v3030_v52  ;;  %v1618_v60 = vadd.f32 %v3679_v10, %v1329_v53  ;;  %2959 = vmatprep.mubr.msk.bf16.mxu1 %vm1186_vm0, %v3302_v58  ;;  %v2022_v48 = vpop.permute.xlu0 %2021 }
 0x11c   : > { %v1333_v62 = vpop.f32.mrf.mxu0  ;;  %1524 = vmatmul.mubr.bf16.gmra.mxu0 %v3292_v50  ;;  %v1640_v11 = vpop.f32.mrf.mxu1  ;;  %v3312_v50 = vld [vmem:[%s3420_s22 + $0x3ec] ss:$16 sps:$4 sm:$0xff]  }
 0x11d   : > { %v3031_v63 = vpack.c.bf16 %v2311_v59, %v2311_v59  ;;  %v1864_v0 = vmax.f32 %v1618_v60, 0.0  ;;  %v1334_v1 = vadd.f32 %v3685_v12, %v1333_v62  ;;  %1531 = vmatprep.mubr.bf16.mxu0 %v3295_v54  ;;  %v2027_v59 = vpop.permute.xlu1 %2026  ;;  %v354_v62 = vld [vmem:[%s3420_s22 + $0x3f8] sm:$0xff] }
 0x11e   : > { %v1335_v6 = vpop.f32.mrf.mxu0  ;;  %v3736_v20 = vpop.f32.mrf.mxu1 }
 0x11f   : > { %2632 = vst.msk [vmem:[%s3704_s12 + $0x8] sm:$0xf] %vm2629_vm1, %v3031_v63  ;;  %v2312_v9 = vmul.f32 %v2007_v5, %v1864_v0  ;;  %v1623_v10 = vadd.f32 %v3689_v17, %v1334_v1 }
 0x120   : > { %v1336_v13 = vpop.f32.mrf.mxu0  ;;  %v1643_v26 = vpop.f32.mrf.mxu1 }
 0x121   : > { %v3032_v15 = vpack.c.bf16 %v2312_v9, %v2312_v9  ;;  %v1865_v16 = vmax.f32 %v1623_v10, 0.0  ;;  %v1337_v18 = vadd.f32 %v3685_v12, %v1336_v13  ;;  %v2901_v9 = vcombine.low %v352_v61, %v354_v62  ;;  %v2032_v10 = vpop.permute.xlu0 %2031  ;;  %v3309_v26 = vld [vmem:[%s3420_s22 + $0x3c0] ss:$16 sps:$4 sm:$0xff]  }
 0x122   : > { %v1338_v23 = vpop.f32.mrf.mxu0  ;;  %v3743_v32 = vpop.f32.mrf.mxu1  ;;  %1837 = vmatmul.mubr.bf16.gmra.mxu1 %v2893_v21 }
 0x123   : > { %2633 = vst.msk [vmem:[%s3704_s12 + $0xc] sm:$0xf] %vm2629_vm1, %v3032_v15  ;;  %v2313_v25 = vmul.f32 %v2012_v22, %v1865_v16  ;;  %v1626_v17 = vadd.f32 %v3698_v29, %v1337_v18  ;;  %2960 = vmatprep.mubr.msk.bf16.mxu1 %vm1186_vm0, %v3307_v24  ;;  %v2037_v22 = vpop.permute.xlu1 %2036 }
 0x124   : > { %v1341_v27 = vpop.f32.mrf.mxu0  ;;  %1532 = vmatmul.mubr.bf16.gmra.mxu0 %v2883_v14  ;;  %v1648_v38 = vpop.f32.mrf.mxu1 }
 0x125   : > { %v3033_v28 = vpack.c.bf16 %v2313_v25, %v2313_v25  ;;  %v1866_v30 = vmax.f32 %v1626_v17, 0.0  ;;  %v1342_v31 = vadd.f32 %v3685_v12, %v1341_v27  ;;  %1539 = vmatprep.mubr.bf16.mxu0 %v3301_v19 }
 0x126   : > { %v1343_v34 = vpop.f32.mrf.mxu0  ;;  %v3754_v46 = vpop.f32.mrf.mxu1 }
 0x127   : > { %2634 = vst.msk [vmem:[%s3704_s12 + $0x10] sm:$0xf] %vm2629_vm1, %v3033_v28  ;;  %v2314_v29 = vmul.f32 %v2017_v33, %v1866_v30  ;;  %v1631_v37 = vadd.f32 %v3707_v41, %v1342_v31  ;;  %v3316_v31 = vld [vmem:[%s3420_s22 + $0x3e4] ss:$16 sps:$4 sm:$0xff]   ;;  %v2042_v34 = vpop.permute.xlu0 %2041 }
 0x128   : > { %v1344_v39 = vpop.f32.mrf.mxu0  ;;  %v1651_v52 = vpop.f32.mrf.mxu1 }
 0x129   : > { %v3034_v42 = vpack.c.bf16 %v2314_v29, %v2314_v29  ;;  %v1867_v43 = vmax.f32 %v1631_v37, 0.0  ;;  %v1345_v44 = vadd.f32 %v3685_v12, %v1344_v39 }
 0x12a   : > { %v1346_v49 = vpop.f32.mrf.mxu0  ;;  %v3761_v58 = vpop.f32.mrf.mxu1  ;;  %1845 = vmatmul.mubr.bf16.gmra.mxu1 %v2897_v47 }
 0x12b   : > { %2635 = vst.msk [vmem:[%s3704_s12 + $0x14] sm:$0xf] %vm2629_vm1, %v3034_v42  ;;  %v2315_v51 = vmul.f32 %v2022_v48, %v1867_v43  ;;  %v1634_v41 = vadd.f32 %v3717_v55, %v1345_v44  ;;  %2961 = vmatprep.mubr.msk.bf16.mxu1 %vm1186_vm0, %v3312_v50  ;;  %v2047_v43 = vpop.permute.xlu1 %2046  ;;  %v3314_v49 = vld [vmem:[%s3420_s22 + $0x3e0] ss:$16 sps:$4 sm:$0xff]  }
 0x12c   : > { %v1349_v53 = vpop.f32.mrf.mxu0  ;;  %1540 = vmatmul.mubr.bf16.gmra.mxu0 %v3299_v40  ;;  %v1656_v0 = vpop.f32.mrf.mxu1 }
 0x12d   : > { %v3035_v54 = vpack.c.bf16 %v2315_v51, %v2315_v51  ;;  %v1868_v56 = vmax.f32 %v1634_v41, 0.0  ;;  %v1350_v57 = vadd.f32 %v3685_v12, %v1349_v53  ;;  %1547 = vmatprep.mubr.bf16.mxu0 %v3306_v45  ;;  %v2052_v53 = vpop.permute.xlu0 %2051 }
 0x12e   : > { %v1351_v60 = vpop.f32.mrf.mxu0  ;;  %v1657_v8 = vpop.f32.mrf.mxu1 }
 0x12f   : > { %2636 = vst.msk [vmem:[%s3704_s12 + $0x18] sm:$0xf] %vm2629_vm1, %v3035_v54  ;;  %v2316_v55 = vmul.f32 %v2027_v59, %v1868_v56  ;;  %v1639_v63 = vadd.f32 %v3726_v4, %v1350_v57 }
 0x130   : > { %v1352_v1 = vpop.f32.mrf.mxu0  ;;  %v1659_v15 = vpop.f32.mrf.mxu1 }
 0x131   : > { %v3036_v3 = vpack.c.bf16 %v2316_v55, %v2316_v55  ;;  %v1869_v5 = vmax.f32 %v1639_v63, 0.0  ;;  %v1353_v6 = vadd.f32 %v3685_v12, %v1352_v1  ;;  %v2057_v63 = vpop.permute.xlu1 %2056 }
 0x132   : > { %v1354_v11 = vpop.f32.mrf.mxu0  ;;  %v1662_v21 = vpop.f32.mrf.mxu1  ;;  %1853 = vmatmul.mubr.bf16.gmra.mxu1 %v2901_v9 }
 0x133   : > { %2637 = vst.msk [vmem:[%s3704_s12 + $0x1c] sm:$0xf] %vm2629_vm1, %v3036_v3  ;;  %v2317_v13 = vmul.f32 %v2032_v10, %v1869_v5  ;;  %v1642_v14 = vadd.f32 %v3736_v20, %v1353_v6  ;;  %v2062_v10 = vpop.permute.xlu0 %2061 }
 0x134   : > { %v1357_v4 = vpop.f32.mrf.mxu0  ;;  %1548 = vmatmul.mubr.bf16.gmra.mxu0 %v3304_v2  ;;  %v1664_v25 = vpop.f32.mrf.mxu1 }
 0x135   : > { %v3037_v16 = vpack.c.bf16 %v2317_v13, %v2317_v13  ;;  %v1870_v18 = vmax.f32 %v1642_v14, 0.0  ;;  %v1358_v19 = vadd.f32 %v3685_v12, %v1357_v4  ;;  %1555 = vmatprep.mubr.bf16.mxu0 %v3311_v7 }
 0x136   : > { %v1359_v23 = vpop.f32.mrf.mxu0  ;;  %v1665_v33 = vpop.f32.mrf.mxu1 }
 0x137   : > { %2638 = vst.msk [vmem:[%s3704_s12 + $0x20] sm:$0xf] %vm2629_vm1, %v3037_v16  ;;  %v2318_v24 = vmul.f32 %v2037_v22, %v1870_v18  ;;  %v1647_v20 = vadd.f32 %v3743_v32, %v1358_v19  ;;  %v2067_v22 = vpop.permute.xlu1 %2066 }
 0x138   : > { %v1360_v17 = vpop.f32.mrf.mxu0  ;;  %v1667_v37 = vpop.f32.mrf.mxu1 }
 0x139   : > { %v3038_v27 = vpack.c.bf16 %v2318_v24, %v2318_v24  ;;  %v1871_v28 = vmax.f32 %v1647_v20, 0.0  ;;  %v1361_v30 = vadd.f32 %v3685_v12, %v1360_v17 }
 0x13a   : > { %v1362_v35 = vpop.f32.mrf.mxu0  ;;  %v1670_v42 = vpop.f32.mrf.mxu1 }
 0x13b   : > { %2639 = vst.msk [vmem:[%s3704_s12 + $0x24] sm:$0xf] %vm2629_vm1, %v3038_v27  ;;  %v2319_v36 = vmul.f32 %v2042_v34, %v1871_v28  ;;  %v1650_v29 = vadd.f32 %v3754_v46, %v1361_v30 }
 0x13c   : > { %v1365_v32 = vpop.f32.mrf.mxu0  ;;  %1556 = vmatmul.mubr.bf16.gmra.mxu0 %v3309_v26  ;;  %v1672_v48 = vpop.f32.mrf.mxu1 }
 0x13d   : > { %v3039_v38 = vpack.c.bf16 %v2319_v36, %v2319_v36  ;;  %v1872_v39 = vmax.f32 %v1650_v29, 0.0  ;;  %v1366_v40 = vadd.f32 %v3685_v12, %v1365_v32  ;;  %1563 = vmatprep.mubr.bf16.mxu0 %v3316_v31  ;;  %v2072_v31 = vpop.permute.xlu0 %2071 }
 0x13e   : > { %v1367_v44 = vpop.f32.mrf.mxu0  ;;  %v1673_v52 = vpop.f32.mrf.mxu1 }
 0x13f   : > { %2640 = vst.msk [vmem:[%s3704_s12 + $0x28] sm:$0xf] %vm2629_vm1, %v3039_v38  ;;  %v2320_v45 = vmul.f32 %v2047_v43, %v1872_v39  ;;  %v1655_v47 = vadd.f32 %v3761_v58, %v1366_v40  ;;  %v2077_v40 = vpop.permute.xlu1 %2076 }
 0x140   : > { %v1368_v46 = vpop.f32.mrf.mxu0  ;;  %v1675_v59 = vpop.f32.mrf.mxu1 }
 0x141   : > { %v3040_v50 = vpack.c.bf16 %v2320_v45, %v2320_v45  ;;  %v1873_v51 = vmax.f32 %v1655_v47, 0.0  ;;  %v1369_v41 = vadd.f32 %v3685_v12, %v1368_v46 }
 0x142   : > { %v1370_v54 = vpop.f32.mrf.mxu0  ;;  %v1678_v55 = vpop.f32.mrf.mxu1 }
 0x143   : > { %2641 = vst.msk [vmem:[%s3704_s12 + $0x2c] sm:$0xf] %vm2629_vm1, %v3040_v50  ;;  %v2321_v56 = vmul.f32 %v2052_v53, %v1873_v51  ;;  %v1658_v57 = vadd.f32 %v1657_v8, %v1369_v41  ;;  %v2082_v51 = vpop.permute.xlu0 %2081 }
 0x144   : > { %v1373_v60 = vpop.f32.mrf.mxu0  ;;  %1564 = vmatmul.mubr.bf16.gmra.mxu0 %v3314_v49  ;;  %v1680_v3 = vpop.f32.mrf.mxu1 }
 0x145   : > { %v3041_v61 = vpack.c.bf16 %v2321_v56, %v2321_v56  ;;  %v1874_v58 = vmax.f32 %v1658_v57, 0.0  ;;  %v1374_v62 = vadd.f32 %v3685_v12, %v1373_v60 }
 0x146   : > { %v1375_v0 = vpop.f32.mrf.mxu0  ;;  %v1681_v9 = vpop.f32.mrf.mxu1 }
 0x147   : > { %2642 = vst.msk [vmem:[%s3704_s12 + $0x30] sm:$0xf] %vm2629_vm1, %v3041_v61  ;;  %v2322_v1 = vmul.f32 %v2057_v63, %v1874_v58  ;;  %v1663_v2 = vadd.f32 %v1662_v21, %v1374_v62  ;;  %v2087_v58 = vpop.permute.xlu1 %2086 }
 0x148   : > { %v1376_v5 = vpop.f32.mrf.mxu0  ;;  %v1683_v15 = vpop.f32.mrf.mxu1 }
 0x149   : > { %v3042_v6 = vpack.c.bf16 %v2322_v1, %v2322_v1  ;;  %v1875_v7 = vmax.f32 %v1663_v2, 0.0  ;;  %v1377_v8 = vadd.f32 %v3685_v12, %v1376_v5 }
 0x14a   : > { %v1378_v11 = vpop.f32.mrf.mxu0  ;;  %v1686_v21 = vpop.f32.mrf.mxu1 }
 0x14b   : > { %2643 = vst.msk [vmem:[%s3704_s12 + $0x34] sm:$0xf] %vm2629_vm1, %v3042_v6  ;;  %v2323_v13 = vmul.f32 %v2062_v10, %v1875_v7  ;;  %v1666_v14 = vadd.f32 %v1665_v33, %v1377_v8  ;;  %v2092_v7 = vpop.permute.xlu0 %2091 }
 0x14c   : > { %v1381_v4 = vpop.f32.mrf.mxu0  ;;  %v1688_v25 = vpop.f32.mrf.mxu1 }
 0x14d   : > { %v3043_v16 = vpack.c.bf16 %v2323_v13, %v2323_v13  ;;  %v1876_v18 = vmax.f32 %v1666_v14, 0.0  ;;  %v1382_v19 = vadd.f32 %v3685_v12, %v1381_v4 }
 0x14e   : > { %v1383_v23 = vpop.f32.mrf.mxu0  ;;  %v1689_v30 = vpop.f32.mrf.mxu1 }
 0x14f   : > { %2644 = vst.msk [vmem:[%s3704_s12 + $0x38] sm:$0xf] %vm2629_vm1, %v3043_v16  ;;  %v2324_v24 = vmul.f32 %v2067_v22, %v1876_v18  ;;  %v1671_v20 = vadd.f32 %v1670_v42, %v1382_v19  ;;  %v2097_v18 = vpop.permute.xlu1 %2096 }
 0x150   : > { %v1384_v17 = vpop.f32.mrf.mxu0  ;;  %v1691_v36 = vpop.f32.mrf.mxu1 }
 0x151   : > { %v3044_v26 = vpack.c.bf16 %v2324_v24, %v2324_v24  ;;  %v1877_v27 = vmax.f32 %v1671_v20, 0.0  ;;  %v1385_v28 = vadd.f32 %v3685_v12, %v1384_v17 }
 0x152   : > { %v1386_v33 = vpop.f32.mrf.mxu0  ;;  %v1694_v39 = vpop.f32.mrf.mxu1 }
 0x153   : > { %2645 = vst.msk [vmem:[%s3704_s12 + $0x3c] sm:$0xf] %vm2629_vm1, %v3044_v26  ;;  %v2325_v34 = vmul.f32 %v2072_v31, %v1877_v27  ;;  %v1674_v35 = vadd.f32 %v1673_v52, %v1385_v28  ;;  %v2102_v27 = vpop.permute.xlu0 %2101 }
 0x154   : > { %v1389_v29 = vpop.f32.mrf.mxu0  ;;  %v1696_v45 = vpop.f32.mrf.mxu1 }
 0x155   : > { %v3045_v37 = vpack.c.bf16 %v2325_v34, %v2325_v34  ;;  %v1878_v32 = vmax.f32 %v1674_v35, 0.0  ;;  %v1390_v38 = vadd.f32 %v3685_v12, %v1389_v29 }
 0x156   : > { %v1391_v42 = vpop.f32.mrf.mxu0  ;;  %v1697_v50 = vpop.f32.mrf.mxu1 }
 0x157   : > { %2646 = vst.msk [vmem:[%s3704_s12 + $0x40] sm:$0xf] %vm2629_vm1, %v3045_v37  ;;  %v2326_v43 = vmul.f32 %v2077_v40, %v1878_v32  ;;  %v1679_v44 = vadd.f32 %v1678_v55, %v1390_v38  ;;  %v2107_v32 = vpop.permute.xlu1 %2106 }
 0x158   : > { %v1392_v47 = vpop.f32.mrf.mxu0  ;;  %v1699_v54 = vpop.f32.mrf.mxu1 }
 0x159   : > { %v3046_v48 = vpack.c.bf16 %v2326_v43, %v2326_v43  ;;  %v1879_v46 = vmax.f32 %v1679_v44, 0.0  ;;  %v1393_v49 = vadd.f32 %v3685_v12, %v1392_v47 }
 0x15a   : > { %v1394_v41 = vpop.f32.mrf.mxu0  ;;  %v1702_v61 = vpop.f32.mrf.mxu1 }
 0x15b   : > { %2647 = vst.msk [vmem:[%s3704_s12 + $0x44] sm:$0xf] %vm2629_vm1, %v3046_v48  ;;  %v2327_v52 = vmul.f32 %v2082_v51, %v1879_v46  ;;  %v1682_v53 = vadd.f32 %v1681_v9, %v1393_v49  ;;  %v2112_v46 = vpop.permute.xlu0 %2111 }
 0x15c   : > { %v1397_v56 = vpop.f32.mrf.mxu0  ;;  %v1704_v0 = vpop.f32.mrf.mxu1 }
 0x15d   : > { %v3047_v57 = vpack.c.bf16 %v2327_v52, %v2327_v52  ;;  %v1880_v59 = vmax.f32 %v1682_v53, 0.0  ;;  %v1398_v60 = vadd.f32 %v3685_v12, %v1397_v56 }
 0x15e   : > { %v1399_v62 = vpop.f32.mrf.mxu0  ;;  %v1705_v6 = vpop.f32.mrf.mxu1 }
 0x15f   : > { %2648 = vst.msk [vmem:[%s3704_s12 + $0x48] sm:$0xf] %vm2629_vm1, %v3047_v57  ;;  %v2328_v55 = vmul.f32 %v2087_v58, %v1880_v59  ;;  %v1687_v63 = vadd.f32 %v1686_v21, %v1398_v60  ;;  %v2117_v59 = vpop.permute.xlu1 %2116 }
 0x160   : > { %v1400_v1 = vpop.f32.mrf.mxu0  ;;  %v1707_v11 = vpop.f32.mrf.mxu1 }
 0x161   : > { %v3048_v2 = vpack.c.bf16 %v2328_v55, %v2328_v55  ;;  %v1881_v3 = vmax.f32 %v1687_v63, 0.0  ;;  %v1401_v5 = vadd.f32 %v3685_v12, %v1400_v1 }
 0x162   : > { %v1402_v8 = vpop.f32.mrf.mxu0  ;;  %v1710_v16 = vpop.f32.mrf.mxu1 }
 0x163   : > { %2649 = vst.msk [vmem:[%s3704_s12 + $0x4c] sm:$0xf] %vm2629_vm1, %v3048_v2  ;;  %v2329_v9 = vmul.f32 %v2092_v7, %v1881_v3  ;;  %v1690_v10 = vadd.f32 %v1689_v30, %v1401_v5  ;;  %v2122_v3 = vpop.permute.xlu0 %2121 }
 0x164   : > { %v1405_v13 = vpop.f32.mrf.mxu0  ;;  %v1712_v23 = vpop.f32.mrf.mxu1 }
 0x165   : > { %v3049_v14 = vpack.c.bf16 %v2329_v9, %v2329_v9  ;;  %v1882_v15 = vmax.f32 %v1690_v10, 0.0  ;;  %v1406_v4 = vadd.f32 %v3685_v12, %v1405_v13 }
 0x166   : > { %v1407_v19 = vpop.f32.mrf.mxu0  ;;  %v1713_v26 = vpop.f32.mrf.mxu1 }
 0x167   : > { %2650 = vst.msk [vmem:[%s3704_s12 + $0x50] sm:$0xf] %vm2629_vm1, %v3049_v14  ;;  %v2330_v21 = vmul.f32 %v2097_v18, %v1882_v15  ;;  %v1695_v22 = vadd.f32 %v1694_v39, %v1406_v4  ;;  %v2127_v15 = vpop.permute.xlu1 %2126 }
 0x168   : > { %v1408_v24 = vpop.f32.mrf.mxu0  ;;  %v1715_v33 = vpop.f32.mrf.mxu1 }
 0x169   : > { %v3050_v20 = vpack.c.bf16 %v2330_v21, %v2330_v21  ;;  %v1883_v25 = vmax.f32 %v1695_v22, 0.0  ;;  %v1409_v17 = vadd.f32 %v3685_v12, %v1408_v24 }
 0x16a   : > { %v1410_v28 = vpop.f32.mrf.mxu0  ;;  %v1718_v37 = vpop.f32.mrf.mxu1 }
 0x16b   : > { %2651 = vst.msk [vmem:[%s3704_s12 + $0x54] sm:$0xf] %vm2629_vm1, %v3050_v20  ;;  %v2331_v30 = vmul.f32 %v2102_v27, %v1883_v25  ;;  %v1698_v31 = vadd.f32 %v1697_v50, %v1409_v17  ;;  %v2132_v25 = vpop.permute.xlu0 %2131 }
 0x16c   : > { %v1413_v34 = vpop.f32.mrf.mxu0  ;;  %v1720_v42 = vpop.f32.mrf.mxu1 }
 0x16d   : > { %v3051_v35 = vpack.c.bf16 %v2331_v30, %v2331_v30  ;;  %v1884_v36 = vmax.f32 %v1698_v31, 0.0  ;;  %v1414_v29 = vadd.f32 %v3685_v12, %v1413_v34 }
 0x16e   : > { %v1415_v38 = vpop.f32.mrf.mxu0  ;;  %v1721_v48 = vpop.f32.mrf.mxu1 }
 0x16f   : > { %2652 = vst.msk [vmem:[%s3704_s12 + $0x58] sm:$0xf] %vm2629_vm1, %v3051_v35  ;;  %v2332_v39 = vmul.f32 %v2107_v32, %v1884_v36  ;;  %v1703_v40 = vadd.f32 %v1702_v61, %v1414_v29  ;;  %v2137_v36 = vpop.permute.xlu1 %2136 }
 0x170   : > { %v1416_v43 = vpop.f32.mrf.mxu0  ;;  %v1723_v41 = vpop.f32.mrf.mxu1 }
 0x171   : > { %v3052_v44 = vpack.c.bf16 %v2332_v39, %v2332_v39  ;;  %v1885_v45 = vmax.f32 %v1703_v40, 0.0  ;;  %v1417_v47 = vadd.f32 %v3685_v12, %v1416_v43 }
 0x172   : > { %v1418_v49 = vpop.f32.mrf.mxu0  ;;  %v1726_v57 = vpop.f32.mrf.mxu1 }
 0x173   : > { %2653 = vst.msk [vmem:[%s3704_s12 + $0x5c] sm:$0xf] %vm2629_vm1, %v3052_v44  ;;  %v2333_v50 = vmul.f32 %v2112_v46, %v1885_v45  ;;  %v1706_v51 = vadd.f32 %v1705_v6, %v1417_v47  ;;  %v2142_v45 = vpop.permute.xlu0 %2141 }
 0x174   : > { %v1421_v52 = vpop.f32.mrf.mxu0  ;;  %v1728_v62 = vpop.f32.mrf.mxu1 }
 0x175   : > { %v3053_v53 = vpack.c.bf16 %v2333_v50, %v2333_v50  ;;  %v1886_v54 = vmax.f32 %v1706_v51, 0.0  ;;  %v1422_v56 = vadd.f32 %v3685_v12, %v1421_v52 }
 0x176   : > { %v1423_v60 = vpop.f32.mrf.mxu0  ;;  %v1729_v2 = vpop.f32.mrf.mxu1 }
 0x177   : > { %2654 = vst.msk [vmem:[%s3704_s12 + $0x60] sm:$0xf] %vm2629_vm1, %v3053_v53  ;;  %v2334_v61 = vmul.f32 %v2117_v59, %v1886_v54  ;;  %v1711_v58 = vadd.f32 %v1710_v16, %v1422_v56  ;;  %v2147_v54 = vpop.permute.xlu1 %2146 }
 0x178   : > { %v1424_v55 = vpop.f32.mrf.mxu0  ;;  %v1731_v8 = vpop.f32.mrf.mxu1 }
 0x179   : > { %v3054_v63 = vpack.c.bf16 %v2334_v61, %v2334_v61  ;;  %v1887_v0 = vmax.f32 %v1711_v58, 0.0  ;;  %v1425_v1 = vadd.f32 %v3685_v12, %v1424_v55 }
 0x17a   : > { %v1426_v5 = vpop.f32.mrf.mxu0  ;;  %v1734_v14 = vpop.f32.mrf.mxu1 }
 0x17b   : > { %2655 = vst.msk [vmem:[%s3704_s12 + $0x64] sm:$0xf] %vm2629_vm1, %v3054_v63  ;;  %v2335_v6 = vmul.f32 %v2122_v3, %v1887_v0  ;;  %v1714_v7 = vadd.f32 %v1713_v26, %v1425_v1  ;;  %v2152_v0 = vpop.permute.xlu0 %2151 }
 0x17c   : > { %v1429_v9 = vpop.f32.mrf.mxu0  ;;  %v1736_v19 = vpop.f32.mrf.mxu1 }
 0x17d   : > { %v3055_v10 = vpack.c.bf16 %v2335_v6, %v2335_v6  ;;  %v1888_v11 = vmax.f32 %v1714_v7, 0.0  ;;  %v1430_v13 = vadd.f32 %v3685_v12, %v1429_v9 }
 0x17e   : > { %v1431_v4 = vpop.f32.mrf.mxu0  ;;  %v1737_v20 = vpop.f32.mrf.mxu1 }
 0x17f   : > { %2656 = vst.msk [vmem:[%s3704_s12 + $0x68] sm:$0xf] %vm2629_vm1, %v3055_v10  ;;  %v2336_v16 = vmul.f32 %v2127_v15, %v1888_v11  ;;  %v1719_v18 = vadd.f32 %v1718_v37, %v1430_v13  ;;  %v2157_v11 = vpop.permute.xlu1 %2156 }
 0x180   : > { %v1432_v21 = vpop.f32.mrf.mxu0  ;;  %v1739_v28 = vpop.f32.mrf.mxu1 }
 0x181   : > { %v3056_v22 = vpack.c.bf16 %v2336_v16, %v2336_v16  ;;  %v1889_v23 = vmax.f32 %v1719_v18, 0.0  ;;  %v1433_v24 = vadd.f32 %v3685_v12, %v1432_v21 }
 0x182   : > { %v1434_v17 = vpop.f32.mrf.mxu0  ;;  %v1742_v35 = vpop.f32.mrf.mxu1 }
 0x183   : > { %2657 = vst.msk [vmem:[%s3704_s12 + $0x6c] sm:$0xf] %vm2629_vm1, %v3056_v22  ;;  %v2337_v26 = vmul.f32 %v2132_v25, %v1889_v23  ;;  %v1722_v27 = vadd.f32 %v1721_v48, %v1433_v24  ;;  %v2162_v23 = vpop.permute.xlu0 %2161 }
 0x184   : > { %v1437_v30 = vpop.f32.mrf.mxu0  ;;  %v1744_v38 = vpop.f32.mrf.mxu1 }
 0x185   : > { %v3057_v31 = vpack.c.bf16 %v2337_v26, %v2337_v26  ;;  %v1890_v33 = vmax.f32 %v1722_v27, 0.0  ;;  %v1438_v34 = vadd.f32 %v3685_v12, %v1437_v30 }
 0x186   : > { %v1439_v29 = vpop.f32.mrf.mxu0  ;;  %v1745_v44 = vpop.f32.mrf.mxu1 }
 0x187   : > { %2658 = vst.msk [vmem:[%s3704_s12 + $0x70] sm:$0xf] %vm2629_vm1, %v3057_v31  ;;  %v2338_v37 = vmul.f32 %v2137_v36, %v1890_v33  ;;  %v1727_v32 = vadd.f32 %v1726_v57, %v1438_v34  ;;  %v2167_v33 = vpop.permute.xlu1 %2166 }
 0x188   : > { %v1440_v39 = vpop.f32.mrf.mxu0  ;;  %v1747_v49 = vpop.f32.mrf.mxu1 }
 0x189   : > { %v3058_v40 = vpack.c.bf16 %v2338_v37, %v2338_v37  ;;  %v1891_v42 = vmax.f32 %v1727_v32, 0.0  ;;  %v1441_v43 = vadd.f32 %v3685_v12, %v1440_v39 }
 0x18a   : > { %v1442_v47 = vpop.f32.mrf.mxu0  ;;  %v1750_v53 = vpop.f32.mrf.mxu1 }
 0x18b   : > { %2659 = vst.msk [vmem:[%s3704_s12 + $0x74] sm:$0xf] %vm2629_vm1, %v3058_v40  ;;  %v2339_v48 = vmul.f32 %v2142_v45, %v1891_v42  ;;  %v1730_v46 = vadd.f32 %v1729_v2, %v1441_v43  ;;  %v2172_v42 = vpop.permute.xlu0 %2171 }
 0x18c   : > { %v1445_v50 = vpop.f32.mrf.mxu0  ;;  %v1752_v60 = vpop.f32.mrf.mxu1 }
 0x18d   : > { %v3059_v51 = vpack.c.bf16 %v2339_v48, %v2339_v48  ;;  %v1892_v41 = vmax.f32 %v1730_v46, 0.0  ;;  %v1446_v52 = vadd.f32 %v3685_v12, %v1445_v50 }
 0x18e   : > { %v1447_v56 = vpop.f32.mrf.mxu0  ;;  %v1753_v63 = vpop.f32.mrf.mxu1 }
 0x18f   : > { %2660 = vst.msk [vmem:[%s3704_s12 + $0x78] sm:$0xf] %vm2629_vm1, %v3059_v51  ;;  %v2340_v57 = vmul.f32 %v2147_v54, %v1892_v41  ;;  %v1735_v59 = vadd.f32 %v1734_v14, %v1446_v52  ;;  %v2177_v41 = vpop.permute.xlu1 %2176 }
 0x190   : > { %v1448_v61 = vpop.f32.mrf.mxu0  ;;  %v1755_v5 = vpop.f32.mrf.mxu1 }
 0x191   : > { %v3060_v58 = vpack.c.bf16 %v2340_v57, %v2340_v57  ;;  %v1893_v62 = vmax.f32 %v1735_v59, 0.0  ;;  %v1449_v55 = vadd.f32 %v3685_v12, %v1448_v61 }
 0x192   : > { %v1450_v1 = vpop.f32.mrf.mxu0  ;;  %v1758_v10 = vpop.f32.mrf.mxu1 }
 0x193   : > { %2661 = vst.msk [vmem:[%s3704_s12 + $0x7c] sm:$0xf] %vm2629_vm1, %v3060_v58  ;;  %v2341_v2 = vmul.f32 %v2152_v0, %v1893_v62  ;;  %v1738_v3 = vadd.f32 %v1737_v20, %v1449_v55  ;;  %v2182_v62 = vpop.permute.xlu0 %2181 }
 0x194   : > { %v1453_v6 = vpop.f32.mrf.mxu0  ;;  %v1760_v4 = vpop.f32.mrf.mxu1 }
 0x195   : > { %v3061_v7 = vpack.c.bf16 %v2341_v2, %v2341_v2  ;;  %v1894_v8 = vmax.f32 %v1738_v3, 0.0  ;;  %v1454_v9 = vadd.f32 %v3685_v12, %v1453_v6 }
 0x196   : > { %v1455_v13 = vpop.f32.mrf.mxu0  ;;  %v1761_v22 = vpop.f32.mrf.mxu1 }
 0x197   : > { %2662 = vst.msk [vmem:[%s3704_s12 + $0x80] sm:$0xf] %vm2629_vm1, %v3061_v7  ;;  %v2342_v14 = vmul.f32 %v2157_v11, %v1894_v8  ;;  %v1743_v15 = vadd.f32 %v1742_v35, %v1454_v9  ;;  %v2187_v8 = vpop.permute.xlu1 %2186 }
 0x198   : > { %v1456_v16 = vpop.f32.mrf.mxu0  ;;  %v1763_v17 = vpop.f32.mrf.mxu1 }
 0x199   : > { %v3062_v18 = vpack.c.bf16 %v2342_v14, %v2342_v14  ;;  %v1895_v19 = vmax.f32 %v1743_v15, 0.0  ;;  %v1457_v21 = vadd.f32 %v3685_v12, %v1456_v16  ;;  %v3877_v16 = vld [vmem:[%s3957_s2] ss:$0 sm:$0xff] }
 0x19a   : > { %v1458_v24 = vpop.f32.mrf.mxu0  ;;  %v1766_v31 = vpop.f32.mrf.mxu1 }
 0x19b   : > { %2663 = vst.msk [vmem:[%s3704_s12 + $0x84] sm:$0xf] %vm2629_vm1, %v3062_v18  ;;  %v2343_v20 = vmul.f32 %v2162_v23, %v1895_v19  ;;  %v1746_v25 = vadd.f32 %v1745_v44, %v1457_v21  ;;  %v2192_v19 = vpop.permute.xlu0 %2191 }
 0x19c   : > { %v1461_v26 = vpop.f32.mrf.mxu0  ;;  %v1768_v29 = vpop.f32.mrf.mxu1 }
 0x19d   : > { %v3063_v27 = vpack.c.bf16 %v2343_v20, %v2343_v20  ;;  %v1896_v28 = vmax.f32 %v1746_v25, 0.0  ;;  %v1462_v30 = vadd.f32 %v3685_v12, %v1461_v26 }
 0x19e   : > { %v1463_v34 = vpop.f32.mrf.mxu0  ;;  %v1769_v40 = vpop.f32.mrf.mxu1 }
 0x19f   : > { %2664 = vst.msk [vmem:[%s3704_s12 + $0x88] sm:$0xf] %vm2629_vm1, %v3063_v27  ;;  %v2344_v35 = vmul.f32 %v2167_v33, %v1896_v28  ;;  %v1751_v36 = vadd.f32 %v1750_v53, %v1462_v30  ;;  %v2197_v28 = vpop.permute.xlu1 %2196 }
 0x1a0   : > { %v1464_v37 = vpop.f32.mrf.mxu0  ;;  %v1771_v47 = vpop.f32.mrf.mxu1 }
 0x1a1   : > { %v3064_v32 = vpack.c.bf16 %v2344_v35, %v2344_v35  ;;  %v1897_v38 = vmax.f32 %v1751_v36, 0.0  ;;  %v1465_v39 = vadd.f32 %v3685_v12, %v1464_v37 }
 0x1a2   : > { %v1466_v43 = vpop.f32.mrf.mxu0  ;;  %v1774_v51 = vpop.f32.mrf.mxu1 }
 0x1a3   : > { %2665 = vst.msk [vmem:[%s3704_s12 + $0x8c] sm:$0xf] %vm2629_vm1, %v3064_v32  ;;  %v2345_v44 = vmul.f32 %v2172_v42, %v1897_v38  ;;  %v1754_v45 = vadd.f32 %v1753_v63, %v1465_v39  ;;  %v2202_v38 = vpop.permute.xlu0 %2201 }
 0x1a4   : > { %v1469_v48 = vpop.f32.mrf.mxu0  ;;  %v1776_v56 = vpop.f32.mrf.mxu1 }
 0x1a5   : > { %v3065_v46 = vpack.c.bf16 %v2345_v44, %v2345_v44  ;;  %v1898_v49 = vmax.f32 %v1754_v45, 0.0  ;;  %v1470_v50 = vadd.f32 %v3685_v12, %v1469_v48 }
 0x1a6   : > { %v1471_v52 = vpop.f32.mrf.mxu0  ;;  %v1777_v58 = vpop.f32.mrf.mxu1 }
 0x1a7   : > { %2666 = vst.msk [vmem:[%s3704_s12 + $0x90] sm:$0xf] %vm2629_vm1, %v3065_v46  ;;  %v2346_v53 = vmul.f32 %v2177_v41, %v1898_v49  ;;  %v1759_v54 = vadd.f32 %v1758_v10, %v1470_v50  ;;  %v2207_v49 = vpop.permute.xlu1 %2206 }
 0x1a8   : > { %v1472_v57 = vpop.f32.mrf.mxu0  ;;  %v1779_v1 = vpop.f32.mrf.mxu1 }
 0x1a9   : > { %v3066_v59 = vpack.c.bf16 %v2346_v53, %v2346_v53  ;;  %v1899_v60 = vmax.f32 %v1759_v54, 0.0  ;;  %v1473_v61 = vadd.f32 %v3685_v12, %v1472_v57 }
 0x1aa   : > { %v1474_v55 = vpop.f32.mrf.mxu0  ;;  %v1782_v7 = vpop.f32.mrf.mxu1 }
 0x1ab   : > { %2667 = vst.msk [vmem:[%s3704_s12 + $0x94] sm:$0xf] %vm2629_vm1, %v3066_v59  ;;  %v2347_v63 = vmul.f32 %v2182_v62, %v1899_v60  ;;  %v1762_v0 = vadd.f32 %v1761_v22, %v1473_v61  ;;  %v2212_v60 = vpop.permute.xlu0 %2211 }
 0x1ac   : > { %v1477_v2 = vpop.f32.mrf.mxu0  ;;  %v1784_v13 = vpop.f32.mrf.mxu1 }
 0x1ad   : > { %v3067_v3 = vpack.c.bf16 %v2347_v63, %v2347_v63  ;;  %v1900_v5 = vmax.f32 %v1762_v0, 0.0  ;;  %v1478_v6 = vadd.f32 %v3685_v12, %v1477_v2 }
 0x1ae   : > { %v1479_v9 = vpop.f32.mrf.mxu0  ;;  %v1785_v18 = vpop.f32.mrf.mxu1 }
 0x1af   : > { %2668 = vst.msk [vmem:[%s3704_s12 + $0x98] sm:$0xf] %vm2629_vm1, %v3067_v3  ;;  %v2348_v10 = vmul.f32 %v2187_v8, %v1900_v5  ;;  %v1767_v11 = vadd.f32 %v1766_v31, %v1478_v6  ;;  %v2217_v5 = vpop.permute.xlu1 %2216 }
 0x1b0   : > { %v1480_v14 = vpop.f32.mrf.mxu0  ;;  %v1787_v24 = vpop.f32.mrf.mxu1 }
 0x1b1   : > { %v3068_v15 = vpack.c.bf16 %v2348_v10, %v2348_v10  ;;  %v1901_v4 = vmax.f32 %v1767_v11, 0.0  ;;  %v1481_v12 = vadd.f32 %v3877_v16, %v1480_v14 }
 0x1b2   : > { %v1482_v21 = vpop.f32.mrf.mxu0  ;;  %v1790_v27 = vpop.f32.mrf.mxu1 }
 0x1b3   : > { %2669 = vst.msk [vmem:[%s3704_s12 + $0x9c] sm:$0xf] %vm2629_vm1, %v3068_v15  ;;  %v2349_v22 = vmul.f32 %v2192_v19, %v1901_v4  ;;  %v1770_v23 = vadd.f32 %v1769_v40, %v1481_v12  ;;  %v2222_v4 = vpop.permute.xlu0 %2221 }
 0x1b4   : > { %v1485_v20 = vpop.f32.mrf.mxu0  ;;  %v1792_v34 = vpop.f32.mrf.mxu1 }
 0x1b5   : > { %v3069_v25 = vpack.c.bf16 %v2349_v22, %v2349_v22  ;;  %v1902_v17 = vmax.f32 %v1770_v23, 0.0  ;;  %v1486_v26 = vadd.f32 %v3877_v16, %v1485_v20 }
 0x1b6   : > { %v1487_v30 = vpop.f32.mrf.mxu0  ;;  %v1793_v32 = vpop.f32.mrf.mxu1 }
 0x1b7   : > { %2670 = vst.msk [vmem:[%s3704_s12 + $0xa0] sm:$0xf] %vm2629_vm1, %v3069_v25  ;;  %v2350_v31 = vmul.f32 %v2197_v28, %v1902_v17  ;;  %v1775_v33 = vadd.f32 %v1774_v51, %v1486_v26  ;;  %v2227_v17 = vpop.permute.xlu1 %2226 }
 0x1b8   : > { %v1488_v35 = vpop.f32.mrf.mxu0  ;;  %v1795_v43 = vpop.f32.mrf.mxu1 }
 0x1b9   : > { %v3070_v36 = vpack.c.bf16 %v2350_v31, %v2350_v31  ;;  %v1903_v29 = vmax.f32 %v1775_v33, 0.0  ;;  %v1489_v37 = vadd.f32 %v3877_v16, %v1488_v35 }
 0x1ba   : > { %v1490_v39 = vpop.f32.mrf.mxu0  ;;  %v1798_v46 = vpop.f32.mrf.mxu1 }
 0x1bb   : > { %2671 = vst.msk [vmem:[%s3704_s12 + $0xa4] sm:$0xf] %vm2629_vm1, %v3070_v36  ;;  %v2351_v40 = vmul.f32 %v2202_v38, %v1903_v29  ;;  %v1778_v42 = vadd.f32 %v1777_v58, %v1489_v37  ;;  %v2232_v29 = vpop.permute.xlu0 %2231 }
 0x1bc   : > { %v1493_v44 = vpop.f32.mrf.mxu0  ;;  %v1800_v52 = vpop.f32.mrf.mxu1 }
 0x1bd   : > { %v3071_v45 = vpack.c.bf16 %v2351_v40, %v2351_v40  ;;  %v1904_v47 = vmax.f32 %v1778_v42, 0.0  ;;  %v1494_v48 = vadd.f32 %v3877_v16, %v1493_v44 }
 0x1be   : > { %v1495_v50 = vpop.f32.mrf.mxu0  ;;  %v1801_v59 = vpop.f32.mrf.mxu1 }
 0x1bf   : > { %2672 = vst.msk [vmem:[%s3704_s12 + $0xa8] sm:$0xf] %vm2629_vm1, %v3071_v45  ;;  %v2352_v51 = vmul.f32 %v2207_v49, %v1904_v47  ;;  %v1783_v41 = vadd.f32 %v1782_v7, %v1494_v48  ;;  %v2237_v47 = vpop.permute.xlu1 %2236 }
 0x1c0   : > { %v1496_v53 = vpop.f32.mrf.mxu0  ;;  %v1803_v55 = vpop.f32.mrf.mxu1 }
 0x1c1   : > { %v3072_v54 = vpack.c.bf16 %v2352_v51, %v2352_v51  ;;  %v1905_v56 = vmax.f32 %v1783_v41, 0.0  ;;  %v1497_v57 = vadd.f32 %v3877_v16, %v1496_v53 }
 0x1c2   : > { %v1498_v61 = vpop.f32.mrf.mxu0  ;;  %v1806_v3 = vpop.f32.mrf.mxu1 }
 0x1c3   : > { %2673 = vst.msk [vmem:[%s3704_s12 + $0xac] sm:$0xf] %vm2629_vm1, %v3072_v54  ;;  %v2353_v58 = vmul.f32 %v2212_v60, %v1905_v56  ;;  %v1786_v62 = vadd.f32 %v1785_v18, %v1497_v57  ;;  %v2242_v56 = vpop.permute.xlu0 %2241 }
 0x1c4   : > { %v1501_v63 = vpop.f32.mrf.mxu0  ;;  %v1808_v9 = vpop.f32.mrf.mxu1 }
 0x1c5   : > { %v3073_v0 = vpack.c.bf16 %v2353_v58, %v2353_v58  ;;  %v1906_v1 = vmax.f32 %v1786_v62, 0.0  ;;  %v1502_v2 = vadd.f32 %v3877_v16, %v1501_v63 }
 0x1c6   : > { %v1503_v6 = vpop.f32.mrf.mxu0  ;;  %v1809_v15 = vpop.f32.mrf.mxu1 }
 0x1c7   : > { %2674 = vst.msk [vmem:[%s3704_s12 + $0xb0] sm:$0xf] %vm2629_vm1, %v3073_v0  ;;  %v2354_v7 = vmul.f32 %v2217_v5, %v1906_v1  ;;  %v1791_v8 = vadd.f32 %v1790_v27, %v1502_v2  ;;  %v2247_v1 = vpop.permute.xlu1 %2246 }
 0x1c8   : > { %v1504_v10 = vpop.f32.mrf.mxu0  ;;  %v1811_v21 = vpop.f32.mrf.mxu1 }
 0x1c9   : > { %v3074_v11 = vpack.c.bf16 %v2354_v7, %v2354_v7  ;;  %v1907_v13 = vmax.f32 %v1791_v8, 0.0  ;;  %v1505_v14 = vadd.f32 %v3877_v16, %v1504_v10 }
 0x1ca   : > { %v1506_v12 = vpop.f32.mrf.mxu0  ;;  %v1814_v25 = vpop.f32.mrf.mxu1 }
 0x1cb   : > { %2675 = vst.msk [vmem:[%s3704_s12 + $0xb4] sm:$0xf] %vm2629_vm1, %v3074_v11  ;;  %v2355_v18 = vmul.f32 %v2222_v4, %v1907_v13  ;;  %v1794_v19 = vadd.f32 %v1793_v32, %v1505_v14  ;;  %v2252_v13 = vpop.permute.xlu0 %2251 }
 0x1cc   : > { %v1509_v22 = vpop.f32.mrf.mxu0  ;;  %v1816_v30 = vpop.f32.mrf.mxu1 }
 0x1cd   : > { %v3075_v23 = vpack.c.bf16 %v2355_v18, %v2355_v18  ;;  %v1908_v24 = vmax.f32 %v1794_v19, 0.0  ;;  %v1510_v20 = vadd.f32 %v3877_v16, %v1509_v22 }
 0x1ce   : > { %v1511_v26 = vpop.f32.mrf.mxu0  ;;  %v1817_v36 = vpop.f32.mrf.mxu1 }
 0x1cf   : > { %2676 = vst.msk [vmem:[%s3704_s12 + $0xb8] sm:$0xf] %vm2629_vm1, %v3075_v23  ;;  %v2356_v27 = vmul.f32 %v2227_v17, %v1908_v24  ;;  %v1799_v28 = vadd.f32 %v1798_v46, %v1510_v20  ;;  %v2257_v24 = vpop.permute.xlu1 %2256 }
 0x1d0   : > { %v1512_v31 = vpop.f32.mrf.mxu0  ;;  %v1819_v39 = vpop.f32.mrf.mxu1 }
 0x1d1   : > { %v3076_v33 = vpack.c.bf16 %v2356_v27, %v2356_v27  ;;  %v1909_v34 = vmax.f32 %v1799_v28, 0.0  ;;  %v1513_v35 = vadd.f32 %v3877_v16, %v1512_v31 }
 0x1d2   : > { %v1514_v37 = vpop.f32.mrf.mxu0  ;;  %v1822_v45 = vpop.f32.mrf.mxu1 }
 0x1d3   : > { %2677 = vst.msk [vmem:[%s3704_s12 + $0xbc] sm:$0xf] %vm2629_vm1, %v3076_v33  ;;  %v2357_v32 = vmul.f32 %v2232_v29, %v1909_v34  ;;  %v1802_v38 = vadd.f32 %v1801_v59, %v1513_v35  ;;  %v2262_v34 = vpop.permute.xlu0 %2261 }
 0x1d4   : > { %v1517_v40 = vpop.f32.mrf.mxu0  ;;  %v1824_v50 = vpop.f32.mrf.mxu1 }
 0x1d5   : > { %v3077_v42 = vpack.c.bf16 %v2357_v32, %v2357_v32  ;;  %v1910_v43 = vmax.f32 %v1802_v38, 0.0  ;;  %v1518_v44 = vadd.f32 %v3877_v16, %v1517_v40 }
 0x1d6   : > { %v1519_v48 = vpop.f32.mrf.mxu0  ;;  %v1825_v54 = vpop.f32.mrf.mxu1 }
 0x1d7   : > { %2678 = vst.msk [vmem:[%s3704_s12 + $0xc0] sm:$0xf] %vm2629_vm1, %v3077_v42  ;;  %v2358_v46 = vmul.f32 %v2237_v47, %v1910_v43  ;;  %v1807_v49 = vadd.f32 %v1806_v3, %v1518_v44  ;;  %v2267_v43 = vpop.permute.xlu1 %2266 }
 0x1d8   : > { %v1520_v51 = vpop.f32.mrf.mxu0  ;;  %v1827_v61 = vpop.f32.mrf.mxu1 }
 0x1d9   : > { %v3078_v41 = vpack.c.bf16 %v2358_v46, %v2358_v46  ;;  %v1911_v52 = vmax.f32 %v1807_v49, 0.0  ;;  %v1521_v53 = vadd.f32 %v3877_v16, %v1520_v51 }
 0x1da   : > { %v1522_v57 = vpop.f32.mrf.mxu0  ;;  %v1830_v0 = vpop.f32.mrf.mxu1 }
 0x1db   : > { %2679 = vst.msk [vmem:[%s3704_s12 + $0xc4] sm:$0xf] %vm2629_vm1, %v3078_v41  ;;  %v2359_v59 = vmul.f32 %v2242_v56, %v1911_v52  ;;  %v1810_v60 = vadd.f32 %v1809_v15, %v1521_v53  ;;  %v2272_v52 = vpop.permute.xlu0 %2271 }
 0x1dc   : > { %v1525_v58 = vpop.f32.mrf.mxu0  ;;  %v1832_v6 = vpop.f32.mrf.mxu1 }
 0x1dd   : > { %v3079_v62 = vpack.c.bf16 %v2359_v59, %v2359_v59  ;;  %v1912_v55 = vmax.f32 %v1810_v60, 0.0  ;;  %v1526_v63 = vadd.f32 %v3877_v16, %v1525_v58 }
 0x1de   : > { %v1527_v2 = vpop.f32.mrf.mxu0  ;;  %v1833_v11 = vpop.f32.mrf.mxu1 }
 0x1df   : > { %2680 = vst.msk [vmem:[%s3704_s12 + $0xc8] sm:$0xf] %vm2629_vm1, %v3079_v62  ;;  %v2360_v3 = vmul.f32 %v2247_v1, %v1912_v55  ;;  %v1815_v5 = vadd.f32 %v1814_v25, %v1526_v63  ;;  %v2277_v55 = vpop.permute.xlu1 %2276 }
 0x1e0   : > { %v1528_v7 = vpop.f32.mrf.mxu0  ;;  %v1835_v12 = vpop.f32.mrf.mxu1 }
 0x1e1   : > { %v3080_v8 = vpack.c.bf16 %v2360_v3, %v2360_v3  ;;  %v1913_v9 = vmax.f32 %v1815_v5, 0.0  ;;  %v1529_v10 = vadd.f32 %v3877_v16, %v1528_v7 }
 0x1e2   : > { %v1530_v14 = vpop.f32.mrf.mxu0  ;;  %v1838_v23 = vpop.f32.mrf.mxu1 }
 0x1e3   : > { %2681 = vst.msk [vmem:[%s3704_s12 + $0xcc] sm:$0xf] %vm2629_vm1, %v3080_v8  ;;  %v2361_v15 = vmul.f32 %v2252_v13, %v1913_v9  ;;  %v1818_v4 = vadd.f32 %v1817_v36, %v1529_v10  ;;  %v2282_v9 = vpop.permute.xlu0 %2281 }
 0x1e4   : > { %v1533_v18 = vpop.f32.mrf.mxu0  ;;  %v1840_v26 = vpop.f32.mrf.mxu1 }
 0x1e5   : > { %v3081_v19 = vpack.c.bf16 %v2361_v15, %v2361_v15  ;;  %v1914_v21 = vmax.f32 %v1818_v4, 0.0  ;;  %v1534_v22 = vadd.f32 %v3877_v16, %v1533_v18 }
 0x1e6   : > { %v1535_v20 = vpop.f32.mrf.mxu0  ;;  %v1841_v33 = vpop.f32.mrf.mxu1 }
 0x1e7   : > { %2682 = vst.msk [vmem:[%s3704_s12 + $0xd0] sm:$0xf] %vm2629_vm1, %v3081_v19  ;;  %v2362_v25 = vmul.f32 %v2257_v24, %v1914_v21  ;;  %v1823_v17 = vadd.f32 %v1822_v45, %v1534_v22  ;;  %v2287_v19 = vpop.permute.xlu1 %2286  ;;  %v2292_v26 = vpop.permute.xlu0 %2291 }
 0x1e8   : > { %v1536_v27 = vpop.f32.mrf.mxu0  ;;  %v1843_v37 = vpop.f32.mrf.mxu1 }
 0x1e9   : > { %v3082_v28 = vpack.c.bf16 %v2362_v25, %v2362_v25  ;;  %v1915_v30 = vmax.f32 %v1823_v17, 0.0  ;;  %v1537_v31 = vadd.f32 %v3877_v16, %v1536_v27 }
 0x1ea   : > { %v1538_v35 = vpop.f32.mrf.mxu0  ;;  %v1846_v42 = vpop.f32.mrf.mxu1 }
 0x1eb   : > { %2683 = vst.msk [vmem:[%s3704_s12 + $0xd4] sm:$0xf] %vm2629_vm1, %v3082_v28  ;;  %v2363_v36 = vmul.f32 %v2262_v34, %v1915_v30  ;;  %v1826_v29 = vadd.f32 %v1825_v54, %v1537_v31 }
 0x1ec   : > { %v1541_v32 = vpop.f32.mrf.mxu0  ;;  %v1848_v48 = vpop.f32.mrf.mxu1 }
 0x1ed   : > { %v3083_v38 = vpack.c.bf16 %v2363_v36, %v2363_v36  ;;  %v1916_v39 = vmax.f32 %v1826_v29, 0.0  ;;  %v1542_v40 = vadd.f32 %v3877_v16, %v1541_v32  ;;  %v2297_v36 = vpop.permute.xlu1 %2296 }
 0x1ee   : > { %v1543_v44 = vpop.f32.mrf.mxu0  ;;  %v1849_v41 = vpop.f32.mrf.mxu1 }
 0x1ef   : > { %2684 = vst.msk [vmem:[%s3704_s12 + $0xd8] sm:$0xf] %vm2629_vm1, %v3083_v38  ;;  %v2364_v45 = vmul.f32 %v2267_v43, %v1916_v39  ;;  %v1831_v47 = vadd.f32 %v1830_v0, %v1542_v40  ;;  %v2302_v43 = vpop.permute.xlu0 %2301 }
 0x1f0   : > { %v1544_v46 = vpop.f32.mrf.mxu0  ;;  %v1851_v57 = vpop.f32.mrf.mxu1 }
 0x1f1   : > { %v3084_v49 = vpack.c.bf16 %v2364_v45, %v2364_v45  ;;  %v1917_v50 = vmax.f32 %v1831_v47, 0.0  ;;  %v1545_v51 = vadd.f32 %v3877_v16, %v1544_v46 }
 0x1f2   : > { %v1546_v53 = vpop.f32.mrf.mxu0  ;;  %v1854_v62 = vpop.f32.mrf.mxu1 }
 0x1f3   : > { %2685 = vst.msk [vmem:[%s3704_s12 + $0xdc] sm:$0xf] %vm2629_vm1, %v3084_v49  ;;  %v2365_v54 = vmul.f32 %v2272_v52, %v1917_v50  ;;  %v1834_v56 = vadd.f32 %v1833_v11, %v1545_v51  ;;  %v2307_v49 = vpop.permute.xlu1 %2306 }
 0x1f4   : > { %v1549_v59 = vpop.f32.mrf.mxu0  ;;  %v1856_v2 = vpop.f32.mrf.mxu1 }
 0x1f5   : > { %v3085_v60 = vpack.c.bf16 %v2365_v54, %v2365_v54  ;;  %v1918_v61 = vmax.f32 %v1834_v56, 0.0  ;;  %v1550_v58 = vadd.f32 %v3877_v16, %v1549_v59 }
 0x1f6   : > { %v1551_v63 = vpop.f32.mrf.mxu0  ;;  %v1857_v8 = vpop.f32.mrf.mxu1 }
 0x1f7   : > { %2686 = vst.msk [vmem:[%s3704_s12 + $0xe0] sm:$0xf] %vm2629_vm1, %v3085_v60  ;;  %v2366_v0 = vmul.f32 %v2277_v55, %v1918_v61  ;;  %v1839_v1 = vadd.f32 %v1838_v23, %v1550_v58 }
 0x1f8   : > { %v1552_v3 = vpop.f32.mrf.mxu0  ;;  %v1859_v14 = vpop.f32.mrf.mxu1 }
 0x1f9   : > { %v3086_v5 = vpack.c.bf16 %v2366_v0, %v2366_v0  ;;  %v1919_v6 = vmax.f32 %v1839_v1, 0.0  ;;  %v1553_v7 = vadd.f32 %v3877_v16, %v1552_v3 }
 0x1fa   : > { %v1554_v10 = vpop.f32.mrf.mxu0 }
 0x1fb   : > { %2687 = vst.msk [vmem:[%s3704_s12 + $0xe4] sm:$0xf] %vm2629_vm1, %v3086_v5  ;;  %v2367_v11 = vmul.f32 %v2282_v9, %v1919_v6  ;;  %v1842_v13 = vadd.f32 %v1841_v33, %v1553_v7 }
 0x1fc   : > { %v1557_v15 = vpop.f32.mrf.mxu0 }
 0x1fd   : > { %v3087_v4 = vpack.c.bf16 %v2367_v11, %v2367_v11  ;;  %v1920_v12 = vmax.f32 %v1842_v13, 0.0  ;;  %v1558_v18 = vadd.f32 %v3877_v16, %v1557_v15 }
 0x1fe   : > { %v1559_v21 = vpop.f32.mrf.mxu0 }
 0x1ff   : > { %2688 = vst.msk [vmem:[%s3704_s12 + $0xe8] sm:$0xf] %vm2629_vm1, %v3087_v4  ;;  %v2368_v22 = vmul.f32 %v2287_v19, %v1920_v12  ;;  %v1847_v23 = vadd.f32 %v1846_v42, %v1558_v18 }
 0x200   : > { %v1560_v24 = vpop.f32.mrf.mxu0 }
 0x201   : > { %v3088_v20 = vpack.c.bf16 %v2368_v22, %v2368_v22  ;;  %v1921_v25 = vmax.f32 %v1847_v23, 0.0  ;;  %v1561_v17 = vadd.f32 %v3877_v16, %v1560_v24 }
 0x202   : > { %v1562_v27 = vpop.f32.mrf.mxu0 }
 0x203   : > { %2689 = vst.msk [vmem:[%s3704_s12 + $0xec] sm:$0xf] %vm2629_vm1, %v3088_v20  ;;  %v2369_v28 = vmul.f32 %v2292_v26, %v1921_v25  ;;  %v1850_v30 = vadd.f32 %v1849_v41, %v1561_v17 }
 0x204   : > { %v1565_v31 = vpop.f32.mrf.mxu0 }
 0x205   : > { %v3089_v33 = vpack.c.bf16 %v2369_v28, %v2369_v28  ;;  %v1922_v34 = vmax.f32 %v1850_v30, 0.0  ;;  %v1566_v35 = vadd.f32 %v3877_v16, %v1565_v31 }
 0x206   : > { %v1567_v29 = vpop.f32.mrf.mxu0 }
 0x207   : > { %2690 = vst.msk [vmem:[%s3704_s12 + $0xf0] sm:$0xf] %vm2629_vm1, %v3089_v33  ;;  %v2370_v37 = vmul.f32 %v2297_v36, %v1922_v34  ;;  %v1855_v32 = vadd.f32 %v1854_v62, %v1566_v35 }
 0x208   : > { %v1568_v38 = vpop.f32.mrf.mxu0 }
 0x209   : > { %v3090_v39 = vpack.c.bf16 %v2370_v37, %v2370_v37  ;;  %v1923_v40 = vmax.f32 %v1855_v32, 0.0  ;;  %v1569_v42 = vadd.f32 %v3877_v16, %v1568_v38 }
 0x20a   : > { %v1570_v44 = vpop.f32.mrf.mxu0 }
 0x20b   : > { %2691 = vst.msk [vmem:[%s3704_s12 + $0xf4] sm:$0xf] %vm2629_vm1, %v3090_v39  ;;  %v2371_v45 = vmul.f32 %v2302_v43, %v1923_v40  ;;  %v1858_v47 = vadd.f32 %v1857_v8, %v1569_v42 }
 0x20d   : > { %v3091_v48 = vpack.c.bf16 %v2371_v45, %v2371_v45  ;;  %v1924_v46 = vmax.f32 %v1858_v47, 0.0 }
 0x20f   : > { %2692 = vst.msk [vmem:[%s3704_s12 + $0xf8] sm:$0xf] %vm2629_vm1, %v3091_v48  ;;  %v2372_v50 = vmul.f32 %v2307_v49, %v1924_v46 }
 0x211   : > { %v3092_v51 = vpack.c.bf16 %v2372_v50, %v2372_v50 }
 0x213   : > { %2693 = vst.msk [vmem:[%s3704_s12 + $0xfc] sm:$0xf] %vm2629_vm1, %v3092_v51 }
 0x214 PF: > { %s14_s15 = sadd.s32 1, %s3324_s15  }
 0x215   : > { %p11_p4 = scmp.ge.s32.totalorder %s14_s15, 4  }
 0x217   :  { %13 = sbr.rel (!%p11_p4) target bundleno = 1 (0x1), region = 69 }

// kernel: _forward_jit.15
= control target key start
LH: loop header
LB: loop body
LE: loop exit
PB: predicated region body
PF: predicated region fallthrough
CT: control target
= control target key end

     0   :  { %s5215_s15 = smov 0   ;;  %s6710_s0 = inlined_call_operand.vmem [shape: bf16[1024,864], index: 0, kind: input, shape index: {}]   ;;  %s6711_s1 = inlined_call_operand.vmem [shape: bf16[864,32], index: 1, kind: input, shape index: {}]   ;;  %s6712_s2 = inlined_call_operand.vmem [shape: f32[1,32], index: 2, kind: input, shape index: {}]   ;;  %s6713_s3 = inlined_call_operand.vmem [shape: f32[1024,1], index: 3, kind: input, shape index: {}]   ;;  %s6714_s4 = inlined_call_operand.vmem [shape: bf16[1024,32], index: 4, kind: output, shape index: {}]  }
   0x1 LB: > { %s4196_s16 = sadd.s32 4294967295, %s5187_s15   ;;  %p4200_p0 = scmp.ge.s32.totalorder %s5187_s15, 1  ;;  %s5187_s15 = sphi %s5215_s15, %s14_s15  }
   0x2   : > { %p175_p1 = scmp.lt.s32.totalorder %s5187_s15, 3 }
   0x4   : > { %p176_p2 = pnand %p4200_p0, %p175_p1 }
   0x6   : > { %179 = sbr.rel (%p176_p2) target bundleno = 724 (0x2d4), region = 36 }
   0xb   : > { %v4806_v0 = vld [vmem:[%s6711_s1 + $0x38] sm:$0xff]   ;;  %v5189_v1 = vmov 0   ;;  %s4201_s19 = sshll.u32 %s4196_s16, 6  ;;  %v4807_v2 = vld [vmem:[%s6711_s1 + $0x30] sm:$0xff]   ;;  %v4808_v3 = vld [vmem:[%s6711_s1 + $0x28] sm:$0xff]   ;;  %vm2042_vm0 = vcmask 785408  }
   0xc   : > { %2139 = vmatprep.subr.bf16.mxu0 %v5189_v1  ;;  %4762 = vmatprep.subr.bf16.mxu1 %v5189_v1  ;;  %p208_p3 = scmp.lt.s32.totalorder %s4201_s19, 127  ;;  %v4809_v4 = vld [vmem:[%s6711_s1 + $0x20] sm:$0xff]   ;;  %v4810_v5 = vld [vmem:[%s6711_s1 + $0x18] sm:$0xff]   ;;  %v4811_v7 = vld [vmem:[%s6711_s1 + $0x10] sm:$0xff]   ;;  %vm4063_vm1 = vcmask 257024  }
   0xd   : > { %2140 = vmatpush1.bf16.msra.mxu0 %v4806_v0  ;;  %4778 = vmatpush1.bf16.msra.mxu1 %v4806_v0  ;;  %v4812_v9 = vld [vmem:[%s6711_s1 + $0x8] sm:$0xff]   ;;  %v4813_v10 = vld [vmem:[%s6711_s1] sm:$0xff]   ;;  %v4814_v11 = vld [vmem:[%s6711_s1 + $0x78] sm:$0xff]  }
   0xe   : > { %2141 = vmatprep.subr.bf16.mxu0 %v5189_v1  ;;  %4763 = vmatprep.subr.bf16.mxu1 %v5189_v1  ;;  %s6820_s19 = smov (!%p208_p3, %s4201_s19), 127  ;;  %v4815_v12 = vld [vmem:[%s6711_s1 + $0x70] sm:$0xff]   ;;  %v4816_v13 = vld [vmem:[%s6711_s1 + $0x68] sm:$0xff]   ;;  %v4817_v14 = vld [vmem:[%s6711_s1 + $0x60] sm:$0xff]  }
   0xf   : > { %4805 = vset.pattern.permute.xlu1 %v5189_v1  ;;  %4804 = vset.pattern.permute.xlu0 %v5189_v1  ;;  %s4794_s26 = smul.u32 28, %s6820_s19  ;;  %v4818_v15 = vld [vmem:[%s6711_s1 + $0x58] sm:$0xff]   ;;  %v4819_v16 = vld [vmem:[%s6711_s1 + $0x50] sm:$0xff]   ;;  %v4820_v17 = vld [vmem:[%s6711_s1 + $0x48] sm:$0xff]   ;;  %s4204_s10 = sshll.u32 %s6820_s19, 3 }
  0x10   : > { %v4821_v18 = vld [vmem:[%s6711_s1 + $0x40] sm:$0xff]   ;;  %v4828_v21 = vld [vmem:[%s6711_s1 + $0xb8] sm:$0xff]   ;;  %v4830_v25 = vld [vmem:[%s6711_s1 + $0xb0] sm:$0xff]   ;;  %s5538_s13 = scalar_lea.vmem %s6713_s3, %s4204_s10  ;;  %s4206_s21 = sshll.u32 %s6820_s19, 2 }
  0x11   : > { %2142 = vmatpush1.bf16.msra.mxu0 %v4807_v2  ;;  %4779 = vmatpush1.bf16.msra.mxu1 %v4807_v2  ;;  %s5254_s5 = scalar_lea.vmem %s6710_s0, %s4794_s26  ;;  %v4829_v22 = vld [vmem:[%s6711_s1 + $0x138] sm:$0xff]   ;;  %v4839_v26 = vld [vmem:[%s6711_s1 + $0x130] sm:$0xff]   ;;  %v4837_v29 = vld [vmem:[%s6711_s1 + $0xa8] sm:$0xff]   ;;  %s6333_s24 = scalar_lea.vmem %s6714_s4, %s4206_s21 }
  0x12   : > { %2143 = vmatprep.subr.bf16.mxu0 %v5189_v1  ;;  %4764 = vmatprep.subr.bf16.mxu1 %v5189_v1  ;;  %v4824_v6 = vld [vmem:[%s5254_s5 + $0x4] ss:$28 sps:$4 sm:$0xff]   ;;  %v4831_v23 = vld [vmem:[%s5254_s5 + $0x3c] ss:$28 sps:$4 sm:$0xff]   ;;  %v4840_v30 = vld [vmem:[%s5254_s5 + $0x74] ss:$28 sps:$4 sm:$0xff]  }
  0x13   : > { %v4827_v8 = vld [vmem:[%s5254_s5 + $0x544] ss:$28 sps:$4 sm:$0xff]   ;;  %2171 = vmatprep.mubr.bf16.mxu0 %v4824_v6  ;;  %v4833_v24 = vld [vmem:[%s5254_s5 + $0x57c] ss:$28 sps:$4 sm:$0xff]   ;;  %v4842_v31 = vld [vmem:[%s5254_s5 + $0x5b4] ss:$28 sps:$4 sm:$0xff]  }
  0x14   : > { %2363 = vmatprep.mubr.bf16.mxu1 %v4827_v8  ;;  %v4822_v19 = vld [vmem:[%s5254_s5] ss:$28 sps:$4 sm:$0xff]   ;;  %v4835_v27 = vld [vmem:[%s5254_s5 + $0x38] ss:$28 sps:$4 sm:$0xff]   ;;  %v4855_v32 = vld [vmem:[%s6711_s1 + $0x128] sm:$0xff]  }
  0x15   : > { %2144 = vmatpush1.bf16.msra.mxu0 %v4808_v3  ;;  %4780 = vmatpush1.bf16.msra.mxu1 %v4808_v3  ;;  %v4825_v20 = vld [vmem:[%s5254_s5 + $0x540] ss:$28 sps:$4 sm:$0xff]   ;;  %v4836_v28 = vld [vmem:[%s5254_s5 + $0x578] ss:$28 sps:$4 sm:$0xff]   ;;  %v4844_v34 = vld [vmem:[%s5254_s5 + $0x70] ss:$28 sps:$4 sm:$0xff]  }
  0x16   : > { %2145 = vmatprep.subr.bf16.mxu0 %v5189_v1  ;;  %4765 = vmatprep.subr.bf16.mxu1 %v5189_v1  ;;  %v4838_v33 = vld [vmem:[%s6711_s1 + $0xa0] sm:$0xff]   ;;  %v4845_v36 = vld [vmem:[%s5254_s5 + $0x5b0] ss:$28 sps:$4 sm:$0xff]   ;;  %v4846_v37 = vld [vmem:[%s6711_s1 + $0x98] sm:$0xff]  }
  0x17   : > { %v4865_v35 = vld [vmem:[%s6711_s1 + $0x120] sm:$0xff]   ;;  %v4848_v38 = vld [vmem:[%s5254_s5 + $0xac] ss:$28 sps:$4 sm:$0xff]   ;;  %v4881_v40 = vld [vmem:[%s6711_s1 + $0x118] sm:$0xff]  }
  0x18   : > { %v4850_v39 = vld [vmem:[%s5254_s5 + $0x5ec] ss:$28 sps:$4 sm:$0xff]   ;;  %v4847_v41 = vld [vmem:[%s6711_s1 + $0x90] sm:$0xff]   ;;  %v4857_v45 = vld [vmem:[%s5254_s5 + $0xe4] ss:$28 sps:$4 sm:$0xff]  }
  0x19   : > { %2146 = vmatpush1.bf16.msra.mxu0 %v4809_v4  ;;  %4781 = vmatpush1.bf16.msra.mxu1 %v4809_v4  ;;  %v4852_v42 = vld [vmem:[%s5254_s5 + $0xa8] ss:$28 sps:$4 sm:$0xff]   ;;  %v4891_v47 = vld [vmem:[%s6711_s1 + $0x110] sm:$0xff]   ;;  %v4861_v50 = vld [vmem:[%s5254_s5 + $0xe0] ss:$28 sps:$4 sm:$0xff]  }
  0x1a   : > { %2147 = vmatprep.subr.bf16.mxu0 %v5189_v1  ;;  %4766 = vmatprep.subr.bf16.mxu1 %v5189_v1  ;;  %v4853_v43 = vld [vmem:[%s5254_s5 + $0x5e8] ss:$28 sps:$4 sm:$0xff]   ;;  %v4862_v51 = vld [vmem:[%s5254_s5 + $0x620] ss:$28 sps:$4 sm:$0xff]   ;;  %v4864_v56 = vld [vmem:[%s6711_s1 + $0xf0] sm:$0xff]  }
  0x1b   : > { %v4854_v44 = vld [vmem:[%s6711_s1 + $0x88] sm:$0xff]   ;;  %v4859_v46 = vld [vmem:[%s5254_s5 + $0x624] ss:$28 sps:$4 sm:$0xff]   ;;  %v4863_v52 = vld [vmem:[%s6711_s1 + $0xf8] sm:$0xff]  }
  0x1c   : > { %v4856_v48 = vld [vmem:[%s6711_s1 + $0x80] sm:$0xff]   ;;  %v4905_v49 = vld [vmem:[%s6711_s1 + $0x108] sm:$0xff]   ;;  %v4866_v53 = vld [vmem:[%s5254_s5 + $0x11c] ss:$28 sps:$4 sm:$0xff]  }
  0x1d   : > { %2148 = vmatpush1.bf16.msra.mxu0 %v4810_v5  ;;  %4782 = vmatpush1.bf16.msra.mxu1 %v4810_v5  ;;  %v4868_v54 = vld [vmem:[%s5254_s5 + $0x65c] ss:$28 sps:$4 sm:$0xff]   ;;  %v4912_v55 = vld [vmem:[%s6711_s1 + $0x100] sm:$0xff]   ;;  %v4872_v59 = vld [vmem:[%s6711_s1 + $0xe8] sm:$0xff]  }
  0x1e   : > { %2149 = vmatprep.subr.bf16.mxu0 %v5189_v1  ;;  %4767 = vmatprep.subr.bf16.mxu1 %v5189_v1  ;;  %v4870_v57 = vld [vmem:[%s5254_s5 + $0x118] ss:$28 sps:$4 sm:$0xff]   ;;  %v4873_v63 = vld [vmem:[%s6711_s1 + $0xe0] sm:$0xff]   ;;  %v4878_v0 = vld [vmem:[%s5254_s5 + $0x150] ss:$28 sps:$4 sm:$0xff]  }
  0x1f   : > { %v4871_v58 = vld [vmem:[%s5254_s5 + $0x658] ss:$28 sps:$4 sm:$0xff]   ;;  %v4879_v3 = vld [vmem:[%s5254_s5 + $0x690] ss:$28 sps:$4 sm:$0xff]  }
  0x20   : > { %v4874_v60 = vld [vmem:[%s5254_s5 + $0x154] ss:$28 sps:$4 sm:$0xff]   ;;  %v4925_v62 = vld [vmem:[%s6711_s1 + $0x178] sm:$0xff]   ;;  %v4883_v5 = vld [vmem:[%s5254_s5 + $0x18c] ss:$28 sps:$4 sm:$0xff]  }
  0x21   : > { %2150 = vmatpush1.bf16.msra.mxu0 %v4811_v7  ;;  %4783 = vmatpush1.bf16.msra.mxu1 %v4811_v7  ;;  %v4876_v61 = vld [vmem:[%s5254_s5 + $0x694] ss:$28 sps:$4 sm:$0xff]   ;;  %v4880_v4 = vld [vmem:[%s6711_s1 + $0xd8] sm:$0xff]   ;;  %v4885_v6 = vld [vmem:[%s5254_s5 + $0x6cc] ss:$28 sps:$4 sm:$0xff]  }
  0x22   : > { %2151 = vmatprep.subr.bf16.mxu0 %v5189_v1  ;;  %4768 = vmatprep.subr.bf16.mxu1 %v5189_v1  ;;  %v4933_v2 = vld [vmem:[%s6711_s1 + $0x170] sm:$0xff]   ;;  %v4946_v7 = vld [vmem:[%s6711_s1 + $0x168] sm:$0xff]  }
  0x23   : > { %v4882_v8 = vld [vmem:[%s6711_s1 + $0xd0] sm:$0xff]  }
  0x25   : > { %2152 = vmatpush1.bf16.msra.mxu0 %v4812_v9  ;;  %4784 = vmatpush1.bf16.msra.mxu1 %v4812_v9  ;;  %v4887_v9 = vld [vmem:[%s5254_s5 + $0x188] ss:$28 sps:$4 sm:$0xff]  }
  0x26   : > { %2153 = vmatprep.subr.bf16.mxu0 %v5189_v1  ;;  %4769 = vmatprep.subr.bf16.mxu1 %v5189_v1 }
  0x29   : > { %2154 = vmatpush1.bf16.msra.mxu0 %v4813_v10  ;;  %4785 = vmatpush1.bf16.msra.mxu1 %v4813_v10  ;;  %v4888_v10 = vld [vmem:[%s5254_s5 + $0x6c8] ss:$28 sps:$4 sm:$0xff]  }
  0x2a   : > { %2155 = vmatprep.subr.bf16.mxu0 %v5189_v1  ;;  %4770 = vmatprep.subr.bf16.mxu1 %v5189_v1 }
  0x2d   : > { %2156 = vmatpush2.bf16.msra.mxu0 %v4814_v11  ;;  %4786 = vmatpush2.bf16.msra.mxu1 %v4814_v11  ;;  %v4889_v11 = vld [vmem:[%s6711_s1 + $0xc8] sm:$0xff]  }
  0x2e   : > { %2157 = vmatprep.subr.bf16.mxu0 %v5189_v1  ;;  %4771 = vmatprep.subr.bf16.mxu1 %v5189_v1 }
  0x31   : > { %2158 = vmatpush2.bf16.msra.mxu0 %v4815_v12  ;;  %4787 = vmatpush2.bf16.msra.mxu1 %v4815_v12  ;;  %v4892_v12 = vld [vmem:[%s5254_s5 + $0x1c4] ss:$28 sps:$4 sm:$0xff]  }
  0x32   : > { %2159 = vmatprep.subr.bf16.mxu0 %v5189_v1  ;;  %4772 = vmatprep.subr.bf16.mxu1 %v5189_v1 }
  0x35   : > { %2160 = vmatpush2.bf16.msra.mxu0 %v4816_v13  ;;  %4788 = vmatpush2.bf16.msra.mxu1 %v4816_v13  ;;  %v4896_v13 = vld [vmem:[%s5254_s5 + $0xc] ss:$28 sps:$4 sm:$0xff]  }
  0x36   : > { %2161 = vmatprep.subr.bf16.mxu0 %v5189_v1  ;;  %4773 = vmatprep.subr.bf16.mxu1 %v5189_v1 }
  0x39   : > { %2162 = vmatpush2.bf16.msra.mxu0 %v4817_v14  ;;  %4789 = vmatpush2.bf16.msra.mxu1 %v4817_v14  ;;  %v4953_v14 = vld [vmem:[%s6711_s1 + $0x160] sm:$0xff]  }
  0x3a   : > { %2163 = vmatprep.subr.bf16.mxu0 %v5189_v1  ;;  %4774 = vmatprep.subr.bf16.mxu1 %v5189_v1 }
  0x3d   : > { %2164 = vmatpush2.bf16.msra.mxu0 %v4818_v15  ;;  %4790 = vmatpush2.bf16.msra.mxu1 %v4818_v15  ;;  %v4890_v15 = vld [vmem:[%s6711_s1 + $0xc0] sm:$0xff]  }
  0x3e   : > { %2165 = vmatprep.subr.bf16.mxu0 %v5189_v1  ;;  %4775 = vmatprep.subr.bf16.mxu1 %v5189_v1 }
  0x41   : > { %2166 = vmatpush2.bf16.msra.mxu0 %v4819_v16  ;;  %4791 = vmatpush2.bf16.msra.mxu1 %v4819_v16  ;;  %v4898_v16 = vld [vmem:[%s6711_s1 + $0x1a8] sm:$0xff]  }
  0x42   : > { %2167 = vmatprep.subr.bf16.mxu0 %v5189_v1  ;;  %4776 = vmatprep.subr.bf16.mxu1 %v5189_v1 }
  0x45   : > { %2168 = vmatpush2.bf16.msra.mxu0 %v4820_v17  ;;  %4792 = vmatpush2.bf16.msra.mxu1 %v4820_v17  ;;  %v4966_v17 = vld [vmem:[%s6711_s1 + $0x158] sm:$0xff]  }
  0x46   : > { %2169 = vmatprep.subr.bf16.mxu0 %v5189_v1  ;;  %4777 = vmatprep.subr.bf16.mxu1 %v5189_v1 }
  0x49   : > { %2170 = vmatpush2.bf16.msra.mxu0 %v4821_v18  ;;  %4793 = vmatpush2.bf16.msra.mxu1 %v4821_v18  ;;  %v4894_v18 = vld [vmem:[%s5254_s5 + $0x8] ss:$28 sps:$4 sm:$0xff]  }
  0x4a   : > { %2428 = vmatprep.subr.bf16.mxu1 %v5189_v1  ;;  %2717 = vmatprep.subr.bf16.mxu0 %v5189_v1 }
  0x4c   : > { %2172 = vmatmul.mubr.bf16.vlgmr.msra.gmra.mxu0 %v4822_v19  ;;  %2364 = vmatmul.mubr.bf16.vlgmr.msra.gmra.mxu1 %v4825_v20  ;;  %v4897_v19 = vld [vmem:[%s5254_s5 + $0x1c0] ss:$28 sps:$4 sm:$0xff]  }
  0x4d   : > { %2429 = vmatpush1.bf16.msra.mxu1 %v4828_v21  ;;  %2718 = vmatpush1.bf16.msra.mxu0 %v4829_v22  ;;  %v4899_v20 = vld [vmem:[%s5254_s5 + $0x1fc] ss:$28 sps:$4 sm:$0xff]   ;;  %v4901_v21 = vld [vmem:[%s5254_s5 + $0x44] ss:$28 sps:$4 sm:$0xff]  }
  0x4e   : > { %2430 = vmatprep.subr.bf16.mxu1 %v5189_v1  ;;  %2179 = vmatprep.mubr.bf16.mxu0 %v4831_v23  ;;  %v4932_v22 = vld [vmem:[%s6711_s1 + $0x1a0] sm:$0xff]   ;;  %v4974_v23 = vld [vmem:[%s6711_s1 + $0x150] sm:$0xff]  }
  0x4f   : > { %2371 = vmatprep.mubr.bf16.mxu1 %v4833_v24  ;;  %2719 = vmatprep.subr.bf16.mxu0 %v5189_v1  ;;  %v4967_v24 = vld [vmem:[%s6711_s1 + $0x198] sm:$0xff]  }
  0x51   : > { %2431 = vmatpush1.bf16.msra.mxu1 %v4830_v25  ;;  %2720 = vmatpush1.bf16.msra.mxu0 %v4839_v26  ;;  %v4903_v25 = vld [vmem:[%s5254_s5 + $0x1f8] ss:$28 sps:$4 sm:$0xff]   ;;  %v4904_v26 = vld [vmem:[%s5254_s5 + $0x40] ss:$28 sps:$4 sm:$0xff]  }
  0x52   : > { %2432 = vmatprep.subr.bf16.mxu1 %v5189_v1  ;;  %2721 = vmatprep.subr.bf16.mxu0 %v5189_v1 }
  0x54   : > { %2180 = vmatmul.mubr.bf16.gmra.mxu0 %v4835_v27  ;;  %2372 = vmatmul.mubr.bf16.gmra.mxu1 %v4836_v28  ;;  %v4906_v27 = vld [vmem:[%s5254_s5 + $0x234] ss:$28 sps:$4 sm:$0xff]   ;;  %v4908_v28 = vld [vmem:[%s5254_s5 + $0x7c] ss:$28 sps:$4 sm:$0xff]  }
  0x55   : > { %2433 = vmatpush1.bf16.msra.mxu1 %v4837_v29  ;;  %2187 = vmatprep.mubr.bf16.mxu0 %v4840_v30  ;;  %v4987_v29 = vld [vmem:[%s6711_s1 + $0x148] sm:$0xff]   ;;  %v5007_v30 = vld [vmem:[%s6711_s1 + $0x190] sm:$0xff]  }
  0x56   : > { %2434 = vmatprep.subr.bf16.mxu1 %v5189_v1  ;;  %2379 = vmatprep.mubr.bf16.mxu1 %v4842_v31  ;;  %v4994_v31 = vld [vmem:[%s6711_s1 + $0x140] sm:$0xff]  }
  0x57   : > { %2722 = vmatpush1.bf16.msra.mxu0 %v4855_v32  ;;  %v4910_v32 = vld [vmem:[%s5254_s5 + $0x230] ss:$28 sps:$4 sm:$0xff]  }
  0x58   : > { %2723 = vmatprep.subr.bf16.mxu0 %v5189_v1 }
  0x59   : > { %2435 = vmatpush1.bf16.msra.mxu1 %v4838_v33  ;;  %v4911_v33 = vld [vmem:[%s5254_s5 + $0x78] ss:$28 sps:$4 sm:$0xff]  }
  0x5a   : > { %2436 = vmatprep.subr.bf16.mxu1 %v5189_v1 }
  0x5b   : > { %2724 = vmatpush1.bf16.msra.mxu0 %v4865_v35  ;;  %v4915_v35 = vld [vmem:[%s5254_s5 + $0xb4] ss:$28 sps:$4 sm:$0xff]  }
  0x5c   : > { %2188 = vmatmul.mubr.bf16.gmra.mxu0 %v4844_v34  ;;  %2380 = vmatmul.mubr.bf16.gmra.mxu1 %v4845_v36  ;;  %v4913_v34 = vld [vmem:[%s5254_s5 + $0x26c] ss:$28 sps:$4 sm:$0xff]  }
  0x5d   : > { %2437 = vmatpush1.bf16.msra.mxu1 %v4846_v37  ;;  %2195 = vmatprep.mubr.bf16.mxu0 %v4848_v38  ;;  %v4917_v36 = vld [vmem:[%s5254_s5 + $0x268] ss:$28 sps:$4 sm:$0xff]   ;;  %v4918_v37 = vld [vmem:[%s5254_s5 + $0xb0] ss:$28 sps:$4 sm:$0xff]  }
  0x5e   : > { %2438 = vmatprep.subr.bf16.mxu1 %v5189_v1  ;;  %2387 = vmatprep.mubr.bf16.mxu1 %v4850_v39  ;;  %v4919_v38 = vld [vmem:[%s5254_s5 + $0x2a4] ss:$28 sps:$4 sm:$0xff]  }
  0x5f   : > { %2725 = vmatprep.subr.bf16.mxu0 %v5189_v1  ;;  %v4923_v39 = vld [vmem:[%s5254_s5 + $0x2a0] ss:$28 sps:$4 sm:$0xff]  }
  0x60   : > { %2726 = vmatpush1.bf16.msra.mxu0 %v4881_v40  ;;  %v4924_v40 = vld [vmem:[%s5254_s5 + $0xe8] ss:$28 sps:$4 sm:$0xff]  }
  0x61   : > { %2439 = vmatpush1.bf16.msra.mxu1 %v4847_v41  ;;  %2727 = vmatprep.subr.bf16.mxu0 %v5189_v1  ;;  %v4926_v41 = vld [vmem:[%s5254_s5 + $0x2dc] ss:$28 sps:$4 sm:$0xff]  }
  0x62   : > { %2440 = vmatprep.subr.bf16.mxu1 %v5189_v1 }
  0x64   : > { %2196 = vmatmul.mubr.bf16.gmra.mxu0 %v4852_v42  ;;  %2388 = vmatmul.mubr.bf16.gmra.mxu1 %v4853_v43  ;;  %v4928_v42 = vld [vmem:[%s5254_s5 + $0x124] ss:$28 sps:$4 sm:$0xff]   ;;  %v4930_v43 = vld [vmem:[%s5254_s5 + $0x2d8] ss:$28 sps:$4 sm:$0xff]  }
  0x65   : > { %2441 = vmatpush1.bf16.msra.mxu1 %v4854_v44  ;;  %2203 = vmatprep.mubr.bf16.mxu0 %v4857_v45  ;;  %v4931_v44 = vld [vmem:[%s5254_s5 + $0x120] ss:$28 sps:$4 sm:$0xff]   ;;  %v4934_v45 = vld [vmem:[%s5254_s5 + $0x314] ss:$28 sps:$4 sm:$0xff]  }
  0x66   : > { %2442 = vmatprep.subr.bf16.mxu1 %v5189_v1  ;;  %2395 = vmatprep.mubr.bf16.mxu1 %v4859_v46  ;;  %v4936_v46 = vld [vmem:[%s5254_s5 + $0x15c] ss:$28 sps:$4 sm:$0xff]  }
  0x67   : > { %2728 = vmatpush1.bf16.msra.mxu0 %v4891_v47  ;;  %v4938_v47 = vld [vmem:[%s5254_s5 + $0x310] ss:$28 sps:$4 sm:$0xff]  }
  0x68   : > { %2729 = vmatprep.subr.bf16.mxu0 %v5189_v1 }
  0x69   : > { %2443 = vmatpush1.bf16.msra.mxu1 %v4856_v48  ;;  %v4939_v48 = vld [vmem:[%s5254_s5 + $0x158] ss:$28 sps:$4 sm:$0xff]  }
  0x6a   : > { %2444 = vmatprep.subr.bf16.mxu1 %v5189_v1 }
  0x6b   : > { %2730 = vmatpush1.bf16.msra.mxu0 %v4905_v49  ;;  %v5038_v49 = vld [vmem:[%s6711_s1 + $0x188] sm:$0xff]  }
  0x6c   : > { %2204 = vmatmul.mubr.bf16.gmra.mxu0 %v4861_v50  ;;  %2396 = vmatmul.mubr.bf16.gmra.mxu1 %v4862_v51  ;;  %v4940_v50 = vld [vmem:[%s5254_s5 + $0x34c] ss:$28 sps:$4 sm:$0xff]   ;;  %v4942_v51 = vld [vmem:[%s5254_s5 + $0x194] ss:$28 sps:$4 sm:$0xff]  }
  0x6d   : > { %2445 = vmatpush2.bf16.msra.mxu1 %v4863_v52  ;;  %2211 = vmatprep.mubr.bf16.mxu0 %v4866_v53  ;;  %v4944_v52 = vld [vmem:[%s5254_s5 + $0x348] ss:$28 sps:$4 sm:$0xff]   ;;  %v4945_v53 = vld [vmem:[%s5254_s5 + $0x190] ss:$28 sps:$4 sm:$0xff]  }
  0x6e   : > { %2446 = vmatprep.subr.bf16.mxu1 %v5189_v1  ;;  %2403 = vmatprep.mubr.bf16.mxu1 %v4868_v54  ;;  %v4947_v54 = vld [vmem:[%s5254_s5 + $0x384] ss:$28 sps:$4 sm:$0xff]  }
  0x6f   : > { %2731 = vmatprep.subr.bf16.mxu0 %v5189_v1 }
  0x70   : > { %2732 = vmatpush1.bf16.msra.mxu0 %v4912_v55  ;;  %v4949_v55 = vld [vmem:[%s5254_s5 + $0x1cc] ss:$28 sps:$4 sm:$0xff]  }
  0x71   : > { %2447 = vmatpush2.bf16.msra.mxu1 %v4864_v56  ;;  %2733 = vmatprep.subr.bf16.mxu0 %v5189_v1  ;;  %v4951_v56 = vld [vmem:[%s5254_s5 + $0x380] ss:$28 sps:$4 sm:$0xff]  }
  0x72   : > { %2448 = vmatprep.subr.bf16.mxu1 %v5189_v1 }
  0x74   : > { %2212 = vmatmul.mubr.bf16.gmra.mxu0 %v4870_v57  ;;  %2404 = vmatmul.mubr.bf16.gmra.mxu1 %v4871_v58  ;;  %v4952_v57 = vld [vmem:[%s5254_s5 + $0x1c8] ss:$28 sps:$4 sm:$0xff]   ;;  %v4954_v58 = vld [vmem:[%s5254_s5 + $0x3bc] ss:$28 sps:$4 sm:$0xff]  }
  0x75   : > { %2449 = vmatpush2.bf16.msra.mxu1 %v4872_v59  ;;  %2219 = vmatprep.mubr.bf16.mxu0 %v4874_v60  ;;  %v4956_v59 = vld [vmem:[%s5254_s5 + $0x204] ss:$28 sps:$4 sm:$0xff]   ;;  %v4958_v60 = vld [vmem:[%s5254_s5 + $0x3b8] ss:$28 sps:$4 sm:$0xff]  }
  0x76   : > { %2450 = vmatprep.subr.bf16.mxu1 %v5189_v1  ;;  %2411 = vmatprep.mubr.bf16.mxu1 %v4876_v61  ;;  %v4959_v61 = vld [vmem:[%s5254_s5 + $0x200] ss:$28 sps:$4 sm:$0xff]  }
  0x77   : > { %2734 = vmatpush2.bf16.msra.mxu0 %v4925_v62  ;;  %v4960_v62 = vld [vmem:[%s5254_s5 + $0x3f4] ss:$28 sps:$4 sm:$0xff]  }
  0x78   : > { %2735 = vmatprep.subr.bf16.mxu0 %v5189_v1 }
  0x79   : > { %2451 = vmatpush2.bf16.msra.mxu1 %v4873_v63  ;;  %v4962_v63 = vld [vmem:[%s5254_s5 + $0x23c] ss:$28 sps:$4 sm:$0xff]  }
  0x7a   : > { %2452 = vmatprep.subr.bf16.mxu1 %v5189_v1 }
  0x7b   : > { %2736 = vmatpush2.bf16.msra.mxu0 %v4933_v2  ;;  %v4965_v2 = vld [vmem:[%s5254_s5 + $0x238] ss:$28 sps:$4 sm:$0xff]  }
  0x7c   : > { %2220 = vmatmul.mubr.bf16.gmra.mxu0 %v4878_v0  ;;  %2412 = vmatmul.mubr.bf16.gmra.mxu1 %v4879_v3  ;;  %v4964_v0 = vld [vmem:[%s5254_s5 + $0x3f0] ss:$28 sps:$4 sm:$0xff]  }
  0x7d   : > { %2453 = vmatpush2.bf16.msra.mxu1 %v4880_v4  ;;  %2227 = vmatprep.mubr.bf16.mxu0 %v4883_v5  ;;  %v4968_v3 = vld [vmem:[%s5254_s5 + $0x42c] ss:$28 sps:$4 sm:$0xff]   ;;  %v4970_v4 = vld [vmem:[%s5254_s5 + $0x274] ss:$28 sps:$4 sm:$0xff]  }
  0x7e   : > { %2454 = vmatprep.subr.bf16.mxu1 %v5189_v1  ;;  %2419 = vmatprep.mubr.bf16.mxu1 %v4885_v6  ;;  %v3361_v5 = vld [vmem:[%s5538_s13 + $0x10] sm:$0xff]  ;;  %v3359_v6 = vld [vmem:[%s5538_s13] sm:$0xff] }
  0x7f   : > { %2737 = vmatprep.subr.bf16.mxu0 %v5189_v1  ;;  %3435 = vperm.xlu1 %4805, %v3361_v5  }
  0x80   : > { %2738 = vmatpush2.bf16.msra.mxu0 %v4946_v7  ;;  %3425 = vperm.xlu0 %4804, %v3359_v6   ;;  %v3362_v7 = vld [vmem:[%s5538_s13 + $0x18] sm:$0xff]  ;;  %v3388_v6 = vld [vmem:[%s5538_s13 + $0xe8] sm:$0xff] }
  0x81   : > { %2455 = vmatpush2.bf16.msra.mxu1 %v4882_v8  ;;  %2739 = vmatprep.subr.bf16.mxu0 %v5189_v1  ;;  %v3360_v8 = vld [vmem:[%s5538_s13 + $0x8] sm:$0xff] }
  0x82   : > { %2456 = vmatprep.subr.bf16.mxu1 %v5189_v1 }
  0x83   : > { %3440 = vperm.xlu1 %4805, %v3362_v7  }
  0x84   : > { %2228 = vmatmul.mubr.bf16.gmra.mxu0 %v4887_v9  ;;  %2420 = vmatmul.mubr.bf16.gmra.mxu1 %v4888_v10  ;;  %v4972_v9 = vld [vmem:[%s5254_s5 + $0x428] ss:$28 sps:$4 sm:$0xff]   ;;  %v4973_v10 = vld [vmem:[%s5254_s5 + $0x270] ss:$28 sps:$4 sm:$0xff]  }
  0x85   : > { %2457 = vmatpush2.bf16.msra.mxu1 %v4889_v11  ;;  %2235 = vmatprep.mubr.bf16.mxu0 %v4892_v12  ;;  %v4975_v11 = vld [vmem:[%s5254_s5 + $0x464] ss:$28 sps:$4 sm:$0xff]   ;;  %v4977_v12 = vld [vmem:[%s5254_s5 + $0x2ac] ss:$28 sps:$4 sm:$0xff]  }
  0x86   : > { %2458 = vmatprep.subr.bf16.mxu1 %v5189_v1  ;;  %2460 = vmatprep.mubr.bf16.mxu1 %v4896_v13  ;;  %v5069_v13 = vld [vmem:[%s6711_s1 + $0x180] sm:$0xff]  }
  0x87   : > { %2740 = vmatpush2.bf16.msra.mxu0 %v4953_v14  ;;  %3430 = vperm.xlu0 %4804, %v3360_v8   ;;  %v3364_v14 = vld [vmem:[%s5538_s13 + $0x28] sm:$0xff] }
  0x88   : > { %2741 = vmatprep.subr.bf16.mxu0 %v5189_v1  ;;  %3450 = vperm.xlu1 %4805, %v3364_v14  }
  0x89   : > { %2459 = vmatpush2.bf16.msra.mxu1 %v4890_v15  ;;  %v3363_v15 = vld [vmem:[%s5538_s13 + $0x20] sm:$0xff] }
  0x8a   : > { %4686 = vmatprep.subr.bf16.mxu1 %v4898_v16 }
  0x8b   : > { %2742 = vmatpush2.bf16.msra.mxu0 %v4966_v17  ;;  %3445 = vperm.xlu0 %4804, %v3363_v15   ;;  %v4979_v17 = vld [vmem:[%s5254_s5 + $0x460] ss:$28 sps:$4 sm:$0xff]   ;;  %v5018_v15 = vld [vmem:[%s5254_s5 + $0x3f8] ss:$28 sps:$4 sm:$0xff]  }
  0x8c   : > { %2236 = vmatmul.mubr.bf16.gmra.mxu0 %v4897_v19  ;;  %2461 = vmatmul.mubr.bf16.vlgmr.msra.gmra.mxu1 %v4894_v18  ;;  %v4980_v18 = vld [vmem:[%s5254_s5 + $0x2a8] ss:$28 sps:$4 sm:$0xff]   ;;  %v3365_v19 = vld [vmem:[%s5538_s13 + $0x30] sm:$0xff] }
  0x8d   : > { %4687 = vmatpush3.bf16.msra.mxu1 %v4898_v16  ;;  %2243 = vmatprep.mubr.bf16.mxu0 %v4899_v20  ;;  %v3366_v16 = vld [vmem:[%s5538_s13 + $0x38] sm:$0xff] }
  0x8e   : > { %2468 = vmatprep.mubr.bf16.mxu1 %v4901_v21  ;;  %4688 = vmatprep.subr.bf16.mxu1 %v4932_v22  ;;  %v4981_v20 = vld [vmem:[%s5254_s5 + $0x49c] ss:$28 sps:$4 sm:$0xff]   ;;  %v4983_v21 = vld [vmem:[%s5254_s5 + $0x2e4] ss:$28 sps:$4 sm:$0xff]  }
  0x8f   : > { %2743 = vmatprep.subr.bf16.mxu0 %v5189_v1  ;;  %3460 = vperm.xlu1 %4805, %v3366_v16   ;;  %v5019_v16 = vld [vmem:[%s5254_s5 + $0x80] ss:$28 sps:$4 sm:$0xff]  }
  0x90   : > { %2744 = vmatpush2.bf16.msra.mxu0 %v4974_v23  ;;  %3455 = vperm.xlu0 %4804, %v3365_v19   ;;  %v3367_v23 = vld [vmem:[%s5538_s13 + $0x40] sm:$0xff]  ;;  %v5022_v19 = vld [vmem:[%s5254_s5 + $0xbc] ss:$28 sps:$4 sm:$0xff]  }
  0x91   : > { %4689 = vmatpush3.bf16.msra.mxu1 %v4932_v22  ;;  %2745 = vmatprep.subr.bf16.mxu0 %v5189_v1  ;;  %v3368_v22 = vld [vmem:[%s5538_s13 + $0x48] sm:$0xff] }
  0x92   : > { %4690 = vmatprep.subr.bf16.mxu1 %v4967_v24 }
  0x93   : > { %3470 = vperm.xlu1 %4805, %v3368_v22   ;;  %v3392_v22 = vld [vmem:[%s5538_s13 + $0x108] sm:$0xff] }
  0x94   : > { %2244 = vmatmul.mubr.bf16.gmra.mxu0 %v4903_v25  ;;  %2469 = vmatmul.mubr.bf16.gmra.mxu1 %v4904_v26  ;;  %v4985_v25 = vld [vmem:[%s5254_s5 + $0x498] ss:$28 sps:$4 sm:$0xff]   ;;  %v4986_v26 = vld [vmem:[%s5254_s5 + $0x2e0] ss:$28 sps:$4 sm:$0xff]  }
  0x95   : > { %2251 = vmatprep.mubr.bf16.mxu0 %v4906_v27  ;;  %2476 = vmatprep.mubr.bf16.mxu1 %v4908_v28  ;;  %v3369_v27 = vld [vmem:[%s5538_s13 + $0x50] sm:$0xff] }
  0x96   : > { %4691 = vmatpush3.bf16.msra.mxu1 %v4967_v24  ;;  %2746 = vmatpush2.bf16.msra.mxu0 %v4987_v29  ;;  %v3370_v24 = vld [vmem:[%s5538_s13 + $0x58] sm:$0xff]  ;;  %v4988_v28 = vld [vmem:[%s5254_s5 + $0x4d4] ss:$28 sps:$4 sm:$0xff]  }
  0x97   : > { %2747 = vmatprep.subr.bf16.mxu0 %v5189_v1  ;;  %4692 = vmatprep.subr.bf16.mxu1 %v5007_v30  ;;  %v4921_v1 = vld [vmem:[%s5254_s5 + $0xec] ss:$28 sps:$4 sm:$0xff]   ;;  %v4990_v29 = vld [vmem:[%s5254_s5 + $0x31c] ss:$28 sps:$4 sm:$0xff]  }
  0x98   : > { %3465 = vperm.xlu0 %4804, %v3367_v23   ;;  %3480 = vperm.xlu1 %4805, %v3370_v24  }
  0x9a   : > { %2748 = vmatpush2.bf16.msra.mxu0 %v4994_v31  ;;  %4693 = vmatpush3.bf16.msra.mxu1 %v5007_v30  ;;  %v3372_v30 = vld [vmem:[%s5538_s13 + $0x68] sm:$0xff]  ;;  %v3371_v31 = vld [vmem:[%s5538_s13 + $0x60] sm:$0xff] }
  0x9b   : > { %4694 = vmatprep.subr.bf16.mxu1 %v5038_v49 }
  0x9c   : > { %2252 = vmatmul.mubr.bf16.gmra.mxu0 %v4910_v32  ;;  %2477 = vmatmul.mubr.bf16.gmra.mxu1 %v4911_v33  ;;  %v3374_v32 = vld [vmem:[%s5538_s13 + $0x78] sm:$0xff]  ;;  %v4992_v33 = vld [vmem:[%s5254_s5 + $0x4d0] ss:$28 sps:$4 sm:$0xff]  }
  0x9d   : > { %2259 = vmatprep.mubr.bf16.mxu0 %v4913_v34  ;;  %2484 = vmatprep.mubr.bf16.mxu1 %v4915_v35  ;;  %v4993_v34 = vld [vmem:[%s5254_s5 + $0x318] ss:$28 sps:$4 sm:$0xff]  }
  0x9e   : > { %4695 = vmatpush3.bf16.msra.mxu1 %v5038_v49  ;;  %3475 = vperm.xlu0 %4804, %v3369_v27   ;;  %v3373_v35 = vld [vmem:[%s5538_s13 + $0x70] sm:$0xff]  ;;  %v5006_v49 = vld [vmem:[%s5254_s5 + $0x388] ss:$28 sps:$4 sm:$0xff]  }
  0x9f   : > { %4696 = vmatprep.subr.bf16.mxu1 %v5069_v13  ;;  %3490 = vperm.xlu1 %4805, %v3372_v30  }
  0xa2   : > { %4697 = vmatpush3.bf16.msra.mxu1 %v5069_v13  ;;  %3485 = vperm.xlu0 %4804, %v3371_v31   ;;  %v5024_v31 = vld [vmem:[%s5254_s5 + $0x430] ss:$28 sps:$4 sm:$0xff]  }
  0xa3   : > { %3500 = vperm.xlu1 %4805, %v3374_v32   ;;  %v5025_v32 = vld [vmem:[%s5254_s5 + $0xb8] ss:$28 sps:$4 sm:$0xff]  }
  0xa4   : > { %2260 = vmatmul.mubr.bf16.gmra.mxu0 %v4917_v36  ;;  %2485 = vmatmul.mubr.bf16.gmra.mxu1 %v4918_v37  ;;  %v4995_v36 = vld [vmem:[%s5254_s5 + $0x50c] ss:$28 sps:$4 sm:$0xff]   ;;  %v4997_v37 = vld [vmem:[%s5254_s5 + $0x354] ss:$28 sps:$4 sm:$0xff]  }
  0xa5   : > { %2267 = vmatprep.mubr.bf16.mxu0 %v4919_v38  ;;  %2492 = vmatprep.mubr.bf16.mxu1 %v4921_v1  ;;  %v3376_v38 = vld [vmem:[%s5538_s13 + $0x88] sm:$0xff]  ;;  %v3375_v1 = vld [vmem:[%s5538_s13 + $0x80] sm:$0xff] }
  0xa6   : > { %3495 = vperm.xlu0 %4804, %v3373_v35   ;;  %v5031_v35 = vld [vmem:[%s5254_s5 + $0xf4] ss:$28 sps:$4 sm:$0xff]  }
  0xa7   : > { %3510 = vperm.xlu1 %4805, %v3376_v38   ;;  %v3396_v38 = vld [vmem:[%s5538_s13 + $0x128] sm:$0xff] }
  0xaa   : > { %3505 = vperm.xlu0 %4804, %v3375_v1  }
  0xac   : > { %2268 = vmatmul.mubr.bf16.gmra.mxu0 %v4923_v39  ;;  %2493 = vmatmul.mubr.bf16.gmra.mxu1 %v4924_v40  ;;  %v3378_v39 = vld [vmem:[%s5538_s13 + $0x98] sm:$0xff]  ;;  %v4999_v40 = vld [vmem:[%s5254_s5 + $0x508] ss:$28 sps:$4 sm:$0xff]  }
  0xad   : > { %2275 = vmatprep.mubr.bf16.mxu0 %v4926_v41  ;;  %2500 = vmatprep.mubr.bf16.mxu1 %v4928_v42  ;;  %v5000_v41 = vld [vmem:[%s5254_s5 + $0x350] ss:$28 sps:$4 sm:$0xff]  }
  0xae   : > { %v3377_v42 = vld [vmem:[%s5538_s13 + $0x90] sm:$0xff]  ;;  %3520 = vperm.xlu1 %4805, %v3378_v39  }
  0xaf   : > { %3515 = vperm.xlu0 %4804, %v3377_v42  }
  0xb4   : > { %2276 = vmatmul.mubr.bf16.gmra.mxu0 %v4930_v43  ;;  %2501 = vmatmul.mubr.bf16.gmra.mxu1 %v4931_v44  ;;  %v5001_v43 = vld [vmem:[%s5254_s5 + $0x38c] ss:$28 sps:$4 sm:$0xff]   ;;  %v5005_v44 = vld [vmem:[%s5254_s5 + $0x14] ss:$28 sps:$4 sm:$0xff]  }
  0xb5   : > { %2283 = vmatprep.mubr.bf16.mxu0 %v4934_v45  ;;  %2508 = vmatprep.mubr.bf16.mxu1 %v4936_v46  ;;  %v3380_v45 = vld [vmem:[%s5538_s13 + $0xa8] sm:$0xff]  ;;  %v3379_v46 = vld [vmem:[%s5538_s13 + $0xa0] sm:$0xff] }
  0xb6   : > { %3530 = vperm.xlu1 %4805, %v3380_v45   ;;  %3525 = vperm.xlu0 %4804, %v3379_v46   ;;  %v5026_v46 = vld [vmem:[%s5254_s5 + $0x468] ss:$28 sps:$4 sm:$0xff]  }
  0xbc   : > { %2284 = vmatmul.mubr.bf16.gmra.mxu0 %v4938_v47  ;;  %2509 = vmatmul.mubr.bf16.gmra.mxu1 %v4939_v48  ;;  %v3382_v47 = vld [vmem:[%s5538_s13 + $0xb8] sm:$0xff]  ;;  %v5003_v48 = vld [vmem:[%s5254_s5 + $0x10] ss:$28 sps:$4 sm:$0xff]  }
  0xbd   : > { %2291 = vmatprep.mubr.bf16.mxu0 %v4940_v50  ;;  %2516 = vmatprep.mubr.bf16.mxu1 %v4942_v51  ;;  %v3381_v50 = vld [vmem:[%s5538_s13 + $0xb0] sm:$0xff]  ;;  %v5008_v51 = vld [vmem:[%s5254_s5 + $0x3c4] ss:$28 sps:$4 sm:$0xff]  }
  0xbe   : > { %3540 = vperm.xlu1 %4805, %v3382_v47   ;;  %3535 = vperm.xlu0 %4804, %v3381_v50   ;;  %v5029_v47 = vld [vmem:[%s5254_s5 + $0xf0] ss:$28 sps:$4 sm:$0xff]  }
  0xbf   : > { %v5037_v50 = vld [vmem:[%s5254_s5 + $0x12c] ss:$28 sps:$4 sm:$0xff]  }
  0xc4   : > { %2292 = vmatmul.mubr.bf16.gmra.mxu0 %v4944_v52  ;;  %2517 = vmatmul.mubr.bf16.gmra.mxu1 %v4945_v53  ;;  %v5010_v52 = vld [vmem:[%s5254_s5 + $0x4c] ss:$28 sps:$4 sm:$0xff]  }
  0xc5   : > { %2299 = vmatprep.mubr.bf16.mxu0 %v4947_v54  ;;  %2524 = vmatprep.mubr.bf16.mxu1 %v4949_v55  ;;  %v3384_v53 = vld [vmem:[%s5538_s13 + $0xc8] sm:$0xff] }
  0xc6   : > { %3550 = vperm.xlu1 %4805, %v3384_v53   ;;  %v3400_v53 = vld [vmem:[%s5538_s13 + $0x148] sm:$0xff] }
  0xcc   : > { %2300 = vmatmul.mubr.bf16.gmra.mxu0 %v4951_v56  ;;  %2525 = vmatmul.mubr.bf16.gmra.mxu1 %v4952_v57  ;;  %v3383_v56 = vld [vmem:[%s5538_s13 + $0xc0] sm:$0xff] }
  0xcd   : > { %2307 = vmatprep.mubr.bf16.mxu0 %v4954_v58  ;;  %2532 = vmatprep.mubr.bf16.mxu1 %v4956_v59  ;;  %v3386_v59 = vld [vmem:[%s5538_s13 + $0xd8] sm:$0xff] }
  0xce   : > { %3545 = vperm.xlu0 %4804, %v3383_v56   ;;  %3560 = vperm.xlu1 %4805, %v3386_v59  }
  0xd2   : > { %3570 = vperm.xlu1 %4805, %v3388_v6   ;;  %v5041_v6 = vld [vmem:[%s5254_s5 + $0x4dc] ss:$28 sps:$4 sm:$0xff]  }
  0xd4   : > { %2308 = vmatmul.mubr.bf16.gmra.mxu0 %v4958_v60  ;;  %2533 = vmatmul.mubr.bf16.gmra.mxu1 %v4959_v61 }
  0xd5   : > { %2315 = vmatprep.mubr.bf16.mxu0 %v4960_v62  ;;  %2540 = vmatprep.mubr.bf16.mxu1 %v4962_v63  ;;  %v5012_v62 = vld [vmem:[%s5254_s5 + $0x3c0] ss:$28 sps:$4 sm:$0xff]   ;;  %v5013_v63 = vld [vmem:[%s5254_s5 + $0x48] ss:$28 sps:$4 sm:$0xff]  }
  0xdc   : > { %2316 = vmatmul.mubr.bf16.gmra.mxu0 %v4964_v0  ;;  %2541 = vmatmul.mubr.bf16.gmra.mxu1 %v4965_v2  ;;  %v3385_v0 = vld [vmem:[%s5538_s13 + $0xd0] sm:$0xff]  ;;  %v5014_v2 = vld [vmem:[%s5254_s5 + $0x3fc] ss:$28 sps:$4 sm:$0xff]  }
  0xdd   : > { %2323 = vmatprep.mubr.bf16.mxu0 %v4968_v3  ;;  %2548 = vmatprep.mubr.bf16.mxu1 %v4970_v4  ;;  %v5016_v3 = vld [vmem:[%s5254_s5 + $0x84] ss:$28 sps:$4 sm:$0xff]  }
  0xde   : > { %3555 = vperm.xlu0 %4804, %v3385_v0  }
  0xe4   : > { %2324 = vmatmul.mubr.bf16.gmra.mxu0 %v4972_v9  ;;  %2549 = vmatmul.mubr.bf16.gmra.mxu1 %v4973_v10  ;;  %v3387_v9 = vld [vmem:[%s5538_s13 + $0xe0] sm:$0xff] }
  0xe5   : > { %2331 = vmatprep.mubr.bf16.mxu0 %v4975_v11  ;;  %2556 = vmatprep.mubr.bf16.mxu1 %v4977_v12  ;;  %v3390_v12 = vld [vmem:[%s5538_s13 + $0xf8] sm:$0xff] }
  0xe6   : > { %3565 = vperm.xlu0 %4804, %v3387_v9   ;;  %3580 = vperm.xlu1 %4805, %v3390_v12   ;;  %v5044_v9 = vld [vmem:[%s5254_s5 + $0x164] ss:$28 sps:$4 sm:$0xff]   ;;  %v3404_v12 = vld [vmem:[%s5538_s13 + $0x168] sm:$0xff] }
  0xea   : > { %3590 = vperm.xlu1 %4805, %v3392_v22  }
  0xec   : > { %2332 = vmatmul.mubr.bf16.gmra.mxu0 %v4979_v17  ;;  %2557 = vmatmul.mubr.bf16.gmra.mxu1 %v4980_v18  ;;  %v3389_v17 = vld [vmem:[%s5538_s13 + $0xf0] sm:$0xff] }
  0xed   : > { %2339 = vmatprep.mubr.bf16.mxu0 %v4981_v20  ;;  %2564 = vmatprep.mubr.bf16.mxu1 %v4983_v21  ;;  %v5020_v18 = vld [vmem:[%s5254_s5 + $0x434] ss:$28 sps:$4 sm:$0xff]  }
  0xee   : > { %3575 = vperm.xlu0 %4804, %v3389_v17   ;;  %v3403_v17 = vld [vmem:[%s5538_s13 + $0x160] sm:$0xff] }
  0xf4   : > { %2340 = vmatmul.mubr.bf16.gmra.mxu0 %v4985_v25  ;;  %2565 = vmatmul.mubr.bf16.gmra.mxu1 %v4986_v26  ;;  %v3391_v25 = vld [vmem:[%s5538_s13 + $0x100] sm:$0xff] }
  0xf5   : > { %2347 = vmatprep.mubr.bf16.mxu0 %v4988_v28  ;;  %2572 = vmatprep.mubr.bf16.mxu1 %v4990_v29  ;;  %v3394_v28 = vld [vmem:[%s5538_s13 + $0x118] sm:$0xff] }
  0xf6   : > { %3585 = vperm.xlu0 %4804, %v3391_v25   ;;  %3600 = vperm.xlu1 %4805, %v3394_v28   ;;  %v5039_v25 = vld [vmem:[%s5254_s5 + $0x4d8] ss:$28 sps:$4 sm:$0xff]  }
  0xf7   : > { %v5047_v28 = vld [vmem:[%s5254_s5 + $0x514] ss:$28 sps:$4 sm:$0xff]  }
  0xfa   : > { %3610 = vperm.xlu1 %4805, %v3396_v38  }
  0xfc   : > { %2348 = vmatmul.mubr.bf16.gmra.mxu0 %v4992_v33  ;;  %2573 = vmatmul.mubr.bf16.gmra.mxu1 %v4993_v34  ;;  %v3393_v33 = vld [vmem:[%s5538_s13 + $0x110] sm:$0xff]  ;;  %v5028_v34 = vld [vmem:[%s5254_s5 + $0x46c] ss:$28 sps:$4 sm:$0xff]  }
  0xfd   : > { %2355 = vmatprep.mubr.bf16.mxu0 %v4995_v36  ;;  %2580 = vmatprep.mubr.bf16.mxu1 %v4997_v37 }
  0xfe   : > { %3595 = vperm.xlu0 %4804, %v3393_v33  }
 0x104   : > { %2356 = vmatmul.mubr.bf16.gmra.mxu0 %v4999_v40  ;;  %2581 = vmatmul.mubr.bf16.gmra.mxu1 %v5000_v41  ;;  %v3395_v40 = vld [vmem:[%s5538_s13 + $0x120] sm:$0xff] }
 0x105   : > { %2588 = vmatprep.mubr.bf16.mxu1 %v5001_v43  ;;  %2749 = vmatprep.mubr.bf16.mxu0 %v5005_v44  ;;  %v3398_v43 = vld [vmem:[%s5538_s13 + $0x138] sm:$0xff] }
 0x106   : > { %3605 = vperm.xlu0 %4804, %v3395_v40   ;;  %3620 = vperm.xlu1 %4805, %v3398_v43  }
 0x10a   : > { %3630 = vperm.xlu1 %4805, %v3400_v53   ;;  %v3412_v53 = vld [vmem:[%s5538_s13 + $0x1a8] sm:$0xff] }
 0x10c   : > { %v5592_v54 = vpop.f32.mrf.mxu0  ;;  %v5594_v55 = vpop.f32.mrf.mxu1  ;;  %2589 = vmatmul.mubr.bf16.gmra.mxu1 %v5006_v49  ;;  %2750 = vmatmul.mubr.bf16.vlgmr.msra.gmra.mxu0 %v5003_v48  ;;  %v3397_v48 = vld [vmem:[%s5538_s13 + $0x130] sm:$0xff]  ;;  %v5034_v49 = vld [vmem:[%s5254_s5 + $0x4a4] ss:$28 sps:$4 sm:$0xff]  }
 0x10d   : > { %2596 = vmatprep.mubr.bf16.mxu1 %v5008_v51  ;;  %2757 = vmatprep.mubr.bf16.mxu0 %v5010_v52 }
 0x10e   : > { %v2175_v57 = vpop.f32.mrf.mxu0  ;;  %v2367_v58 = vpop.f32.mrf.mxu1  ;;  %3615 = vperm.xlu0 %4804, %v3397_v48   ;;  %v3409_v48 = vld [vmem:[%s5538_s13 + $0x190] sm:$0xff] }
 0x10f   : > { %v3399_v58 = vld [vmem:[%s5538_s13 + $0x140] sm:$0xff] }
 0x110   : > { %v5598_v60 = vpop.f32.mrf.mxu0  ;;  %v5600_v61 = vpop.f32.mrf.mxu1 }
 0x112   : > { %v2178_v4 = vpop.f32.mrf.mxu0  ;;  %v2370_v5 = vpop.f32.mrf.mxu1  ;;  %3625 = vperm.xlu0 %4804, %v3399_v58  }
 0x113   : > { %v5035_v4 = vld [vmem:[%s5254_s5 + $0x128] ss:$28 sps:$4 sm:$0xff]   ;;  %v3401_v5 = vld [vmem:[%s5538_s13 + $0x150] sm:$0xff] }
 0x114   : > { %v5608_v7 = vpop.f32.mrf.mxu0  ;;  %v5610_v8 = vpop.f32.mrf.mxu1  ;;  %2597 = vmatmul.mubr.bf16.gmra.mxu1 %v5012_v62  ;;  %2758 = vmatmul.mubr.bf16.gmra.mxu0 %v5013_v63  ;;  %v3402_v63 = vld [vmem:[%s5538_s13 + $0x158] sm:$0xff] }
 0x115   : > { %2604 = vmatprep.mubr.bf16.mxu1 %v5014_v2  ;;  %2765 = vmatprep.mubr.bf16.mxu0 %v5016_v3  ;;  %v5032_v3 = vld [vmem:[%s5254_s5 + $0x4a0] ss:$28 sps:$4 sm:$0xff]  }
 0x116   : > { %v2183_v10 = vpop.f32.mrf.mxu0  ;;  %v2375_v11 = vpop.f32.mrf.mxu1  ;;  %3640 = vperm.xlu1 %4805, %v3402_v63   ;;  %3635 = vperm.xlu0 %4804, %v3401_v5   ;;  %v3414_v5 = vld [vmem:[%s5538_s13 + $0x1b8] sm:$0xff] }
 0x118   : > { %v5614_v13 = vpop.f32.mrf.mxu0  ;;  %v5616_v14 = vpop.f32.mrf.mxu1 }
 0x11a   : > { %v2186_v20 = vpop.f32.mrf.mxu0  ;;  %v2378_v21 = vpop.f32.mrf.mxu1  ;;  %3650 = vperm.xlu1 %4805, %v3404_v12   ;;  %3645 = vperm.xlu0 %4804, %v3403_v17   ;;  %v3413_v12 = vld [vmem:[%s5538_s13 + $0x1b0] sm:$0xff]  ;;  %v5059_v17 = vld [vmem:[%s5254_s5 + $0x584] ss:$28 sps:$4 sm:$0xff]  }
 0x11b   : > { %v3406_v20 = vld [vmem:[%s5538_s13 + $0x178] sm:$0xff] }
 0x11c   : > { %v5624_v23 = vpop.f32.mrf.mxu0  ;;  %v5626_v24 = vpop.f32.mrf.mxu1  ;;  %2605 = vmatmul.mubr.bf16.gmra.mxu1 %v5018_v15  ;;  %2766 = vmatmul.mubr.bf16.gmra.mxu0 %v5019_v16 }
 0x11d   : > { %2612 = vmatprep.mubr.bf16.mxu1 %v5020_v18  ;;  %2773 = vmatprep.mubr.bf16.mxu0 %v5022_v19 }
 0x11e   : > { %v2191_v26 = vpop.f32.mrf.mxu0  ;;  %v2383_v27 = vpop.f32.mrf.mxu1  ;;  %3660 = vperm.xlu1 %4805, %v3406_v20  }
 0x11f   : > { %v5042_v26 = vld [vmem:[%s5254_s5 + $0x160] ss:$28 sps:$4 sm:$0xff]   ;;  %v3405_v27 = vld [vmem:[%s5538_s13 + $0x170] sm:$0xff] }
 0x120   : > { %v5630_v29 = vpop.f32.mrf.mxu0  ;;  %v5632_v30 = vpop.f32.mrf.mxu1  ;;  %3655 = vperm.xlu0 %4804, %v3405_v27  }
 0x122   : > { %v2194_v36 = vpop.f32.mrf.mxu0  ;;  %v2386_v37 = vpop.f32.mrf.mxu1 }
 0x123   : > { %v3407_v37 = vld [vmem:[%s5538_s13 + $0x180] sm:$0xff] }
 0x124   : > { %v5640_v1 = vpop.f32.mrf.mxu0  ;;  %v5642_v39 = vpop.f32.mrf.mxu1  ;;  %2613 = vmatmul.mubr.bf16.gmra.mxu1 %v5024_v31  ;;  %2774 = vmatmul.mubr.bf16.gmra.mxu0 %v5025_v32  ;;  %v5050_v31 = vld [vmem:[%s5254_s5 + $0x19c] ss:$28 sps:$4 sm:$0xff]  }
 0x125   : > { %2620 = vmatprep.mubr.bf16.mxu1 %v5028_v34  ;;  %2781 = vmatprep.mubr.bf16.mxu0 %v5031_v35  ;;  %v3408_v34 = vld [vmem:[%s5538_s13 + $0x188] sm:$0xff] }
 0x126   : > { %v2199_v41 = vpop.f32.mrf.mxu0  ;;  %v2391_v42 = vpop.f32.mrf.mxu1  ;;  %3670 = vperm.xlu1 %4805, %v3408_v34   ;;  %3665 = vperm.xlu0 %4804, %v3407_v37   ;;  %v3418_v37 = vld [vmem:[%s5538_s13 + $0x1d8] sm:$0xff] }
 0x127   : > { %v3410_v41 = vld [vmem:[%s5538_s13 + $0x198] sm:$0xff] }
 0x128   : > { %v5646_v44 = vpop.f32.mrf.mxu0  ;;  %v5648_v45 = vpop.f32.mrf.mxu1 }
 0x12a   : > { %v2202_v51 = vpop.f32.mrf.mxu0  ;;  %v2394_v52 = vpop.f32.mrf.mxu1  ;;  %3680 = vperm.xlu1 %4805, %v3410_v41   ;;  %3675 = vperm.xlu0 %4804, %v3409_v48   ;;  %v5057_v41 = vld [vmem:[%s5254_s5 + $0x580] ss:$28 sps:$4 sm:$0xff]  }
 0x12c   : > { %v5656_v56 = vpop.f32.mrf.mxu0  ;;  %v5658_v57 = vpop.f32.mrf.mxu1  ;;  %2621 = vmatmul.mubr.bf16.gmra.mxu1 %v5026_v46  ;;  %2782 = vmatmul.mubr.bf16.gmra.mxu0 %v5029_v47  ;;  %v5045_v46 = vld [vmem:[%s5254_s5 + $0x510] ss:$28 sps:$4 sm:$0xff]   ;;  %v5048_v47 = vld [vmem:[%s5254_s5 + $0x198] ss:$28 sps:$4 sm:$0xff]  }
 0x12d   : > { %6715 = vst [vmem:[#allocation2_spill] sm:$0xff] %v5658_v57  ;;  %2628 = vmatprep.mubr.bf16.mxu1 %v5034_v49  ;;  %2789 = vmatprep.mubr.bf16.mxu0 %v5037_v50  ;;  %v5053_v49 = vld [vmem:[%s5254_s5 + $0x54c] ss:$28 sps:$4 sm:$0xff]   ;;  %v5056_v50 = vld [vmem:[%s5254_s5 + $0x1d4] ss:$28 sps:$4 sm:$0xff]  }
 0x12e   : > { %v2207_v59 = vpop.f32.mrf.mxu0  ;;  %v2399_v62 = vpop.f32.mrf.mxu1  ;;  %3690 = vperm.xlu1 %4805, %v3412_v53   ;;  %v3420_v53 = vld [vmem:[%s5538_s13 + $0x1e8] sm:$0xff] }
 0x12f   : > { %v3411_v62 = vld [vmem:[%s5538_s13 + $0x1a0] sm:$0xff] }
 0x130   : > { %v5662_v0 = vpop.f32.mrf.mxu0  ;;  %v5664_v2 = vpop.f32.mrf.mxu1  ;;  %3685 = vperm.xlu0 %4804, %v3411_v62  }
 0x131   : > { %6716 = vst [vmem:[#allocation3_spill] sm:$0xff] %v5664_v2  ;;  %v5128_v2 = vld [vmem:[%s5254_s5 + $0x248] ss:$28 sps:$4 sm:$0xff]  }
 0x132   : > { %v2210_v10 = vpop.f32.mrf.mxu0  ;;  %v2402_v11 = vpop.f32.mrf.mxu1  ;;  %3700 = vperm.xlu1 %4805, %v3414_v5  }
 0x133   : > { %v5051_v10 = vld [vmem:[%s5254_s5 + $0x548] ss:$28 sps:$4 sm:$0xff]   ;;  %v5054_v11 = vld [vmem:[%s5254_s5 + $0x1d0] ss:$28 sps:$4 sm:$0xff]  }
 0x134   : > { %v5672_v15 = vpop.f32.mrf.mxu0  ;;  %v5674_v16 = vpop.f32.mrf.mxu1  ;;  %2629 = vmatmul.mubr.bf16.gmra.mxu1 %v5032_v3  ;;  %2790 = vmatmul.mubr.bf16.gmra.mxu0 %v5035_v4  ;;  %v5712_v4 = vld [vmem:[%s6712_s2] ss:$0 sm:$0xff] }
 0x135   : > { %6717 = vst [vmem:[#allocation4_spill] sm:$0xff] %v5674_v16  ;;  %2636 = vmatprep.mubr.bf16.mxu1 %v5041_v6  ;;  %2797 = vmatprep.mubr.bf16.mxu0 %v5044_v9  ;;  %v2177_v34 = vadd.f32 %v5712_v4, %v5598_v60  ;;  %v2182_v60 = vadd.f32 %v5712_v4, %v5608_v7 }
 0x136   : > { %v2215_v18 = vpop.f32.mrf.mxu0  ;;  %v2407_v19 = vpop.f32.mrf.mxu1  ;;  %3695 = vperm.xlu0 %4804, %v3413_v12   ;;  %v3422_v12 = vld [vmem:[%s5538_s13 + $0x1f8] sm:$0xff] }
 0x137   : > { %v5062_v18 = vld [vmem:[%s5254_s5 + $0x20c] ss:$28 sps:$4 sm:$0xff]  }
 0x138   : > { %v5678_v21 = vpop.f32.mrf.mxu0  ;;  %v5680_v22 = vpop.f32.mrf.mxu1 }
 0x139   : > { %6718 = vst [vmem:[#allocation5_spill] sm:$0xff] %v5680_v22  ;;  %v5123_v22 = vld [vmem:[%s5254_s5 + $0x1d8] ss:$28 sps:$4 sm:$0xff]  }
 0x13a   : > { %v2218_v32 = vpop.f32.mrf.mxu0  ;;  %v2410_v33 = vpop.f32.mrf.mxu1 }
 0x13c   : > { %v5688_v35 = vpop.f32.mrf.mxu0  ;;  %v5690_v36 = vpop.f32.mrf.mxu1  ;;  %2637 = vmatmul.mubr.bf16.gmra.mxu1 %v5039_v25  ;;  %2798 = vmatmul.mubr.bf16.gmra.mxu0 %v5042_v26  ;;  %v2174_v25 = vadd.f32 %v5712_v4, %v5592_v54  ;;  %v3416_v26 = vld [vmem:[%s5538_s13 + $0x1c8] sm:$0xff] }
 0x13d   : > { %6719 = vst [vmem:[#allocation6_spill] sm:$0xff] %v5690_v36  ;;  %2644 = vmatprep.mubr.bf16.mxu1 %v5047_v28  ;;  %2805 = vmatprep.mubr.bf16.mxu0 %v5050_v31  ;;  %v3415_v31 = vld [vmem:[%s5538_s13 + $0x1c0] sm:$0xff] }
 0x13e   : > { %v2223_v38 = vpop.f32.mrf.mxu0  ;;  %v2415_v40 = vpop.f32.mrf.mxu1  ;;  %3710 = vperm.xlu1 %4805, %v3416_v26   ;;  %3705 = vperm.xlu0 %4804, %v3415_v31   ;;  %v5075_v31 = vld [vmem:[%s5254_s5 + $0x27c] ss:$28 sps:$4 sm:$0xff]  }
 0x140   : > { %v5694_v42 = vpop.f32.mrf.mxu0  ;;  %v5696_v43 = vpop.f32.mrf.mxu1 }
 0x141   : > { %6720 = vst [vmem:[#allocation7_spill] sm:$0xff] %v5696_v43  ;;  %v5118_v43 = vld [vmem:[%s5254_s5 + $0x168] ss:$28 sps:$4 sm:$0xff]  }
 0x142   : > { %v2226_v51 = vpop.f32.mrf.mxu0  ;;  %v2418_v52 = vpop.f32.mrf.mxu1  ;;  %3720 = vperm.xlu1 %4805, %v3418_v37  }
 0x144   : > { %v5704_v58 = vpop.f32.mrf.mxu0  ;;  %v5706_v59 = vpop.f32.mrf.mxu1  ;;  %2645 = vmatmul.mubr.bf16.gmra.mxu1 %v5045_v46  ;;  %2806 = vmatmul.mubr.bf16.gmra.mxu0 %v5048_v47  ;;  %v5060_v46 = vld [vmem:[%s5254_s5 + $0x208] ss:$28 sps:$4 sm:$0xff]   ;;  %v3417_v47 = vld [vmem:[%s5538_s13 + $0x1d0] sm:$0xff] }
 0x145   : > { %6721 = vst [vmem:[#allocation8_spill] sm:$0xff] %v5706_v59  ;;  %2652 = vmatprep.mubr.bf16.mxu1 %v5053_v49  ;;  %2813 = vmatprep.mubr.bf16.mxu0 %v5056_v50  ;;  %v5065_v49 = vld [vmem:[%s5254_s5 + $0x5bc] ss:$28 sps:$4 sm:$0xff]   ;;  %v5068_v50 = vld [vmem:[%s5254_s5 + $0x244] ss:$28 sps:$4 sm:$0xff]  }
 0x146   : > { %v2231_v63 = vpop.f32.mrf.mxu0  ;;  %v2423_v3 = vpop.f32.mrf.mxu1  ;;  %3715 = vperm.xlu0 %4804, %v3417_v47   ;;  %3730 = vperm.xlu1 %4805, %v3420_v53   ;;  %v2193_v47 = vadd.f32 %v5712_v4, %v5630_v29  ;;  %v5081_v53 = vld [vmem:[%s5254_s5 + $0x2b4] ss:$28 sps:$4 sm:$0xff]  }
 0x147   : > { %v3419_v3 = vld [vmem:[%s5538_s13 + $0x1e0] sm:$0xff] }
 0x148   : > { %v5715_v6 = vpop.f32.mrf.mxu0  ;;  %v5717_v9 = vpop.f32.mrf.mxu1 }
 0x149   : > { %6722 = vst [vmem:[#allocation9_spill] sm:$0xff] %v5717_v9  ;;  %v5113_v9 = vld [vmem:[%s5254_s5 + $0xf8] ss:$28 sps:$4 sm:$0xff]  }
 0x14a   : > { %v2234_v19 = vpop.f32.mrf.mxu0  ;;  %v2426_v20 = vpop.f32.mrf.mxu1  ;;  %3725 = vperm.xlu0 %4804, %v3419_v3   ;;  %3740 = vperm.xlu1 %4805, %v3422_v12  }
 0x14b   : > { %v5063_v19 = vld [vmem:[%s5254_s5 + $0x5b8] ss:$28 sps:$4 sm:$0xff]   ;;  %v5066_v20 = vld [vmem:[%s5254_s5 + $0x240] ss:$28 sps:$4 sm:$0xff]  }
 0x14c   : > { %v5727_v27 = vpop.f32.mrf.mxu0  ;;  %v2462_v28 = vpop.f32.mrf.mxu1  ;;  %2653 = vmatmul.mubr.bf16.gmra.mxu1 %v5051_v10  ;;  %2814 = vmatmul.mubr.bf16.gmra.mxu0 %v5054_v11  ;;  %v2185_v11 = vadd.f32 %v5712_v4, %v5614_v13  ;;  %v2190_v13 = vadd.f32 %v5712_v4, %v5624_v23 }
 0x14d   : > { %v5730_v32 = vadd.f32 %v2462_v28, %v2174_v25  ;;  %2660 = vmatprep.mubr.bf16.mxu1 %v5059_v17  ;;  %2821 = vmatprep.mubr.bf16.mxu0 %v5062_v18  ;;  %v3421_v25 = vld [vmem:[%s5538_s13 + $0x1f0] sm:$0xff] }
 0x14e   : > { %v2239_v33 = vpop.f32.mrf.mxu0  ;;  %v2464_v54 = vpop.f32.mrf.mxu1  ;;  %v5072_v28 = vld [vmem:[%s5254_s5 + $0x5f4] ss:$28 sps:$4 sm:$0xff]   ;;  %3735 = vperm.xlu0 %4804, %v3421_v25  }
 0x150   : > { %v5735_v38 = vpop.f32.mrf.mxu0  ;;  %v2465_v40 = vpop.f32.mrf.mxu1 }
 0x151   : > { %v5740_v48 = vadd.f32 %v2465_v40, %v2177_v34 }
 0x152   : > { %v2242_v51 = vpop.f32.mrf.mxu0  ;;  %v2467_v52 = vpop.f32.mrf.mxu1 }
 0x153   : > { %v5073_v51 = vld [vmem:[%s5254_s5 + $0x278] ss:$28 sps:$4 sm:$0xff]  }
 0x154   : > { %v5747_v62 = vpop.f32.mrf.mxu0  ;;  %v2470_v63 = vpop.f32.mrf.mxu1  ;;  %2661 = vmatmul.mubr.bf16.gmra.mxu1 %v5057_v41  ;;  %2822 = vmatmul.mubr.bf16.gmra.mxu0 %v5060_v46 }
 0x155   : > { %v5750_v5 = vadd.f32 %v2470_v63, %v2182_v60  ;;  %2668 = vmatprep.mubr.bf16.mxu1 %v5065_v49  ;;  %2829 = vmatprep.mubr.bf16.mxu0 %v5068_v50  ;;  %v5070_v50 = vld [vmem:[%s5254_s5 + $0x5f0] ss:$28 sps:$4 sm:$0xff]  }
 0x156   : > { %v2247_v10 = vpop.f32.mrf.mxu0  ;;  %v2472_v7 = vpop.f32.mrf.mxu1  ;;  %v5078_v60 = vld [vmem:[%s5254_s5 + $0x62c] ss:$28 sps:$4 sm:$0xff]  }
 0x157   : > { %v2198_v10 = vadd.f32 %v5712_v4, %v5640_v1  ;;  %v5076_v1 = vld [vmem:[%s5254_s5 + $0x628] ss:$28 sps:$4 sm:$0xff]  }
 0x158   : > { %v5755_v17 = vpop.f32.mrf.mxu0  ;;  %v2473_v18 = vpop.f32.mrf.mxu1 }
 0x159   : > { %v5760_v26 = vadd.f32 %v2473_v18, %v2185_v11 }
 0x15a   : > { %v2250_v33 = vpop.f32.mrf.mxu0  ;;  %v2475_v54 = vpop.f32.mrf.mxu1 }
 0x15b   : > { %v5084_v33 = vld [vmem:[%s5254_s5 + $0x664] ss:$28 sps:$4 sm:$0xff]   ;;  %v5087_v54 = vld [vmem:[%s5254_s5 + $0x2ec] ss:$28 sps:$4 sm:$0xff]  }
 0x15c   : > { %v5766_v34 = vpop.f32.mrf.mxu0  ;;  %v2478_v37 = vpop.f32.mrf.mxu1  ;;  %2669 = vmatmul.mubr.bf16.gmra.mxu1 %v5063_v19  ;;  %2830 = vmatmul.mubr.bf16.gmra.mxu0 %v5066_v20  ;;  %v2201_v19 = vadd.f32 %v5712_v4, %v5646_v44 }
 0x15d   : > { %v5768_v40 = vadd.f32 %v2478_v37, %v2190_v13  ;;  %2676 = vmatprep.mubr.bf16.mxu1 %v5072_v28  ;;  %2837 = vmatprep.mubr.bf16.mxu0 %v5075_v31  ;;  %v5079_v28 = vld [vmem:[%s5254_s5 + $0x2b0] ss:$28 sps:$4 sm:$0xff]  }
 0x15e   : > { %v2255_v41 = vpop.f32.mrf.mxu0  ;;  %v2480_v46 = vpop.f32.mrf.mxu1 }
 0x15f   : > { %v2206_v41 = vadd.f32 %v5712_v4, %v5656_v56  ;;  %v5082_v56 = vld [vmem:[%s5254_s5 + $0x660] ss:$28 sps:$4 sm:$0xff]  }
 0x160   : > { %v5772_v49 = vpop.f32.mrf.mxu0  ;;  %v2481_v23 = vpop.f32.mrf.mxu1 }
 0x161   : > { %v5776_v52 = vadd.f32 %v2481_v23, %v2193_v47 }
 0x162   : > { %v2258_v63 = vpop.f32.mrf.mxu0  ;;  %v2483_v3 = vpop.f32.mrf.mxu1 }
 0x163   : > { %v5085_v63 = vld [vmem:[%s5254_s5 + $0x2e8] ss:$28 sps:$4 sm:$0xff]  }
 0x164   : > { %v5782_v7 = vpop.f32.mrf.mxu0  ;;  %v2486_v29 = vpop.f32.mrf.mxu1  ;;  %2677 = vmatmul.mubr.bf16.gmra.mxu1 %v5070_v50  ;;  %2838 = vmatmul.mubr.bf16.gmra.mxu0 %v5073_v51  ;;  %v2209_v51 = vadd.f32 %v5712_v4, %v5662_v0 }
 0x165   : > { %v5784_v11 = vadd.f32 %v2486_v29, %v2198_v10  ;;  %2684 = vmatprep.mubr.bf16.mxu1 %v5078_v60  ;;  %2845 = vmatprep.mubr.bf16.mxu0 %v5081_v53  ;;  %v5090_v10 = vld [vmem:[%s5254_s5 + $0x69c] ss:$28 sps:$4 sm:$0xff]   ;;  %v5093_v29 = vld [vmem:[%s5254_s5 + $0x324] ss:$28 sps:$4 sm:$0xff]  }
 0x166   : > { %v2263_v12 = vpop.f32.mrf.mxu0  ;;  %v2488_v18 = vpop.f32.mrf.mxu1 }
 0x168   : > { %v5788_v20 = vpop.f32.mrf.mxu0  ;;  %v2489_v25 = vpop.f32.mrf.mxu1 }
 0x169   : > { %v5792_v31 = vadd.f32 %v2489_v25, %v2201_v19  ;;  %v2214_v19 = vadd.f32 %v5712_v4, %v5672_v15  ;;  %v5088_v15 = vld [vmem:[%s5254_s5 + $0x698] ss:$28 sps:$4 sm:$0xff]  }
 0x16a   : > { %v2266_v13 = vpop.f32.mrf.mxu0  ;;  %v2491_v37 = vpop.f32.mrf.mxu1 }
 0x16c   : > { %v5798_v46 = vpop.f32.mrf.mxu0  ;;  %v2494_v44 = vpop.f32.mrf.mxu1  ;;  %2685 = vmatmul.mubr.bf16.gmra.mxu1 %v5076_v1  ;;  %2846 = vmatmul.mubr.bf16.gmra.mxu0 %v5079_v28 }
 0x16d   : > { %v5800_v47 = vadd.f32 %v2494_v44, %v2206_v41  ;;  %2692 = vmatprep.mubr.bf16.mxu1 %v5084_v33  ;;  %2853 = vmatprep.mubr.bf16.mxu0 %v5087_v54  ;;  %v2217_v54 = vadd.f32 %v5712_v4, %v5678_v21  ;;  %v5091_v41 = vld [vmem:[%s5254_s5 + $0x320] ss:$28 sps:$4 sm:$0xff]  }
 0x16e   : > { %v2271_v23 = vpop.f32.mrf.mxu0  ;;  %v2496_v50 = vpop.f32.mrf.mxu1 }
 0x16f   : > { %v5096_v23 = vld [vmem:[%s5254_s5 + $0x6d4] ss:$28 sps:$4 sm:$0xff]   ;;  %v5099_v50 = vld [vmem:[%s5254_s5 + $0x35c] ss:$28 sps:$4 sm:$0xff]  }
 0x170   : > { %v5804_v60 = vpop.f32.mrf.mxu0  ;;  %v2497_v53 = vpop.f32.mrf.mxu1 }
 0x171   : > { %v5808_v3 = vadd.f32 %v2497_v53, %v2209_v51 }
 0x172   : > { %v2274_v12 = vpop.f32.mrf.mxu0  ;;  %v2499_v18 = vpop.f32.mrf.mxu1 }
 0x173   : > { %v2225_v18 = vadd.f32 %v5712_v4, %v5694_v42 }
 0x174   : > { %v5814_v25 = vpop.f32.mrf.mxu0  ;;  %v2502_v0 = vpop.f32.mrf.mxu1  ;;  %2693 = vmatmul.mubr.bf16.gmra.mxu1 %v5082_v56  ;;  %2854 = vmatmul.mubr.bf16.gmra.mxu0 %v5085_v63  ;;  %v2222_v56 = vadd.f32 %v5712_v4, %v5688_v35  ;;  %v5094_v35 = vld [vmem:[%s5254_s5 + $0x6d0] ss:$28 sps:$4 sm:$0xff]  }
 0x175   : > { %v5816_v1 = vadd.f32 %v2502_v0, %v2214_v19  ;;  %2700 = vmatprep.mubr.bf16.mxu1 %v5090_v10  ;;  %2861 = vmatprep.mubr.bf16.mxu0 %v5093_v29 }
 0x176   : > { %v2279_v28 = vpop.f32.mrf.mxu0  ;;  %v2504_v33 = vpop.f32.mrf.mxu1 }
 0x177   : > { %v5097_v28 = vld [vmem:[%s5254_s5 + $0x358] ss:$28 sps:$4 sm:$0xff]  }
 0x178   : > { %v5820_v13 = vpop.f32.mrf.mxu0  ;;  %v2505_v37 = vpop.f32.mrf.mxu1 }
 0x179   : > { %v5824_v44 = vadd.f32 %v2505_v37, %v2217_v54  ;;  %v5102_v54 = vld [vmem:[%s5254_s5 + $0x394] ss:$28 sps:$4 sm:$0xff]  }
 0x17a   : > { %v2282_v51 = vpop.f32.mrf.mxu0  ;;  %v2507_v53 = vpop.f32.mrf.mxu1  ;;  %v5103_v37 = vld [vmem:[%s5254_s5 + $0x18] ss:$28 sps:$4 sm:$0xff]  }
 0x17c   : > { %v5830_v63 = vpop.f32.mrf.mxu0  ;;  %v2510_v21 = vpop.f32.mrf.mxu1  ;;  %2701 = vmatmul.mubr.bf16.gmra.mxu1 %v5088_v15  ;;  %2862 = vmatmul.mubr.bf16.gmra.mxu0 %v5091_v41 }
 0x17d   : > { %v5832_v10 = vadd.f32 %v2510_v21, %v2222_v56  ;;  %2708 = vmatprep.mubr.bf16.mxu1 %v5096_v23  ;;  %2869 = vmatprep.mubr.bf16.mxu0 %v5099_v50  ;;  %v2230_v23 = vadd.f32 %v5712_v4, %v5704_v58  ;;  %v2233_v21 = vadd.f32 %v5712_v4, %v5715_v6 }
 0x17e   : > { %v2287_v29 = vpop.f32.mrf.mxu0  ;;  %v2512_v12 = vpop.f32.mrf.mxu1 }
 0x17f   : > { %v5100_v12 = vld [vmem:[%s5254_s5 + $0x390] ss:$28 sps:$4 sm:$0xff]  }
 0x180   : > { %v5836_v19 = vpop.f32.mrf.mxu0  ;;  %v2513_v0 = vpop.f32.mrf.mxu1 }
 0x181   : > { %v5840_v33 = vadd.f32 %v2513_v0, %v2225_v18  ;;  %v5104_v18 = vld [vmem:[%s5254_s5 + $0x50] ss:$28 sps:$4 sm:$0xff]  }
 0x182   : > { %v2290_v15 = vpop.f32.mrf.mxu0  ;;  %v2515_v41 = vpop.f32.mrf.mxu1 }
 0x183   : > { %v5107_v15 = vld [vmem:[%s5254_s5 + $0x3cc] ss:$28 sps:$4 sm:$0xff]  }
 0x184   : > { %v5846_v50 = vpop.f32.mrf.mxu0  ;;  %v2518_v42 = vpop.f32.mrf.mxu1  ;;  %2709 = vmatmul.mubr.bf16.gmra.mxu1 %v5094_v35  ;;  %2870 = vmatmul.mubr.bf16.gmra.mxu0 %v5097_v28  ;;  %v5108_v35 = vld [vmem:[%s5254_s5 + $0x88] ss:$28 sps:$4 sm:$0xff]  }
 0x185   : > { %v5848_v51 = vadd.f32 %v2518_v42, %v2230_v23  ;;  %2877 = vmatprep.mubr.bf16.mxu0 %v5102_v54  ;;  %4698 = vmatprep.mubr.msk.bf16.mxu1 %vm2042_vm0, %v5103_v37  ;;  %v2238_v37 = vadd.f32 %v5712_v4, %v5727_v27 }
 0x186   : > { %v2295_v53 = vpop.f32.mrf.mxu0  ;;  %v2520_v56 = vpop.f32.mrf.mxu1 }
 0x187   : > { %v2241_v56 = vadd.f32 %v5712_v4, %v5735_v38 }
 0x188   : > { %v5853_v29 = vpop.f32.mrf.mxu0  ;;  %v2521_v58 = vpop.f32.mrf.mxu1 }
 0x189   : > { %v5857_v0 = vadd.f32 %v2521_v58, %v2233_v21  ;;  %v5105_v58 = vld [vmem:[%s5254_s5 + $0x3c8] ss:$28 sps:$4 sm:$0xff]  }
 0x18a   : > { %v2298_v28 = vpop.f32.mrf.mxu0  ;;  %v2523_v54 = vpop.f32.mrf.mxu1 }
 0x18b   : > { %v5109_v28 = vld [vmem:[%s5254_s5 + $0xc0] ss:$28 sps:$4 sm:$0xff]  }
 0x18c   : > { %v5863_v41 = vpop.f32.mrf.mxu0  ;;  %v2526_v6 = vpop.f32.mrf.mxu1  ;;  %2878 = vmatmul.mubr.bf16.gmra.mxu0 %v5100_v12  ;;  %4699 = vmatmul.mubr.msk.bf16.vlgmr.msra.gmra.mxu1 %vm2042_vm0, %v5104_v18  ;;  %v5112_v12 = vld [vmem:[%s5254_s5 + $0x404] ss:$28 sps:$4 sm:$0xff]  }
 0x18d   : > { %v5866_v23 = vadd.f32 %v2526_v6, %v2238_v37  ;;  %2885 = vmatprep.mubr.bf16.mxu0 %v5107_v15  ;;  %4702 = vmatprep.mubr.msk.bf16.mxu1 %vm2042_vm0, %v5108_v35  ;;  %v2246_v35 = vadd.f32 %v5712_v4, %v5747_v62 }
 0x18e   : > { %v2303_v42 = vpop.f32.mrf.mxu0  ;;  %v2528_v53 = vpop.f32.mrf.mxu1 }
 0x190   : > { %v5871_v21 = vpop.f32.mrf.mxu0  ;;  %v2529_v27 = vpop.f32.mrf.mxu1 }
 0x191   : > { %v5875_v54 = vadd.f32 %v2529_v27, %v2241_v56  ;;  %v2249_v56 = vadd.f32 %v5712_v4, %v5755_v17 }
 0x192   : > { %v2306_v18 = vpop.f32.mrf.mxu0  ;;  %v2531_v15 = vpop.f32.mrf.mxu1 }
 0x193   : > { %v5110_v18 = vld [vmem:[%s5254_s5 + $0x400] ss:$28 sps:$4 sm:$0xff]   ;;  %v5114_v15 = vld [vmem:[%s5254_s5 + $0x130] ss:$28 sps:$4 sm:$0xff]  }
 0x194   : > { %v5881_v37 = vpop.f32.mrf.mxu0  ;;  %v2534_v38 = vpop.f32.mrf.mxu1  ;;  %2886 = vmatmul.mubr.bf16.gmra.mxu0 %v5105_v58  ;;  %4703 = vmatmul.mubr.msk.bf16.gmra.mxu1 %vm2042_vm0, %v5109_v28  ;;  %v5117_v58 = vld [vmem:[%s5254_s5 + $0x43c] ss:$28 sps:$4 sm:$0xff]  }
 0x195   : > { %v5884_v6 = vadd.f32 %v2534_v38, %v2246_v35  ;;  %2893 = vmatprep.mubr.bf16.mxu0 %v5112_v12  ;;  %4706 = vmatprep.mubr.msk.bf16.mxu1 %vm2042_vm0, %v5113_v9  ;;  %v2254_v9 = vadd.f32 %v5712_v4, %v5766_v34 }
 0x196   : > { %v2311_v42 = vpop.f32.mrf.mxu0  ;;  %v2536_v53 = vpop.f32.mrf.mxu1 }
 0x198   : > { %v5889_v27 = vpop.f32.mrf.mxu0  ;;  %v2537_v62 = vpop.f32.mrf.mxu1 }
 0x199   : > { %v5893_v59 = vadd.f32 %v2537_v62, %v2249_v56  ;;  %v2257_v56 = vadd.f32 %v5712_v4, %v5772_v49 }
 0x19a   : > { %v2314_v28 = vpop.f32.mrf.mxu0  ;;  %v2539_v12 = vpop.f32.mrf.mxu1 }
 0x19b   : > { %v5115_v28 = vld [vmem:[%s5254_s5 + $0x438] ss:$28 sps:$4 sm:$0xff]   ;;  %v5119_v12 = vld [vmem:[%s5254_s5 + $0x1a0] ss:$28 sps:$4 sm:$0xff]  }
 0x19c   : > { %v5899_v35 = vpop.f32.mrf.mxu0  ;;  %v2542_v17 = vpop.f32.mrf.mxu1  ;;  %2894 = vmatmul.mubr.bf16.gmra.mxu0 %v5110_v18  ;;  %4707 = vmatmul.mubr.msk.bf16.gmra.mxu1 %vm2042_vm0, %v5114_v15  ;;  %v5122_v18 = vld [vmem:[%s5254_s5 + $0x474] ss:$28 sps:$4 sm:$0xff]  }
 0x19d   : > { %v5902_v38 = vadd.f32 %v2542_v17, %v2254_v9  ;;  %2901 = vmatprep.mubr.bf16.mxu0 %v5117_v58  ;;  %4710 = vmatprep.mubr.msk.bf16.mxu1 %vm2042_vm0, %v5118_v43  ;;  %v2262_v43 = vadd.f32 %v5712_v4, %v5782_v7 }
 0x19e   : > { %v2319_v42 = vpop.f32.mrf.mxu0  ;;  %v2544_v53 = vpop.f32.mrf.mxu1 }
 0x1a0   : > { %v5907_v62 = vpop.f32.mrf.mxu0  ;;  %v2545_v34 = vpop.f32.mrf.mxu1 }
 0x1a1   : > { %v5911_v36 = vadd.f32 %v2545_v34, %v2257_v56  ;;  %v2265_v56 = vadd.f32 %v5712_v4, %v5788_v20 }
 0x1a2   : > { %v2322_v15 = vpop.f32.mrf.mxu0  ;;  %v2547_v58 = vpop.f32.mrf.mxu1 }
 0x1a3   : > { %v5120_v15 = vld [vmem:[%s5254_s5 + $0x470] ss:$28 sps:$4 sm:$0xff]  }
 0x1a4   : > { %v5917_v9 = vpop.f32.mrf.mxu0  ;;  %v2550_v49 = vpop.f32.mrf.mxu1  ;;  %2902 = vmatmul.mubr.bf16.gmra.mxu0 %v5115_v28  ;;  %4711 = vmatmul.mubr.msk.bf16.gmra.mxu1 %vm2042_vm0, %v5119_v12  ;;  %v5124_v58 = vld [vmem:[%s5254_s5 + $0x210] ss:$28 sps:$4 sm:$0xff]  }
 0x1a5   : > { %v5920_v17 = vadd.f32 %v2550_v49, %v2262_v43  ;;  %2909 = vmatprep.mubr.bf16.mxu0 %v5122_v18  ;;  %4714 = vmatprep.mubr.msk.bf16.mxu1 %vm2042_vm0, %v5123_v22  ;;  %v5127_v28 = vld [vmem:[%s5254_s5 + $0x4ac] ss:$28 sps:$4 sm:$0xff]   ;;  %v2270_v22 = vadd.f32 %v5712_v4, %v5798_v46 }
 0x1a6   : > { %v2327_v42 = vpop.f32.mrf.mxu0  ;;  %v2552_v53 = vpop.f32.mrf.mxu1 }
 0x1a8   : > { %v5925_v34 = vpop.f32.mrf.mxu0  ;;  %v2553_v7 = vpop.f32.mrf.mxu1 }
 0x1a9   : > { %v5929_v16 = vadd.f32 %v2553_v7, %v2265_v56  ;;  %v2273_v56 = vadd.f32 %v5712_v4, %v5804_v60 }
 0x1aa   : > { %v2330_v12 = vpop.f32.mrf.mxu0  ;;  %v2555_v18 = vpop.f32.mrf.mxu1 }
 0x1ab   : > { %6723 = vst [vmem:[#allocation10_spill] sm:$0xff] %v5929_v16  ;;  %v5125_v12 = vld [vmem:[%s5254_s5 + $0x4a8] ss:$28 sps:$4 sm:$0xff]   ;;  %v5129_v18 = vld [vmem:[%s5254_s5 + $0x280] ss:$28 sps:$4 sm:$0xff]  }
 0x1ac   : > { %v5935_v43 = vpop.f32.mrf.mxu0  ;;  %v2558_v20 = vpop.f32.mrf.mxu1  ;;  %2910 = vmatmul.mubr.bf16.gmra.mxu0 %v5120_v15  ;;  %4715 = vmatmul.mubr.msk.bf16.gmra.mxu1 %vm2042_vm0, %v5124_v58  ;;  %v5132_v15 = vld [vmem:[%s5254_s5 + $0x4e4] ss:$28 sps:$4 sm:$0xff]   ;;  %v5133_v16 = vld [vmem:[%s5254_s5 + $0x2b8] ss:$28 sps:$4 sm:$0xff]  }
 0x1ad   : > { %v5938_v49 = vadd.f32 %v2558_v20, %v2270_v22  ;;  %2917 = vmatprep.mubr.bf16.mxu0 %v5127_v28  ;;  %4718 = vmatprep.mubr.msk.bf16.mxu1 %vm2042_vm0, %v5128_v2  ;;  %v2278_v2 = vadd.f32 %v5712_v4, %v5814_v25 }
 0x1ae   : > { %v2335_v42 = vpop.f32.mrf.mxu0  ;;  %v2560_v53 = vpop.f32.mrf.mxu1 }
 0x1af   : > { %6724 = vst [vmem:[#allocation11_spill] sm:$0xff] %v5938_v49  ;;  %v5138_v49 = vld [vmem:[%s5254_s5 + $0x328] ss:$28 sps:$4 sm:$0xff]  }
 0x1b0   : > { %v5943_v7 = vpop.f32.mrf.mxu0  ;;  %v2561_v46 = vpop.f32.mrf.mxu1 }
 0x1b1   : > { %v5947_v57 = vadd.f32 %v2561_v46, %v2273_v56  ;;  %v2281_v56 = vadd.f32 %v5712_v4, %v5820_v13 }
 0x1b2   : > { %v2338_v58 = vpop.f32.mrf.mxu0  ;;  %v2563_v28 = vpop.f32.mrf.mxu1 }
 0x1b3   : > { %6725 = vst [vmem:[#allocation12_spill] sm:$0xff] %v5947_v57  ;;  %v5130_v58 = vld [vmem:[%s5254_s5 + $0x4e0] ss:$28 sps:$4 sm:$0xff]   ;;  %v5134_v28 = vld [vmem:[%s5254_s5 + $0x2f0] ss:$28 sps:$4 sm:$0xff]  }
 0x1b4   : > { %v5953_v22 = vpop.f32.mrf.mxu0  ;;  %v2566_v60 = vpop.f32.mrf.mxu1  ;;  %2918 = vmatmul.mubr.bf16.gmra.mxu0 %v5125_v12  ;;  %4719 = vmatmul.mubr.msk.bf16.gmra.mxu1 %vm2042_vm0, %v5129_v18  ;;  %v5137_v12 = vld [vmem:[%s5254_s5 + $0x51c] ss:$28 sps:$4 sm:$0xff]  }
 0x1b5   : > { %v5956_v20 = vadd.f32 %v2566_v60, %v2278_v2  ;;  %2925 = vmatprep.mubr.bf16.mxu0 %v5132_v15  ;;  %4722 = vmatprep.mubr.msk.bf16.mxu1 %vm2042_vm0, %v5133_v16  ;;  %v2286_v16 = vadd.f32 %v5712_v4, %v5830_v63 }
 0x1b6   : > { %v2343_v42 = vpop.f32.mrf.mxu0  ;;  %v2568_v53 = vpop.f32.mrf.mxu1 }
 0x1b7   : > { %6726 = vst [vmem:[#allocation13_spill] sm:$0xff] %v5956_v20  ;;  %v5143_v20 = vld [vmem:[%s5254_s5 + $0x398] ss:$28 sps:$4 sm:$0xff]  }
 0x1b8   : > { %v5961_v46 = vpop.f32.mrf.mxu0  ;;  %v2569_v25 = vpop.f32.mrf.mxu1 }
 0x1b9   : > { %v5965_v57 = vadd.f32 %v2569_v25, %v2281_v56  ;;  %v2289_v56 = vadd.f32 %v5712_v4, %v5836_v19 }
 0x1ba   : > { %v2346_v18 = vpop.f32.mrf.mxu0  ;;  %v2571_v15 = vpop.f32.mrf.mxu1 }
 0x1bb   : > { %6727 = vst [vmem:[#allocation14_spill] sm:$0xff] %v5965_v57  ;;  %v5135_v18 = vld [vmem:[%s5254_s5 + $0x518] ss:$28 sps:$4 sm:$0xff]   ;;  %v5139_v15 = vld [vmem:[%s5254_s5 + $0x360] ss:$28 sps:$4 sm:$0xff]  }
 0x1bc   : > { %v5971_v2 = vpop.f32.mrf.mxu0  ;;  %v2574_v13 = vpop.f32.mrf.mxu1  ;;  %2926 = vmatmul.mubr.bf16.gmra.mxu0 %v5130_v58  ;;  %4723 = vmatmul.mubr.msk.bf16.gmra.mxu1 %vm2042_vm0, %v5134_v28  ;;  %v5142_v58 = vld [vmem:[%s5254_s5 + $0x554] ss:$28 sps:$4 sm:$0xff]  }
 0x1bd   : > { %v5974_v60 = vadd.f32 %v2574_v13, %v2286_v16  ;;  %2933 = vmatprep.mubr.bf16.mxu0 %v5137_v12  ;;  %4726 = vmatprep.mubr.msk.bf16.mxu1 %vm2042_vm0, %v5138_v49  ;;  %v2294_v49 = vadd.f32 %v5712_v4, %v5846_v50 }
 0x1be   : > { %v2351_v42 = vpop.f32.mrf.mxu0  ;;  %v2576_v53 = vpop.f32.mrf.mxu1 }
 0x1bf   : > { %6728 = vst [vmem:[#allocation15_spill] sm:$0xff] %v5974_v60  ;;  %v5148_v60 = vld [vmem:[%s5254_s5 + $0x408] ss:$28 sps:$4 sm:$0xff]  }
 0x1c0   : > { %v5979_v25 = vpop.f32.mrf.mxu0  ;;  %v2577_v63 = vpop.f32.mrf.mxu1 }
 0x1c1   : > { %v5983_v57 = vadd.f32 %v2577_v63, %v2289_v56  ;;  %v2297_v56 = vadd.f32 %v5712_v4, %v5853_v29 }
 0x1c2   : > { %v2354_v28 = vpop.f32.mrf.mxu0  ;;  %v2579_v12 = vpop.f32.mrf.mxu1 }
 0x1c3   : > { %6729 = vst [vmem:[#allocation16_spill] sm:$0xff] %v5983_v57  ;;  %v5140_v28 = vld [vmem:[%s5254_s5 + $0x550] ss:$28 sps:$4 sm:$0xff]  }
 0x1c4   : > { %v5989_v16 = vpop.f32.mrf.mxu0  ;;  %v2582_v19 = vpop.f32.mrf.mxu1  ;;  %2934 = vmatmul.mubr.bf16.gmra.mxu0 %v5135_v18  ;;  %4727 = vmatmul.mubr.msk.bf16.gmra.mxu1 %vm2042_vm0, %v5139_v15  ;;  %v5144_v12 = vld [vmem:[%s5254_s5 + $0x3d0] ss:$28 sps:$4 sm:$0xff]  }
 0x1c5   : > { %v5992_v13 = vadd.f32 %v2582_v19, %v2294_v49  ;;  %2941 = vmatprep.mubr.bf16.mxu0 %v5142_v58  ;;  %4730 = vmatprep.mubr.msk.bf16.mxu1 %vm2042_vm0, %v5143_v20  ;;  %v5147_v18 = vld [vmem:[%s5254_s5 + $0x58c] ss:$28 sps:$4 sm:$0xff]   ;;  %v2302_v20 = vadd.f32 %v5712_v4, %v5863_v41  ;;  %v2305_v41 = vadd.f32 %v5712_v4, %v5871_v21 }
 0x1c6   : > { %v2359_v42 = vpop.f32.mrf.mxu0  ;;  %v2584_v53 = vpop.f32.mrf.mxu1 }
 0x1c7   : > { %6730 = vst [vmem:[#allocation17_spill] sm:$0xff] %v5992_v13 }
 0x1c8   : > { %v5997_v63 = vpop.f32.mrf.mxu0  ;;  %v2585_v50 = vpop.f32.mrf.mxu1 }
 0x1c9   : > { %v6001_v57 = vadd.f32 %v2585_v50, %v2297_v56 }
 0x1ca   : > { %v2362_v15 = vpop.f32.mrf.mxu0  ;;  %v2587_v49 = vpop.f32.mrf.mxu1 }
 0x1cb   : > { %6731 = vst [vmem:[#allocation18_spill] sm:$0xff] %v6001_v57  ;;  %v5145_v49 = vld [vmem:[%s5254_s5 + $0x588] ss:$28 sps:$4 sm:$0xff]  }
 0x1cc   : > { %v2590_v58 = vpop.f32.mrf.mxu1  ;;  %v2751_v19 = vpop.f32.mrf.mxu0  ;;  %2942 = vmatmul.mubr.bf16.gmra.mxu0 %v5140_v28  ;;  %4731 = vmatmul.mubr.msk.bf16.gmra.mxu1 %vm2042_vm0, %v5144_v12  ;;  %v5149_v28 = vld [vmem:[%s5254_s5 + $0x440] ss:$28 sps:$4 sm:$0xff]  }
 0x1cd   : > { %v6008_v29 = vadd.f32 %v2590_v58, %v2302_v20  ;;  %v6011_v42 = vadd.f32 %v2751_v19, %v5730_v32  ;;  %2949 = vmatprep.mubr.bf16.mxu0 %v5147_v18  ;;  %4734 = vmatprep.mubr.msk.bf16.mxu1 %vm2042_vm0, %v5148_v60  ;;  %v5152_v20 = vld [vmem:[%s5254_s5 + $0x5c4] ss:$28 sps:$4 sm:$0xff]   ;;  %v5153_v32 = vld [vmem:[%s5254_s5 + $0x478] ss:$28 sps:$4 sm:$0xff]   ;;  %v2310_v60 = vadd.f32 %v5712_v4, %v5881_v37 }
 0x1ce   : > { %v2592_v53 = vpop.f32.mrf.mxu1  ;;  %v2753_v56 = vpop.f32.mrf.mxu0  ;;  %v2313_v37 = vadd.f32 %v5712_v4, %v5889_v27 }
 0x1d0   : > { %v2593_v50 = vpop.f32.mrf.mxu1  ;;  %v2754_v15 = vpop.f32.mrf.mxu0 }
 0x1d1   : > { %v6018_v57 = vadd.f32 %v2593_v50, %v2305_v41  ;;  %v6021_v12 = vadd.f32 %v2754_v15, %v5740_v48 }
 0x1d2   : > { %v2595_v58 = vpop.f32.mrf.mxu1  ;;  %v2756_v18 = vpop.f32.mrf.mxu0 }
 0x1d3   : > { %v5150_v58 = vld [vmem:[%s5254_s5 + $0x5c0] ss:$28 sps:$4 sm:$0xff]  }
 0x1d4   : > { %v2598_v19 = vpop.f32.mrf.mxu1  ;;  %v2759_v21 = vpop.f32.mrf.mxu0  ;;  %2950 = vmatmul.mubr.bf16.gmra.mxu0 %v5145_v49  ;;  %4735 = vmatmul.mubr.msk.bf16.gmra.mxu1 %vm2042_vm0, %v5149_v28  ;;  %v5154_v49 = vld [vmem:[%s5254_s5 + $0x4b0] ss:$28 sps:$4 sm:$0xff]  }
 0x1d5   : > { %v6028_v53 = vadd.f32 %v2598_v19, %v2310_v60  ;;  %v6031_v48 = vadd.f32 %v2759_v21, %v5750_v5  ;;  %2957 = vmatprep.mubr.bf16.mxu0 %v5152_v20  ;;  %4738 = vmatprep.mubr.msk.bf16.mxu1 %vm2042_vm0, %v5153_v32  ;;  %v5157_v60 = vld [vmem:[%s5254_s5 + $0x5fc] ss:$28 sps:$4 sm:$0xff]   ;;  %v5158_v5 = vld [vmem:[%s5254_s5 + $0x4e8] ss:$28 sps:$4 sm:$0xff]   ;;  %v2318_v32 = vadd.f32 %v5712_v4, %v5899_v35 }
 0x1d6   : > { %v2600_v56 = vpop.f32.mrf.mxu1  ;;  %v2761_v41 = vpop.f32.mrf.mxu0  ;;  %v2321_v35 = vadd.f32 %v5712_v4, %v5907_v62 }
 0x1d7   : > { %6732 = vst [vmem:[#allocation19_spill] sm:$0xff] %v6028_v53 }
 0x1d8   : > { %v2601_v50 = vpop.f32.mrf.mxu1  ;;  %v2762_v15 = vpop.f32.mrf.mxu0 }
 0x1d9   : > { %v6038_v18 = vadd.f32 %v2601_v50, %v2313_v37  ;;  %v6041_v28 = vadd.f32 %v2762_v15, %v5760_v26 }
 0x1da   : > { %v2603_v19 = vpop.f32.mrf.mxu1  ;;  %v2764_v20 = vpop.f32.mrf.mxu0 }
 0x1db   : > { %6733 = vst [vmem:[#allocation20_spill] sm:$0xff] %v6038_v18  ;;  %v5155_v19 = vld [vmem:[%s5254_s5 + $0x5f8] ss:$28 sps:$4 sm:$0xff]  }
 0x1dc   : > { %v2606_v21 = vpop.f32.mrf.mxu1  ;;  %v2767_v27 = vpop.f32.mrf.mxu0  ;;  %2958 = vmatmul.mubr.bf16.gmra.mxu0 %v5150_v58  ;;  %4739 = vmatmul.mubr.msk.bf16.gmra.mxu1 %vm2042_vm0, %v5154_v49  ;;  %v5159_v58 = vld [vmem:[%s5254_s5 + $0x520] ss:$28 sps:$4 sm:$0xff]  }
 0x1dd   : > { %v6048_v56 = vadd.f32 %v2606_v21, %v2318_v32  ;;  %v6051_v26 = vadd.f32 %v2767_v27, %v5768_v40  ;;  %2965 = vmatprep.mubr.bf16.mxu0 %v5157_v60  ;;  %4742 = vmatprep.mubr.msk.bf16.mxu1 %vm2042_vm0, %v5158_v5  ;;  %v5162_v32 = vld [vmem:[%s5254_s5 + $0x634] ss:$28 sps:$4 sm:$0xff]   ;;  %v2326_v5 = vadd.f32 %v5712_v4, %v5917_v9 }
 0x1de   : > { %v2608_v41 = vpop.f32.mrf.mxu1  ;;  %v2769_v37 = vpop.f32.mrf.mxu0  ;;  %v5163_v40 = vld [vmem:[%s5254_s5 + $0x558] ss:$28 sps:$4 sm:$0xff]   ;;  %v2329_v9 = vadd.f32 %v5712_v4, %v5925_v34 }
 0x1df   : > { %6734 = vst [vmem:[#allocation21_spill] sm:$0xff] %v6048_v56  ;;  %v6770_v56 = vld [vmem:[#allocation15_spill] sm:$0xff] }
 0x1e0   : > { %v2609_v50 = vpop.f32.mrf.mxu1  ;;  %v2770_v15 = vpop.f32.mrf.mxu0 }
 0x1e1   : > { %v6058_v20 = vadd.f32 %v2609_v50, %v2321_v35  ;;  %v6061_v49 = vadd.f32 %v2770_v15, %v5776_v52 }
 0x1e2   : > { %v2611_v21 = vpop.f32.mrf.mxu1  ;;  %v2772_v60 = vpop.f32.mrf.mxu0 }
 0x1e3   : > { %6735 = vst [vmem:[#allocation22_spill] sm:$0xff] %v6058_v20  ;;  %v5160_v21 = vld [vmem:[%s5254_s5 + $0x630] ss:$28 sps:$4 sm:$0xff]   ;;  %v6767_v20 = vld [vmem:[#allocation14_spill] sm:$0xff] }
 0x1e4   : > { %v2614_v27 = vpop.f32.mrf.mxu1  ;;  %v2775_v62 = vpop.f32.mrf.mxu0  ;;  %2966 = vmatmul.mubr.bf16.gmra.mxu0 %v5155_v19  ;;  %4743 = vmatmul.mubr.msk.bf16.gmra.mxu1 %vm2042_vm0, %v5159_v58  ;;  %v5164_v19 = vld [vmem:[%s5254_s5 + $0x590] ss:$28 sps:$4 sm:$0xff]  }
 0x1e5   : > { %v6068_v41 = vadd.f32 %v2614_v27, %v2326_v5  ;;  %v6071_v52 = vadd.f32 %v2775_v62, %v5784_v11  ;;  %2973 = vmatprep.mubr.bf16.mxu0 %v5162_v32  ;;  %4746 = vmatprep.mubr.msk.bf16.mxu1 %vm2042_vm0, %v5163_v40  ;;  %v5167_v5 = vld [vmem:[%s5254_s5 + $0x66c] ss:$28 sps:$4 sm:$0xff]   ;;  %v2334_v40 = vadd.f32 %v5712_v4, %v5935_v43 }
 0x1e6   : > { %v2616_v37 = vpop.f32.mrf.mxu1  ;;  %v2777_v35 = vpop.f32.mrf.mxu0  ;;  %v5168_v11 = vld [vmem:[%s5254_s5 + $0x5c8] ss:$28 sps:$4 sm:$0xff]   ;;  %v2337_v43 = vadd.f32 %v5712_v4, %v5943_v7 }
 0x1e7   : > { %6736 = vst [vmem:[#allocation23_spill] sm:$0xff] %v6068_v41 }
 0x1e8   : > { %v2617_v50 = vpop.f32.mrf.mxu1  ;;  %v2778_v15 = vpop.f32.mrf.mxu0 }
 0x1e9   : > { %v6078_v60 = vadd.f32 %v2617_v50, %v2329_v9  ;;  %v6081_v58 = vadd.f32 %v2778_v15, %v5792_v31 }
 0x1ea   : > { %v2619_v27 = vpop.f32.mrf.mxu1  ;;  %v2780_v32 = vpop.f32.mrf.mxu0 }
 0x1eb   : > { %6737 = vst [vmem:[#allocation24_spill] sm:$0xff] %v6078_v60  ;;  %v5165_v27 = vld [vmem:[%s5254_s5 + $0x668] ss:$28 sps:$4 sm:$0xff]  }
 0x1ec   : > { %v2622_v62 = vpop.f32.mrf.mxu1  ;;  %v2783_v34 = vpop.f32.mrf.mxu0  ;;  %2974 = vmatmul.mubr.bf16.gmra.mxu0 %v5160_v21  ;;  %4747 = vmatmul.mubr.msk.bf16.gmra.mxu1 %vm2042_vm0, %v5164_v19  ;;  %v5169_v21 = vld [vmem:[%s5254_s5 + $0x600] ss:$28 sps:$4 sm:$0xff]  }
 0x1ed   : > { %v6088_v37 = vadd.f32 %v2622_v62, %v2334_v40  ;;  %v6091_v31 = vadd.f32 %v2783_v34, %v5800_v47  ;;  %2981 = vmatprep.mubr.bf16.mxu0 %v5167_v5  ;;  %4750 = vmatprep.mubr.msk.bf16.mxu1 %vm2042_vm0, %v5168_v11  ;;  %v5172_v40 = vld [vmem:[%s5254_s5 + $0x6a4] ss:$28 sps:$4 sm:$0xff]   ;;  %v5173_v47 = vld [vmem:[%s5254_s5 + $0x638] ss:$28 sps:$4 sm:$0xff]   ;;  %v2342_v11 = vadd.f32 %v5712_v4, %v5953_v22 }
 0x1ee   : > { %v2624_v35 = vpop.f32.mrf.mxu1  ;;  %v2785_v9 = vpop.f32.mrf.mxu0  ;;  %v2345_v22 = vadd.f32 %v5712_v4, %v5961_v46 }
 0x1ef   : > { %6738 = vst [vmem:[#allocation25_spill] sm:$0xff] %v6088_v37 }
 0x1f0   : > { %v2625_v50 = vpop.f32.mrf.mxu1  ;;  %v2786_v15 = vpop.f32.mrf.mxu0 }
 0x1f1   : > { %v6098_v32 = vadd.f32 %v2625_v50, %v2337_v43  ;;  %v6101_v19 = vadd.f32 %v2786_v15, %v5808_v3 }
 0x1f2   : > { %v2627_v62 = vpop.f32.mrf.mxu1  ;;  %v2788_v5 = vpop.f32.mrf.mxu0 }
 0x1f3   : > { %6739 = vst [vmem:[#allocation26_spill] sm:$0xff] %v6098_v32  ;;  %v5170_v62 = vld [vmem:[%s5254_s5 + $0x6a0] ss:$28 sps:$4 sm:$0xff]  }
 0x1f4   : > { %v2630_v34 = vpop.f32.mrf.mxu1  ;;  %v2791_v7 = vpop.f32.mrf.mxu0  ;;  %2982 = vmatmul.mubr.bf16.gmra.mxu0 %v5165_v27  ;;  %4751 = vmatmul.mubr.msk.bf16.gmra.mxu1 %vm2042_vm0, %v5169_v21  ;;  %v5174_v27 = vld [vmem:[%s5254_s5 + $0x670] ss:$28 sps:$4 sm:$0xff]  }
 0x1f5   : > { %v6108_v35 = vadd.f32 %v2630_v34, %v2342_v11  ;;  %v6111_v3 = vadd.f32 %v2791_v7, %v5816_v1  ;;  %2989 = vmatprep.mubr.bf16.mxu0 %v5172_v40  ;;  %4754 = vmatprep.mubr.msk.bf16.mxu1 %vm2042_vm0, %v5173_v47  ;;  %v5177_v11 = vld [vmem:[%s5254_s5 + $0x6dc] ss:$28 sps:$4 sm:$0xff]   ;;  %v5178_v1 = vld [vmem:[%s5254_s5 + $0x6a8] ss:$28 sps:$4 sm:$0xff]   ;;  %v2350_v47 = vadd.f32 %v5712_v4, %v5971_v2 }
 0x1f6   : > { %v2632_v9 = vpop.f32.mrf.mxu1  ;;  %v2793_v43 = vpop.f32.mrf.mxu0 }
 0x1f7   : > { %6740 = vst [vmem:[#allocation27_spill] sm:$0xff] %v6108_v35 }
 0x1f8   : > { %v2633_v50 = vpop.f32.mrf.mxu1  ;;  %v2794_v15 = vpop.f32.mrf.mxu0 }
 0x1f9   : > { %v6118_v5 = vadd.f32 %v2633_v50, %v2345_v22  ;;  %v6121_v21 = vadd.f32 %v2794_v15, %v5824_v44  ;;  %v2353_v50 = vadd.f32 %v5712_v4, %v5979_v25 }
 0x1fa   : > { %v2635_v34 = vpop.f32.mrf.mxu1  ;;  %v2796_v40 = vpop.f32.mrf.mxu0 }
 0x1fb   : > { %6741 = vst [vmem:[#allocation28_spill] sm:$0xff] %v6118_v5  ;;  %v5175_v34 = vld [vmem:[%s5254_s5 + $0x6d8] ss:$28 sps:$4 sm:$0xff]   ;;  %v5179_v40 = vld [vmem:[%s5254_s5 + $0x6e0] ss:$28 sps:$4 sm:$0xff]  }
 0x1fc   : > { %v2638_v7 = vpop.f32.mrf.mxu1  ;;  %v2799_v46 = vpop.f32.mrf.mxu0  ;;  %2990 = vmatmul.mubr.bf16.gmra.mxu0 %v5170_v62  ;;  %4755 = vmatmul.mubr.msk.bf16.gmra.mxu1 %vm2042_vm0, %v5174_v27 }
 0x1fd   : > { %v6128_v9 = vadd.f32 %v2638_v7, %v2350_v47  ;;  %v6131_v43 = vadd.f32 %v2799_v46, %v5832_v10  ;;  %2997 = vmatprep.mubr.bf16.mxu0 %v5177_v11  ;;  %4758 = vmatprep.mubr.msk.bf16.mxu1 %vm2042_vm0, %v5178_v1  ;;  %v2358_v11 = vadd.f32 %v5712_v4, %v5989_v16 }
 0x1fe   : > { %v2640_v44 = vpop.f32.mrf.mxu1  ;;  %v2801_v22 = vpop.f32.mrf.mxu0 }
 0x1ff   : > { %6742 = vst [vmem:[#allocation29_spill] sm:$0xff] %v6128_v9 }
 0x200   : > { %v2641_v15 = vpop.f32.mrf.mxu1  ;;  %v2802_v2 = vpop.f32.mrf.mxu0 }
 0x201   : > { %v6138_v62 = vadd.f32 %v2641_v15, %v2353_v50  ;;  %v6141_v27 = vadd.f32 %v2802_v2, %v5840_v33  ;;  %v6154_v33 = vld [vmem:[%s6712_s2] ss:$0 sm:$0xff] }
 0x202   : > { %v2643_v47 = vpop.f32.mrf.mxu1  ;;  %v2804_v10 = vpop.f32.mrf.mxu0  ;;  %v2361_v4 = vadd.f32 %v6154_v33, %v5997_v63 }
 0x203   : > { %6743 = vst [vmem:[#allocation30_spill] sm:$0xff] %v6138_v62 }
 0x204   : > { %v2646_v1 = vpop.f32.mrf.mxu1  ;;  %v2807_v7 = vpop.f32.mrf.mxu0  ;;  %2998 = vmatmul.mubr.bf16.gmra.mxu0 %v5175_v34  ;;  %4759 = vmatmul.mubr.msk.bf16.gmra.mxu1 %vm2042_vm0, %v5179_v40  ;;  %v2366_v40 = vadd.f32 %v6154_v33, %v5594_v55 }
 0x205   : > { %v6146_v25 = vadd.f32 %v2646_v1, %v2358_v11  ;;  %v6149_v46 = vadd.f32 %v2807_v7, %v5848_v51 }
 0x206   : > { %v2648_v44 = vpop.f32.mrf.mxu1  ;;  %v2809_v22 = vpop.f32.mrf.mxu0 }
 0x207   : > { %6744 = vst [vmem:[#allocation31_spill] sm:$0xff] %v6146_v25  ;;  %v2369_v44 = vadd.f32 %v6154_v33, %v5600_v61  ;;  %v6172_v22 = vpop.permute.xlu0 %3425  ;;  %v6760_v25 = vld [vmem:[#allocation12_spill] sm:$0xff] }
 0x208   : > { %v2649_v16 = vpop.f32.mrf.mxu1  ;;  %v2810_v50 = vpop.f32.mrf.mxu0 }
 0x209   : > { %v6158_v15 = vadd.f32 %v2649_v16, %v2361_v4  ;;  %v6161_v2 = vadd.f32 %v2810_v50, %v5857_v0 }
 0x20a   : > { %v2651_v34 = vpop.f32.mrf.mxu1  ;;  %v2812_v51 = vpop.f32.mrf.mxu0 }
 0x20b   : > { %6745 = vst [vmem:[#allocation32_spill] sm:$0xff] %v6158_v15  ;;  %v6181_v51 = vpop.permute.xlu1 %3435  ;;  %v6757_v15 = vld [vmem:[#allocation11_spill] sm:$0xff] }
 0x20c   : > { %v2654_v47 = vpop.f32.mrf.mxu1  ;;  %v2815_v10 = vpop.f32.mrf.mxu0 }
 0x20d   : > { %v6165_v11 = vadd.f32 %v2654_v47, %v2366_v40  ;;  %v6168_v1 = vadd.f32 %v2815_v10, %v5866_v23  ;;  %v2374_v23 = vadd.f32 %v6154_v33, %v5610_v8  ;;  %v6183_v10 = vpop.permute.xlu0 %3430 }
 0x20e   : > { %v2656_v63 = vpop.f32.mrf.mxu1  ;;  %v2817_v7 = vpop.f32.mrf.mxu0 }
 0x20f   : > { %6746 = vst [vmem:[#allocation33_spill] sm:$0xff] %v6165_v11 }
 0x210   : > { %v2657_v0 = vpop.f32.mrf.mxu1  ;;  %v2818_v4 = vpop.f32.mrf.mxu0 }
 0x211   : > { %v6174_v16 = vadd.f32 %v2657_v0, %v2369_v44  ;;  %v6177_v55 = vadd.f32 %v2818_v4, %v5875_v54  ;;  %v2377_v54 = vadd.f32 %v6154_v33, %v5616_v14 }
 0x212   : > { %v2659_v50 = vpop.f32.mrf.mxu1  ;;  %v2820_v34 = vpop.f32.mrf.mxu0 }
 0x213   : > { %6747 = vst [vmem:[#allocation34_spill] sm:$0xff] %v6174_v16  ;;  %v6192_v50 = vpop.permute.xlu1 %3440 }
 0x214   : > { %v2662_v40 = vpop.f32.mrf.mxu1  ;;  %v2823_v47 = vpop.f32.mrf.mxu0 }
 0x215   : > { %v6185_v61 = vadd.f32 %v2662_v40, %v2374_v23  ;;  %v6188_v63 = vadd.f32 %v2823_v47, %v5884_v6  ;;  %v2382_v6 = vadd.f32 %v6154_v33, %v5626_v24  ;;  %v6201_v40 = vpop.permute.xlu0 %3445 }
 0x216   : > { %v2664_v7 = vpop.f32.mrf.mxu1  ;;  %v2825_v44 = vpop.f32.mrf.mxu0 }
 0x217   : > { %6748 = vst [vmem:[#allocation35_spill] sm:$0xff] %v6185_v61 }
 0x218   : > { %v2665_v0 = vpop.f32.mrf.mxu1  ;;  %v2826_v4 = vpop.f32.mrf.mxu0 }
 0x219   : > { %v6194_v8 = vadd.f32 %v2665_v0, %v2377_v54  ;;  %v6197_v34 = vadd.f32 %v2826_v4, %v5893_v59  ;;  %v2385_v59 = vadd.f32 %v6154_v33, %v5632_v30  ;;  %v6210_v0 = vpop.permute.xlu1 %3450 }
 0x21a   : > { %v2667_v16 = vpop.f32.mrf.mxu1  ;;  %v2828_v23 = vpop.f32.mrf.mxu0 }
 0x21b   : > { %6749 = vst [vmem:[#allocation36_spill] sm:$0xff] %v6194_v8  ;;  %v6212_v23 = vpop.permute.xlu0 %3455 }
 0x21c   : > { %v2670_v47 = vpop.f32.mrf.mxu1  ;;  %v2831_v7 = vpop.f32.mrf.mxu0 }
 0x21d   : > { %v6203_v44 = vadd.f32 %v2670_v47, %v2382_v6  ;;  %v6206_v14 = vadd.f32 %v2831_v7, %v5902_v38  ;;  %v2390_v38 = vadd.f32 %v6154_v33, %v5642_v39  ;;  %v6754_v39 = vld [vmem:[#allocation10_spill] sm:$0xff] }
 0x21e   : > { %v2672_v11 = vpop.f32.mrf.mxu1  ;;  %v2833_v54 = vpop.f32.mrf.mxu0 }
 0x21f   : > { %6750 = vst [vmem:[#allocation37_spill] sm:$0xff] %v6203_v44  ;;  %v6221_v54 = vpop.permute.xlu1 %3460 }
 0x220   : > { %v2673_v16 = vpop.f32.mrf.mxu1  ;;  %v2834_v4 = vpop.f32.mrf.mxu0 }
 0x221   : > { %v6214_v24 = vadd.f32 %v2673_v16, %v2385_v59  ;;  %v6217_v8 = vadd.f32 %v2834_v4, %v5911_v36  ;;  %v2393_v36 = vadd.f32 %v6154_v33, %v5648_v45  ;;  %v6230_v16 = vpop.permute.xlu0 %3465 }
 0x222   : > { %v2675_v6 = vpop.f32.mrf.mxu1  ;;  %v2836_v47 = vpop.f32.mrf.mxu0 }
 0x223   : > { %6751 = vst [vmem:[#allocation38_spill] sm:$0xff] %v6214_v24 }
 0x224   : > { %v2678_v11 = vpop.f32.mrf.mxu1  ;;  %v2839_v7 = vpop.f32.mrf.mxu0 }
 0x225   : > { %v6223_v30 = vadd.f32 %v2678_v11, %v2390_v38  ;;  %v6226_v44 = vadd.f32 %v2839_v7, %v5920_v17  ;;  %v6755_v11 = vld [vmem:[#allocation2_spill] sm:$0xff]  ;;  %v6239_v7 = vpop.permute.xlu1 %3470 }
 0x226   : > { %v2680_v61 = vpop.f32.mrf.mxu1  ;;  %v2841_v59 = vpop.f32.mrf.mxu0  ;;  %v2398_v17 = vadd.f32 %v6154_v33, %v6755_v11 }
 0x227   : > { %6752 = vst [vmem:[#allocation39_spill] sm:$0xff] %v6223_v30  ;;  %v6241_v30 = vpop.permute.xlu0 %3475 }
 0x228   : > { %v2681_v4 = vpop.f32.mrf.mxu1  ;;  %v2842_v6 = vpop.f32.mrf.mxu0 }
 0x229   : > { %v6232_v47 = vadd.f32 %v2681_v4, %v2393_v36  ;;  %v6235_v24 = vadd.f32 %v2842_v6, %v6754_v39  ;;  %v6758_v6 = vld [vmem:[#allocation3_spill] sm:$0xff] }
 0x22a   : > { %v2683_v62 = vpop.f32.mrf.mxu1  ;;  %v2844_v38 = vpop.f32.mrf.mxu0 }
 0x22b   : > { %6753 = vst [vmem:[#allocation40_spill] sm:$0xff] %v6232_v47  ;;  %v2401_v62 = vadd.f32 %v6154_v33, %v6758_v6  ;;  %v6250_v47 = vpop.permute.xlu1 %3480  ;;  %v6764_v6 = vld [vmem:[#allocation13_spill] sm:$0xff] }
 0x22c   : > { %v2686_v61 = vpop.f32.mrf.mxu1  ;;  %v2847_v59 = vpop.f32.mrf.mxu0 }
 0x22d   : > { %v6243_v45 = vadd.f32 %v2686_v61, %v2398_v17  ;;  %v6246_v9 = vadd.f32 %v2847_v59, %v6757_v15  ;;  %v6762_v61 = vld [vmem:[#allocation4_spill] sm:$0xff]  ;;  %v6259_v59 = vpop.permute.xlu0 %3485 }
 0x22e   : > { %v2688_v36 = vpop.f32.mrf.mxu1  ;;  %v2849_v4 = vpop.f32.mrf.mxu0  ;;  %v2406_v15 = vadd.f32 %v6154_v33, %v6762_v61 }
 0x22f   : > { %6756 = vst [vmem:[#allocation10_spill] sm:$0xff] %v6243_v45 }
 0x230   : > { %v2689_v39 = vpop.f32.mrf.mxu1  ;;  %v2850_v38 = vpop.f32.mrf.mxu0 }
 0x231   : > { %v6252_v11 = vadd.f32 %v2689_v39, %v2401_v62  ;;  %v6255_v32 = vadd.f32 %v2850_v38, %v6760_v25  ;;  %v6765_v39 = vld [vmem:[#allocation5_spill] sm:$0xff]  ;;  %v6268_v38 = vpop.permute.xlu1 %3490 }
 0x232   : > { %v2691_v5 = vpop.f32.mrf.mxu1  ;;  %v2852_v17 = vpop.f32.mrf.mxu0  ;;  %v2409_v25 = vadd.f32 %v6154_v33, %v6765_v39 }
 0x233   : > { %6759 = vst [vmem:[#allocation2_spill] sm:$0xff] %v6252_v11  ;;  %6761 = vst [vmem:[#allocation11_spill] sm:$0xff] %v6255_v32  ;;  %v6270_v11 = vpop.permute.xlu0 %3495 }
 0x234   : > { %v2694_v36 = vpop.f32.mrf.mxu1  ;;  %v2855_v4 = vpop.f32.mrf.mxu0 }
 0x235   : > { %v6261_v45 = vadd.f32 %v2694_v36, %v2406_v15  ;;  %v6264_v37 = vadd.f32 %v2855_v4, %v6764_v6  ;;  %v6768_v4 = vld [vmem:[#allocation6_spill] sm:$0xff] }
 0x236   : > { %v2696_v35 = vpop.f32.mrf.mxu1  ;;  %v2857_v62 = vpop.f32.mrf.mxu0 }
 0x237   : > { %6763 = vst [vmem:[#allocation3_spill] sm:$0xff] %v6261_v45  ;;  %v2414_v35 = vadd.f32 %v6154_v33, %v6768_v4  ;;  %v6279_v45 = vpop.permute.xlu1 %3500  ;;  %v6774_v4 = vld [vmem:[#allocation16_spill] sm:$0xff] }
 0x238   : > { %v2697_v5 = vpop.f32.mrf.mxu1  ;;  %v2858_v17 = vpop.f32.mrf.mxu0 }
 0x239   : > { %v6272_v61 = vadd.f32 %v2697_v5, %v2409_v25  ;;  %v6275_v60 = vadd.f32 %v2858_v17, %v6767_v20  ;;  %v6772_v5 = vld [vmem:[#allocation7_spill] sm:$0xff]  ;;  %v6288_v17 = vpop.permute.xlu0 %3505 }
 0x23a   : > { %v2699_v15 = vpop.f32.mrf.mxu1  ;;  %v2860_v36 = vpop.f32.mrf.mxu0  ;;  %v2417_v20 = vadd.f32 %v6154_v33, %v6772_v5 }
 0x23b   : > { %6766 = vst [vmem:[#allocation12_spill] sm:$0xff] %v6272_v61 }
 0x23c   : > { %v2702_v6 = vpop.f32.mrf.mxu1  ;;  %v2863_v62 = vpop.f32.mrf.mxu0 }
 0x23d   : > { %v6281_v39 = vadd.f32 %v2702_v6, %v2414_v35  ;;  %v6284_v41 = vadd.f32 %v2863_v62, %v6770_v56  ;;  %v6776_v6 = vld [vmem:[#allocation8_spill] sm:$0xff]  ;;  %v6297_v62 = vpop.permute.xlu1 %3510  ;;  %v6301_v5 = vpop.permute.xlu0 %3515 }
 0x23e   : > { %v2704_v18 = vpop.f32.mrf.mxu1  ;;  %v2865_v25 = vpop.f32.mrf.mxu0  ;;  %v2422_v56 = vadd.f32 %v6154_v33, %v6776_v6 }
 0x23f   : > { %6769 = vst [vmem:[#allocation4_spill] sm:$0xff] %v6281_v39  ;;  %6771 = vst [vmem:[#allocation13_spill] sm:$0xff] %v6284_v41 }
 0x240   : > { %v2705_v15 = vpop.f32.mrf.mxu1  ;;  %v2866_v36 = vpop.f32.mrf.mxu0 }
 0x241   : > { %v6290_v61 = vadd.f32 %v2705_v15, %v2417_v20  ;;  %v6293_v53 = vadd.f32 %v2866_v36, %v6774_v4  ;;  %v6779_v15 = vld [vmem:[#allocation9_spill] sm:$0xff] }
 0x242   : > { %v2707_v13 = vpop.f32.mrf.mxu1  ;;  %v2868_v35 = vpop.f32.mrf.mxu0  ;;  %v2425_v36 = vadd.f32 %v6154_v33, %v6779_v15 }
 0x243   : > { %6773 = vst [vmem:[#allocation5_spill] sm:$0xff] %v6290_v61  ;;  %6775 = vst [vmem:[#allocation14_spill] sm:$0xff] %v6293_v53  ;;  %v6309_v35 = vpop.permute.xlu1 %3520 }
 0x244   : > { %v2710_v18 = vpop.f32.mrf.mxu1  ;;  %v6299_v25 = vpop.f32.mrf.mxu0 }
 0x245   : > { %6777 = vst [vmem:[#allocation6_spill] sm:$0xff] %v6299_v25  ;;  %v6303_v39 = vadd.f32 %v2710_v18, %v2422_v56  ;;  %v6313_v25 = vpop.permute.xlu0 %3525 }
 0x246   : > { %v2712_v41 = vpop.f32.mrf.mxu1  ;;  %v2873_v20 = vpop.f32.mrf.mxu0 }
 0x247   : > { %6778 = vst [vmem:[#allocation15_spill] sm:$0xff] %v6303_v39  ;;  %v6319_v15 = vpop.permute.xlu1 %3530 }
 0x248   : > { %v2713_v13 = vpop.f32.mrf.mxu1  ;;  %v6307_v4 = vpop.f32.mrf.mxu0 }
 0x249   : > { %6780 = vst [vmem:[#allocation7_spill] sm:$0xff] %v6307_v4  ;;  %v6311_v6 = vadd.f32 %v2713_v13, %v2425_v36 }
 0x24a   : > { %v2715_v61 = vpop.f32.mrf.mxu1  ;;  %v2876_v53 = vpop.f32.mrf.mxu0 }
 0x24b   : > { %6781 = vst [vmem:[#allocation16_spill] sm:$0xff] %v6311_v6  ;;  %v6323_v53 = vpop.permute.xlu0 %3535 }
 0x24c   : > { %v2879_v32 = vpop.f32.mrf.mxu0  ;;  %v4700_v56 = vpop.f32.mrf.mxu1 }
 0x24d   : > { %v6316_v41 = vadd.f32 %v2879_v32, %v6008_v29  ;;  %v3049_v18 = vadd.f32 %v4700_v56, %v6031_v48 }
 0x24e   : > { %v2881_v20 = vpop.f32.mrf.mxu0  ;;  %v3040_v33 = vpop.f32.mrf.mxu1 }
 0x24f   : > { %v3297_v39 = vmax.f32 %v3049_v18, 0.0  ;;  %v3041_v36 = vadd.f32 %v3040_v33, %v6011_v42 }
 0x250   : > { %v2882_v13 = vpop.f32.mrf.mxu0  ;;  %v4701_v61 = vpop.f32.mrf.mxu1 }
 0x251   : > { %v3745_v6 = vmul.f32 %v6181_v51, %v3297_v39  ;;  %v3295_v4 = vmax.f32 %v3041_v36, 0.0  ;;  %v6327_v29 = vadd.f32 %v2882_v13, %v6018_v57  ;;  %v3052_v48 = vadd.f32 %v4701_v61, %v6041_v28  ;;  %v6339_v28 = vpop.permute.xlu1 %3540 }
 0x252   : > { %v2884_v42 = vpop.f32.mrf.mxu0  ;;  %v3043_v32 = vpop.f32.mrf.mxu1 }
 0x253   : > { %v4586_v56 = vpack.c.bf16 %v3745_v6, %v3745_v6  ;;  %v3743_v18 = vmul.f32 %v6172_v22, %v3295_v4  ;;  %v3298_v51 = vmax.f32 %v3052_v48, 0.0  ;;  %v3044_v39 = vadd.f32 %v3043_v32, %v6021_v12  ;;  %v6345_v22 = vpop.permute.xlu0 %3545 }
 0x254   : > { %v6337_v57 = vpop.f32.mrf.mxu0  ;;  %v4704_v20 = vpop.f32.mrf.mxu1 }
 0x255   : > { %4066 = vst.msk [vmem:[%s6333_s24 + $0x8] sm:$0xf] %vm4063_vm1, %v4586_v56  ;;  %v4584_v33 = vpack.c.bf16 %v3743_v18, %v3743_v18  ;;  %v3746_v36 = vmul.f32 %v6192_v50, %v3298_v51  ;;  %v3296_v13 = vmax.f32 %v3044_v39, 0.0  ;;  %v3065_v61 = vadd.f32 %v4704_v20, %v6071_v52 }
 0x256   : > { %v2889_v6 = vpop.f32.mrf.mxu0  ;;  %v3056_v42 = vpop.f32.mrf.mxu1 }
 0x257   : > { %4064 = vst.msk [vmem:[%s6333_s24] sm:$0xf] %vm4063_vm1, %v4584_v33  ;;  %v4587_v12 = vpack.c.bf16 %v3746_v36, %v3746_v36  ;;  %v3744_v4 = vmul.f32 %v6183_v10, %v3296_v13  ;;  %v3057_v48 = vadd.f32 %v3056_v42, %v6051_v26  ;;  %v3301_v32 = vmax.f32 %v3065_v61, 0.0  ;;  %v6357_v36 = vpop.permute.xlu1 %3550 }
 0x258   : > { %v6351_v56 = vpop.f32.mrf.mxu0  ;;  %v4705_v18 = vpop.f32.mrf.mxu1 }
 0x259   : > { %4067 = vst.msk [vmem:[%s6333_s24 + $0xc] sm:$0xf] %vm4063_vm1, %v4587_v12  ;;  %v4585_v50 = vpack.c.bf16 %v3744_v4, %v3744_v4  ;;  %v3299_v52 = vmax.f32 %v3057_v48, 0.0  ;;  %v3068_v51 = vadd.f32 %v4705_v18, %v6081_v58  ;;  %v3749_v39 = vmul.f32 %v6212_v23, %v3301_v32  ;;  %v6365_v58 = vpop.permute.xlu0 %3555 }
 0x25a   : > { %v2892_v20 = vpop.f32.mrf.mxu0  ;;  %v3059_v33 = vpop.f32.mrf.mxu1 }
 0x25b   : > { %4065 = vst.msk [vmem:[%s6333_s24 + $0x4] sm:$0xf] %vm4063_vm1, %v4585_v50  ;;  %v3747_v26 = vmul.f32 %v6201_v40, %v3299_v52  ;;  %v3302_v10 = vmax.f32 %v3068_v51, 0.0  ;;  %v3060_v13 = vadd.f32 %v3059_v33, %v6061_v49  ;;  %v4590_v61 = vpack.c.bf16 %v3749_v39, %v3749_v39 }
 0x25c   : > { %v6363_v6 = vpop.f32.mrf.mxu0  ;;  %v4708_v42 = vpop.f32.mrf.mxu1 }
 0x25d   : > { %v4588_v23 = vpack.c.bf16 %v3747_v26, %v3747_v26  ;;  %v3750_v12 = vmul.f32 %v6221_v54, %v3302_v10  ;;  %v3300_v4 = vmax.f32 %v3060_v13, 0.0  ;;  %4070 = vst.msk [vmem:[%s6333_s24 + $0x18] sm:$0xf] %vm4063_vm1, %v4590_v61  ;;  %v3081_v48 = vadd.f32 %v4708_v42, %v6111_v3  ;;  %v6377_v54 = vpop.permute.xlu1 %3560 }
 0x25e   : > { %v2897_v32 = vpop.f32.mrf.mxu0  ;;  %v3072_v40 = vpop.f32.mrf.mxu1 }
 0x25f   : > { %4068 = vst.msk [vmem:[%s6333_s24 + $0x10] sm:$0xf] %vm4063_vm1, %v4588_v23  ;;  %v4591_v49 = vpack.c.bf16 %v3750_v12, %v3750_v12  ;;  %v3748_v18 = vmul.f32 %v6210_v0, %v3300_v4  ;;  %v3073_v50 = vadd.f32 %v3072_v40, %v6091_v31  ;;  %v3305_v52 = vmax.f32 %v3081_v48, 0.0  ;;  %v6383_v0 = vpop.permute.xlu0 %3565 }
 0x260   : > { %v6375_v51 = vpop.f32.mrf.mxu0  ;;  %v4709_v39 = vpop.f32.mrf.mxu1 }
 0x261   : > { %4071 = vst.msk [vmem:[%s6333_s24 + $0x1c] sm:$0xf] %vm4063_vm1, %v4591_v49  ;;  %v4589_v20 = vpack.c.bf16 %v3748_v18, %v3748_v18  ;;  %v3303_v3 = vmax.f32 %v3073_v50, 0.0  ;;  %v3084_v33 = vadd.f32 %v4709_v39, %v6121_v21  ;;  %v3753_v26 = vmul.f32 %v6241_v30, %v3305_v52  ;;  %v6395_v18 = vpop.permute.xlu1 %3570 }
 0x262   : > { %v2900_v10 = vpop.f32.mrf.mxu0  ;;  %v3075_v13 = vpop.f32.mrf.mxu1 }
 0x263   : > { %4069 = vst.msk [vmem:[%s6333_s24 + $0x14] sm:$0xf] %vm4063_vm1, %v4589_v20  ;;  %v3751_v31 = vmul.f32 %v6230_v16, %v3303_v3  ;;  %v3306_v61 = vmax.f32 %v3084_v33, 0.0  ;;  %v3076_v42 = vadd.f32 %v3075_v13, %v6101_v19  ;;  %v4594_v23 = vpack.c.bf16 %v3753_v26, %v3753_v26  ;;  %v6403_v20 = vpop.permute.xlu0 %3575 }
 0x264   : > { %v6389_v12 = vpop.f32.mrf.mxu0  ;;  %v4712_v4 = vpop.f32.mrf.mxu1 }
 0x265   : > { %v4592_v48 = vpack.c.bf16 %v3751_v31, %v3751_v31  ;;  %v3754_v21 = vmul.f32 %v6250_v47, %v3306_v61  ;;  %v3304_v30 = vmax.f32 %v3076_v42, 0.0  ;;  %4074 = vst.msk [vmem:[%s6333_s24 + $0x28] sm:$0xf] %vm4063_vm1, %v4594_v23  ;;  %v3097_v32 = vadd.f32 %v4712_v4, %v6149_v46  ;;  %v6415_v4 = vpop.permute.xlu1 %3580 }
 0x266   : > { %v2905_v40 = vpop.f32.mrf.mxu0  ;;  %v3088_v49 = vpop.f32.mrf.mxu1 }
 0x267   : > { %4072 = vst.msk [vmem:[%s6333_s24 + $0x20] sm:$0xf] %vm4063_vm1, %v4592_v48  ;;  %v4595_v19 = vpack.c.bf16 %v3754_v21, %v3754_v21  ;;  %v3752_v16 = vmul.f32 %v6239_v7, %v3304_v30  ;;  %v3089_v50 = vadd.f32 %v3088_v49, %v6131_v43  ;;  %v3309_v52 = vmax.f32 %v3097_v32, 0.0  ;;  %v6421_v32 = vpop.permute.xlu0 %3585 }
 0x268   : > { %v6401_v39 = vpop.f32.mrf.mxu0  ;;  %v4713_v47 = vpop.f32.mrf.mxu1 }
 0x269   : > { %4075 = vst.msk [vmem:[%s6333_s24 + $0x2c] sm:$0xf] %vm4063_vm1, %v4595_v19  ;;  %v4593_v46 = vpack.c.bf16 %v3752_v16, %v3752_v16  ;;  %v3307_v3 = vmax.f32 %v3089_v50, 0.0  ;;  %v3100_v33 = vadd.f32 %v4713_v47, %v6161_v2  ;;  %v3757_v26 = vmul.f32 %v6270_v11, %v3309_v52 }
 0x26a   : > { %v2908_v10 = vpop.f32.mrf.mxu0  ;;  %v3091_v13 = vpop.f32.mrf.mxu1 }
 0x26b   : > { %4073 = vst.msk [vmem:[%s6333_s24 + $0x24] sm:$0xf] %vm4063_vm1, %v4593_v46  ;;  %v3755_v43 = vmul.f32 %v6259_v59, %v3307_v3  ;;  %v3310_v7 = vmax.f32 %v3100_v33, 0.0  ;;  %v3092_v31 = vadd.f32 %v3091_v13, %v6141_v27  ;;  %v4598_v61 = vpack.c.bf16 %v3757_v26, %v3757_v26  ;;  %v6433_v33 = vpop.permute.xlu1 %3590 }
 0x26c   : > { %v6413_v42 = vpop.f32.mrf.mxu0  ;;  %v4716_v23 = vpop.f32.mrf.mxu1 }
 0x26d   : > { %v4596_v2 = vpack.c.bf16 %v3755_v43, %v3755_v43  ;;  %v3758_v11 = vmul.f32 %v6279_v45, %v3310_v7  ;;  %v3308_v48 = vmax.f32 %v3092_v31, 0.0  ;;  %4078 = vst.msk [vmem:[%s6333_s24 + $0x38] sm:$0xf] %vm4063_vm1, %v4598_v61  ;;  %v3113_v21 = vadd.f32 %v4716_v23, %v6188_v63 }
 0x26e   : > { %v2913_v30 = vpop.f32.mrf.mxu0  ;;  %v3104_v59 = vpop.f32.mrf.mxu1 }
 0x26f   : > { %4076 = vst.msk [vmem:[%s6333_s24 + $0x30] sm:$0xf] %vm4063_vm1, %v4596_v2  ;;  %v4599_v27 = vpack.c.bf16 %v3758_v11, %v3758_v11  ;;  %v3756_v40 = vmul.f32 %v6268_v38, %v3308_v48  ;;  %v3105_v49 = vadd.f32 %v3104_v59, %v6168_v1  ;;  %v3313_v19 = vmax.f32 %v3113_v21, 0.0 }
 0x270   : > { %v6427_v16 = vpop.f32.mrf.mxu0  ;;  %v4717_v45 = vpop.f32.mrf.mxu1 }
 0x271   : > { %4079 = vst.msk [vmem:[%s6333_s24 + $0x3c] sm:$0xf] %vm4063_vm1, %v4599_v27  ;;  %v4597_v50 = vpack.c.bf16 %v3756_v40, %v3756_v40  ;;  %v3311_v63 = vmax.f32 %v3105_v49, 0.0  ;;  %v3116_v52 = vadd.f32 %v4717_v45, %v6197_v34  ;;  %v3761_v47 = vmul.f32 %v6301_v5, %v3313_v19  ;;  %v6441_v34 = vpop.permute.xlu0 %3595 }
 0x272   : > { %v2916_v46 = vpop.f32.mrf.mxu0  ;;  %v3107_v3 = vpop.f32.mrf.mxu1 }
 0x273   : > { %4077 = vst.msk [vmem:[%s6333_s24 + $0x34] sm:$0xf] %vm4063_vm1, %v4597_v50  ;;  %v3759_v1 = vmul.f32 %v6288_v17, %v3311_v63  ;;  %v3314_v38 = vmax.f32 %v3116_v52, 0.0  ;;  %v3108_v26 = vadd.f32 %v3107_v3, %v6177_v55  ;;  %v4602_v10 = vpack.c.bf16 %v3761_v47, %v3761_v47 }
 0x274   : > { %v6439_v13 = vpop.f32.mrf.mxu0  ;;  %v4720_v43 = vpop.f32.mrf.mxu1 }
 0x275   : > { %v4600_v5 = vpack.c.bf16 %v3759_v1, %v3759_v1  ;;  %v3762_v7 = vmul.f32 %v6309_v35, %v3314_v38  ;;  %v3312_v31 = vmax.f32 %v3108_v26, 0.0  ;;  %4082 = vst.msk [vmem:[%s6333_s24 + $0x48] sm:$0xf] %vm4063_vm1, %v4602_v10  ;;  %v3129_v61 = vadd.f32 %v4720_v43, %v6226_v44  ;;  %v6453_v35 = vpop.permute.xlu1 %3600 }
 0x276   : > { %v2921_v23 = vpop.f32.mrf.mxu0  ;;  %v3120_v17 = vpop.f32.mrf.mxu1 }
 0x277   : > { %4080 = vst.msk [vmem:[%s6333_s24 + $0x40] sm:$0xf] %vm4063_vm1, %v4600_v5  ;;  %v4603_v55 = vpack.c.bf16 %v3762_v7, %v3762_v7  ;;  %v3760_v2 = vmul.f32 %v6297_v62, %v3312_v31  ;;  %v3121_v11 = vadd.f32 %v3120_v17, %v6206_v14  ;;  %v3317_v48 = vmax.f32 %v3129_v61, 0.0  ;;  %v6459_v62 = vpop.permute.xlu0 %3605 }
 0x278   : > { %v6451_v21 = vpop.f32.mrf.mxu0  ;;  %v4721_v30 = vpop.f32.mrf.mxu1 }
 0x279   : > { %4083 = vst.msk [vmem:[%s6333_s24 + $0x4c] sm:$0xf] %vm4063_vm1, %v4603_v55  ;;  %v4601_v59 = vpack.c.bf16 %v3760_v2, %v3760_v2  ;;  %v3315_v44 = vmax.f32 %v3121_v11, 0.0  ;;  %v3132_v27 = vadd.f32 %v4721_v30, %v6235_v24  ;;  %v3765_v40 = vmul.f32 %v6323_v53, %v3317_v48  ;;  %v6471_v26 = vpop.permute.xlu1 %3610  ;;  %v6782_v2 = vld [vmem:[#allocation11_spill] sm:$0xff]  ;;  %v6783_v48 = vld [vmem:[#allocation17_spill] sm:$0xff]  ;;  %v6784_v30 = vld [vmem:[#allocation6_spill] sm:$0xff] }
 0x27a   : > { %v2924_v49 = vpop.f32.mrf.mxu0  ;;  %v3123_v19 = vpop.f32.mrf.mxu1 }
 0x27b   : > { %4081 = vst.msk [vmem:[%s6333_s24 + $0x44] sm:$0xf] %vm4063_vm1, %v4601_v59  ;;  %v3763_v14 = vmul.f32 %v6313_v25, %v3315_v44  ;;  %v3318_v45 = vmax.f32 %v3132_v27, 0.0  ;;  %v3124_v50 = vadd.f32 %v3123_v19, %v6217_v8  ;;  %v4606_v63 = vpack.c.bf16 %v3765_v40, %v3765_v40  ;;  %v6479_v7 = vpop.permute.xlu0 %3615 }
 0x27c   : > { %v6465_v52 = vpop.f32.mrf.mxu0  ;;  %v4724_v47 = vpop.f32.mrf.mxu1  ;;  %v2872_v59 = vadd.f32 %v6784_v30, %v6783_v48 }
 0x27d   : > { %v4604_v46 = vpack.c.bf16 %v3763_v14, %v3763_v14  ;;  %v3766_v24 = vmul.f32 %v6339_v28, %v3318_v45  ;;  %v3316_v53 = vmax.f32 %v3124_v50, 0.0  ;;  %4086 = vst.msk [vmem:[%s6333_s24 + $0x58] sm:$0xf] %vm4063_vm1, %v4606_v63  ;;  %v3145_v3 = vadd.f32 %v4724_v47, %v6264_v37  ;;  %v6493_v40 = vpop.permute.xlu1 %3620  ;;  %v6785_v63 = vld [vmem:[#allocation18_spill] sm:$0xff]  ;;  %v6786_v47 = vld [vmem:[#allocation7_spill] sm:$0xff] }
 0x27e   : > { %v2929_v1 = vpop.f32.mrf.mxu0  ;;  %v3136_v38 = vpop.f32.mrf.mxu1 }
 0x27f   : > { %4084 = vst.msk [vmem:[%s6333_s24 + $0x50] sm:$0xf] %vm4063_vm1, %v4604_v46  ;;  %v4607_v8 = vpack.c.bf16 %v3766_v24, %v3766_v24  ;;  %v3764_v25 = vmul.f32 %v6319_v15, %v3316_v53  ;;  %v3137_v10 = vadd.f32 %v3136_v38, %v6246_v9  ;;  %v3321_v43 = vmax.f32 %v3145_v3, 0.0  ;;  %v6498_v50 = vpop.permute.xlu0 %3625  ;;  %v6787_v3 = vld [vmem:[#allocation13_spill] sm:$0xff] }
 0x280   : > { %v6477_v5 = vpop.f32.mrf.mxu0  ;;  %v4725_v28 = vpop.f32.mrf.mxu1  ;;  %v2875_v46 = vadd.f32 %v6786_v47, %v6785_v63 }
 0x281   : > { %4087 = vst.msk [vmem:[%s6333_s24 + $0x5c] sm:$0xf] %vm4063_vm1, %v4607_v8  ;;  %v4605_v37 = vpack.c.bf16 %v3764_v25, %v3764_v25  ;;  %v3319_v31 = vmax.f32 %v3137_v10, 0.0  ;;  %v3148_v61 = vadd.f32 %v4725_v28, %v6275_v60  ;;  %v3769_v23 = vmul.f32 %v6365_v58, %v3321_v43 }
 0x282   : > { %v2932_v17 = vpop.f32.mrf.mxu0  ;;  %v3139_v55 = vpop.f32.mrf.mxu1 }
 0x283   : > { %4085 = vst.msk [vmem:[%s6333_s24 + $0x54] sm:$0xf] %vm4063_vm1, %v4605_v37  ;;  %v3767_v9 = vmul.f32 %v6345_v22, %v3319_v31  ;;  %v3322_v15 = vmax.f32 %v3148_v61, 0.0  ;;  %v3140_v11 = vadd.f32 %v3139_v55, %v6782_v2  ;;  %v4610_v44 = vpack.c.bf16 %v3769_v23, %v3769_v23  ;;  %v6511_v61 = vpop.permute.xlu1 %3630  ;;  %v6788_v17 = vld [vmem:[#allocation14_spill] sm:$0xff]  ;;  %v6521_v48 = vpop.permute.xlu0 %3635 }
 0x284   : > { %v6491_v27 = vpop.f32.mrf.mxu0  ;;  %v4728_v60 = vpop.f32.mrf.mxu1 }
 0x285   : > { %v4608_v58 = vpack.c.bf16 %v3767_v9, %v3767_v9  ;;  %v3770_v49 = vmul.f32 %v6377_v54, %v3322_v15  ;;  %v3320_v19 = vmax.f32 %v3140_v11, 0.0  ;;  %4090 = vst.msk [vmem:[%s6333_s24 + $0x68] sm:$0xf] %vm4063_vm1, %v4610_v44  ;;  %v3161_v22 = vadd.f32 %v4728_v60, %v2872_v59  ;;  %v6789_v9 = vld [vmem:[#allocation19_spill] sm:$0xff] }
 0x286   : > { %v2937_v14 = vpop.f32.mrf.mxu0  ;;  %v3152_v45 = vpop.f32.mrf.mxu1  ;;  %v2888_v15 = vadd.f32 %v6337_v57, %v6789_v9 }
 0x287   : > { %4088 = vst.msk [vmem:[%s6333_s24 + $0x60] sm:$0xf] %vm4063_vm1, %v4608_v58  ;;  %v4611_v24 = vpack.c.bf16 %v3770_v49, %v3770_v49  ;;  %v3768_v53 = vmul.f32 %v6357_v36, %v3320_v19  ;;  %v3153_v1 = vadd.f32 %v3152_v45, %v6787_v3  ;;  %v3325_v54 = vmax.f32 %v3161_v22, 0.0  ;;  %v6790_v49 = vld [vmem:[#allocation20_spill] sm:$0xff]  ;;  %v6534_v47 = vpop.permute.xlu1 %3640 }
 0x288   : > { %v6506_v38 = vpop.f32.mrf.mxu0  ;;  %v4729_v8 = vpop.f32.mrf.mxu1  ;;  %v2891_v19 = vadd.f32 %v6351_v56, %v6790_v49 }
 0x289   : > { %4091 = vst.msk [vmem:[%s6333_s24 + $0x6c] sm:$0xf] %vm4063_vm1, %v4611_v24  ;;  %v4609_v25 = vpack.c.bf16 %v3768_v53, %v3768_v53  ;;  %v3323_v10 = vmax.f32 %v3153_v1, 0.0  ;;  %v3164_v43 = vadd.f32 %v4729_v8, %v2875_v46  ;;  %v3773_v28 = vmul.f32 %v6403_v20, %v3325_v54  ;;  %v6539_v54 = vpop.permute.xlu0 %3645 }
 0x28a   : > { %v2940_v37 = vpop.f32.mrf.mxu0  ;;  %v3155_v31 = vpop.f32.mrf.mxu1 }
 0x28b   : > { %4089 = vst.msk [vmem:[%s6333_s24 + $0x64] sm:$0xf] %vm4063_vm1, %v4609_v25  ;;  %v3771_v36 = vmul.f32 %v6383_v0, %v3323_v10  ;;  %v3326_v23 = vmax.f32 %v3164_v43, 0.0  ;;  %v3156_v55 = vadd.f32 %v3155_v31, %v6788_v17  ;;  %v4614_v2 = vpack.c.bf16 %v3773_v28, %v3773_v28  ;;  %v6791_v25 = vld [vmem:[#allocation23_spill] sm:$0xff]  ;;  %v6792_v37 = vld [vmem:[#allocation21_spill] sm:$0xff]  ;;  %v6554_v9 = vpop.permute.xlu1 %3650 }
 0x28c   : > { %v6519_v11 = vpop.f32.mrf.mxu0  ;;  %v4732_v20 = vpop.f32.mrf.mxu1  ;;  %v2904_v10 = vadd.f32 %v6389_v12, %v6791_v25  ;;  %v2896_v31 = vadd.f32 %v6363_v6, %v6792_v37  ;;  %v6793_v12 = vld [vmem:[#allocation24_spill] sm:$0xff] }
 0x28d   : > { %v4612_v30 = vpack.c.bf16 %v3771_v36, %v3771_v36  ;;  %v3774_v59 = vmul.f32 %v6415_v4, %v3326_v23  ;;  %v3324_v44 = vmax.f32 %v3156_v55, 0.0  ;;  %4094 = vst.msk [vmem:[%s6333_s24 + $0x78] sm:$0xf] %vm4063_vm1, %v4614_v2  ;;  %v3177_v0 = vadd.f32 %v4732_v20, %v2888_v15 }
 0x28e   : > { %v2945_v60 = vpop.f32.mrf.mxu0  ;;  %v3168_v58 = vpop.f32.mrf.mxu1  ;;  %v2907_v15 = vadd.f32 %v6401_v39, %v6793_v12 }
 0x28f   : > { %4092 = vst.msk [vmem:[%s6333_s24 + $0x70] sm:$0xf] %vm4063_vm1, %v4612_v30  ;;  %v4615_v57 = vpack.c.bf16 %v3774_v59, %v3774_v59  ;;  %v3772_v22 = vmul.f32 %v6395_v18, %v3324_v44  ;;  %v3169_v14 = vadd.f32 %v3168_v58, %v6316_v41  ;;  %v3329_v45 = vmax.f32 %v3177_v0, 0.0  ;;  %v6563_v44 = vpop.permute.xlu0 %3655  ;;  %v6794_v0 = vld [vmem:[#allocation22_spill] sm:$0xff] }
 0x290   : > { %v6532_v63 = vpop.f32.mrf.mxu0  ;;  %v4733_v4 = vpop.f32.mrf.mxu1  ;;  %v2899_v60 = vadd.f32 %v6375_v51, %v6794_v0 }
 0x291   : > { %4095 = vst.msk [vmem:[%s6333_s24 + $0x7c] sm:$0xf] %vm4063_vm1, %v4615_v57  ;;  %v4613_v46 = vpack.c.bf16 %v3772_v22, %v3772_v22  ;;  %v3327_v24 = vmax.f32 %v3169_v14, 0.0  ;;  %v3180_v53 = vadd.f32 %v4733_v4, %v2891_v19  ;;  %v3777_v56 = vmul.f32 %v6441_v34, %v3329_v45  ;;  %v6795_v4 = vld [vmem:[#allocation27_spill] sm:$0xff] }
 0x292   : > { %v2948_v3 = vpop.f32.mrf.mxu0  ;;  %v3171_v1 = vpop.f32.mrf.mxu1  ;;  %v2920_v51 = vadd.f32 %v6439_v13, %v6795_v4 }
 0x293   : > { %4093 = vst.msk [vmem:[%s6333_s24 + $0x74] sm:$0xf] %vm4063_vm1, %v4613_v46  ;;  %v3775_v41 = vmul.f32 %v6421_v32, %v3327_v24  ;;  %v3330_v18 = vmax.f32 %v3180_v53, 0.0  ;;  %v3172_v8 = vadd.f32 %v3171_v1, %v6327_v29  ;;  %v4618_v43 = vpack.c.bf16 %v3777_v56, %v3777_v56  ;;  %v6577_v56 = vpop.permute.xlu1 %3660  ;;  %v6584_v13 = vpop.permute.xlu0 %3665 }
 0x294   : > { %v6547_v28 = vpop.f32.mrf.mxu0  ;;  %v4736_v34 = vpop.f32.mrf.mxu1 }
 0x295   : > { %v4616_v36 = vpack.c.bf16 %v3775_v41, %v3775_v41  ;;  %v3778_v23 = vmul.f32 %v6453_v35, %v3330_v18  ;;  %v3328_v17 = vmax.f32 %v3172_v8, 0.0  ;;  %4098 = vst.msk [vmem:[%s6333_s24 + $0x88] sm:$0xf] %vm4063_vm1, %v4618_v43  ;;  %v3193_v32 = vadd.f32 %v4736_v34, %v2904_v10  ;;  %v6797_v10 = vld [vmem:[#allocation28_spill] sm:$0xff] }
 0x296   : > { %v2953_v55 = vpop.f32.mrf.mxu0  ;;  %v3184_v29 = vpop.f32.mrf.mxu1  ;;  %v2923_v43 = vadd.f32 %v6451_v21, %v6797_v10 }
 0x297   : > { %4096 = vst.msk [vmem:[%s6333_s24 + $0x80] sm:$0xf] %vm4063_vm1, %v4616_v36  ;;  %v4619_v2 = vpack.c.bf16 %v3778_v23, %v3778_v23  ;;  %v3776_v6 = vmul.f32 %v6433_v33, %v3328_v17  ;;  %v3185_v20 = vadd.f32 %v3184_v29, %v2896_v31  ;;  %v3333_v35 = vmax.f32 %v3193_v32, 0.0  ;;  %v6798_v23 = vld [vmem:[#allocation26_spill] sm:$0xff] }
 0x298   : > { %v6561_v30 = vpop.f32.mrf.mxu0  ;;  %v4737_v59 = vpop.f32.mrf.mxu1  ;;  %v2915_v17 = vadd.f32 %v6427_v16, %v6798_v23  ;;  %v6799_v16 = vld [vmem:[#allocation31_spill] sm:$0xff] }
 0x299   : > { %4099 = vst.msk [vmem:[%s6333_s24 + $0x8c] sm:$0xf] %vm4063_vm1, %v4619_v2  ;;  %v4617_v58 = vpack.c.bf16 %v3776_v6, %v3776_v6  ;;  %v3331_v39 = vmax.f32 %v3185_v20, 0.0  ;;  %v3196_v49 = vadd.f32 %v4737_v59, %v2907_v15  ;;  %v3781_v19 = vmul.f32 %v6479_v7, %v3333_v35  ;;  %v6796_v7 = vld [vmem:[#allocation25_spill] sm:$0xff]  ;;  %v6598_v2 = vpop.permute.xlu1 %3670 }
 0x29a   : > { %v2956_v57 = vpop.f32.mrf.mxu0  ;;  %v3187_v33 = vpop.f32.mrf.mxu1  ;;  %v2912_v3 = vadd.f32 %v6413_v42, %v6796_v7  ;;  %v2936_v35 = vadd.f32 %v6491_v27, %v6799_v16  ;;  %v6802_v7 = vld [vmem:[#allocation30_spill] sm:$0xff] }
 0x29b   : > { %4097 = vst.msk [vmem:[%s6333_s24 + $0x84] sm:$0xf] %vm4063_vm1, %v4617_v58  ;;  %v3779_v22 = vmul.f32 %v6459_v62, %v3331_v39  ;;  %v3334_v14 = vmax.f32 %v3196_v49, 0.0  ;;  %v3188_v45 = vadd.f32 %v3187_v33, %v2899_v60  ;;  %v4622_v46 = vpack.c.bf16 %v3781_v19, %v3781_v19  ;;  %v6800_v58 = vld [vmem:[#allocation29_spill] sm:$0xff] }
 0x29c   : > { %v6575_v24 = vpop.f32.mrf.mxu0  ;;  %v4740_v53 = vpop.f32.mrf.mxu1  ;;  %v2928_v39 = vadd.f32 %v6465_v52, %v6800_v58 }
 0x29d   : > { %v4620_v1 = vpack.c.bf16 %v3779_v22, %v3779_v22  ;;  %v3782_v41 = vmul.f32 %v6493_v40, %v3334_v14  ;;  %v3332_v62 = vmax.f32 %v3188_v45, 0.0  ;;  %4102 = vst.msk [vmem:[%s6333_s24 + $0x98] sm:$0xf] %vm4063_vm1, %v4622_v46  ;;  %v3209_v18 = vadd.f32 %v4740_v53, %v2920_v51  ;;  %v6801_v14 = vld [vmem:[#allocation32_spill] sm:$0xff]  ;;  %v3681_v53 = vpop.permute.xlu1 %3680 }
 0x29e   : > { %v2961_v8 = vpop.f32.mrf.mxu0  ;;  %v3200_v25 = vpop.f32.mrf.mxu1  ;;  %v2939_v27 = vadd.f32 %v6506_v38, %v6801_v14 }
 0x29f   : > { %4100 = vst.msk [vmem:[%s6333_s24 + $0x90] sm:$0xf] %vm4063_vm1, %v4620_v1  ;;  %v4623_v34 = vpack.c.bf16 %v3782_v41, %v3782_v41  ;;  %v3780_v42 = vmul.f32 %v6471_v26, %v3332_v62  ;;  %v3201_v37 = vadd.f32 %v3200_v25, %v2912_v3  ;;  %v3337_v40 = vmax.f32 %v3209_v18, 0.0 }
 0x2a0   : > { %v6591_v31 = vpop.f32.mrf.mxu0  ;;  %v4741_v36 = vpop.f32.mrf.mxu1  ;;  %v2931_v3 = vadd.f32 %v6477_v5, %v6802_v7  ;;  %v6803_v5 = vld [vmem:[#allocation35_spill] sm:$0xff] }
 0x2a1   : > { %4103 = vst.msk [vmem:[%s6333_s24 + $0x9c] sm:$0xf] %vm4063_vm1, %v4623_v34  ;;  %v4621_v32 = vpack.c.bf16 %v3780_v42, %v3780_v42  ;;  %v3335_v55 = vmax.f32 %v3201_v37, 0.0  ;;  %v3212_v29 = vadd.f32 %v4741_v36, %v2923_v43  ;;  %v3785_v21 = vmul.f32 %v6521_v48, %v3337_v40  ;;  %v3676_v48 = vpop.permute.xlu0 %3675 }
 0x2a2   : > { %v2964_v12 = vpop.f32.mrf.mxu0  ;;  %v3203_v15 = vpop.f32.mrf.mxu1  ;;  %v2952_v34 = vadd.f32 %v6547_v28, %v6803_v5  ;;  %v6805_v28 = vld [vmem:[#allocation36_spill] sm:$0xff] }
 0x2a3   : > { %4101 = vst.msk [vmem:[%s6333_s24 + $0x94] sm:$0xf] %vm4063_vm1, %v4621_v32  ;;  %v3783_v26 = vmul.f32 %v6498_v50, %v3335_v55  ;;  %v3338_v6 = vmax.f32 %v3212_v29, 0.0  ;;  %v3204_v20 = vadd.f32 %v3203_v15, %v2915_v17  ;;  %v4626_v59 = vpack.c.bf16 %v3785_v21, %v3785_v21  ;;  %v6638_v21 = vpop.permute.xlu1 %3690 }
 0x2a4   : > { %v6605_v0 = vpop.f32.mrf.mxu0  ;;  %v4744_v60 = vpop.f32.mrf.mxu1  ;;  %v2955_v12 = vadd.f32 %v6561_v30, %v6805_v28  ;;  %v6812_v28 = vld [vmem:[#allocation10_spill] sm:$0xff] }
 0x2a5   : > { %v4624_v49 = vpack.c.bf16 %v3783_v26, %v3783_v26  ;;  %v3786_v19 = vmul.f32 %v6534_v47, %v3338_v6  ;;  %v3336_v57 = vmax.f32 %v3204_v20, 0.0  ;;  %4106 = vst.msk [vmem:[%s6333_s24 + $0xa8] sm:$0xf] %vm4063_vm1, %v4626_v59  ;;  %v3225_v50 = vadd.f32 %v4744_v60, %v2936_v35  ;;  %v6806_v35 = vld [vmem:[#allocation34_spill] sm:$0xff] }
 0x2a6   : > { %v2969_v33 = vpop.f32.mrf.mxu0  ;;  %v3216_v22 = vpop.f32.mrf.mxu1  ;;  %v2947_v59 = vadd.f32 %v6532_v63, %v6806_v35 }
 0x2a7   : > { %4104 = vst.msk [vmem:[%s6333_s24 + $0xa0] sm:$0xf] %vm4063_vm1, %v4624_v49  ;;  %v4627_v45 = vpack.c.bf16 %v3786_v19, %v3786_v19  ;;  %v3784_v4 = vmul.f32 %v6511_v61, %v3336_v57  ;;  %v3217_v52 = vadd.f32 %v3216_v22, %v2928_v39  ;;  %v3341_v51 = vmax.f32 %v3225_v50, 0.0  ;;  %v6624_v61 = vpop.permute.xlu0 %3685  ;;  %v6807_v33 = vld [vmem:[#allocation39_spill] sm:$0xff] }
 0x2a8   : > { %v6617_v46 = vpop.f32.mrf.mxu0  ;;  %v4745_v47 = vpop.f32.mrf.mxu1  ;;  %v2968_v22 = vadd.f32 %v6605_v0, %v6807_v33 }
 0x2a9   : > { %4107 = vst.msk [vmem:[%s6333_s24 + $0xac] sm:$0xf] %vm4063_vm1, %v4627_v45  ;;  %v4625_v1 = vpack.c.bf16 %v3784_v4, %v3784_v4  ;;  %v3339_v41 = vmax.f32 %v3217_v52, 0.0  ;;  %v3228_v38 = vadd.f32 %v4745_v47, %v2939_v27  ;;  %v3789_v62 = vmul.f32 %v6563_v44, %v3341_v51  ;;  %v6804_v44 = vld [vmem:[#allocation33_spill] sm:$0xff]  ;;  %v3701_v45 = vpop.permute.xlu1 %3700 }
 0x2aa   : > { %v2972_v18 = vpop.f32.mrf.mxu0  ;;  %v3219_v8 = vpop.f32.mrf.mxu1  ;;  %v2944_v36 = vadd.f32 %v6519_v11, %v6804_v44  ;;  %v6808_v4 = vld [vmem:[#allocation37_spill] sm:$0xff] }
 0x2ab   : > { %4105 = vst.msk [vmem:[%s6333_s24 + $0xa4] sm:$0xf] %vm4063_vm1, %v4625_v1  ;;  %v3787_v25 = vmul.f32 %v6539_v54, %v3339_v41  ;;  %v3342_v10 = vmax.f32 %v3228_v38, 0.0  ;;  %v3220_v43 = vadd.f32 %v3219_v8, %v2931_v3  ;;  %v4630_v42 = vpack.c.bf16 %v3789_v62, %v3789_v62  ;;  %v3696_v16 = vpop.permute.xlu0 %3695  ;;  %v6809_v41 = vld [vmem:[#allocation40_spill] sm:$0xff] }
 0x2ac   : > { %v6631_v37 = vpop.f32.mrf.mxu0  ;;  %v4748_v40 = vpop.f32.mrf.mxu1  ;;  %v2971_v0 = vadd.f32 %v6617_v46, %v6809_v41  ;;  %v6816_v41 = vld [vmem:[#allocation15_spill] sm:$0xff] }
 0x2ad   : > { %v4628_v23 = vpack.c.bf16 %v3787_v25, %v3787_v25  ;;  %v3790_v17 = vmul.f32 %v6577_v56, %v3342_v10  ;;  %v3340_v32 = vmax.f32 %v3220_v43, 0.0  ;;  %4110 = vst.msk [vmem:[%s6333_s24 + $0xb8] sm:$0xf] %vm4063_vm1, %v4630_v42  ;;  %v3241_v54 = vadd.f32 %v4748_v40, %v2952_v34  ;;  %v6810_v25 = vld [vmem:[#allocation38_spill] sm:$0xff]  ;;  %v3711_v44 = vpop.permute.xlu1 %3710 }
 0x2ae   : > { %v2977_v55 = vpop.f32.mrf.mxu0  ;;  %v3232_v29 = vpop.f32.mrf.mxu1  ;;  %v2963_v10 = vadd.f32 %v6591_v31, %v6810_v25  ;;  %v6817_v25 = vld [vmem:[#allocation5_spill] sm:$0xff] }
 0x2af   : > { %4108 = vst.msk [vmem:[%s6333_s24 + $0xb0] sm:$0xf] %vm4063_vm1, %v4628_v23  ;;  %v4631_v15 = vpack.c.bf16 %v3790_v17, %v3790_v17  ;;  %v3788_v11 = vmul.f32 %v6554_v9, %v3340_v32  ;;  %v3233_v26 = vadd.f32 %v3232_v29, %v2944_v36  ;;  %v3345_v56 = vmax.f32 %v3241_v54, 0.0  ;;  %v3706_v1 = vpop.permute.xlu0 %3705  ;;  %v6811_v17 = vld [vmem:[#allocation3_spill] sm:$0xff] }
 0x2b0   : > { %v6645_v6 = vpop.f32.mrf.mxu0  ;;  %v4749_v20 = vpop.f32.mrf.mxu1 }
 0x2b1   : > { %4111 = vst.msk [vmem:[%s6333_s24 + $0xbc] sm:$0xf] %vm4063_vm1, %v4631_v15  ;;  %v4629_v60 = vpack.c.bf16 %v3788_v11, %v3788_v11  ;;  %v3343_v58 = vmax.f32 %v3233_v26, 0.0  ;;  %v3244_v30 = vadd.f32 %v4749_v20, %v2955_v12  ;;  %v3793_v39 = vmul.f32 %v3676_v48, %v3345_v56 }
 0x2b2   : > { %v2980_v49 = vpop.f32.mrf.mxu0  ;;  %v3235_v19 = vpop.f32.mrf.mxu1  ;;  %v2960_v48 = vadd.f32 %v6575_v24, %v6808_v4  ;;  %v2976_v12 = vadd.f32 %v6631_v37, %v6812_v28 }
 0x2b3   : > { %4109 = vst.msk [vmem:[%s6333_s24 + $0xb4] sm:$0xf] %vm4063_vm1, %v4629_v60  ;;  %v3791_v9 = vmul.f32 %v6584_v13, %v3343_v58  ;;  %v3346_v57 = vmax.f32 %v3244_v30, 0.0  ;;  %v3236_v50 = vadd.f32 %v3235_v19, %v2947_v59  ;;  %v4634_v63 = vpack.c.bf16 %v3793_v39, %v3793_v39  ;;  %v3716_v29 = vpop.permute.xlu0 %3715  ;;  %v3721_v49 = vpop.permute.xlu1 %3720  ;;  %v6814_v19 = vld [vmem:[#allocation2_spill] sm:$0xff] }
 0x2b4   : > { %v2983_v14 = vpop.f32.mrf.mxu0  ;;  %v4752_v27 = vpop.f32.mrf.mxu1 }
 0x2b5   : > { %v4632_v52 = vpack.c.bf16 %v3791_v9, %v3791_v9  ;;  %v3794_v51 = vmul.f32 %v3681_v53, %v3346_v57  ;;  %v3344_v47 = vmax.f32 %v3236_v50, 0.0  ;;  %4114 = vst.msk [vmem:[%s6333_s24 + $0xc8] sm:$0xf] %vm4063_vm1, %v4634_v63  ;;  %v3257_v13 = vadd.f32 %v4752_v27, %v2968_v22 }
 0x2b6   : > { %v2985_v7 = vpop.f32.mrf.mxu0  ;;  %v3248_v3 = vpop.f32.mrf.mxu1  ;;  %v2984_v32 = vadd.f32 %v2983_v14, %v6811_v17  ;;  %v2979_v9 = vadd.f32 %v6645_v6, %v6814_v19 }
 0x2b7   : > { %4112 = vst.msk [vmem:[%s6333_s24 + $0xc0] sm:$0xf] %vm4063_vm1, %v4632_v52  ;;  %v4635_v38 = vpack.c.bf16 %v3794_v51, %v3794_v51  ;;  %v3792_v62 = vmul.f32 %v6598_v2, %v3344_v47  ;;  %v3249_v24 = vadd.f32 %v3248_v3, %v2960_v48  ;;  %v3349_v18 = vmax.f32 %v3257_v13, 0.0  ;;  %v3726_v27 = vpop.permute.xlu0 %3725  ;;  %v6815_v48 = vld [vmem:[#allocation4_spill] sm:$0xff] }
 0x2b8   : > { %v2986_v53 = vpop.f32.mrf.mxu0  ;;  %v4753_v8 = vpop.f32.mrf.mxu1 }
 0x2b9   : > { %4115 = vst.msk [vmem:[%s6333_s24 + $0xcc] sm:$0xf] %vm4063_vm1, %v4635_v38  ;;  %v4633_v43 = vpack.c.bf16 %v3792_v62, %v3792_v62  ;;  %v3347_v5 = vmax.f32 %v3249_v24, 0.0  ;;  %v3260_v34 = vadd.f32 %v4753_v8, %v2971_v0  ;;  %v3797_v42 = vmul.f32 %v3696_v16, %v3349_v18  ;;  %v6813_v16 = vld [vmem:[#allocation12_spill] sm:$0xff]  ;;  %v3731_v24 = vpop.permute.xlu1 %3730 }
 0x2ba   : > { %v2988_v46 = vpop.f32.mrf.mxu0  ;;  %v3251_v40 = vpop.f32.mrf.mxu1  ;;  %v2987_v35 = vadd.f32 %v2986_v53, %v6813_v16 }
 0x2bb   : > { %4113 = vst.msk [vmem:[%s6333_s24 + $0xc4] sm:$0xf] %vm4063_vm1, %v4633_v43  ;;  %v3795_v2 = vmul.f32 %v6624_v61, %v3347_v5  ;;  %v3350_v36 = vmax.f32 %v3260_v34, 0.0  ;;  %v3252_v23 = vadd.f32 %v3251_v40, %v2963_v10  ;;  %v4638_v31 = vpack.c.bf16 %v3797_v42, %v3797_v42  ;;  %v3736_v34 = vpop.permute.xlu0 %3735 }
 0x2bc   : > { %v2991_v54 = vpop.f32.mrf.mxu0  ;;  %v4756_v55 = vpop.f32.mrf.mxu1 }
 0x2bd   : > { %v4636_v15 = vpack.c.bf16 %v3795_v2, %v3795_v2  ;;  %v3798_v11 = vmul.f32 %v3701_v45, %v3350_v36  ;;  %v3348_v26 = vmax.f32 %v3252_v23, 0.0  ;;  %4118 = vst.msk [vmem:[%s6333_s24 + $0xd8] sm:$0xf] %vm4063_vm1, %v4638_v31  ;;  %v3273_v56 = vadd.f32 %v4756_v55, %v2984_v32  ;;  %v6818_v2 = vld [vmem:[#allocation16_spill] sm:$0xff] }
 0x2be   : > { %v2993_v61 = vpop.f32.mrf.mxu0  ;;  %v3264_v20 = vpop.f32.mrf.mxu1  ;;  %v2992_v52 = vadd.f32 %v2991_v54, %v6815_v48 }
 0x2bf   : > { %4116 = vst.msk [vmem:[%s6333_s24 + $0xd0] sm:$0xf] %vm4063_vm1, %v4636_v15  ;;  %v4639_v59 = vpack.c.bf16 %v3798_v11, %v3798_v11  ;;  %v3796_v60 = vmul.f32 %v6638_v21, %v3348_v26  ;;  %v3265_v58 = vadd.f32 %v3264_v20, %v2976_v12  ;;  %v3353_v30 = vmax.f32 %v3273_v56, 0.0  ;;  %v3741_v15 = vpop.permute.xlu1 %3740 }
 0x2c0   : > { %v2994_v37 = vpop.f32.mrf.mxu0  ;;  %v4757_v39 = vpop.f32.mrf.mxu1 }
 0x2c1   : > { %4119 = vst.msk [vmem:[%s6333_s24 + $0xdc] sm:$0xf] %vm4063_vm1, %v4639_v59  ;;  %v4637_v57 = vpack.c.bf16 %v3796_v60, %v3796_v60  ;;  %v3351_v50 = vmax.f32 %v3265_v58, 0.0  ;;  %v3276_v33 = vadd.f32 %v4757_v39, %v2987_v35  ;;  %v3801_v22 = vmul.f32 %v3716_v29, %v3353_v30 }
 0x2c2   : > { %v2996_v63 = vpop.f32.mrf.mxu0  ;;  %v3267_v14 = vpop.f32.mrf.mxu1  ;;  %v2995_v10 = vadd.f32 %v2994_v37, %v6817_v25 }
 0x2c3   : > { %4117 = vst.msk [vmem:[%s6333_s24 + $0xd4] sm:$0xf] %vm4063_vm1, %v4637_v57  ;;  %v3799_v21 = vmul.f32 %v3706_v1, %v3351_v50  ;;  %v3354_v45 = vmax.f32 %v3276_v33, 0.0  ;;  %v3268_v4 = vadd.f32 %v3267_v14, %v2979_v9  ;;  %v4642_v51 = vpack.c.bf16 %v3801_v22, %v3801_v22 }
 0x2c4   : > { %v2999_v6 = vpop.f32.mrf.mxu0  ;;  %v4760_v47 = vpop.f32.mrf.mxu1 }
 0x2c5   : > { %v4640_v13 = vpack.c.bf16 %v3799_v21, %v3799_v21  ;;  %v3802_v7 = vmul.f32 %v3721_v49, %v3354_v45  ;;  %v3352_v3 = vmax.f32 %v3268_v4, 0.0  ;;  %v3000_v0 = vadd.f32 %v2999_v6, %v6816_v41  ;;  %4122 = vst.msk [vmem:[%s6333_s24 + $0xe8] sm:$0xf] %vm4063_vm1, %v4642_v51 }
 0x2c6   : > { %v3001_v38 = vpop.f32.mrf.mxu0  ;;  %v3280_v62 = vpop.f32.mrf.mxu1 }
 0x2c7   : > { %4120 = vst.msk [vmem:[%s6333_s24 + $0xe0] sm:$0xf] %vm4063_vm1, %v4640_v13  ;;  %v4643_v1 = vpack.c.bf16 %v3802_v7, %v3802_v7  ;;  %v3800_v18 = vmul.f32 %v3711_v44, %v3352_v3  ;;  %v3289_v53 = vadd.f32 %v4760_v47, %v3000_v0  ;;  %v3281_v8 = vadd.f32 %v3280_v62, %v2992_v52 }
 0x2c8   : > { %v3002_v43 = vpop.f32.mrf.mxu0  ;;  %v4761_v5 = vpop.f32.mrf.mxu1 }
 0x2c9   : > { %4123 = vst.msk [vmem:[%s6333_s24 + $0xec] sm:$0xf] %vm4063_vm1, %v4643_v1  ;;  %v4641_v42 = vpack.c.bf16 %v3800_v18, %v3800_v18  ;;  %v3357_v46 = vmax.f32 %v3289_v53, 0.0  ;;  %v3355_v40 = vmax.f32 %v3281_v8, 0.0  ;;  %v3003_v36 = vadd.f32 %v3002_v43, %v6818_v2 }
 0x2ca   : > { %v3004_v23 = vpop.f32.mrf.mxu0  ;;  %v3283_v17 = vpop.f32.mrf.mxu1 }
 0x2cb   : > { %4121 = vst.msk [vmem:[%s6333_s24 + $0xe4] sm:$0xf] %vm4063_vm1, %v4641_v42  ;;  %v3805_v44 = vmul.f32 %v3736_v34, %v3357_v46  ;;  %v3803_v32 = vmul.f32 %v3726_v27, %v3355_v40  ;;  %v3292_v31 = vadd.f32 %v4761_v5, %v3003_v36  ;;  %v3284_v54 = vadd.f32 %v3283_v17, %v2995_v10 }
 0x2cd   : > { %v4646_v55 = vpack.c.bf16 %v3805_v44, %v3805_v44  ;;  %v4644_v29 = vpack.c.bf16 %v3803_v32, %v3803_v32  ;;  %v3358_v28 = vmax.f32 %v3292_v31, 0.0  ;;  %v3356_v12 = vmax.f32 %v3284_v54, 0.0 }
 0x2cf   : > { %4126 = vst.msk [vmem:[%s6333_s24 + $0xf8] sm:$0xf] %vm4063_vm1, %v4646_v55  ;;  %4124 = vst.msk [vmem:[%s6333_s24 + $0xf0] sm:$0xf] %vm4063_vm1, %v4644_v29  ;;  %v3806_v11 = vmul.f32 %v3741_v15, %v3358_v28  ;;  %v3804_v26 = vmul.f32 %v3731_v24, %v3356_v12 }
 0x2d1   : > { %v4647_v56 = vpack.c.bf16 %v3806_v11, %v3806_v11  ;;  %v4645_v61 = vpack.c.bf16 %v3804_v26, %v3804_v26 }
 0x2d3   : > { %4127 = vst.msk [vmem:[%s6333_s24 + $0xfc] sm:$0xf] %vm4063_vm1, %v4647_v56  ;;  %4125 = vst.msk [vmem:[%s6333_s24 + $0xf4] sm:$0xf] %vm4063_vm1, %v4645_v61 }
 0x2d4 PF: > { %s14_s15 = sadd.s32 1, %s5187_s15  }
 0x2d5   : > { %p11_p4 = scmp.ge.s32.totalorder %s14_s15, 4  }
 0x2d7   :  { %13 = sbr.rel (!%p11_p4) target bundleno = 1 (0x1), region = 69 }

// kernel: _forward_jit.17
= control target key start
LH: loop header
LB: loop body
LE: loop exit
PB: predicated region body
PF: predicated region fallthrough
CT: control target
= control target key end

     0   :  { %s2278_s15 = smov 0   ;;  %s2792_s0 = inlined_call_operand.vmem [shape: bf16[256,864], index: 0, kind: input, shape index: {}]   ;;  %s2793_s1 = inlined_call_operand.vmem [shape: bf16[864,64], index: 1, kind: input, shape index: {}]   ;;  %s2794_s2 = inlined_call_operand.vmem [shape: f32[1,64], index: 2, kind: input, shape index: {}]   ;;  %s2795_s3 = inlined_call_operand.vmem [shape: f32[256,1], index: 3, kind: input, shape index: {}]   ;;  %s2796_s4 = inlined_call_operand.vmem [shape: bf16[256,64], index: 4, kind: output, shape index: {}]  }
   0x1 LB: > { %s1700_s16 = sadd.s32 4294967295, %s2250_s15   ;;  %p1704_p0 = scmp.ge.s32.totalorder %s2250_s15, 1  ;;  %s2250_s15 = sphi %s2278_s15, %s14_s15  }
   0x2   : > { %p175_p1 = scmp.lt.s32.totalorder %s2250_s15, 3 }
   0x4   : > { %p176_p2 = pnand %p1704_p0, %p175_p1 }
   0x6   : > { %179 = sbr.rel (%p176_p2) target bundleno = 376 (0x178), region = 36 }
   0xb   : > { %v2110_v0 = vld [vmem:[%s2793_s1 + $0x78] sm:$0xff]   ;;  %v2114_v4 = vld [vmem:[%s2793_s1 + $0x70] sm:$0xff]   ;;  %v2118_v8 = vld [vmem:[%s2793_s1 + $0x68] sm:$0xff]   ;;  %s1705_s21 = sshll.u32 %s1700_s16, 4  ;;  %v2252_v29 = vmov 0   ;;  %vm1010_vm0 = vcmask 785408  }
   0xc   : > { %v2111_v1 = vld [vmem:[%s2793_s1 + $0x38] sm:$0xff]   ;;  %1864 = vmatprep.subr.bf16.mxu0 %v2110_v0  ;;  %v2115_v5 = vld [vmem:[%s2793_s1 + $0x30] sm:$0xff]   ;;  %v2119_v9 = vld [vmem:[%s2793_s1 + $0x28] sm:$0xff]   ;;  %p208_p3 = scmp.lt.s32.totalorder %s1705_s21, 31  ;;  %2108 = vset.pattern.permute.xlu0 %v2252_v29  ;;  %vm1615_vm1 = vcmask 519168  }
   0xd   : > { %v2112_v2 = vld [vmem:[%s2793_s1 + $0xf8] sm:$0xff]   ;;  %1865 = vmatpush3.bf16.msra.mxu0 %v2111_v1  ;;  %v2116_v6 = vld [vmem:[%s2793_s1 + $0xf0] sm:$0xff]   ;;  %v2120_v10 = vld [vmem:[%s2793_s1 + $0xe8] sm:$0xff]   ;;  %2109 = vset.pattern.permute.xlu1 %v2252_v29 }
   0xe   : > { %v2113_v3 = vld [vmem:[%s2793_s1 + $0xb8] sm:$0xff]   ;;  %1928 = vmatprep.subr.bf16.mxu1 %v2112_v2  ;;  %1866 = vmatprep.subr.bf16.mxu0 %v2114_v4  ;;  %v2117_v7 = vld [vmem:[%s2793_s1 + $0xb0] sm:$0xff]   ;;  %v2121_v11 = vld [vmem:[%s2793_s1 + $0xa8] sm:$0xff]   ;;  %s2824_s21 = smov (!%p208_p3, %s1705_s21), 31 }
   0xf   : > { %1929 = vmatpush3.bf16.msra.mxu1 %v2113_v3  ;;  %v2122_v12 = vld [vmem:[%s2793_s1 + $0x60] sm:$0xff]   ;;  %v2126_v16 = vld [vmem:[%s2793_s1 + $0x58] sm:$0xff]   ;;  %v2130_v20 = vld [vmem:[%s2793_s1 + $0x50] sm:$0xff]   ;;  %s2098_s19 = smul.u32 28, %s2824_s21  ;;  %s1708_s9 = sshll.u32 %s2824_s21, 3 }
  0x10   : > { %1930 = vmatprep.subr.bf16.mxu1 %v2116_v6  ;;  %v2123_v13 = vld [vmem:[%s2793_s1 + $0x20] sm:$0xff]   ;;  %v2127_v17 = vld [vmem:[%s2793_s1 + $0x18] sm:$0xff]   ;;  %v2131_v21 = vld [vmem:[%s2793_s1 + $0x10] sm:$0xff]   ;;  %s2496_s12 = scalar_lea.vmem %s2795_s3, %s1708_s9  ;;  %s1710_s14 = sshll.u32 %s2824_s21, 2 }
  0x11   : > { %1867 = vmatpush3.bf16.msra.mxu0 %v2115_v5  ;;  %v2124_v14 = vld [vmem:[%s2793_s1 + $0xe0] sm:$0xff]   ;;  %v2128_v18 = vld [vmem:[%s2793_s1 + $0xd8] sm:$0xff]   ;;  %v2132_v22 = vld [vmem:[%s2793_s1 + $0xd0] sm:$0xff]   ;;  %s2381_s30 = scalar_lea.vmem %s2792_s0, %s2098_s19  ;;  %s2688_s21 = scalar_lea.vmem %s2796_s4, %s1710_s14 }
  0x12   : > { %1868 = vmatprep.subr.bf16.mxu0 %v2118_v8  ;;  %v2125_v15 = vld [vmem:[%s2793_s1 + $0xa0] sm:$0xff]   ;;  %v2129_v19 = vld [vmem:[%s2793_s1 + $0x98] sm:$0xff]   ;;  %v2133_v23 = vld [vmem:[%s2793_s1 + $0x90] sm:$0xff]  }
  0x13   : > { %1931 = vmatpush3.bf16.msra.mxu1 %v2117_v7  ;;  %v2134_v24 = vld [vmem:[%s2793_s1 + $0x48] sm:$0xff]   ;;  %v2138_v28 = vld [vmem:[%s2793_s1 + $0x40] sm:$0xff]   ;;  %v2145_v35 = vld [vmem:[%s2793_s1 + $0x178] sm:$0xff]  }
  0x14   : > { %1932 = vmatprep.subr.bf16.mxu1 %v2120_v10  ;;  %v2135_v25 = vld [vmem:[%s2793_s1 + $0x8] sm:$0xff]   ;;  %v2139_v30 = vld [vmem:[%s2793_s1] sm:$0xff]   ;;  %v2149_v38 = vld [vmem:[%s2793_s1 + $0x138] sm:$0xff]  }
  0x15   : > { %1869 = vmatpush3.bf16.msra.mxu0 %v2119_v9  ;;  %v2136_v26 = vld [vmem:[%s2793_s1 + $0xc8] sm:$0xff]   ;;  %v2140_v31 = vld [vmem:[%s2793_s1 + $0xc0] sm:$0xff]   ;;  %v2150_v39 = vld [vmem:[%s2381_s30 + $0x3c] ss:$28 sps:$4 sm:$0xff]  }
  0x16   : > { %1870 = vmatprep.subr.bf16.mxu0 %v2122_v12  ;;  %v2137_v27 = vld [vmem:[%s2793_s1 + $0x88] sm:$0xff]   ;;  %v2141_v32 = vld [vmem:[%s2381_s30] ss:$28 sps:$4 sm:$0xff]   ;;  %v2152_v40 = vld [vmem:[%s2381_s30 + $0x38] ss:$28 sps:$4 sm:$0xff]  }
  0x17   : > { %1933 = vmatpush3.bf16.msra.mxu1 %v2121_v11  ;;  %v2143_v33 = vld [vmem:[%s2381_s30 + $0x4] ss:$28 sps:$4 sm:$0xff]   ;;  %v2148_v37 = vld [vmem:[%s2381_s30 + $0xc] ss:$28 sps:$4 sm:$0xff]   ;;  %v2153_v41 = vld [vmem:[%s2793_s1 + $0x170] sm:$0xff]  }
  0x18   : > { %1934 = vmatprep.subr.bf16.mxu1 %v2124_v14  ;;  %v2144_v34 = vld [vmem:[%s2793_s1 + $0x80] sm:$0xff]   ;;  %1067 = vmatprep.mubr.bf16.mxu0 %v2143_v33  ;;  %v2156_v43 = vld [vmem:[%s2793_s1 + $0x130] sm:$0xff]   ;;  %v2161_v46 = vld [vmem:[%s2793_s1 + $0x168] sm:$0xff]  }
  0x19   : > { %1871 = vmatpush3.bf16.msra.mxu0 %v2123_v13  ;;  %v2146_v36 = vld [vmem:[%s2381_s30 + $0x8] ss:$28 sps:$4 sm:$0xff]   ;;  %1164 = vmatprep.mubr.bf16.mxu1 %v2148_v37  ;;  %v2157_v44 = vld [vmem:[%s2381_s30 + $0x40] ss:$28 sps:$4 sm:$0xff]   ;;  %v2158_v45 = vld [vmem:[%s2381_s30 + $0x74] ss:$28 sps:$4 sm:$0xff]  }
  0x1a   : > { %1872 = vmatprep.subr.bf16.mxu0 %v2126_v16  ;;  %v2154_v42 = vld [vmem:[%s2381_s30 + $0x44] ss:$28 sps:$4 sm:$0xff]   ;;  %v2162_v47 = vld [vmem:[%s2381_s30 + $0x7c] ss:$28 sps:$4 sm:$0xff]   ;;  %v2164_v48 = vld [vmem:[%s2793_s1 + $0x128] sm:$0xff]  }
  0x1b   : > { %1935 = vmatpush3.bf16.msra.mxu1 %v2125_v15  ;;  %v2160_v49 = vld [vmem:[%s2381_s30 + $0x70] ss:$28 sps:$4 sm:$0xff]   ;;  %v2169_v51 = vld [vmem:[%s2793_s1 + $0x160] sm:$0xff]   ;;  %v2165_v52 = vld [vmem:[%s2381_s30 + $0x78] ss:$28 sps:$4 sm:$0xff]  }
  0x1c   : > { %1936 = vmatprep.subr.bf16.mxu1 %v2128_v18  ;;  %v2166_v50 = vld [vmem:[%s2381_s30 + $0xac] ss:$28 sps:$4 sm:$0xff]   ;;  %v2172_v53 = vld [vmem:[%s2793_s1 + $0x120] sm:$0xff]   ;;  %v2170_v54 = vld [vmem:[%s2381_s30 + $0xb4] ss:$28 sps:$4 sm:$0xff]  }
  0x1d   : > { %1873 = vmatpush3.bf16.msra.mxu0 %v2127_v17  ;;  %v2177_v55 = vld [vmem:[%s2793_s1 + $0x158] sm:$0xff]   ;;  %v2168_v56 = vld [vmem:[%s2381_s30 + $0xa8] ss:$28 sps:$4 sm:$0xff]   ;;  %v2173_v60 = vld [vmem:[%s2381_s30 + $0xb0] ss:$28 sps:$4 sm:$0xff]  }
  0x1e   : > { %1874 = vmatprep.subr.bf16.mxu0 %v2130_v20  ;;  %v2180_v57 = vld [vmem:[%s2793_s1 + $0x118] sm:$0xff]   ;;  %v2174_v58 = vld [vmem:[%s2381_s30 + $0xe4] ss:$28 sps:$4 sm:$0xff]   ;;  %v2182_v59 = vld [vmem:[%s2793_s1 + $0x1a8] sm:$0xff]  }
  0x1f   : > { %1937 = vmatpush3.bf16.msra.mxu1 %v2129_v19  ;;  %v2186_v61 = vld [vmem:[%s2793_s1 + $0x150] sm:$0xff]   ;;  %v2178_v62 = vld [vmem:[%s2381_s30 + $0xec] ss:$28 sps:$4 sm:$0xff]   ;;  %v2176_v0 = vld [vmem:[%s2381_s30 + $0xe0] ss:$28 sps:$4 sm:$0xff]  }
  0x20   : > { %1938 = vmatprep.subr.bf16.mxu1 %v2132_v22  ;;  %v2189_v63 = vld [vmem:[%s2793_s1 + $0x110] sm:$0xff]   ;;  %v2193_v1 = vld [vmem:[%s2793_s1 + $0x1a0] sm:$0xff]   ;;  %v2183_v2 = vld [vmem:[%s2381_s30 + $0x11c] ss:$28 sps:$4 sm:$0xff]  }
  0x21   : > { %1875 = vmatpush3.bf16.msra.mxu0 %v2131_v21  ;;  %v2195_v3 = vld [vmem:[%s2793_s1 + $0x148] sm:$0xff]   ;;  %v2187_v5 = vld [vmem:[%s2381_s30 + $0x124] ss:$28 sps:$4 sm:$0xff]   ;;  %v2200_v7 = vld [vmem:[%s2793_s1 + $0x198] sm:$0xff]  }
  0x22   : > { %1876 = vmatprep.subr.bf16.mxu0 %v2134_v24  ;;  %v2181_v4 = vld [vmem:[%s2381_s30 + $0xe8] ss:$28 sps:$4 sm:$0xff]   ;;  %v2185_v8 = vld [vmem:[%s2381_s30 + $0x118] ss:$28 sps:$4 sm:$0xff]   ;;  %v2190_v13 = vld [vmem:[%s2381_s30 + $0x120] ss:$28 sps:$4 sm:$0xff]  }
  0x23   : > { %1939 = vmatpush3.bf16.msra.mxu1 %v2133_v23  ;;  %v2198_v6 = vld [vmem:[%s2793_s1 + $0x108] sm:$0xff]   ;;  %v2204_v9 = vld [vmem:[%s2793_s1 + $0x140] sm:$0xff]   ;;  %v2205_v10 = vld [vmem:[%s2793_s1 + $0x190] sm:$0xff]  }
  0x24   : > { %1940 = vmatprep.subr.bf16.mxu1 %v2136_v26  ;;  %v2191_v11 = vld [vmem:[%s2381_s30 + $0x154] ss:$28 sps:$4 sm:$0xff]   ;;  %v2208_v12 = vld [vmem:[%s2793_s1 + $0x100] sm:$0xff]   ;;  %v2210_v14 = vld [vmem:[%s2793_s1 + $0x188] sm:$0xff]  }
  0x25   : > { %1877 = vmatpush3.bf16.msra.mxu0 %v2135_v25  ;;  %v2196_v15 = vld [vmem:[%s2381_s30 + $0x15c] ss:$28 sps:$4 sm:$0xff]   ;;  %v2214_v16 = vld [vmem:[%s2793_s1 + $0x180] sm:$0xff]   ;;  %v2194_v17 = vld [vmem:[%s2381_s30 + $0x150] ss:$28 sps:$4 sm:$0xff]  }
  0x26   : > { %1878 = vmatprep.subr.bf16.mxu0 %v2138_v28  ;;  %v2201_v18 = vld [vmem:[%s2381_s30 + $0x18c] ss:$28 sps:$4 sm:$0xff]   ;;  %v2199_v19 = vld [vmem:[%s2381_s30 + $0x158] ss:$28 sps:$4 sm:$0xff]   ;;  %v1439_v25 = vld [vmem:[%s2496_s12] sm:$0xff] }
  0x27   : > { %1941 = vmatpush3.bf16.msra.mxu1 %v2137_v27  ;;  %v2206_v20 = vld [vmem:[%s2381_s30 + $0x194] ss:$28 sps:$4 sm:$0xff]   ;;  %v2203_v21 = vld [vmem:[%s2381_s30 + $0x188] ss:$28 sps:$4 sm:$0xff]   ;;  %1457 = vperm.xlu0 %2108, %v1439_v25  }
  0x28   : > { %1942 = vmatprep.subr.bf16.mxu1 %v2140_v31  ;;  %v2213_v22 = vld [vmem:[%s2381_s30 + $0x14] ss:$28 sps:$4 sm:$0xff]   ;;  %v2217_v28 = vld [vmem:[%s2381_s30 + $0x4c] ss:$28 sps:$4 sm:$0xff]   ;;  %v1443_v33 = vld [vmem:[%s2496_s12 + $0x20] sm:$0xff] }
  0x29   : > { %1879 = vmatpush3.bf16.msra.mxu0 %v2139_v30  ;;  %v2209_v23 = vld [vmem:[%s2381_s30 + $0x190] ss:$28 sps:$4 sm:$0xff]   ;;  %v2215_v24 = vld [vmem:[%s2381_s30 + $0x18] ss:$28 sps:$4 sm:$0xff]  }
  0x2a   : > { %1992 = vmatprep.subr.bf16.mxu0 %v2145_v35  ;;  %v1441_v26 = vld [vmem:[%s2496_s12 + $0x10] sm:$0xff]  ;;  %v1440_v29 = vld [vmem:[%s2496_s12 + $0x8] sm:$0xff]  ;;  %v1442_v30 = vld [vmem:[%s2496_s12 + $0x18] sm:$0xff] }
  0x2b   : > { %1943 = vmatpush3.bf16.msra.mxu1 %v2144_v34  ;;  %v2211_v27 = vld [vmem:[%s2381_s30 + $0x10] ss:$28 sps:$4 sm:$0xff]   ;;  %1467 = vperm.xlu1 %2109, %v1441_v26   ;;  %v2219_v35 = vld [vmem:[%s2381_s30 + $0x48] ss:$28 sps:$4 sm:$0xff]  }
  0x2c   : > { %1068 = vmatmul.mubr.bf16.vlgmr.msra.gmra.mxu0 %v2141_v32  ;;  %2070 = vmatprep.subr.bf16.mxu1 %v2182_v59  ;;  %v2216_v31 = vld [vmem:[%s2381_s30 + $0x50] ss:$28 sps:$4 sm:$0xff]   ;;  %v2223_v32 = vld [vmem:[%s2381_s30 + $0x88] ss:$28 sps:$4 sm:$0xff]  }
  0x2d   : > { %1993 = vmatpush3.bf16.msra.mxu0 %v2149_v38  ;;  %1075 = vmatprep.mubr.bf16.mxu0 %v2150_v39  ;;  %v1444_v34 = vld [vmem:[%s2496_s12 + $0x28] sm:$0xff]  ;;  %v1445_v37 = vld [vmem:[%s2496_s12 + $0x30] sm:$0xff]  ;;  %v1446_v38 = vld [vmem:[%s2496_s12 + $0x38] sm:$0xff] }
  0x2e   : > { %1165 = vmatmul.mubr.bf16.vlgmr.msra.gmra.mxu1 %v2146_v36  ;;  %1994 = vmatprep.subr.bf16.mxu0 %v2153_v41  ;;  %v2220_v36 = vld [vmem:[%s2381_s30 + $0x84] ss:$28 sps:$4 sm:$0xff]  }
  0x2f   : > { %1172 = vmatprep.mubr.bf16.mxu1 %v2154_v42  ;;  %2071 = vmatpush3.bf16.msra.mxu1 %v2182_v59  ;;  %v2224_v39 = vld [vmem:[%s2381_s30 + $0xc0] ss:$28 sps:$4 sm:$0xff]   ;;  %v1448_v42 = vld [vmem:[%s2496_s12 + $0x48] sm:$0xff] }
  0x30   : > { %2072 = vmatprep.subr.bf16.mxu1 %v2193_v1  ;;  %1462 = vperm.xlu0 %2108, %v1440_v29   ;;  %v1447_v41 = vld [vmem:[%s2496_s12 + $0x40] sm:$0xff] }
  0x31   : > { %1995 = vmatpush3.bf16.msra.mxu0 %v2156_v43  ;;  %1472 = vperm.xlu1 %2109, %v1442_v30   ;;  %v2222_v43 = vld [vmem:[%s2381_s30 + $0x80] ss:$28 sps:$4 sm:$0xff]  }
  0x32   : > { %1996 = vmatprep.subr.bf16.mxu0 %v2161_v46  ;;  %v1450_v46 = vld [vmem:[%s2496_s12 + $0x58] sm:$0xff]  ;;  %v2236_v59 = vld [vmem:[%s2381_s30 + $0x164] ss:$28 sps:$4 sm:$0xff]  }
  0x33   : > { %2073 = vmatpush3.bf16.msra.mxu1 %v2193_v1 }
  0x34   : > { %1076 = vmatmul.mubr.bf16.gmra.mxu0 %v2152_v40  ;;  %2074 = vmatprep.subr.bf16.mxu1 %v2200_v7  ;;  %v2231_v40 = vld [vmem:[%s2381_s30 + $0xf8] ss:$28 sps:$4 sm:$0xff]  }
  0x35   : > { %1083 = vmatprep.mubr.bf16.mxu0 %v2158_v45  ;;  %1997 = vmatpush3.bf16.msra.mxu0 %v2164_v48  ;;  %v1449_v45 = vld [vmem:[%s2496_s12 + $0x50] sm:$0xff]  ;;  %v2239_v48 = vld [vmem:[%s2381_s30 + $0x168] ss:$28 sps:$4 sm:$0xff]  }
  0x36   : > { %1173 = vmatmul.mubr.bf16.gmra.mxu1 %v2157_v44  ;;  %1998 = vmatprep.subr.bf16.mxu0 %v2169_v51  ;;  %v2225_v44 = vld [vmem:[%s2381_s30 + $0xbc] ss:$28 sps:$4 sm:$0xff]  }
  0x37   : > { %1180 = vmatprep.mubr.bf16.mxu1 %v2162_v47  ;;  %2075 = vmatpush3.bf16.msra.mxu1 %v2200_v7  ;;  %v2232_v47 = vld [vmem:[%s2381_s30 + $0x130] ss:$28 sps:$4 sm:$0xff]   ;;  %v2227_v51 = vld [vmem:[%s2381_s30 + $0xb8] ss:$28 sps:$4 sm:$0xff]  }
  0x38   : > { %2076 = vmatprep.subr.bf16.mxu1 %v2205_v10  ;;  %1477 = vperm.xlu0 %2108, %v1443_v33  }
  0x39   : > { %1999 = vmatpush3.bf16.msra.mxu0 %v2172_v53  ;;  %1482 = vperm.xlu1 %2109, %v1444_v34   ;;  %v1453_v53 = vld [vmem:[%s2496_s12 + $0x70] sm:$0xff] }
  0x3a   : > { %2000 = vmatprep.subr.bf16.mxu0 %v2177_v55  ;;  %v2240_v55 = vld [vmem:[%s2381_s30 + $0x1a0] ss:$28 sps:$4 sm:$0xff]  }
  0x3b   : > { %2077 = vmatpush3.bf16.msra.mxu1 %v2205_v10 }
  0x3c   : > { %1084 = vmatmul.mubr.bf16.gmra.mxu0 %v2160_v49  ;;  %2078 = vmatprep.subr.bf16.mxu1 %v2210_v14  ;;  %v1451_v49 = vld [vmem:[%s2496_s12 + $0x60] sm:$0xff] }
  0x3d   : > { %1091 = vmatprep.mubr.bf16.mxu0 %v2166_v50  ;;  %2001 = vmatpush3.bf16.msra.mxu0 %v2180_v57  ;;  %v1452_v50 = vld [vmem:[%s2496_s12 + $0x68] sm:$0xff] }
  0x3e   : > { %1181 = vmatmul.mubr.bf16.gmra.mxu1 %v2165_v52  ;;  %2002 = vmatprep.subr.bf16.mxu0 %v2186_v61  ;;  %v2228_v52 = vld [vmem:[%s2381_s30 + $0xf4] ss:$28 sps:$4 sm:$0xff]   ;;  %v2233_v57 = vld [vmem:[%s2381_s30 + $0x12c] ss:$28 sps:$4 sm:$0xff]   ;;  %v2241_v61 = vld [vmem:[%s2381_s30 + $0x19c] ss:$28 sps:$4 sm:$0xff]  }
  0x3f   : > { %1188 = vmatprep.mubr.bf16.mxu1 %v2170_v54  ;;  %2079 = vmatpush3.bf16.msra.mxu1 %v2210_v14  ;;  %v1454_v54 = vld [vmem:[%s2496_s12 + $0x78] sm:$0xff] }
  0x40   : > { %2080 = vmatprep.subr.bf16.mxu1 %v2214_v16  ;;  %1487 = vperm.xlu0 %2108, %v1445_v37  }
  0x41   : > { %2003 = vmatpush3.bf16.msra.mxu0 %v2189_v63  ;;  %1492 = vperm.xlu1 %2109, %v1446_v38  }
  0x42   : > { %2004 = vmatprep.subr.bf16.mxu0 %v2195_v3 }
  0x43   : > { %2081 = vmatpush3.bf16.msra.mxu1 %v2214_v16 }
  0x44   : > { %1092 = vmatmul.mubr.bf16.gmra.mxu0 %v2168_v56  ;;  %1497 = vperm.xlu0 %2108, %v1447_v41   ;;  %v2230_v56 = vld [vmem:[%s2381_s30 + $0xf0] ss:$28 sps:$4 sm:$0xff]  }
  0x45   : > { %1099 = vmatprep.mubr.bf16.mxu0 %v2174_v58  ;;  %2005 = vmatpush3.bf16.msra.mxu0 %v2198_v6  ;;  %v2235_v58 = vld [vmem:[%s2381_s30 + $0x128] ss:$28 sps:$4 sm:$0xff]  }
  0x46   : > { %1189 = vmatmul.mubr.bf16.gmra.mxu1 %v2173_v60  ;;  %2006 = vmatprep.subr.bf16.mxu0 %v2204_v9  ;;  %v2238_v60 = vld [vmem:[%s2381_s30 + $0x160] ss:$28 sps:$4 sm:$0xff]  }
  0x47   : > { %1196 = vmatprep.mubr.bf16.mxu1 %v2178_v62  ;;  %1502 = vperm.xlu1 %2109, %v1448_v42   ;;  %v2243_v62 = vld [vmem:[%s2381_s30 + $0x198] ss:$28 sps:$4 sm:$0xff]  }
  0x48   : > { %1507 = vperm.xlu0 %2108, %v1449_v45  }
  0x49   : > { %2007 = vmatpush3.bf16.msra.mxu0 %v2208_v12 }
  0x4b   : > { %1512 = vperm.xlu1 %2109, %v1450_v46  }
  0x4c   : > { %1100 = vmatmul.mubr.bf16.gmra.mxu0 %v2176_v0  ;;  %1517 = vperm.xlu0 %2108, %v1451_v49  }
  0x4d   : > { %1107 = vmatprep.mubr.bf16.mxu0 %v2183_v2 }
  0x4e   : > { %1197 = vmatmul.mubr.bf16.gmra.mxu1 %v2181_v4 }
  0x4f   : > { %1204 = vmatprep.mubr.bf16.mxu1 %v2187_v5  ;;  %1522 = vperm.xlu1 %2109, %v1452_v50  }
  0x50   : > { %1527 = vperm.xlu0 %2108, %v1453_v53  }
  0x53   : > { %1532 = vperm.xlu1 %2109, %v1454_v54  }
  0x54   : > { %1108 = vmatmul.mubr.bf16.gmra.mxu0 %v2185_v8 }
  0x55   : > { %1115 = vmatprep.mubr.bf16.mxu0 %v2191_v11 }
  0x56   : > { %1205 = vmatmul.mubr.bf16.gmra.mxu1 %v2190_v13 }
  0x57   : > { %1212 = vmatprep.mubr.bf16.mxu1 %v2196_v15 }
  0x5c   : > { %1116 = vmatmul.mubr.bf16.gmra.mxu0 %v2194_v17 }
  0x5d   : > { %1123 = vmatprep.mubr.bf16.mxu0 %v2201_v18 }
  0x5e   : > { %1213 = vmatmul.mubr.bf16.gmra.mxu1 %v2199_v19 }
  0x5f   : > { %1220 = vmatprep.mubr.bf16.mxu1 %v2206_v20 }
  0x64   : > { %1124 = vmatmul.mubr.bf16.gmra.mxu0 %v2203_v21 }
  0x65   : > { %1261 = vmatprep.mubr.bf16.mxu0 %v2213_v22 }
  0x66   : > { %1221 = vmatmul.mubr.bf16.gmra.mxu1 %v2209_v23 }
  0x67   : > { %2082 = vmatprep.mubr.msk.bf16.mxu1 %vm1010_vm0, %v2215_v24 }
  0x6c   : > { %1262 = vmatmul.mubr.bf16.vlgmr.msra.gmra.mxu0 %v2211_v27 }
  0x6d   : > { %1269 = vmatprep.mubr.bf16.mxu0 %v2217_v28 }
  0x6e   : > { %2083 = vmatmul.mubr.msk.bf16.vlgmr.msra.gmra.mxu1 %vm1010_vm0, %v2216_v31 }
  0x6f   : > { %2086 = vmatprep.mubr.msk.bf16.mxu1 %vm1010_vm0, %v2223_v32 }
  0x74   : > { %1270 = vmatmul.mubr.bf16.gmra.mxu0 %v2219_v35 }
  0x75   : > { %1277 = vmatprep.mubr.bf16.mxu0 %v2220_v36 }
  0x76   : > { %2087 = vmatmul.mubr.msk.bf16.gmra.mxu1 %vm1010_vm0, %v2224_v39 }
  0x77   : > { %2090 = vmatprep.mubr.msk.bf16.mxu1 %vm1010_vm0, %v2231_v40 }
  0x7c   : > { %1278 = vmatmul.mubr.bf16.gmra.mxu0 %v2222_v43 }
  0x7d   : > { %1285 = vmatprep.mubr.bf16.mxu0 %v2225_v44 }
  0x7e   : > { %2091 = vmatmul.mubr.msk.bf16.gmra.mxu1 %vm1010_vm0, %v2232_v47 }
  0x7f   : > { %2094 = vmatprep.mubr.msk.bf16.mxu1 %vm1010_vm0, %v2239_v48 }
  0x84   : > { %1286 = vmatmul.mubr.bf16.gmra.mxu0 %v2227_v51 }
  0x85   : > { %1293 = vmatprep.mubr.bf16.mxu0 %v2228_v52 }
  0x86   : > { %2095 = vmatmul.mubr.msk.bf16.gmra.mxu1 %vm1010_vm0, %v2240_v55 }
  0x8c   : > { %1294 = vmatmul.mubr.bf16.gmra.mxu0 %v2230_v56 }
  0x8d   : > { %1301 = vmatprep.mubr.bf16.mxu0 %v2233_v57 }
  0x94   : > { %1302 = vmatmul.mubr.bf16.gmra.mxu0 %v2235_v58 }
  0x95   : > { %1309 = vmatprep.mubr.bf16.mxu0 %v2236_v59  ;;  %v2655_v59 = vld [vmem:[%s2794_s2] ss:$0 sm:$0xff] }
  0x9c   : > { %1310 = vmatmul.mubr.bf16.gmra.mxu0 %v2238_v60 }
  0x9d   : > { %1317 = vmatprep.mubr.bf16.mxu0 %v2241_v61 }
  0xa4   : > { %1318 = vmatmul.mubr.bf16.gmra.mxu0 %v2243_v62 }
  0xec   : > { %v1880_v63 = vpop.f32.mrf.mxu0 }
  0xee   : > { %v1881_v0 = vpop.f32.mrf.mxu0  ;;  %v2544_v1 = vpop.f32.mrf.mxu1 }
  0xef   : > { %v1882_v57 = vadd.f32 %v1881_v0, %v1880_v63 }
  0xf0   : > { %v2546_v2 = vpop.f32.mrf.mxu0  ;;  %v1945_v3 = vpop.f32.mrf.mxu1 }
  0xf2   : > { %v1884_v4 = vpop.f32.mrf.mxu0  ;;  %v2548_v5 = vpop.f32.mrf.mxu1 }
  0xf4   : > { %v2550_v6 = vpop.f32.mrf.mxu0  ;;  %v2552_v7 = vpop.f32.mrf.mxu1 }
  0xf6   : > { %v1887_v8 = vpop.f32.mrf.mxu0  ;;  %v2554_v9 = vpop.f32.mrf.mxu1 }
  0xf8   : > { %v2556_v10 = vpop.f32.mrf.mxu0  ;;  %v2558_v11 = vpop.f32.mrf.mxu1 }
  0xfa   : > { %v2560_v12 = vpop.f32.mrf.mxu0  ;;  %v2562_v13 = vpop.f32.mrf.mxu1 }
  0xfc   : > { %v2564_v14 = vpop.f32.mrf.mxu0  ;;  %v2566_v15 = vpop.f32.mrf.mxu1 }
  0xfe   : > { %v2568_v16 = vpop.f32.mrf.mxu0  ;;  %v2570_v17 = vpop.f32.mrf.mxu1 }
 0x100   : > { %v2572_v18 = vpop.f32.mrf.mxu0  ;;  %v2574_v19 = vpop.f32.mrf.mxu1 }
 0x102   : > { %v2576_v20 = vpop.f32.mrf.mxu0  ;;  %v2578_v21 = vpop.f32.mrf.mxu1 }
 0x104   : > { %v2580_v22 = vpop.f32.mrf.mxu0  ;;  %v2582_v23 = vpop.f32.mrf.mxu1 }
 0x106   : > { %v2584_v24 = vpop.f32.mrf.mxu0  ;;  %v2586_v25 = vpop.f32.mrf.mxu1 }
 0x108   : > { %v2588_v26 = vpop.f32.mrf.mxu0  ;;  %v2590_v27 = vpop.f32.mrf.mxu1 }
 0x10a   : > { %v2592_v28 = vpop.f32.mrf.mxu0  ;;  %v2594_v29 = vpop.f32.mrf.mxu1 }
 0x10c   : > { %v2596_v30 = vpop.f32.mrf.mxu0  ;;  %v2598_v31 = vpop.f32.mrf.mxu1 }
 0x10e   : > { %v2600_v32 = vpop.f32.mrf.mxu0  ;;  %v2602_v33 = vpop.f32.mrf.mxu1 }
 0x110   : > { %v2604_v34 = vpop.f32.mrf.mxu0  ;;  %v2606_v35 = vpop.f32.mrf.mxu1 }
 0x112   : > { %v2608_v36 = vpop.f32.mrf.mxu0  ;;  %v2610_v37 = vpop.f32.mrf.mxu1 }
 0x114   : > { %v2612_v38 = vpop.f32.mrf.mxu0  ;;  %v2614_v39 = vpop.f32.mrf.mxu1 }
 0x116   : > { %v2616_v40 = vpop.f32.mrf.mxu0  ;;  %v2618_v41 = vpop.f32.mrf.mxu1 }
 0x118   : > { %v2620_v42 = vpop.f32.mrf.mxu0  ;;  %v2622_v43 = vpop.f32.mrf.mxu1 }
 0x11a   : > { %v2624_v44 = vpop.f32.mrf.mxu0  ;;  %v2626_v45 = vpop.f32.mrf.mxu1 }
 0x11c   : > { %v2628_v46 = vpop.f32.mrf.mxu0  ;;  %v2630_v47 = vpop.f32.mrf.mxu1 }
 0x11e   : > { %v2632_v48 = vpop.f32.mrf.mxu0  ;;  %v2634_v49 = vpop.f32.mrf.mxu1 }
 0x120   : > { %v2636_v50 = vpop.f32.mrf.mxu0  ;;  %v2638_v51 = vpop.f32.mrf.mxu1 }
 0x121   : > { %2797 = vst [vmem:[#allocation2_spill] sm:$0xff] %v2636_v50  ;;  %2798 = vst [vmem:[#allocation3_spill] sm:$0xff] %v2638_v51 }
 0x122   : > { %v2640_v52 = vpop.f32.mrf.mxu0  ;;  %v2642_v53 = vpop.f32.mrf.mxu1 }
 0x123   : > { %2799 = vst [vmem:[#allocation4_spill] sm:$0xff] %v2640_v52  ;;  %2800 = vst [vmem:[#allocation5_spill] sm:$0xff] %v2642_v53  ;;  %v1070_v53 = vadd.f32 %v1882_v57, %v2655_v59 }
 0x124   : > { %v2644_v54 = vpop.f32.mrf.mxu0  ;;  %v2646_v55 = vpop.f32.mrf.mxu1 }
 0x125   : > { %2801 = vst [vmem:[#allocation6_spill] sm:$0xff] %v2644_v54  ;;  %2802 = vst [vmem:[#allocation7_spill] sm:$0xff] %v2646_v55  ;;  %v1946_v55 = vadd.f32 %v1945_v3, %v2544_v1  ;;  %v1888_v54 = vadd.f32 %v1887_v8, %v2550_v6  ;;  %v1891_v6 = vadd.f32 %v2560_v12, %v2556_v10 }
 0x126   : > { %v2648_v56 = vpop.f32.mrf.mxu0  ;;  %v2650_v58 = vpop.f32.mrf.mxu1  ;;  %v1955_v10 = vadd.f32 %v2566_v15, %v2562_v13  ;;  %v1958_v13 = vadd.f32 %v2574_v19, %v2570_v17  ;;  %v1897_v15 = vadd.f32 %v2576_v20, %v2572_v18  ;;  %v1900_v18 = vadd.f32 %v2584_v24, %v2580_v22 }
 0x127   : > { %2803 = vst [vmem:[#allocation8_spill] sm:$0xff] %v2648_v56  ;;  %2804 = vst [vmem:[#allocation9_spill] sm:$0xff] %v2650_v58  ;;  %v1885_v56 = vadd.f32 %v1884_v4, %v2546_v2  ;;  %v1167_v50 = vadd.f32 %v1946_v55, %v1070_v53  ;;  %v1458_v4 = vpop.permute.xlu0 %1457  ;;  %v1081_v51 = vadd.f32 %v1891_v6, %v2655_v59 }
 0x128   : > { %v2657_v60 = vpop.f32.mrf.mxu0  ;;  %v2659_v61 = vpop.f32.mrf.mxu1  ;;  %v1089_v17 = vadd.f32 %v1897_v15, %v2655_v59  ;;  %v1961_v20 = vadd.f32 %v2582_v23, %v2578_v21  ;;  %v1964_v22 = vadd.f32 %v2590_v27, %v2586_v25  ;;  %v1903_v24 = vadd.f32 %v2592_v28, %v2588_v26 }
 0x129   : > { %2805 = vst [vmem:[#allocation10_spill] sm:$0xff] %v2657_v60  ;;  %2806 = vst [vmem:[#allocation11_spill] sm:$0xff] %v2659_v61  ;;  %v1073_v60 = vadd.f32 %v1885_v56, %v2655_v59  ;;  %v1906_v26 = vadd.f32 %v2600_v32, %v2596_v30  ;;  %v1970_v30 = vadd.f32 %v2606_v35, %v2602_v33 }
 0x12a   : > { %v2661_v62 = vpop.f32.mrf.mxu0  ;;  %v2666_v63 = vpop.f32.mrf.mxu1  ;;  %v1097_v25 = vadd.f32 %v1903_v24, %v2655_v59 }
 0x12b   : > { %2807 = vst [vmem:[#allocation12_spill] sm:$0xff] %v2661_v62  ;;  %2808 = vst [vmem:[#allocation13_spill] sm:$0xff] %v2666_v63  ;;  %v1949_v62 = vadd.f32 %v2552_v7, %v2548_v5  ;;  %v1078_v63 = vadd.f32 %v1888_v54, %v2655_v59  ;;  %v1894_v54 = vadd.f32 %v2568_v16, %v2564_v14 }
 0x12c   : > { %v2008_v0 = vpop.f32.mrf.mxu0  ;;  %v2668_v58 = vpop.f32.mrf.mxu1 }
 0x12d   : > { %2809 = vst [vmem:[#allocation14_spill] sm:$0xff] %v2668_v58  ;;  %v1952_v58 = vadd.f32 %v2558_v11, %v2554_v9  ;;  %v1170_v53 = vadd.f32 %v1949_v62, %v1073_v60  ;;  %v1463_v62 = vpop.permute.xlu0 %1462 }
 0x12e   : > { %v2009_v52 = vpop.f32.mrf.mxu0  ;;  %v2084_v57 = vpop.f32.mrf.mxu1 }
 0x12f   : > { %v2010_v61 = vadd.f32 %v2009_v52, %v2008_v0 }
 0x130   : > { %v2011_v1 = vpop.f32.mrf.mxu0  ;;  %v1360_v2 = vpop.f32.mrf.mxu1 }
 0x131   : > { %v1264_v3 = vadd.f32 %v2010_v61, %v1167_v50  ;;  %v1175_v61 = vadd.f32 %v1952_v58, %v1078_v63  ;;  %v1478_v27 = vpop.permute.xlu0 %1477 }
 0x132   : > { %v2012_v8 = vpop.f32.mrf.mxu0  ;;  %v2085_v5 = vpop.f32.mrf.mxu1 }
 0x133   : > { %v2013_v55 = vadd.f32 %v2012_v8, %v2011_v1  ;;  %v1361_v56 = vadd.f32 %v1360_v2, %v1264_v3  ;;  %v1086_v3 = vadd.f32 %v1894_v54, %v2655_v59 }
 0x134   : > { %v2014_v7 = vpop.f32.mrf.mxu0  ;;  %v1363_v50 = vpop.f32.mrf.mxu1 }
 0x135   : > { %v1423_v52 = vmax.f32 %v1361_v56, 0.0  ;;  %v1267_v0 = vadd.f32 %v2013_v55, %v1170_v53  ;;  %v1468_v53 = vpop.permute.xlu1 %1467  ;;  %v1488_v35 = vpop.permute.xlu0 %1487 }
 0x136   : > { %v2015_v9 = vpop.f32.mrf.mxu0  ;;  %v2690_v63 = vpop.f32.mrf.mxu1 }
 0x137   : > { %v1535_v11 = vmul.f32 %v1458_v4, %v1423_v52  ;;  %v2016_v12 = vadd.f32 %v2015_v9, %v2014_v7  ;;  %v1364_v60 = vadd.f32 %v1363_v50, %v1267_v0  ;;  %v1178_v4 = vadd.f32 %v1955_v10, %v1081_v51 }
 0x138   : > { %v2017_v58 = vpop.f32.mrf.mxu0  ;;  %v1376_v7 = vpop.f32.mrf.mxu1 }
 0x139   : > { %v1848_v1 = vpack.c.bf16 %v1535_v11, %v1535_v11  ;;  %v1272_v14 = vadd.f32 %v2016_v12, %v1175_v61  ;;  %v1424_v16 = vmax.f32 %v1364_v60, 0.0  ;;  %v1183_v61 = vadd.f32 %v1958_v13, %v1086_v3  ;;  %v1473_v21 = vpop.permute.xlu1 %1472 }
 0x13a   : > { %v2018_v2 = vpop.f32.mrf.mxu0  ;;  %v2089_v10 = vpop.f32.mrf.mxu1 }
 0x13b   : > { %1616 = vst.msk [vmem:[%s2688_s21] sm:$0xf] %vm1615_vm1, %v1848_v1  ;;  %v1536_v6 = vmul.f32 %v1463_v62, %v1424_v16  ;;  %v2019_v8 = vadd.f32 %v2018_v2, %v2017_v58  ;;  %v1369_v55 = vadd.f32 %v2084_v57, %v1272_v14  ;;  %v1094_v62 = vadd.f32 %v1900_v18, %v2655_v59 }
 0x13c   : > { %v2020_v56 = vpop.f32.mrf.mxu0  ;;  %v1186_v58 = vadd.f32 %v1961_v20, %v1089_v17  ;;  %v1379_v3 = vpop.f32.mrf.mxu1 }
 0x13d   : > { %v1849_v52 = vpack.c.bf16 %v1536_v6, %v1536_v6  ;;  %v1275_v0 = vadd.f32 %v2019_v8, %v1178_v4  ;;  %v1425_v50 = vmax.f32 %v1369_v55, 0.0  ;;  %v1191_v4 = vadd.f32 %v1964_v22, %v1094_v62 }
 0x13e   : > { %v2021_v19 = vpop.f32.mrf.mxu0  ;;  %v1967_v6 = vadd.f32 %v2598_v31, %v2594_v29  ;;  %v1909_v29 = vadd.f32 %v2608_v36, %v2604_v34  ;;  %v1483_v31 = vpop.permute.xlu1 %1482  ;;  %v1912_v34 = vadd.f32 %v2616_v40, %v2612_v38  ;;  %v1976_v38 = vadd.f32 %v2622_v43, %v2618_v41 }
 0x13f   : > { %1617 = vst.msk [vmem:[%s2688_s21 + $0x4] sm:$0xf] %vm1615_vm1, %v1849_v52  ;;  %v1537_v51 = vmul.f32 %v1468_v53, %v1425_v50  ;;  %v2022_v57 = vadd.f32 %v2021_v19, %v2020_v56  ;;  %v1372_v54 = vadd.f32 %v2085_v5, %v1275_v0  ;;  %v1915_v40 = vadd.f32 %v2624_v44, %v2620_v42  ;;  %v1498_v43 = vpop.permute.xlu0 %1497 }
 0x140   : > { %v2023_v9 = vpop.f32.mrf.mxu0  ;;  %v1194_v17 = vadd.f32 %v1967_v6, %v1097_v25  ;;  %v1105_v33 = vadd.f32 %v1909_v29, %v2655_v59  ;;  %v1918_v42 = vadd.f32 %v2632_v48, %v2628_v46  ;;  %v2810_v46 = vld [vmem:[#allocation3_spill] sm:$0xff] }
 0x141   : > { %v1850_v11 = vpack.c.bf16 %v1537_v51, %v1537_v51  ;;  %v1426_v12 = vmax.f32 %v1372_v54, 0.0  ;;  %v1280_v60 = vadd.f32 %v2022_v57, %v1183_v61  ;;  %v1102_v61 = vadd.f32 %v1906_v26, %v2655_v59 }
 0x142   : > { %v2024_v23 = vpop.f32.mrf.mxu0  ;;  %v1113_v41 = vadd.f32 %v1915_v40, %v2655_v59  ;;  %v1982_v48 = vadd.f32 %v2810_v46, %v2634_v49  ;;  %v2817_v40 = vld [vmem:[#allocation9_spill] sm:$0xff] }
 0x143   : > { %1618 = vst.msk [vmem:[%s2688_s21 + $0x8] sm:$0xf] %vm1615_vm1, %v1850_v11  ;;  %v1538_v5 = vmul.f32 %v1473_v21, %v1426_v12  ;;  %v2025_v1 = vadd.f32 %v2024_v23, %v2023_v9  ;;  %v1377_v14 = vadd.f32 %v1376_v7, %v1280_v60  ;;  %v2720_v7 = vpop.f32.mrf.mxu1  ;;  %v1199_v12 = vadd.f32 %v1970_v30, %v1102_v61  ;;  %v2811_v61 = vld [vmem:[#allocation2_spill] sm:$0xff]  ;;  %v2812_v30 = vld [vmem:[#allocation4_spill] sm:$0xff] }
 0x144   : > { %v2026_v16 = vpop.f32.mrf.mxu0  ;;  %v1973_v60 = vadd.f32 %v2614_v39, %v2610_v37  ;;  %v1493_v37 = vpop.permute.xlu1 %1492 }
 0x145   : > { %v1851_v13 = vpack.c.bf16 %v1538_v5, %v1538_v5  ;;  %v1427_v15 = vmax.f32 %v1377_v14, 0.0  ;;  %v1283_v2 = vadd.f32 %v2025_v1, %v1186_v58  ;;  %v1392_v57 = vpop.f32.mrf.mxu1  ;;  %v1110_v1 = vadd.f32 %v1912_v34, %v2655_v59  ;;  %v1508_v34 = vpop.permute.xlu0 %1507 }
 0x146   : > { %v2027_v28 = vpop.f32.mrf.mxu0  ;;  %v1202_v14 = vadd.f32 %v1973_v60, %v1105_v33  ;;  %v2816_v60 = vld [vmem:[#allocation7_spill] sm:$0xff] }
 0x147   : > { %1619 = vst.msk [vmem:[%s2688_s21 + $0xc] sm:$0xf] %vm1615_vm1, %v1851_v13  ;;  %v1539_v8 = vmul.f32 %v1478_v27, %v1427_v15  ;;  %v2028_v53 = vadd.f32 %v2027_v28, %v2026_v16  ;;  %v1380_v55 = vadd.f32 %v1379_v3, %v1283_v2  ;;  %v2093_v21 = vpop.f32.mrf.mxu1  ;;  %v1207_v26 = vadd.f32 %v1976_v38, %v1110_v1 }
 0x148   : > { %v2029_v56 = vpop.f32.mrf.mxu0  ;;  %v1979_v27 = vadd.f32 %v2630_v47, %v2626_v45  ;;  %v1921_v45 = vadd.f32 %v2812_v30, %v2811_v61  ;;  %v1503_v47 = vpop.permute.xlu1 %1502 }
 0x149   : > { %v1852_v52 = vpack.c.bf16 %v1539_v8, %v1539_v8  ;;  %v1288_v0 = vadd.f32 %v2028_v53, %v1191_v4  ;;  %v1428_v50 = vmax.f32 %v1380_v55, 0.0  ;;  %v1395_v15 = vpop.f32.mrf.mxu1 }
 0x14a   : > { %v2030_v32 = vpop.f32.mrf.mxu0  ;;  %v1121_v49 = vadd.f32 %v1921_v45, %v2655_v59 }
 0x14b   : > { %1620 = vst.msk [vmem:[%s2688_s21 + $0x10] sm:$0xf] %vm1615_vm1, %v1852_v52  ;;  %v1540_v18 = vmul.f32 %v1483_v31, %v1428_v50  ;;  %v1385_v19 = vadd.f32 %v2690_v63, %v1288_v0  ;;  %v2031_v20 = vadd.f32 %v2030_v32, %v2029_v56  ;;  %v2751_v55 = vpop.f32.mrf.mxu1  ;;  %v1118_v50 = vadd.f32 %v1918_v42, %v2655_v59 }
 0x14c   : > { %v2032_v51 = vpop.f32.mrf.mxu0  ;;  %v1210_v31 = vadd.f32 %v1979_v27, %v1113_v41 }
 0x14d   : > { %v1853_v54 = vpack.c.bf16 %v1540_v18, %v1540_v18  ;;  %v1429_v9 = vmax.f32 %v1385_v19, 0.0  ;;  %v1291_v11 = vadd.f32 %v2031_v20, %v1194_v17  ;;  %v1408_v20 = vpop.f32.mrf.mxu1 }
 0x14e   : > { %v2033_v36 = vpop.f32.mrf.mxu0 }
 0x14f   : > { %1621 = vst.msk [vmem:[%s2688_s21 + $0x14] sm:$0xf] %vm1615_vm1, %v1853_v54  ;;  %v1541_v63 = vmul.f32 %v1488_v35, %v1429_v9  ;;  %v1388_v62 = vadd.f32 %v2089_v10, %v1291_v11  ;;  %v2034_v22 = vadd.f32 %v2033_v36, %v2032_v51  ;;  %v1215_v9 = vadd.f32 %v1982_v48, %v1118_v50  ;;  %v2813_v11 = vld [vmem:[#allocation6_spill] sm:$0xff]  ;;  %v2815_v36 = vld [vmem:[#allocation5_spill] sm:$0xff] }
 0x150   : > { %v2035_v24 = vpop.f32.mrf.mxu0 }
 0x151   : > { %v1854_v23 = vpack.c.bf16 %v1541_v63, %v1541_v63  ;;  %v1430_v58 = vmax.f32 %v1388_v62, 0.0  ;;  %v1296_v5 = vadd.f32 %v2034_v22, %v1199_v12  ;;  %v2814_v12 = vld [vmem:[#allocation8_spill] sm:$0xff]  ;;  %v1985_v63 = vadd.f32 %v2816_v60, %v2815_v36 }
 0x152   : > { %v2036_v39 = vpop.f32.mrf.mxu0  ;;  %v1924_v33 = vadd.f32 %v2814_v12, %v2813_v11 }
 0x153   : > { %1622 = vst.msk [vmem:[%s2688_s21 + $0x18] sm:$0xf] %vm1615_vm1, %v1854_v23  ;;  %v1542_v10 = vmul.f32 %v1493_v37, %v1430_v58  ;;  %v2037_v16 = vadd.f32 %v2036_v39, %v2035_v24  ;;  %v1393_v3 = vadd.f32 %v1392_v57, %v1296_v5  ;;  %v2097_v23 = vpop.f32.mrf.mxu1  ;;  %v2818_v37 = vld [vmem:[#allocation11_spill] sm:$0xff] }
 0x154   : > { %v2038_v13 = vpop.f32.mrf.mxu0  ;;  %v1126_v38 = vadd.f32 %v1924_v33, %v2655_v59  ;;  %v1988_v39 = vadd.f32 %v2818_v37, %v2817_v40 }
 0x155   : > { %v1855_v2 = vpack.c.bf16 %v1542_v10, %v1542_v10  ;;  %v1431_v4 = vmax.f32 %v1393_v3, 0.0  ;;  %v1299_v25 = vadd.f32 %v2037_v16, %v1202_v14  ;;  %v2819_v14 = vld [vmem:[#allocation10_spill] sm:$0xff]  ;;  %v2820_v10 = vld [vmem:[#allocation12_spill] sm:$0xff]  ;;  %v1513_v3 = vpop.permute.xlu1 %1512 }
 0x156   : > { %v2039_v44 = vpop.f32.mrf.mxu0  ;;  %v1927_v16 = vadd.f32 %v2820_v10, %v2819_v14 }
 0x157   : > { %1623 = vst.msk [vmem:[%s2688_s21 + $0x1c] sm:$0xf] %vm1615_vm1, %v1855_v2  ;;  %v1543_v28 = vmul.f32 %v1498_v43, %v1431_v4  ;;  %v2040_v6 = vadd.f32 %v2039_v44, %v2038_v13  ;;  %v1396_v8 = vadd.f32 %v1395_v15, %v1299_v25  ;;  %v1218_v15 = vadd.f32 %v1985_v63, %v1121_v49 }
 0x158   : > { %v2041_v53 = vpop.f32.mrf.mxu0  ;;  %v1223_v44 = vadd.f32 %v1988_v39, %v1126_v38  ;;  %v1129_v27 = vadd.f32 %v1927_v16, %v2655_v59 }
 0x159   : > { %v1856_v56 = vpack.c.bf16 %v1543_v28, %v1543_v28  ;;  %v1304_v52 = vadd.f32 %v2040_v6, %v1207_v26  ;;  %v1432_v0 = vmax.f32 %v1396_v8, 0.0  ;;  %v1411_v26 = vpop.f32.mrf.mxu1  ;;  %v1518_v28 = vpop.permute.xlu0 %1517  ;;  %v2821_v8 = vld [vmem:[#allocation13_spill] sm:$0xff] }
 0x15a   : > { %v2042_v29 = vpop.f32.mrf.mxu0  ;;  %v1523_v45 = vpop.permute.xlu1 %1522 }
 0x15b   : > { %1624 = vst.msk [vmem:[%s2688_s21 + $0x20] sm:$0xf] %vm1615_vm1, %v1856_v56  ;;  %v1401_v32 = vadd.f32 %v2720_v7, %v1304_v52  ;;  %v1544_v17 = vmul.f32 %v1503_v47, %v1432_v0  ;;  %v2043_v18 = vadd.f32 %v2042_v29, %v2041_v53  ;;  %v2822_v53 = vld [vmem:[#allocation14_spill] sm:$0xff] }
 0x15c   : > { %v2044_v19 = vpop.f32.mrf.mxu0  ;;  %v1991_v56 = vadd.f32 %v2822_v53, %v2821_v8 }
 0x15d   : > { %v1433_v51 = vmax.f32 %v1401_v32, 0.0  ;;  %v1857_v57 = vpack.c.bf16 %v1544_v17, %v1544_v17  ;;  %v1307_v54 = vadd.f32 %v2043_v18, %v1210_v31 }
 0x15e   : > { %v2045_v35 = vpop.f32.mrf.mxu0  ;;  %v1226_v29 = vadd.f32 %v1991_v56, %v1129_v27  ;;  %v1533_v49 = vpop.permute.xlu1 %1532 }
 0x15f   : > { %v1545_v7 = vmul.f32 %v1508_v34, %v1433_v51  ;;  %1625 = vst.msk [vmem:[%s2688_s21 + $0x24] sm:$0xf] %vm1615_vm1, %v1857_v57  ;;  %v1404_v62 = vadd.f32 %v2093_v21, %v1307_v54  ;;  %v2046_v22 = vadd.f32 %v2045_v35, %v2044_v19 }
 0x160   : > { %v2047_v24 = vpop.f32.mrf.mxu0 }
 0x161   : > { %v1858_v58 = vpack.c.bf16 %v1545_v7, %v1545_v7  ;;  %v1434_v5 = vmax.f32 %v1404_v62, 0.0  ;;  %v1312_v1 = vadd.f32 %v2046_v22, %v1215_v9 }
 0x162   : > { %v2048_v13 = vpop.f32.mrf.mxu0 }
 0x163   : > { %1626 = vst.msk [vmem:[%s2688_s21 + $0x28] sm:$0xf] %vm1615_vm1, %v1858_v58  ;;  %v1546_v21 = vmul.f32 %v1513_v3, %v1434_v5  ;;  %v2049_v2 = vadd.f32 %v2048_v13, %v2047_v24  ;;  %v1409_v4 = vadd.f32 %v1408_v20, %v1312_v1  ;;  %v1528_v20 = vpop.permute.xlu0 %1527 }
 0x164   : > { %v2050_v25 = vpop.f32.mrf.mxu0 }
 0x165   : > { %v1859_v41 = vpack.c.bf16 %v1546_v21, %v1546_v21  ;;  %v1435_v42 = vmax.f32 %v1409_v4, 0.0  ;;  %v1315_v43 = vadd.f32 %v2049_v2, %v1218_v15 }
 0x166   : > { %v2051_v6 = vpop.f32.mrf.mxu0 }
 0x167   : > { %1627 = vst.msk [vmem:[%s2688_s21 + $0x2c] sm:$0xf] %vm1615_vm1, %v1859_v41  ;;  %v1547_v52 = vmul.f32 %v1518_v28, %v1435_v42  ;;  %v2052_v0 = vadd.f32 %v2051_v6, %v2050_v25  ;;  %v1412_v50 = vadd.f32 %v1411_v26, %v1315_v43 }
 0x168   : > { %v2053_v46 = vpop.f32.mrf.mxu0 }
 0x169   : > { %v1860_v48 = vpack.c.bf16 %v1547_v52, %v1547_v52  ;;  %v1320_v61 = vadd.f32 %v2052_v0, %v1223_v44  ;;  %v1436_v30 = vmax.f32 %v1412_v50, 0.0 }
 0x16a   : > { %v2054_v47 = vpop.f32.mrf.mxu0 }
 0x16b   : > { %1628 = vst.msk [vmem:[%s2688_s21 + $0x30] sm:$0xf] %vm1615_vm1, %v1860_v48  ;;  %v1417_v59 = vadd.f32 %v2751_v55, %v1320_v61  ;;  %v1548_v31 = vmul.f32 %v1523_v45, %v1436_v30  ;;  %v2055_v32 = vadd.f32 %v2054_v47, %v2053_v46 }
 0x16d   : > { %v1437_v17 = vmax.f32 %v1417_v59, 0.0  ;;  %v1861_v18 = vpack.c.bf16 %v1548_v31, %v1548_v31  ;;  %v1323_v19 = vadd.f32 %v2055_v32, %v1226_v29 }
 0x16f   : > { %v1549_v51 = vmul.f32 %v1528_v20, %v1437_v17  ;;  %1629 = vst.msk [vmem:[%s2688_s21 + $0x34] sm:$0xf] %vm1615_vm1, %v1861_v18  ;;  %v1420_v57 = vadd.f32 %v2097_v23, %v1323_v19 }
 0x171   : > { %v1862_v54 = vpack.c.bf16 %v1549_v51, %v1549_v51  ;;  %v1438_v9 = vmax.f32 %v1420_v57, 0.0 }
 0x173   : > { %1630 = vst.msk [vmem:[%s2688_s21 + $0x38] sm:$0xf] %vm1615_vm1, %v1862_v54  ;;  %v1550_v11 = vmul.f32 %v1533_v49, %v1438_v9 }
 0x175   : > { %v1863_v12 = vpack.c.bf16 %v1550_v11, %v1550_v11 }
 0x177   : > { %1631 = vst.msk [vmem:[%s2688_s21 + $0x3c] sm:$0xf] %vm1615_vm1, %v1863_v12 }
 0x178 PF: > { %s14_s15 = sadd.s32 1, %s2250_s15  }
 0x179   : > { %p11_p4 = scmp.ge.s32.totalorder %s14_s15, 4  }
 0x17b   :  { %13 = sbr.rel (!%p11_p4) target bundleno = 1 (0x1), region = 69 }

// kernel: custom-call.10
= control target key start
LH: loop header
LB: loop body
LE: loop exit
PB: predicated region body
PF: predicated region fallthrough
CT: control target
= control target key end

     0   :  { %s6_s0 = inlined_call_operand.vmem [shape: u32[3456], index: 0, kind: output, shape index: {}]  }

// kernel: _forward_jit.18
= control target key start
LH: loop header
LB: loop body
LE: loop exit
PB: predicated region body
PF: predicated region fallthrough
CT: control target
= control target key end

     0   :  { %s3739_s15 = smov 0   ;;  %s4441_s0 = inlined_call_operand.vmem [shape: bf16[256,1728], index: 0, kind: input, shape index: {}]   ;;  %s4442_s1 = inlined_call_operand.vmem [shape: bf16[1728,64], index: 1, kind: input, shape index: {}]   ;;  %s4443_s2 = inlined_call_operand.vmem [shape: f32[1,64], index: 2, kind: input, shape index: {}]   ;;  %s4444_s3 = inlined_call_operand.vmem [shape: f32[256,1], index: 3, kind: input, shape index: {}]   ;;  %s4445_s4 = inlined_call_operand.vmem [shape: bf16[256,64], index: 4, kind: output, shape index: {}]  }
   0x1 LB: > { %s2743_s16 = sadd.s32 4294967295, %s3711_s15   ;;  %p2747_p0 = scmp.ge.s32.totalorder %s3711_s15, 1  ;;  %s3711_s15 = sphi %s3739_s15, %s14_s15  }
   0x2   : > { %p175_p1 = scmp.lt.s32.totalorder %s3711_s15, 3 }
   0x4   : > { %p176_p2 = pnand %p2747_p0, %p175_p1 }
   0x5   : > { %s2748_s19 = sshll.u32 (!%p176_p2), %s2743_s16, 4 }
   0x6   : > { %179 = sbr.rel (%p176_p2) target bundleno = 472 (0x1d8), region = 36  ;;  %p208_p3 = scmp.lt.s32.totalorder (!%p176_p2), %s2748_s19, 31 }
   0xb   : > { %v3429_v0 = vld [vmem:[%s4442_s1 + $0x78] sm:$0xff]   ;;  %v3431_v2 = vld [vmem:[%s4442_s1 + $0x70] sm:$0xff]   ;;  %v3433_v4 = vld [vmem:[%s4442_s1 + $0x68] sm:$0xff]   ;;  %v3713_v5 = vmov 0   ;;  %s4447_s19 = smov (!%p208_p3, %s2748_s19), 31  ;;  %vm1762_vm0 = vcmask 523264  }
   0xc   : > { %v3430_v1 = vld [vmem:[%s4442_s1 + $0x38] sm:$0xff]   ;;  %3401 = vmatprep.subr.bf16.mxu1 %v3429_v0  ;;  %3017 = vmatprep.subr.bf16.mxu0 %v3429_v0  ;;  %v3432_v3 = vld [vmem:[%s4442_s1 + $0x30] sm:$0xff]   ;;  %v3434_v6 = vld [vmem:[%s4442_s1 + $0x28] sm:$0xff]   ;;  %s3417_s6 = smul.u32 56, %s4447_s19  ;;  %s2751_s30 = sshll.u32 %s4447_s19, 3  ;;  %vm2658_vm1 = vcmask 519168  }
   0xd   : > { %3409 = vmatpush3.bf16.msra.mxu1 %v3430_v1  ;;  %3018 = vmatpush3.bf16.msra.mxu0 %v3430_v1  ;;  %v3435_v7 = vld [vmem:[%s4442_s1 + $0x60] sm:$0xff]   ;;  %v3437_v9 = vld [vmem:[%s4442_s1 + $0x58] sm:$0xff]   ;;  %v3439_v11 = vld [vmem:[%s4442_s1 + $0x50] sm:$0xff]   ;;  %s4175_s7 = scalar_lea.vmem %s4444_s3, %s2751_s30  ;;  %s2753_s9 = sshll.u32 %s4447_s19, 2 }
   0xe   : > { %3402 = vmatprep.subr.bf16.mxu1 %v3431_v2  ;;  %3019 = vmatprep.subr.bf16.mxu0 %v3431_v2  ;;  %v3436_v8 = vld [vmem:[%s4442_s1 + $0x20] sm:$0xff]   ;;  %s3782_s13 = scalar_lea.vmem %s4441_s0, %s3417_s6  ;;  %v3438_v10 = vld [vmem:[%s4442_s1 + $0x18] sm:$0xff]   ;;  %v3440_v14 = vld [vmem:[%s4442_s1 + $0x10] sm:$0xff]   ;;  %s4390_s12 = scalar_lea.vmem %s4445_s4, %s2753_s9 }
   0xf   : > { %3427 = vset.pattern.permute.xlu0 %v3713_v5  ;;  %3428 = vset.pattern.permute.xlu1 %v3713_v5  ;;  %v3447_v12 = vld [vmem:[%s3782_s13 + $0x1c4] ss:$56 sps:$4 sm:$0xff]   ;;  %v3441_v15 = vld [vmem:[%s4442_s1 + $0x48] sm:$0xff]   ;;  %v3445_v19 = vld [vmem:[%s3782_s13 + $0x1c0] ss:$56 sps:$4 sm:$0xff]  }
  0x10   : > { %v3450_v13 = vld [vmem:[%s3782_s13 + $0x4] ss:$56 sps:$4 sm:$0xff]   ;;  %1851 = vmatprep.mubr.bf16.mxu1 %v3447_v12  ;;  %v3442_v16 = vld [vmem:[%s4442_s1 + $0x8] sm:$0xff]   ;;  %v3448_v20 = vld [vmem:[%s3782_s13] ss:$56 sps:$4 sm:$0xff]  }
  0x11   : > { %3410 = vmatpush3.bf16.msra.mxu1 %v3432_v3  ;;  %3020 = vmatpush3.bf16.msra.mxu0 %v3432_v3  ;;  %v3443_v17 = vld [vmem:[%s4442_s1 + $0x40] sm:$0xff]   ;;  %v3451_v21 = vld [vmem:[%s4442_s1 + $0xf8] sm:$0xff]   ;;  %v3455_v25 = vld [vmem:[%s4442_s1 + $0xf0] sm:$0xff]  }
  0x12   : > { %3403 = vmatprep.subr.bf16.mxu1 %v3433_v4  ;;  %3021 = vmatprep.subr.bf16.mxu0 %v3433_v4  ;;  %v3444_v18 = vld [vmem:[%s4442_s1] sm:$0xff]   ;;  %v3453_v22 = vld [vmem:[%s4442_s1 + $0x178] sm:$0xff]   ;;  %v3457_v26 = vld [vmem:[%s4442_s1 + $0x170] sm:$0xff]  }
  0x13   : > { %1819 = vmatprep.mubr.bf16.mxu0 %v3450_v13  ;;  %v3452_v23 = vld [vmem:[%s4442_s1 + $0xb8] sm:$0xff]   ;;  %v3459_v27 = vld [vmem:[%s3782_s13 + $0x234] ss:$56 sps:$4 sm:$0xff]   ;;  %v3463_v32 = vld [vmem:[%s3782_s13 + $0x230] ss:$56 sps:$4 sm:$0xff]  }
  0x14   : > { %v3454_v24 = vld [vmem:[%s4442_s1 + $0x138] sm:$0xff]   ;;  %v3456_v28 = vld [vmem:[%s4442_s1 + $0xb0] sm:$0xff]   ;;  %v3464_v31 = vld [vmem:[%s4442_s1 + $0xe8] sm:$0xff]  }
  0x15   : > { %3411 = vmatpush3.bf16.msra.mxu1 %v3434_v6  ;;  %3022 = vmatpush3.bf16.msra.mxu0 %v3434_v6  ;;  %v3461_v29 = vld [vmem:[%s3782_s13 + $0x74] ss:$56 sps:$4 sm:$0xff]   ;;  %v3465_v34 = vld [vmem:[%s3782_s13 + $0x70] ss:$56 sps:$4 sm:$0xff]   ;;  %v3469_v37 = vld [vmem:[%s4442_s1 + $0xe0] sm:$0xff]  }
  0x16   : > { %3404 = vmatprep.subr.bf16.mxu1 %v3435_v7  ;;  %3023 = vmatprep.subr.bf16.mxu0 %v3435_v7  ;;  %v3458_v30 = vld [vmem:[%s4442_s1 + $0x130] sm:$0xff]   ;;  %v3467_v33 = vld [vmem:[%s4442_s1 + $0x168] sm:$0xff]   ;;  %v3471_v38 = vld [vmem:[%s4442_s1 + $0x160] sm:$0xff]  }
  0x17   : > { %v3466_v35 = vld [vmem:[%s4442_s1 + $0xa8] sm:$0xff]   ;;  %v3473_v39 = vld [vmem:[%s3782_s13 + $0x2a4] ss:$56 sps:$4 sm:$0xff]   ;;  %v3477_v44 = vld [vmem:[%s3782_s13 + $0x2a0] ss:$56 sps:$4 sm:$0xff]  }
  0x18   : > { %v3468_v36 = vld [vmem:[%s4442_s1 + $0x128] sm:$0xff]   ;;  %v3470_v40 = vld [vmem:[%s4442_s1 + $0xa0] sm:$0xff]   ;;  %v3478_v43 = vld [vmem:[%s4442_s1 + $0xd8] sm:$0xff]  }
  0x19   : > { %3412 = vmatpush3.bf16.msra.mxu1 %v3436_v8  ;;  %3024 = vmatpush3.bf16.msra.mxu0 %v3436_v8  ;;  %v3475_v41 = vld [vmem:[%s3782_s13 + $0xe4] ss:$56 sps:$4 sm:$0xff]   ;;  %v3479_v45 = vld [vmem:[%s3782_s13 + $0xe0] ss:$56 sps:$4 sm:$0xff]   ;;  %v3483_v49 = vld [vmem:[%s4442_s1 + $0xd0] sm:$0xff]  }
  0x1a   : > { %3405 = vmatprep.subr.bf16.mxu1 %v3437_v9  ;;  %3025 = vmatprep.subr.bf16.mxu0 %v3437_v9  ;;  %v3472_v42 = vld [vmem:[%s4442_s1 + $0x120] sm:$0xff]   ;;  %v3481_v46 = vld [vmem:[%s4442_s1 + $0x158] sm:$0xff]   ;;  %v3485_v50 = vld [vmem:[%s4442_s1 + $0x150] sm:$0xff]  }
  0x1b   : > { %v3480_v47 = vld [vmem:[%s4442_s1 + $0x98] sm:$0xff]   ;;  %v3487_v51 = vld [vmem:[%s3782_s13 + $0x314] ss:$56 sps:$4 sm:$0xff]   ;;  %v3491_v56 = vld [vmem:[%s3782_s13 + $0x310] ss:$56 sps:$4 sm:$0xff]  }
  0x1c   : > { %v3482_v48 = vld [vmem:[%s4442_s1 + $0x118] sm:$0xff]   ;;  %v3489_v52 = vld [vmem:[%s3782_s13 + $0x154] ss:$56 sps:$4 sm:$0xff]   ;;  %v3493_v57 = vld [vmem:[%s3782_s13 + $0x150] ss:$56 sps:$4 sm:$0xff]  }
  0x1d   : > { %3413 = vmatpush3.bf16.msra.mxu1 %v3438_v10  ;;  %3026 = vmatpush3.bf16.msra.mxu0 %v3438_v10  ;;  %v3484_v53 = vld [vmem:[%s4442_s1 + $0x90] sm:$0xff]   ;;  %v3492_v55 = vld [vmem:[%s4442_s1 + $0xc8] sm:$0xff]   ;;  %v3497_v61 = vld [vmem:[%s4442_s1 + $0xc0] sm:$0xff]  }
  0x1e   : > { %3406 = vmatprep.subr.bf16.mxu1 %v3439_v11  ;;  %3027 = vmatprep.subr.bf16.mxu0 %v3439_v11  ;;  %v3486_v54 = vld [vmem:[%s4442_s1 + $0x110] sm:$0xff]   ;;  %v3495_v58 = vld [vmem:[%s4442_s1 + $0x148] sm:$0xff]   ;;  %v3499_v62 = vld [vmem:[%s4442_s1 + $0x140] sm:$0xff]  }
  0x1f   : > { %v3494_v59 = vld [vmem:[%s4442_s1 + $0x88] sm:$0xff]   ;;  %v3498_v63 = vld [vmem:[%s4442_s1 + $0x80] sm:$0xff]   ;;  %v3507_v6 = vld [vmem:[%s4442_s1 + $0x1f8] sm:$0xff]  }
  0x20   : > { %v3496_v60 = vld [vmem:[%s4442_s1 + $0x108] sm:$0xff]   ;;  %v3500_v0 = vld [vmem:[%s4442_s1 + $0x100] sm:$0xff]   ;;  %v3508_v7 = vld [vmem:[%s4442_s1 + $0x1b8] sm:$0xff]  }
  0x21   : > { %3414 = vmatpush3.bf16.msra.mxu1 %v3440_v14  ;;  %3028 = vmatpush3.bf16.msra.mxu0 %v3440_v14  ;;  %v3503_v1 = vld [vmem:[%s3782_s13 + $0xc] ss:$56 sps:$4 sm:$0xff]   ;;  %v3501_v2 = vld [vmem:[%s3782_s13 + $0x8] ss:$56 sps:$4 sm:$0xff]   ;;  %v3509_v8 = vld [vmem:[%s4442_s1 + $0x278] sm:$0xff]  }
  0x22   : > { %3407 = vmatprep.subr.bf16.mxu1 %v3441_v15  ;;  %3029 = vmatprep.subr.bf16.mxu0 %v3441_v15  ;;  %v3504_v3 = vld [vmem:[%s3782_s13 + $0x10] ss:$56 sps:$4 sm:$0xff]   ;;  %v3506_v4 = vld [vmem:[%s3782_s13 + $0x14] ss:$56 sps:$4 sm:$0xff]   ;;  %v3512_v10 = vld [vmem:[%s4442_s1 + $0x238] sm:$0xff]  }
  0x23   : > { %v3510_v9 = vld [vmem:[%s3782_s13 + $0x7c] ss:$56 sps:$4 sm:$0xff]   ;;  %v3513_v12 = vld [vmem:[%s3782_s13 + $0x78] ss:$56 sps:$4 sm:$0xff]  }
  0x24   : > { %v3514_v11 = vld [vmem:[%s3782_s13 + $0x84] ss:$56 sps:$4 sm:$0xff]   ;;  %v3516_v13 = vld [vmem:[%s4442_s1 + $0x1f0] sm:$0xff]   ;;  %v3517_v14 = vld [vmem:[%s3782_s13 + $0x80] ss:$56 sps:$4 sm:$0xff]  }
  0x25   : > { %3415 = vmatpush3.bf16.msra.mxu1 %v3442_v16  ;;  %3030 = vmatpush3.bf16.msra.mxu0 %v3442_v16  ;;  %v3518_v15 = vld [vmem:[%s4442_s1 + $0x1b0] sm:$0xff]  }
  0x26   : > { %3408 = vmatprep.subr.bf16.mxu1 %v3443_v17  ;;  %3031 = vmatprep.subr.bf16.mxu0 %v3443_v17  ;;  %v3519_v16 = vld [vmem:[%s4442_s1 + $0x270] sm:$0xff]   ;;  %v3520_v17 = vld [vmem:[%s3782_s13 + $0xec] ss:$56 sps:$4 sm:$0xff]  }
  0x29   : > { %3416 = vmatpush3.bf16.msra.mxu1 %v3444_v18  ;;  %3032 = vmatpush3.bf16.msra.mxu0 %v3444_v18  ;;  %v3522_v18 = vld [vmem:[%s4442_s1 + $0x230] sm:$0xff]  }
  0x2a   : > { %3081 = vmatprep.subr.bf16.mxu1 %v3451_v21  ;;  %3145 = vmatprep.subr.bf16.mxu0 %v3453_v22  ;;  %v3523_v21 = vld [vmem:[%s3782_s13 + $0xe8] ss:$56 sps:$4 sm:$0xff]  }
  0x2b   : > { %v3528_v22 = vld [vmem:[%s4442_s1 + $0x1a8] sm:$0xff]  }
  0x2c   : > { %1852 = vmatmul.mubr.bf16.vlgmr.msra.gmra.mxu1 %v3445_v19  ;;  %1820 = vmatmul.mubr.bf16.vlgmr.msra.gmra.mxu0 %v3448_v20  ;;  %v3524_v19 = vld [vmem:[%s3782_s13 + $0xf4] ss:$56 sps:$4 sm:$0xff]  }
  0x2d   : > { %3082 = vmatpush3.bf16.msra.mxu1 %v3452_v23  ;;  %3146 = vmatpush3.bf16.msra.mxu0 %v3454_v24  ;;  %v3526_v20 = vld [vmem:[%s4442_s1 + $0x1e8] sm:$0xff]  }
  0x2e   : > { %3083 = vmatprep.subr.bf16.mxu1 %v3455_v25  ;;  %3147 = vmatprep.subr.bf16.mxu0 %v3457_v26  ;;  %v3529_v23 = vld [vmem:[%s4442_s1 + $0x268] sm:$0xff]   ;;  %v3530_v25 = vld [vmem:[%s3782_s13 + $0x15c] ss:$56 sps:$4 sm:$0xff]  }
  0x2f   : > { %1859 = vmatprep.mubr.bf16.mxu1 %v3459_v27  ;;  %1827 = vmatprep.mubr.bf16.mxu0 %v3461_v29  ;;  %v3527_v24 = vld [vmem:[%s3782_s13 + $0xf0] ss:$56 sps:$4 sm:$0xff]   ;;  %v3534_v27 = vld [vmem:[%s3782_s13 + $0x164] ss:$56 sps:$4 sm:$0xff]  }
  0x30   : > { %v3532_v26 = vld [vmem:[%s4442_s1 + $0x228] sm:$0xff]   ;;  %v3538_v29 = vld [vmem:[%s4442_s1 + $0x1a0] sm:$0xff]  }
  0x31   : > { %3084 = vmatpush3.bf16.msra.mxu1 %v3456_v28  ;;  %3148 = vmatpush3.bf16.msra.mxu0 %v3458_v30  ;;  %v3536_v28 = vld [vmem:[%s4442_s1 + $0x1e0] sm:$0xff]   ;;  %v3533_v30 = vld [vmem:[%s3782_s13 + $0x158] ss:$56 sps:$4 sm:$0xff]  }
  0x32   : > { %3085 = vmatprep.subr.bf16.mxu1 %v3464_v31  ;;  %3149 = vmatprep.subr.bf16.mxu0 %v3467_v33  ;;  %v3539_v31 = vld [vmem:[%s4442_s1 + $0x260] sm:$0xff]  }
  0x33   : > { %v3540_v33 = vld [vmem:[%s3782_s13 + $0x1cc] ss:$56 sps:$4 sm:$0xff]  }
  0x34   : > { %1860 = vmatmul.mubr.bf16.gmra.mxu1 %v3463_v32  ;;  %1828 = vmatmul.mubr.bf16.gmra.mxu0 %v3465_v34  ;;  %v3537_v32 = vld [vmem:[%s3782_s13 + $0x160] ss:$56 sps:$4 sm:$0xff]  }
  0x35   : > { %3086 = vmatpush3.bf16.msra.mxu1 %v3466_v35  ;;  %3150 = vmatpush3.bf16.msra.mxu0 %v3468_v36  ;;  %v3542_v34 = vld [vmem:[%s4442_s1 + $0x220] sm:$0xff]   ;;  %v3544_v35 = vld [vmem:[%s3782_s13 + $0x1d4] ss:$56 sps:$4 sm:$0xff]   ;;  %v3546_v36 = vld [vmem:[%s4442_s1 + $0x1d8] sm:$0xff]  }
  0x36   : > { %3087 = vmatprep.subr.bf16.mxu1 %v3469_v37  ;;  %3151 = vmatprep.subr.bf16.mxu0 %v3471_v38  ;;  %v3548_v37 = vld [vmem:[%s4442_s1 + $0x198] sm:$0xff]  }
  0x37   : > { %1867 = vmatprep.mubr.bf16.mxu1 %v3473_v39  ;;  %1835 = vmatprep.mubr.bf16.mxu0 %v3475_v41  ;;  %v3549_v38 = vld [vmem:[%s4442_s1 + $0x258] sm:$0xff]   ;;  %v3543_v39 = vld [vmem:[%s3782_s13 + $0x1c8] ss:$56 sps:$4 sm:$0xff]  }
  0x38   : > { %v3547_v41 = vld [vmem:[%s3782_s13 + $0x1d0] ss:$56 sps:$4 sm:$0xff]  }
  0x39   : > { %3088 = vmatpush3.bf16.msra.mxu1 %v3470_v40  ;;  %3152 = vmatpush3.bf16.msra.mxu0 %v3472_v42  ;;  %v3552_v40 = vld [vmem:[%s4442_s1 + $0x218] sm:$0xff]  }
  0x3a   : > { %3089 = vmatprep.subr.bf16.mxu1 %v3478_v43  ;;  %3153 = vmatprep.subr.bf16.mxu0 %v3481_v46  ;;  %v3550_v42 = vld [vmem:[%s3782_s13 + $0x23c] ss:$56 sps:$4 sm:$0xff]  }
  0x3b   : > { %v3554_v43 = vld [vmem:[%s3782_s13 + $0x244] ss:$56 sps:$4 sm:$0xff]   ;;  %v3559_v46 = vld [vmem:[%s4442_s1 + $0x250] sm:$0xff]  }
  0x3c   : > { %1868 = vmatmul.mubr.bf16.gmra.mxu1 %v3477_v44  ;;  %1836 = vmatmul.mubr.bf16.gmra.mxu0 %v3479_v45  ;;  %v3556_v44 = vld [vmem:[%s4442_s1 + $0x1d0] sm:$0xff]  }
  0x3d   : > { %3090 = vmatpush3.bf16.msra.mxu1 %v3480_v47  ;;  %3154 = vmatpush3.bf16.msra.mxu0 %v3482_v48  ;;  %v3558_v45 = vld [vmem:[%s4442_s1 + $0x190] sm:$0xff]  }
  0x3e   : > { %3091 = vmatprep.subr.bf16.mxu1 %v3483_v49  ;;  %3155 = vmatprep.subr.bf16.mxu0 %v3485_v50  ;;  %v3562_v47 = vld [vmem:[%s4442_s1 + $0x210] sm:$0xff]   ;;  %v3557_v49 = vld [vmem:[%s3782_s13 + $0x240] ss:$56 sps:$4 sm:$0xff]   ;;  %v3560_v50 = vld [vmem:[%s3782_s13 + $0x2ac] ss:$56 sps:$4 sm:$0xff]  }
  0x3f   : > { %1875 = vmatprep.mubr.bf16.mxu1 %v3487_v51  ;;  %1843 = vmatprep.mubr.bf16.mxu0 %v3489_v52  ;;  %v3553_v48 = vld [vmem:[%s3782_s13 + $0x238] ss:$56 sps:$4 sm:$0xff]   ;;  %v3566_v51 = vld [vmem:[%s4442_s1 + $0x1c8] sm:$0xff]  }
  0x40   : > { %v3564_v52 = vld [vmem:[%s3782_s13 + $0x2b4] ss:$56 sps:$4 sm:$0xff]  }
  0x41   : > { %3092 = vmatpush3.bf16.msra.mxu1 %v3484_v53  ;;  %3156 = vmatpush3.bf16.msra.mxu0 %v3486_v54  ;;  %v3568_v53 = vld [vmem:[%s4442_s1 + $0x188] sm:$0xff]  }
  0x42   : > { %3093 = vmatprep.subr.bf16.mxu1 %v3492_v55  ;;  %3157 = vmatprep.subr.bf16.mxu0 %v3495_v58  ;;  %v3569_v54 = vld [vmem:[%s4442_s1 + $0x248] sm:$0xff]   ;;  %v3576_v58 = vld [vmem:[%s4442_s1 + $0x1c0] sm:$0xff]  }
  0x43   : > { %v3572_v55 = vld [vmem:[%s4442_s1 + $0x208] sm:$0xff]  }
  0x44   : > { %1876 = vmatmul.mubr.bf16.gmra.mxu1 %v3491_v56  ;;  %1844 = vmatmul.mubr.bf16.gmra.mxu0 %v3493_v57  ;;  %v3563_v56 = vld [vmem:[%s3782_s13 + $0x2a8] ss:$56 sps:$4 sm:$0xff]  }
  0x45   : > { %3094 = vmatpush3.bf16.msra.mxu1 %v3494_v59  ;;  %3158 = vmatpush3.bf16.msra.mxu0 %v3496_v60  ;;  %v3567_v57 = vld [vmem:[%s3782_s13 + $0x2b0] ss:$56 sps:$4 sm:$0xff]   ;;  %v3570_v59 = vld [vmem:[%s3782_s13 + $0x31c] ss:$56 sps:$4 sm:$0xff]  }
  0x46   : > { %3095 = vmatprep.subr.bf16.mxu1 %v3497_v61  ;;  %3159 = vmatprep.subr.bf16.mxu0 %v3499_v62  ;;  %v3574_v60 = vld [vmem:[%s3782_s13 + $0x324] ss:$56 sps:$4 sm:$0xff]  }
  0x47   : > { %1916 = vmatprep.mubr.bf16.mxu1 %v3503_v1  ;;  %2013 = vmatprep.mubr.bf16.mxu0 %v3506_v4  ;;  %v3578_v61 = vld [vmem:[%s4442_s1 + $0x180] sm:$0xff]   ;;  %v3573_v1 = vld [vmem:[%s3782_s13 + $0x318] ss:$56 sps:$4 sm:$0xff]  }
  0x48   : > { %v3579_v62 = vld [vmem:[%s4442_s1 + $0x240] sm:$0xff]  }
  0x49   : > { %3096 = vmatpush3.bf16.msra.mxu1 %v3498_v63  ;;  %3160 = vmatpush3.bf16.msra.mxu0 %v3500_v0  ;;  %v3580_v63 = vld [vmem:[%s4442_s1 + $0x200] sm:$0xff]   ;;  %v3587_v0 = vld [vmem:[%s4442_s1 + $0x2f8] sm:$0xff]  }
  0x4a   : > { %3209 = vmatprep.subr.bf16.mxu1 %v3507_v6  ;;  %3273 = vmatprep.subr.bf16.mxu0 %v3509_v8  ;;  %v3586_v4 = vld [vmem:[%s3782_s13 + $0x24] ss:$56 sps:$4 sm:$0xff]   ;;  %v3581_v6 = vld [vmem:[%s3782_s13 + $0x18] ss:$56 sps:$4 sm:$0xff]  }
  0x4b   : > { %v3588_v8 = vld [vmem:[%s4442_s1 + $0x2b8] sm:$0xff]  }
  0x4c   : > { %1917 = vmatmul.mubr.bf16.vlgmr.msra.gmra.mxu1 %v3501_v2  ;;  %2014 = vmatmul.mubr.bf16.vlgmr.msra.gmra.mxu0 %v3504_v3  ;;  %v3577_v2 = vld [vmem:[%s3782_s13 + $0x320] ss:$56 sps:$4 sm:$0xff]   ;;  %v3583_v3 = vld [vmem:[%s3782_s13 + $0x1c] ss:$56 sps:$4 sm:$0xff]  }
  0x4d   : > { %3210 = vmatpush3.bf16.msra.mxu1 %v3508_v7  ;;  %1924 = vmatprep.mubr.bf16.mxu1 %v3510_v9  ;;  %v3584_v7 = vld [vmem:[%s3782_s13 + $0x20] ss:$56 sps:$4 sm:$0xff]   ;;  %v3589_v9 = vld [vmem:[%s3782_s13 + $0x8c] ss:$56 sps:$4 sm:$0xff]  }
  0x4e   : > { %3274 = vmatpush3.bf16.msra.mxu0 %v3512_v10  ;;  %2021 = vmatprep.mubr.bf16.mxu0 %v3514_v11  ;;  %v3591_v10 = vld [vmem:[%s4442_s1 + $0x338] sm:$0xff]   ;;  %v3593_v11 = vld [vmem:[%s3782_s13 + $0x94] ss:$56 sps:$4 sm:$0xff]  }
  0x4f   : > { %3211 = vmatprep.subr.bf16.mxu1 %v3516_v13  ;;  %3275 = vmatprep.subr.bf16.mxu0 %v3519_v16  ;;  %v3597_v13 = vld [vmem:[%s4442_s1 + $0x2b0] sm:$0xff]   ;;  %v3592_v16 = vld [vmem:[%s3782_s13 + $0x88] ss:$56 sps:$4 sm:$0xff]  }
  0x51   : > { %3212 = vmatpush3.bf16.msra.mxu1 %v3518_v15  ;;  %v3604_v15 = vld [vmem:[%s4442_s1 + $0x2e8] sm:$0xff]  }
  0x52   : > { %3276 = vmatpush3.bf16.msra.mxu0 %v3522_v18  ;;  %3213 = vmatprep.subr.bf16.mxu1 %v3526_v20  ;;  %v3599_v18 = vld [vmem:[%s3782_s13 + $0xfc] ss:$56 sps:$4 sm:$0xff]   ;;  %v3606_v20 = vld [vmem:[%s4442_s1 + $0x2a8] sm:$0xff]  }
  0x53   : > { %3277 = vmatprep.subr.bf16.mxu0 %v3529_v23  ;;  %v3610_v23 = vld [vmem:[%s4442_s1 + $0x320] sm:$0xff]  }
  0x54   : > { %1925 = vmatmul.mubr.bf16.gmra.mxu1 %v3513_v12  ;;  %2022 = vmatmul.mubr.bf16.gmra.mxu0 %v3517_v14  ;;  %v3595_v12 = vld [vmem:[%s4442_s1 + $0x2f0] sm:$0xff]  }
  0x55   : > { %1932 = vmatprep.mubr.bf16.mxu1 %v3520_v17  ;;  %2029 = vmatprep.mubr.bf16.mxu0 %v3524_v19  ;;  %v3598_v14 = vld [vmem:[%s4442_s1 + $0x330] sm:$0xff]   ;;  %v3602_v19 = vld [vmem:[%s3782_s13 + $0x104] ss:$56 sps:$4 sm:$0xff]  }
  0x56   : > { %3214 = vmatpush3.bf16.msra.mxu1 %v3528_v22  ;;  %3278 = vmatpush3.bf16.msra.mxu0 %v3532_v26  ;;  %v3596_v17 = vld [vmem:[%s3782_s13 + $0x90] ss:$56 sps:$4 sm:$0xff]   ;;  %v3614_v22 = vld [vmem:[%s4442_s1 + $0x2e0] sm:$0xff]  }
  0x57   : > { %3215 = vmatprep.subr.bf16.mxu1 %v3536_v28  ;;  %3279 = vmatprep.subr.bf16.mxu0 %v3539_v31  ;;  %v3616_v26 = vld [vmem:[%s4442_s1 + $0x2a0] sm:$0xff]   ;;  %v3625_v31 = vld [vmem:[%s4442_s1 + $0x298] sm:$0xff]  }
  0x58   : > { %v3608_v28 = vld [vmem:[%s3782_s13 + $0x16c] ss:$56 sps:$4 sm:$0xff]  }
  0x5a   : > { %3216 = vmatpush3.bf16.msra.mxu1 %v3538_v29  ;;  %3280 = vmatpush3.bf16.msra.mxu0 %v3542_v34  ;;  %v3612_v29 = vld [vmem:[%s3782_s13 + $0x174] ss:$56 sps:$4 sm:$0xff]   ;;  %v3611_v34 = vld [vmem:[%s3782_s13 + $0x168] ss:$56 sps:$4 sm:$0xff]  }
  0x5b   : > { %3217 = vmatprep.subr.bf16.mxu1 %v3546_v36  ;;  %3281 = vmatprep.subr.bf16.mxu0 %v3549_v38  ;;  %v3635_v36 = vld [vmem:[%s4442_s1 + $0x290] sm:$0xff]   ;;  %v3621_v38 = vld [vmem:[%s3782_s13 + $0x1e4] ss:$56 sps:$4 sm:$0xff]  }
  0x5c   : > { %1933 = vmatmul.mubr.bf16.gmra.mxu1 %v3523_v21  ;;  %2030 = vmatmul.mubr.bf16.gmra.mxu0 %v3527_v24  ;;  %v3607_v21 = vld [vmem:[%s4442_s1 + $0x328] sm:$0xff]   ;;  %v3601_v24 = vld [vmem:[%s3782_s13 + $0xf8] ss:$56 sps:$4 sm:$0xff]  }
  0x5d   : > { %1940 = vmatprep.mubr.bf16.mxu1 %v3530_v25  ;;  %2037 = vmatprep.mubr.bf16.mxu0 %v3534_v27  ;;  %v3605_v25 = vld [vmem:[%s3782_s13 + $0x100] ss:$56 sps:$4 sm:$0xff]  }
  0x5e   : > { %3218 = vmatpush3.bf16.msra.mxu1 %v3548_v37  ;;  %3282 = vmatpush3.bf16.msra.mxu0 %v3552_v40  ;;  %v3623_v27 = vld [vmem:[%s4442_s1 + $0x2d8] sm:$0xff]   ;;  %v3642_v40 = vld [vmem:[%s4442_s1 + $0x2c8] sm:$0xff]  }
  0x5f   : > { %3219 = vmatprep.subr.bf16.mxu1 %v3556_v44  ;;  %3283 = vmatprep.subr.bf16.mxu0 %v3559_v46  ;;  %v3618_v37 = vld [vmem:[%s3782_s13 + $0x1dc] ss:$56 sps:$4 sm:$0xff]   ;;  %v3636_v44 = vld [vmem:[%s4442_s1 + $0x300] sm:$0xff]  }
  0x60   : > { %v3652_v46 = vld [vmem:[%s4442_s1 + $0x2c0] sm:$0xff]  }
  0x62   : > { %3220 = vmatpush3.bf16.msra.mxu1 %v3558_v45  ;;  %3284 = vmatpush3.bf16.msra.mxu0 %v3562_v47  ;;  %v3627_v45 = vld [vmem:[%s3782_s13 + $0x24c] ss:$56 sps:$4 sm:$0xff]  }
  0x63   : > { %3221 = vmatprep.subr.bf16.mxu1 %v3566_v51  ;;  %3285 = vmatprep.subr.bf16.mxu0 %v3569_v54  ;;  %v3631_v47 = vld [vmem:[%s3782_s13 + $0x254] ss:$56 sps:$4 sm:$0xff]   ;;  %v3630_v51 = vld [vmem:[%s3782_s13 + $0x248] ss:$56 sps:$4 sm:$0xff]   ;;  %v3640_v54 = vld [vmem:[%s3782_s13 + $0x2c4] ss:$56 sps:$4 sm:$0xff]  }
  0x64   : > { %1941 = vmatmul.mubr.bf16.gmra.mxu1 %v3533_v30  ;;  %2038 = vmatmul.mubr.bf16.gmra.mxu0 %v3537_v32  ;;  %v3617_v30 = vld [vmem:[%s4442_s1 + $0x318] sm:$0xff]   ;;  %v3633_v32 = vld [vmem:[%s4442_s1 + $0x2d0] sm:$0xff]  }
  0x65   : > { %1948 = vmatprep.mubr.bf16.mxu1 %v3540_v33  ;;  %2045 = vmatprep.mubr.bf16.mxu0 %v3544_v35  ;;  %v3626_v33 = vld [vmem:[%s4442_s1 + $0x310] sm:$0xff]  }
  0x66   : > { %3222 = vmatpush3.bf16.msra.mxu1 %v3568_v53  ;;  %3286 = vmatpush3.bf16.msra.mxu0 %v3572_v55  ;;  %v3615_v35 = vld [vmem:[%s3782_s13 + $0x170] ss:$56 sps:$4 sm:$0xff]   ;;  %v3637_v53 = vld [vmem:[%s3782_s13 + $0x2bc] ss:$56 sps:$4 sm:$0xff]  }
  0x67   : > { %3223 = vmatprep.subr.bf16.mxu1 %v3576_v58  ;;  %3287 = vmatprep.subr.bf16.mxu0 %v3579_v62  ;;  %v3655_v55 = vld [vmem:[%s4442_s1 + $0x348] sm:$0xff]   ;;  %v3643_v58 = vld [vmem:[%s3782_s13 + $0x2c0] ss:$56 sps:$4 sm:$0xff]  }
  0x68   : > { %v3659_v62 = vld [vmem:[%s3782_s13 + $0x2c] ss:$56 sps:$4 sm:$0xff]  }
  0x6a   : > { %3224 = vmatpush3.bf16.msra.mxu1 %v3578_v61  ;;  %3288 = vmatpush3.bf16.msra.mxu0 %v3580_v63  ;;  %v3653_v61 = vld [vmem:[%s3782_s13 + $0x330] ss:$56 sps:$4 sm:$0xff]   ;;  %v3662_v63 = vld [vmem:[%s3782_s13 + $0x34] ss:$56 sps:$4 sm:$0xff]  }
  0x6b   : > { %2369 = vmatprep.subr.bf16.mxu0 %v3713_v5  ;;  %3337 = vmatprep.subr.bf16.mxu1 %v3587_v0  ;;  %v2482_v0 = vld [vmem:[%s4175_s7] sm:$0xff] }
  0x6c   : > { %1949 = vmatmul.mubr.bf16.gmra.mxu1 %v3543_v39  ;;  %2046 = vmatmul.mubr.bf16.gmra.mxu0 %v3547_v41  ;;  %v3629_v39 = vld [vmem:[%s4442_s1 + $0x308] sm:$0xff]  }
  0x6d   : > { %1956 = vmatprep.mubr.bf16.mxu1 %v3550_v42  ;;  %2053 = vmatprep.mubr.bf16.mxu0 %v3554_v43  ;;  %v3644_v41 = vld [vmem:[%s4442_s1 + $0x288] sm:$0xff]   ;;  %v3620_v42 = vld [vmem:[%s3782_s13 + $0x1d8] ss:$56 sps:$4 sm:$0xff]  }
  0x6e   : > { %v3624_v43 = vld [vmem:[%s3782_s13 + $0x1e0] ss:$56 sps:$4 sm:$0xff]   ;;  %2500 = vperm.xlu0 %3427, %v2482_v0  }
  0x74   : > { %1957 = vmatmul.mubr.bf16.gmra.mxu1 %v3553_v48  ;;  %2054 = vmatmul.mubr.bf16.gmra.mxu0 %v3557_v49  ;;  %v3654_v48 = vld [vmem:[%s4442_s1 + $0x280] sm:$0xff]   ;;  %v3645_v49 = vld [vmem:[%s4442_s1 + $0x358] sm:$0xff]  }
  0x75   : > { %1964 = vmatprep.mubr.bf16.mxu1 %v3560_v50  ;;  %2061 = vmatprep.mubr.bf16.mxu0 %v3564_v52  ;;  %v3646_v50 = vld [vmem:[%s4442_s1 + $0x350] sm:$0xff]  }
  0x76   : > { %v3634_v52 = vld [vmem:[%s3782_s13 + $0x250] ss:$56 sps:$4 sm:$0xff]  }
  0x7c   : > { %1965 = vmatmul.mubr.bf16.gmra.mxu1 %v3563_v56  ;;  %2062 = vmatmul.mubr.bf16.gmra.mxu0 %v3567_v57  ;;  %v3656_v56 = vld [vmem:[%s4442_s1 + $0x340] sm:$0xff]   ;;  %v3639_v57 = vld [vmem:[%s3782_s13 + $0x2b8] ss:$56 sps:$4 sm:$0xff]  }
  0x7d   : > { %1972 = vmatprep.mubr.bf16.mxu1 %v3570_v59  ;;  %2069 = vmatprep.mubr.bf16.mxu0 %v3574_v60  ;;  %v3647_v59 = vld [vmem:[%s3782_s13 + $0x32c] ss:$56 sps:$4 sm:$0xff]  }
  0x7e   : > { %v3650_v60 = vld [vmem:[%s3782_s13 + $0x334] ss:$56 sps:$4 sm:$0xff]  }
  0x84   : > { %1973 = vmatmul.mubr.bf16.gmra.mxu1 %v3573_v1  ;;  %2070 = vmatmul.mubr.bf16.gmra.mxu0 %v3577_v2  ;;  %v2484_v1 = vld [vmem:[%s4175_s7 + $0x10] sm:$0xff]  ;;  %v2483_v2 = vld [vmem:[%s4175_s7 + $0x8] sm:$0xff] }
  0x85   : > { %2110 = vmatprep.mubr.bf16.mxu1 %v3583_v3  ;;  %2207 = vmatprep.mubr.bf16.mxu0 %v3586_v4  ;;  %v2485_v3 = vld [vmem:[%s4175_s7 + $0x18] sm:$0xff]  ;;  %v2487_v4 = vld [vmem:[%s4175_s7 + $0x28] sm:$0xff] }
  0x86   : > { %2510 = vperm.xlu1 %3428, %v2484_v1   ;;  %2505 = vperm.xlu0 %3427, %v2483_v2  }
  0x8a   : > { %2515 = vperm.xlu1 %3428, %v2485_v3  }
  0x8c   : > { %2111 = vmatmul.mubr.bf16.vlgmr.msra.gmra.mxu1 %v3581_v6  ;;  %2208 = vmatmul.mubr.bf16.vlgmr.msra.gmra.mxu0 %v3584_v7  ;;  %v2486_v6 = vld [vmem:[%s4175_s7 + $0x20] sm:$0xff] }
  0x8d   : > { %3338 = vmatpush3.bf16.msra.mxu1 %v3588_v8  ;;  %2118 = vmatprep.mubr.bf16.mxu1 %v3589_v9  ;;  %v3657_v7 = vld [vmem:[%s3782_s13 + $0x28] ss:$56 sps:$4 sm:$0xff]   ;;  %v3663_v9 = vld [vmem:[%s3782_s13 + $0x9c] ss:$56 sps:$4 sm:$0xff]  }
  0x8e   : > { %2370 = vmatpush1.bf16.msra.mxu0 %v3591_v10  ;;  %2215 = vmatprep.mubr.bf16.mxu0 %v3593_v11  ;;  %v3660_v8 = vld [vmem:[%s3782_s13 + $0x30] ss:$56 sps:$4 sm:$0xff]   ;;  %v3666_v10 = vld [vmem:[%s3782_s13 + $0xa4] ss:$56 sps:$4 sm:$0xff]  }
  0x8f   : > { %3339 = vmatprep.subr.bf16.mxu1 %v3595_v12  ;;  %2371 = vmatprep.subr.bf16.mxu0 %v3713_v5  ;;  %v2489_v11 = vld [vmem:[%s4175_s7 + $0x38] sm:$0xff]  ;;  %v2488_v12 = vld [vmem:[%s4175_s7 + $0x30] sm:$0xff] }
  0x90   : > { %2525 = vperm.xlu1 %3428, %v2487_v4   ;;  %2520 = vperm.xlu0 %3427, %v2486_v6  }
  0x91   : > { %3340 = vmatpush3.bf16.msra.mxu1 %v3597_v13  ;;  %v2491_v13 = vld [vmem:[%s4175_s7 + $0x48] sm:$0xff] }
  0x92   : > { %2372 = vmatpush1.bf16.msra.mxu0 %v3598_v14  ;;  %3341 = vmatprep.subr.bf16.mxu1 %v3604_v15  ;;  %v2490_v14 = vld [vmem:[%s4175_s7 + $0x40] sm:$0xff]  ;;  %v3665_v15 = vld [vmem:[%s3782_s13 + $0x98] ss:$56 sps:$4 sm:$0xff]  }
  0x93   : > { %2373 = vmatprep.subr.bf16.mxu0 %v3713_v5 }
  0x94   : > { %2119 = vmatmul.mubr.bf16.gmra.mxu1 %v3592_v16  ;;  %2216 = vmatmul.mubr.bf16.gmra.mxu0 %v3596_v17  ;;  %v3668_v16 = vld [vmem:[%s3782_s13 + $0xa0] ss:$56 sps:$4 sm:$0xff]   ;;  %v3669_v17 = vld [vmem:[%s3782_s13 + $0x10c] ss:$56 sps:$4 sm:$0xff]  }
  0x95   : > { %2126 = vmatprep.mubr.bf16.mxu1 %v3599_v18  ;;  %2223 = vmatprep.mubr.bf16.mxu0 %v3602_v19  ;;  %v3672_v18 = vld [vmem:[%s3782_s13 + $0x114] ss:$56 sps:$4 sm:$0xff]   ;;  %v2493_v19 = vld [vmem:[%s4175_s7 + $0x58] sm:$0xff] }
  0x96   : > { %3342 = vmatpush3.bf16.msra.mxu1 %v3606_v20  ;;  %2374 = vmatpush1.bf16.msra.mxu0 %v3607_v21  ;;  %v2492_v20 = vld [vmem:[%s4175_s7 + $0x50] sm:$0xff]  ;;  %v2495_v21 = vld [vmem:[%s4175_s7 + $0x68] sm:$0xff] }
  0x97   : > { %2375 = vmatprep.subr.bf16.mxu0 %v3713_v5  ;;  %3343 = vmatprep.subr.bf16.mxu1 %v3614_v22  ;;  %v2494_v22 = vld [vmem:[%s4175_s7 + $0x60] sm:$0xff] }
  0x98   : > { %2535 = vperm.xlu1 %3428, %v2489_v11   ;;  %2530 = vperm.xlu0 %3427, %v2488_v12  }
  0x9a   : > { %2376 = vmatpush1.bf16.msra.mxu0 %v3610_v23  ;;  %3344 = vmatpush3.bf16.msra.mxu1 %v3616_v26  ;;  %v3671_v23 = vld [vmem:[%s3782_s13 + $0x108] ss:$56 sps:$4 sm:$0xff]   ;;  %v3678_v26 = vld [vmem:[%s3782_s13 + $0x184] ss:$56 sps:$4 sm:$0xff]  }
  0x9b   : > { %2377 = vmatprep.subr.bf16.mxu0 %v3713_v5  ;;  %3345 = vmatprep.subr.bf16.mxu1 %v3623_v27  ;;  %v2497_v27 = vld [vmem:[%s4175_s7 + $0x78] sm:$0xff] }
  0x9c   : > { %2127 = vmatmul.mubr.bf16.gmra.mxu1 %v3601_v24  ;;  %2224 = vmatmul.mubr.bf16.gmra.mxu0 %v3605_v25  ;;  %v3674_v24 = vld [vmem:[%s3782_s13 + $0x110] ss:$56 sps:$4 sm:$0xff]   ;;  %v3675_v25 = vld [vmem:[%s3782_s13 + $0x17c] ss:$56 sps:$4 sm:$0xff]  }
  0x9d   : > { %2134 = vmatprep.mubr.bf16.mxu1 %v3608_v28  ;;  %2231 = vmatprep.mubr.bf16.mxu0 %v3612_v29  ;;  %v2496_v28 = vld [vmem:[%s4175_s7 + $0x70] sm:$0xff] }
  0x9e   : > { %2378 = vmatpush1.bf16.msra.mxu0 %v3617_v30  ;;  %3346 = vmatpush3.bf16.msra.mxu1 %v3625_v31  ;;  %v3677_v29 = vld [vmem:[%s3782_s13 + $0x178] ss:$56 sps:$4 sm:$0xff]   ;;  %v3681_v31 = vld [vmem:[%s3782_s13 + $0x1ec] ss:$56 sps:$4 sm:$0xff]  }
  0x9f   : > { %2379 = vmatprep.subr.bf16.mxu0 %v3713_v5  ;;  %3347 = vmatprep.subr.bf16.mxu1 %v3633_v32  ;;  %v3680_v30 = vld [vmem:[%s3782_s13 + $0x180] ss:$56 sps:$4 sm:$0xff]   ;;  %v3684_v32 = vld [vmem:[%s3782_s13 + $0x1f4] ss:$56 sps:$4 sm:$0xff]  }
  0xa0   : > { %2545 = vperm.xlu1 %3428, %v2491_v13   ;;  %2540 = vperm.xlu0 %3427, %v2490_v14   ;;  %v3701_v13 = vld [vmem:[%s3782_s13 + $0x338] ss:$56 sps:$4 sm:$0xff]  }
  0xa1   : > { %v3704_v14 = vld [vmem:[%s3782_s13 + $0x340] ss:$56 sps:$4 sm:$0xff]  }
  0xa2   : > { %2380 = vmatpush1.bf16.msra.mxu0 %v3626_v33  ;;  %3348 = vmatpush3.bf16.msra.mxu1 %v3635_v36  ;;  %v3683_v33 = vld [vmem:[%s3782_s13 + $0x1e8] ss:$56 sps:$4 sm:$0xff]   ;;  %v3690_v36 = vld [vmem:[%s3782_s13 + $0x264] ss:$56 sps:$4 sm:$0xff]  }
  0xa3   : > { %2381 = vmatprep.subr.bf16.mxu0 %v3713_v5  ;;  %3349 = vmatprep.subr.bf16.mxu1 %v3642_v40 }
  0xa4   : > { %2135 = vmatmul.mubr.bf16.gmra.mxu1 %v3611_v34  ;;  %2232 = vmatmul.mubr.bf16.gmra.mxu0 %v3615_v35  ;;  %v3686_v34 = vld [vmem:[%s3782_s13 + $0x1f0] ss:$56 sps:$4 sm:$0xff]   ;;  %v3687_v35 = vld [vmem:[%s3782_s13 + $0x25c] ss:$56 sps:$4 sm:$0xff]  }
  0xa5   : > { %2142 = vmatprep.mubr.bf16.mxu1 %v3618_v37  ;;  %2239 = vmatprep.mubr.bf16.mxu0 %v3621_v38 }
  0xa6   : > { %2382 = vmatpush1.bf16.msra.mxu0 %v3629_v39  ;;  %3350 = vmatpush3.bf16.msra.mxu1 %v3644_v41 }
  0xa7   : > { %2383 = vmatprep.subr.bf16.mxu0 %v3713_v5  ;;  %3351 = vmatprep.subr.bf16.mxu1 %v3652_v46  ;;  %v3692_v46 = vld [vmem:[%s3782_s13 + $0x260] ss:$56 sps:$4 sm:$0xff]  }
  0xa8   : > { %2555 = vperm.xlu1 %3428, %v2493_v19   ;;  %2550 = vperm.xlu0 %3427, %v2492_v20  }
  0xaa   : > { %2384 = vmatpush1.bf16.msra.mxu0 %v3636_v44  ;;  %3352 = vmatpush3.bf16.msra.mxu1 %v3654_v48  ;;  %v3696_v48 = vld [vmem:[%s3782_s13 + $0x2d4] ss:$56 sps:$4 sm:$0xff]  }
  0xab   : > { %2393 = vmatprep.subr.bf16.mxu0 %v3713_v5 }
  0xac   : > { %2143 = vmatmul.mubr.bf16.gmra.mxu1 %v3620_v42  ;;  %2240 = vmatmul.mubr.bf16.gmra.mxu0 %v3624_v43 }
  0xad   : > { %2150 = vmatprep.mubr.bf16.mxu1 %v3627_v45  ;;  %2247 = vmatprep.mubr.bf16.mxu0 %v3631_v47  ;;  %v3689_v45 = vld [vmem:[%s3782_s13 + $0x258] ss:$56 sps:$4 sm:$0xff]   ;;  %v3693_v47 = vld [vmem:[%s3782_s13 + $0x2cc] ss:$56 sps:$4 sm:$0xff]  }
  0xae   : > { %2394 = vmatpush2.bf16.msra.mxu0 %v3645_v49  ;;  %2565 = vperm.xlu1 %3428, %v2495_v21  }
  0xaf   : > { %2395 = vmatprep.subr.bf16.mxu0 %v3713_v5  ;;  %2560 = vperm.xlu0 %3427, %v2494_v22  }
  0xb2   : > { %2396 = vmatpush2.bf16.msra.mxu0 %v3646_v50  ;;  %2575 = vperm.xlu1 %3428, %v2497_v27  }
  0xb3   : > { %2397 = vmatprep.subr.bf16.mxu0 %v3713_v5  ;;  %2570 = vperm.xlu0 %3427, %v2496_v28  }
  0xb4   : > { %2151 = vmatmul.mubr.bf16.gmra.mxu1 %v3630_v51  ;;  %2248 = vmatmul.mubr.bf16.gmra.mxu0 %v3634_v52 }
  0xb5   : > { %2158 = vmatprep.mubr.bf16.mxu1 %v3637_v53  ;;  %2255 = vmatprep.mubr.bf16.mxu0 %v3640_v54 }
  0xb6   : > { %2398 = vmatpush2.bf16.msra.mxu0 %v3655_v55 }
  0xb7   : > { %2399 = vmatprep.subr.bf16.mxu0 %v3713_v5  ;;  %v3649_v5 = vld [vmem:[%s3782_s13 + $0x328] ss:$56 sps:$4 sm:$0xff]  }
  0xba   : > { %2400 = vmatpush2.bf16.msra.mxu0 %v3656_v56 }
  0xbc   : > { %2159 = vmatmul.mubr.bf16.gmra.mxu1 %v3639_v57  ;;  %2256 = vmatmul.mubr.bf16.gmra.mxu0 %v3643_v58 }
  0xbd   : > { %2166 = vmatprep.mubr.bf16.mxu1 %v3647_v59  ;;  %2263 = vmatprep.mubr.bf16.mxu0 %v3650_v60 }
  0xc4   : > { %2167 = vmatmul.mubr.bf16.gmra.mxu1 %v3649_v5  ;;  %2264 = vmatmul.mubr.bf16.gmra.mxu0 %v3653_v61  ;;  %v3695_v5 = vld [vmem:[%s3782_s13 + $0x2c8] ss:$56 sps:$4 sm:$0xff]  }
  0xc5   : > { %2304 = vmatprep.mubr.bf16.mxu1 %v3659_v62  ;;  %2975 = vmatprep.mubr.msk.bf16.mxu0 %vm1762_vm0, %v3662_v63  ;;  %v3698_v61 = vld [vmem:[%s3782_s13 + $0x2d0] ss:$56 sps:$4 sm:$0xff]   ;;  %v3699_v62 = vld [vmem:[%s3782_s13 + $0x33c] ss:$56 sps:$4 sm:$0xff]  }
  0xc6   : > { %v3702_v63 = vld [vmem:[%s3782_s13 + $0x344] ss:$56 sps:$4 sm:$0xff]  }
  0xcc   : > { %2305 = vmatmul.mubr.bf16.vlgmr.msra.gmra.mxu1 %v3657_v7  ;;  %2402 = vmatmul.mubr.bf16.vlgmr.msra.gmra.mxu0 %v3660_v8 }
  0xcd   : > { %2312 = vmatprep.mubr.bf16.mxu1 %v3663_v9  ;;  %2976 = vmatprep.mubr.msk.bf16.mxu0 %vm1762_vm0, %v3666_v10 }
  0xd4   : > { %2313 = vmatmul.mubr.bf16.gmra.mxu1 %v3665_v15  ;;  %2410 = vmatmul.mubr.bf16.gmra.mxu0 %v3668_v16 }
  0xd5   : > { %2320 = vmatprep.mubr.bf16.mxu1 %v3669_v17  ;;  %2977 = vmatprep.mubr.msk.bf16.mxu0 %vm1762_vm0, %v3672_v18 }
  0xdc   : > { %2321 = vmatmul.mubr.bf16.gmra.mxu1 %v3671_v23  ;;  %2418 = vmatmul.mubr.bf16.gmra.mxu0 %v3674_v24 }
  0xdd   : > { %2328 = vmatprep.mubr.bf16.mxu1 %v3675_v25  ;;  %2978 = vmatprep.mubr.msk.bf16.mxu0 %vm1762_vm0, %v3678_v26 }
  0xe4   : > { %2329 = vmatmul.mubr.bf16.gmra.mxu1 %v3677_v29  ;;  %2426 = vmatmul.mubr.bf16.gmra.mxu0 %v3680_v30 }
  0xe5   : > { %2336 = vmatprep.mubr.bf16.mxu1 %v3681_v31  ;;  %2979 = vmatprep.mubr.msk.bf16.mxu0 %vm1762_vm0, %v3684_v32 }
  0xec   : > { %v3057_v37 = vpop.f32.mrf.mxu1  ;;  %2337 = vmatmul.mubr.bf16.gmra.mxu1 %v3683_v33  ;;  %v3033_v38 = vpop.f32.mrf.mxu0  ;;  %2434 = vmatmul.mubr.bf16.gmra.mxu0 %v3686_v34  ;;  %v4270_v33 = vld [vmem:[%s4443_s2] ss:$0 sm:$0xff] }
  0xed   : > { %2344 = vmatprep.mubr.bf16.mxu1 %v3687_v35  ;;  %2980 = vmatprep.mubr.msk.bf16.mxu0 %vm1762_vm0, %v3690_v36 }
  0xee   : > { %v3058_v39 = vpop.f32.mrf.mxu1  ;;  %v3034_v40 = vpop.f32.mrf.mxu0 }
  0xef   : > { %v4223_v41 = vadd.f32 %v3058_v39, %v3057_v37  ;;  %v4225_v42 = vadd.f32 %v3034_v40, %v3033_v38 }
  0xf0   : > { %v3060_v43 = vpop.f32.mrf.mxu1  ;;  %v3036_v44 = vpop.f32.mrf.mxu0 }
  0xf1   : > { %v1822_v36 = vadd.f32 %v4225_v42, %v4270_v33 }
  0xf2   : > { %v3061_v49 = vpop.f32.mrf.mxu1  ;;  %v3037_v50 = vpop.f32.mrf.mxu0 }
  0xf3   : > { %v4231_v51 = vadd.f32 %v3061_v49, %v3060_v43  ;;  %v4233_v52 = vadd.f32 %v3037_v50, %v3036_v44 }
  0xf4   : > { %v3063_v53 = vpop.f32.mrf.mxu1  ;;  %2345 = vmatmul.mubr.bf16.gmra.mxu1 %v3689_v45  ;;  %v3039_v54 = vpop.f32.mrf.mxu0  ;;  %2442 = vmatmul.mubr.bf16.gmra.mxu0 %v3692_v46 }
  0xf5   : > { %2352 = vmatprep.mubr.bf16.mxu1 %v3693_v47  ;;  %2981 = vmatprep.mubr.msk.bf16.mxu0 %vm1762_vm0, %v3696_v48  ;;  %v1825_v46 = vadd.f32 %v4233_v52, %v4270_v33 }
  0xf6   : > { %v3064_v55 = vpop.f32.mrf.mxu1  ;;  %v3040_v56 = vpop.f32.mrf.mxu0 }
  0xf7   : > { %v4236_v57 = vadd.f32 %v3064_v55, %v3063_v53  ;;  %v4238_v58 = vadd.f32 %v3040_v56, %v3039_v54 }
  0xf8   : > { %v3066_v59 = vpop.f32.mrf.mxu1  ;;  %v3042_v60 = vpop.f32.mrf.mxu0 }
  0xf9   : > { %v1830_v42 = vadd.f32 %v4238_v58, %v4270_v33 }
  0xfa   : > { %v3067_v0 = vpop.f32.mrf.mxu1  ;;  %v3043_v1 = vpop.f32.mrf.mxu0 }
  0xfb   : > { %v4244_v2 = vadd.f32 %v3067_v0, %v3066_v59  ;;  %v4246_v3 = vadd.f32 %v3043_v1, %v3042_v60 }
  0xfc   : > { %v3069_v4 = vpop.f32.mrf.mxu1  ;;  %2353 = vmatmul.mubr.bf16.gmra.mxu1 %v3695_v5  ;;  %v3045_v6 = vpop.f32.mrf.mxu0  ;;  %2450 = vmatmul.mubr.bf16.gmra.mxu0 %v3698_v61 }
  0xfd   : > { %2360 = vmatprep.mubr.bf16.mxu1 %v3699_v62  ;;  %2982 = vmatprep.mubr.msk.bf16.mxu0 %vm1762_vm0, %v3702_v63  ;;  %v1833_v1 = vadd.f32 %v4246_v3, %v4270_v33 }
  0xfe   : > { %v3070_v7 = vpop.f32.mrf.mxu1  ;;  %v3046_v8 = vpop.f32.mrf.mxu0 }
  0xff   : > { %v4249_v9 = vadd.f32 %v3070_v7, %v3069_v4  ;;  %v4251_v10 = vadd.f32 %v3046_v8, %v3045_v6 }
 0x100   : > { %v3072_v11 = vpop.f32.mrf.mxu1  ;;  %v3048_v12 = vpop.f32.mrf.mxu0 }
 0x102   : > { %v3073_v15 = vpop.f32.mrf.mxu1  ;;  %v3049_v16 = vpop.f32.mrf.mxu0 }
 0x103   : > { %v4255_v17 = vadd.f32 %v3073_v15, %v3072_v11  ;;  %v4257_v18 = vadd.f32 %v3049_v16, %v3048_v12 }
 0x104   : > { %v3075_v19 = vpop.f32.mrf.mxu1  ;;  %2361 = vmatmul.mubr.bf16.gmra.mxu1 %v3701_v13  ;;  %v3051_v20 = vpop.f32.mrf.mxu0  ;;  %2458 = vmatmul.mubr.bf16.gmra.mxu0 %v3704_v14  ;;  %v1838_v14 = vadd.f32 %v4251_v10, %v4270_v33 }
 0x106   : > { %v3076_v21 = vpop.f32.mrf.mxu1  ;;  %v3052_v22 = vpop.f32.mrf.mxu0 }
 0x107   : > { %v4259_v23 = vadd.f32 %v3076_v21, %v3075_v19  ;;  %v4261_v24 = vadd.f32 %v3052_v22, %v3051_v20 }
 0x108   : > { %v3078_v25 = vpop.f32.mrf.mxu1  ;;  %v3054_v26 = vpop.f32.mrf.mxu0 }
 0x10a   : > { %v3079_v27 = vpop.f32.mrf.mxu1  ;;  %v3055_v28 = vpop.f32.mrf.mxu0 }
 0x10b   : > { %v4263_v29 = vadd.f32 %v3079_v27, %v3078_v25  ;;  %v4265_v30 = vadd.f32 %v3055_v28, %v3054_v26  ;;  %v1841_v26 = vadd.f32 %v4257_v18, %v4270_v33 }
 0x10c   : > { %v3097_v31 = vpop.f32.mrf.mxu1  ;;  %v3161_v32 = vpop.f32.mrf.mxu0 }
 0x10e   : > { %v3098_v34 = vpop.f32.mrf.mxu1  ;;  %v3162_v35 = vpop.f32.mrf.mxu0 }
 0x10f   : > { %v3099_v37 = vadd.f32 %v3098_v34, %v3097_v31  ;;  %v3163_v38 = vadd.f32 %v3162_v35, %v3161_v32 }
 0x110   : > { %v3100_v39 = vpop.f32.mrf.mxu1  ;;  %v3164_v40 = vpop.f32.mrf.mxu0 }
 0x111   : > { %v1919_v43 = vadd.f32 %v3099_v37, %v1822_v36  ;;  %v1846_v37 = vadd.f32 %v4261_v24, %v4270_v33 }
 0x112   : > { %v3101_v44 = vpop.f32.mrf.mxu1  ;;  %v3165_v45 = vpop.f32.mrf.mxu0 }
 0x113   : > { %v4276_v47 = vadd.f32 %v3163_v38, %v1919_v43  ;;  %v3102_v48 = vadd.f32 %v3101_v44, %v3100_v39  ;;  %v3166_v49 = vadd.f32 %v3165_v45, %v3164_v40 }
 0x114   : > { %v3103_v50 = vpop.f32.mrf.mxu1  ;;  %v3167_v53 = vpop.f32.mrf.mxu0 }
 0x115   : > { %v1922_v54 = vadd.f32 %v3102_v48, %v1825_v46  ;;  %v1849_v48 = vadd.f32 %v4265_v30, %v4270_v33 }
 0x116   : > { %v3104_v55 = vpop.f32.mrf.mxu1  ;;  %v3168_v56 = vpop.f32.mrf.mxu0 }
 0x117   : > { %v4280_v59 = vadd.f32 %v3166_v49, %v1922_v54  ;;  %v3105_v60 = vadd.f32 %v3104_v55, %v3103_v50  ;;  %v3169_v5 = vadd.f32 %v3168_v56, %v3167_v53 }
 0x118   : > { %v3106_v61 = vpop.f32.mrf.mxu1  ;;  %v3170_v62 = vpop.f32.mrf.mxu0 }
 0x119   : > { %v1927_v63 = vadd.f32 %v3105_v60, %v1830_v42  ;;  %v1854_v60 = vadd.f32 %v4223_v41, %v4270_v33 }
 0x11a   : > { %v3107_v52 = vpop.f32.mrf.mxu1  ;;  %v3171_v0 = vpop.f32.mrf.mxu0 }
 0x11b   : > { %v4284_v4 = vadd.f32 %v3169_v5, %v1927_v63  ;;  %v3108_v6 = vadd.f32 %v3107_v52, %v3106_v61  ;;  %v3172_v7 = vadd.f32 %v3171_v0, %v3170_v62 }
 0x11c   : > { %v3109_v8 = vpop.f32.mrf.mxu1  ;;  %v3173_v11 = vpop.f32.mrf.mxu0 }
 0x11d   : > { %v1930_v12 = vadd.f32 %v3108_v6, %v1833_v1  ;;  %v1857_v6 = vadd.f32 %v4231_v51, %v4270_v33 }
 0x11e   : > { %v3110_v58 = vpop.f32.mrf.mxu1  ;;  %v3174_v13 = vpop.f32.mrf.mxu0 }
 0x11f   : > { %v4288_v15 = vadd.f32 %v3172_v7, %v1930_v12  ;;  %v3111_v16 = vadd.f32 %v3110_v58, %v3109_v8  ;;  %v3175_v19 = vadd.f32 %v3174_v13, %v3173_v11 }
 0x120   : > { %v3112_v20 = vpop.f32.mrf.mxu1  ;;  %v3176_v21 = vpop.f32.mrf.mxu0 }
 0x121   : > { %v1935_v22 = vadd.f32 %v3111_v16, %v1838_v14  ;;  %v1862_v16 = vadd.f32 %v4236_v57, %v4270_v33 }
 0x122   : > { %v3113_v3 = vpop.f32.mrf.mxu1  ;;  %v3177_v25 = vpop.f32.mrf.mxu0 }
 0x123   : > { %v4292_v27 = vadd.f32 %v3175_v19, %v1935_v22  ;;  %v3114_v28 = vadd.f32 %v3113_v3, %v3112_v20  ;;  %v3178_v31 = vadd.f32 %v3177_v25, %v3176_v21 }
 0x124   : > { %v3115_v32 = vpop.f32.mrf.mxu1  ;;  %v3179_v34 = vpop.f32.mrf.mxu0 }
 0x125   : > { %v1938_v35 = vadd.f32 %v3114_v28, %v1841_v26  ;;  %v1865_v28 = vadd.f32 %v4244_v2, %v4270_v33 }
 0x126   : > { %v3116_v10 = vpop.f32.mrf.mxu1  ;;  %v3180_v36 = vpop.f32.mrf.mxu0 }
 0x127   : > { %v4296_v38 = vadd.f32 %v3178_v31, %v1938_v35  ;;  %v3117_v39 = vadd.f32 %v3116_v10, %v3115_v32  ;;  %v3181_v40 = vadd.f32 %v3180_v36, %v3179_v34 }
 0x128   : > { %v3118_v43 = vpop.f32.mrf.mxu1  ;;  %v3182_v44 = vpop.f32.mrf.mxu0 }
 0x129   : > { %v1943_v45 = vadd.f32 %v3117_v39, %v1846_v37  ;;  %v1870_v39 = vadd.f32 %v4249_v9, %v4270_v33 }
 0x12a   : > { %v3119_v18 = vpop.f32.mrf.mxu1  ;;  %v3183_v46 = vpop.f32.mrf.mxu0 }
 0x12b   : > { %v4300_v49 = vadd.f32 %v3181_v40, %v1943_v45  ;;  %v3120_v50 = vadd.f32 %v3119_v18, %v3118_v43  ;;  %v3184_v53 = vadd.f32 %v3183_v46, %v3182_v44 }
 0x12c   : > { %v3121_v54 = vpop.f32.mrf.mxu1  ;;  %v3185_v55 = vpop.f32.mrf.mxu0 }
 0x12d   : > { %v1946_v56 = vadd.f32 %v3120_v50, %v1849_v48  ;;  %v1873_v50 = vadd.f32 %v4255_v17, %v4270_v33 }
 0x12e   : > { %v3122_v24 = vpop.f32.mrf.mxu1  ;;  %v3186_v42 = vpop.f32.mrf.mxu0 }
 0x12f   : > { %v4304_v5 = vadd.f32 %v3184_v53, %v1946_v56  ;;  %v3123_v61 = vadd.f32 %v3122_v24, %v3121_v54  ;;  %v3187_v62 = vadd.f32 %v3186_v42, %v3185_v55 }
 0x130   : > { %v3124_v63 = vpop.f32.mrf.mxu1  ;;  %v3188_v52 = vpop.f32.mrf.mxu0 }
 0x131   : > { %v1951_v0 = vadd.f32 %v3123_v61, %v1854_v60  ;;  %v1878_v61 = vadd.f32 %v4259_v23, %v4270_v33 }
 0x132   : > { %v3125_v30 = vpop.f32.mrf.mxu1  ;;  %v3189_v1 = vpop.f32.mrf.mxu0 }
 0x133   : > { %v4308_v7 = vadd.f32 %v3187_v62, %v1951_v0  ;;  %v3126_v8 = vadd.f32 %v3125_v30, %v3124_v63  ;;  %v3190_v11 = vadd.f32 %v3189_v1, %v3188_v52 }
 0x134   : > { %v3127_v12 = vpop.f32.mrf.mxu1  ;;  %v3191_v58 = vpop.f32.mrf.mxu0 }
 0x135   : > { %v1954_v13 = vadd.f32 %v3126_v8, %v1857_v6  ;;  %v1881_v8 = vadd.f32 %v4263_v29, %v4270_v33 }
 0x136   : > { %v3128_v41 = vpop.f32.mrf.mxu1  ;;  %v3192_v14 = vpop.f32.mrf.mxu0 }
 0x137   : > { %v4312_v19 = vadd.f32 %v3190_v11, %v1954_v13  ;;  %v3129_v20 = vadd.f32 %v3128_v41, %v3127_v12  ;;  %v3193_v21 = vadd.f32 %v3192_v14, %v3191_v58 }
 0x138   : > { %v3130_v22 = vpop.f32.mrf.mxu1  ;;  %v3194_v3 = vpop.f32.mrf.mxu0 }
 0x139   : > { %v1959_v25 = vadd.f32 %v3129_v20, %v1862_v16 }
 0x13a   : > { %v3131_v51 = vpop.f32.mrf.mxu1  ;;  %v3195_v26 = vpop.f32.mrf.mxu0 }
 0x13b   : > { %v4316_v31 = vadd.f32 %v3193_v21, %v1959_v25  ;;  %v3132_v32 = vadd.f32 %v3131_v51, %v3130_v22  ;;  %v3196_v34 = vadd.f32 %v3195_v26, %v3194_v3 }
 0x13c   : > { %v3133_v35 = vpop.f32.mrf.mxu1  ;;  %v3197_v10 = vpop.f32.mrf.mxu0 }
 0x13d   : > { %v1962_v36 = vadd.f32 %v3132_v32, %v1865_v28 }
 0x13e   : > { %v3134_v57 = vpop.f32.mrf.mxu1  ;;  %v3198_v37 = vpop.f32.mrf.mxu0 }
 0x13f   : > { %v4320_v40 = vadd.f32 %v3196_v34, %v1962_v36  ;;  %v3135_v43 = vadd.f32 %v3134_v57, %v3133_v35  ;;  %v3199_v44 = vadd.f32 %v3198_v37, %v3197_v10 }
 0x140   : > { %v3136_v45 = vpop.f32.mrf.mxu1  ;;  %v3200_v18 = vpop.f32.mrf.mxu0 }
 0x141   : > { %v1967_v46 = vadd.f32 %v3135_v43, %v1870_v39 }
 0x142   : > { %v3137_v2 = vpop.f32.mrf.mxu1  ;;  %v3201_v48 = vpop.f32.mrf.mxu0 }
 0x143   : > { %v4324_v53 = vadd.f32 %v3199_v44, %v1967_v46  ;;  %v3138_v54 = vadd.f32 %v3137_v2, %v3136_v45  ;;  %v3202_v55 = vadd.f32 %v3201_v48, %v3200_v18 }
 0x144   : > { %v3139_v56 = vpop.f32.mrf.mxu1  ;;  %v3203_v24 = vpop.f32.mrf.mxu0 }
 0x145   : > { %v1970_v42 = vadd.f32 %v3138_v54, %v1873_v50 }
 0x146   : > { %v3140_v9 = vpop.f32.mrf.mxu1  ;;  %v3204_v60 = vpop.f32.mrf.mxu0 }
 0x147   : > { %v4328_v62 = vadd.f32 %v3202_v55, %v1970_v42  ;;  %v3141_v63 = vadd.f32 %v3140_v9, %v3139_v56  ;;  %v3205_v52 = vadd.f32 %v3204_v60, %v3203_v24 }
 0x148   : > { %v3142_v0 = vpop.f32.mrf.mxu1  ;;  %v3206_v30 = vpop.f32.mrf.mxu0 }
 0x149   : > { %v1975_v1 = vadd.f32 %v3141_v63, %v1878_v61 }
 0x14a   : > { %v3143_v17 = vpop.f32.mrf.mxu1  ;;  %v3207_v6 = vpop.f32.mrf.mxu0 }
 0x14b   : > { %v4332_v11 = vadd.f32 %v3205_v52, %v1975_v1  ;;  %v3144_v12 = vadd.f32 %v3143_v17, %v3142_v0  ;;  %v3208_v58 = vadd.f32 %v3207_v6, %v3206_v30 }
 0x14c   : > { %v3225_v13 = vpop.f32.mrf.mxu1  ;;  %v3289_v41 = vpop.f32.mrf.mxu0 }
 0x14d   : > { %v1978_v14 = vadd.f32 %v3144_v12, %v1881_v8 }
 0x14e   : > { %v3226_v23 = vpop.f32.mrf.mxu1  ;;  %v3290_v16 = vpop.f32.mrf.mxu0 }
 0x14f   : > { %v4334_v20 = vadd.f32 %v3208_v58, %v1978_v14  ;;  %v3227_v21 = vadd.f32 %v3226_v23, %v3225_v13  ;;  %v3291_v22 = vadd.f32 %v3290_v16, %v3289_v41 }
 0x150   : > { %v3228_v3 = vpop.f32.mrf.mxu1  ;;  %v3292_v25 = vpop.f32.mrf.mxu0 }
 0x151   : > { %v2113_v51 = vadd.f32 %v3227_v21, %v4276_v47 }
 0x152   : > { %v3229_v26 = vpop.f32.mrf.mxu1  ;;  %v3293_v28 = vpop.f32.mrf.mxu0 }
 0x153   : > { %v4337_v29 = vadd.f32 %v3291_v22, %v2113_v51  ;;  %v3230_v33 = vadd.f32 %v3229_v26, %v3228_v3  ;;  %v3294_v10 = vadd.f32 %v3293_v28, %v3292_v25 }
 0x154   : > { %v3231_v32 = vpop.f32.mrf.mxu1  ;;  %v3295_v34 = vpop.f32.mrf.mxu0 }
 0x155   : > { %v2116_v35 = vadd.f32 %v3230_v33, %v4280_v59 }
 0x156   : > { %v3232_v36 = vpop.f32.mrf.mxu1  ;;  %v3296_v57 = vpop.f32.mrf.mxu0 }
 0x157   : > { %v4340_v37 = vadd.f32 %v3294_v10, %v2116_v35  ;;  %v3233_v39 = vadd.f32 %v3232_v36, %v3231_v32  ;;  %v3297_v43 = vadd.f32 %v3296_v57, %v3295_v34 }
 0x158   : > { %v3234_v44 = vpop.f32.mrf.mxu1  ;;  %v3298_v45 = vpop.f32.mrf.mxu0 }
 0x159   : > { %v2121_v47 = vadd.f32 %v3233_v39, %v4284_v4 }
 0x15a   : > { %v3235_v18 = vpop.f32.mrf.mxu1  ;;  %v3299_v46 = vpop.f32.mrf.mxu0 }
 0x15b   : > { %v4343_v2 = vadd.f32 %v3297_v43, %v2121_v47  ;;  %v3236_v48 = vadd.f32 %v3235_v18, %v3234_v44  ;;  %v3300_v55 = vadd.f32 %v3299_v46, %v3298_v45 }
 0x15c   : > { %v3237_v50 = vpop.f32.mrf.mxu1  ;;  %v3301_v54 = vpop.f32.mrf.mxu0 }
 0x15d   : > { %v2124_v59 = vadd.f32 %v3236_v48, %v4288_v15 }
 0x15e   : > { %v3238_v56 = vpop.f32.mrf.mxu1  ;;  %v3302_v24 = vpop.f32.mrf.mxu0 }
 0x15f   : > { %v4346_v42 = vadd.f32 %v3300_v55, %v2124_v59  ;;  %v3239_v9 = vadd.f32 %v3238_v56, %v3237_v50  ;;  %v3303_v60 = vadd.f32 %v3302_v24, %v3301_v54 }
 0x160   : > { %v3240_v61 = vpop.f32.mrf.mxu1  ;;  %v3304_v63 = vpop.f32.mrf.mxu0 }
 0x161   : > { %v2129_v4 = vadd.f32 %v3239_v9, %v4292_v27 }
 0x162   : > { %v3241_v52 = vpop.f32.mrf.mxu1  ;;  %v3305_v0 = vpop.f32.mrf.mxu0 }
 0x163   : > { %v4349_v30 = vadd.f32 %v3303_v60, %v2129_v4  ;;  %v3242_v1 = vadd.f32 %v3241_v52, %v3240_v61  ;;  %v3306_v8 = vadd.f32 %v3305_v0, %v3304_v63 }
 0x164   : > { %v3243_v17 = vpop.f32.mrf.mxu1  ;;  %v3307_v6 = vpop.f32.mrf.mxu0 }
 0x165   : > { %v2132_v15 = vadd.f32 %v3242_v1, %v4296_v38 }
 0x166   : > { %v3244_v12 = vpop.f32.mrf.mxu1  ;;  %v3308_v58 = vpop.f32.mrf.mxu0 }
 0x167   : > { %v4352_v13 = vadd.f32 %v3306_v8, %v2132_v15  ;;  %v3245_v41 = vadd.f32 %v3244_v12, %v3243_v17  ;;  %v3309_v14 = vadd.f32 %v3308_v58, %v3307_v6 }
 0x168   : > { %v3246_v23 = vpop.f32.mrf.mxu1  ;;  %v3310_v16 = vpop.f32.mrf.mxu0 }
 0x169   : > { %v2137_v27 = vadd.f32 %v3245_v41, %v4300_v49 }
 0x16a   : > { %v3247_v21 = vpop.f32.mrf.mxu1  ;;  %v3311_v22 = vpop.f32.mrf.mxu0 }
 0x16b   : > { %v4355_v3 = vadd.f32 %v3309_v14, %v2137_v27  ;;  %v3248_v25 = vadd.f32 %v3247_v21, %v3246_v23  ;;  %v3312_v28 = vadd.f32 %v3311_v22, %v3310_v16 }
 0x16c   : > { %v3249_v51 = vpop.f32.mrf.mxu1  ;;  %v3313_v26 = vpop.f32.mrf.mxu0 }
 0x16d   : > { %v2140_v38 = vadd.f32 %v3248_v25, %v4304_v5 }
 0x16e   : > { %v3250_v33 = vpop.f32.mrf.mxu1  ;;  %v3314_v32 = vpop.f32.mrf.mxu0 }
 0x16f   : > { %v4358_v34 = vadd.f32 %v3312_v28, %v2140_v38  ;;  %v3251_v35 = vadd.f32 %v3250_v33, %v3249_v51  ;;  %v3315_v10 = vadd.f32 %v3314_v32, %v3313_v26 }
 0x170   : > { %v3252_v36 = vpop.f32.mrf.mxu1  ;;  %v3316_v57 = vpop.f32.mrf.mxu0 }
 0x171   : > { %v2145_v49 = vadd.f32 %v3251_v35, %v4308_v7 }
 0x172   : > { %v3253_v39 = vpop.f32.mrf.mxu1  ;;  %v3317_v43 = vpop.f32.mrf.mxu0 }
 0x173   : > { %v4361_v44 = vadd.f32 %v3315_v10, %v2145_v49  ;;  %v3254_v45 = vadd.f32 %v3253_v39, %v3252_v36  ;;  %v3318_v46 = vadd.f32 %v3317_v43, %v3316_v57 }
 0x174   : > { %v3255_v47 = vpop.f32.mrf.mxu1  ;;  %v3319_v18 = vpop.f32.mrf.mxu0 }
 0x175   : > { %v2148_v5 = vadd.f32 %v3254_v45, %v4312_v19 }
 0x176   : > { %v3256_v48 = vpop.f32.mrf.mxu1  ;;  %v3320_v50 = vpop.f32.mrf.mxu0 }
 0x177   : > { %v4364_v54 = vadd.f32 %v3318_v46, %v2148_v5  ;;  %v3257_v59 = vadd.f32 %v3256_v48, %v3255_v47  ;;  %v3321_v55 = vadd.f32 %v3320_v50, %v3319_v18  ;;  %v2501_v50 = vpop.permute.xlu0 %2500 }
 0x178   : > { %v3258_v56 = vpop.f32.mrf.mxu1  ;;  %v3322_v24 = vpop.f32.mrf.mxu0 }
 0x179   : > { %v2153_v7 = vadd.f32 %v3257_v59, %v4316_v31 }
 0x17a   : > { %v3259_v9 = vpop.f32.mrf.mxu1  ;;  %v3323_v60 = vpop.f32.mrf.mxu0 }
 0x17b   : > { %v4367_v61 = vadd.f32 %v3321_v55, %v2153_v7  ;;  %v3260_v63 = vadd.f32 %v3259_v9, %v3258_v56  ;;  %v3324_v0 = vadd.f32 %v3323_v60, %v3322_v24 }
 0x17c   : > { %v3261_v4 = vpop.f32.mrf.mxu1  ;;  %v3325_v52 = vpop.f32.mrf.mxu0 }
 0x17d   : > { %v2156_v19 = vadd.f32 %v3260_v63, %v4320_v40 }
 0x17e   : > { %v3262_v1 = vpop.f32.mrf.mxu1  ;;  %v3326_v17 = vpop.f32.mrf.mxu0 }
 0x17f   : > { %v4370_v6 = vadd.f32 %v3324_v0, %v2156_v19  ;;  %v3263_v15 = vadd.f32 %v3262_v1, %v3261_v4  ;;  %v3327_v8 = vadd.f32 %v3326_v17, %v3325_v52  ;;  %v2506_v0 = vpop.permute.xlu0 %2505 }
 0x180   : > { %v3264_v12 = vpop.f32.mrf.mxu1  ;;  %v3328_v58 = vpop.f32.mrf.mxu0 }
 0x181   : > { %v2161_v31 = vadd.f32 %v3263_v15, %v4324_v53 }
 0x182   : > { %v3265_v41 = vpop.f32.mrf.mxu1  ;;  %v3329_v14 = vpop.f32.mrf.mxu0 }
 0x183   : > { %v4373_v23 = vadd.f32 %v3327_v8, %v2161_v31  ;;  %v3266_v16 = vadd.f32 %v3265_v41, %v3264_v12  ;;  %v3330_v22 = vadd.f32 %v3329_v14, %v3328_v58  ;;  %v2511_v14 = vpop.permute.xlu1 %2510 }
 0x184   : > { %v3267_v27 = vpop.f32.mrf.mxu1  ;;  %v3331_v21 = vpop.f32.mrf.mxu0 }
 0x185   : > { %v2164_v40 = vadd.f32 %v3266_v16, %v4328_v62 }
 0x186   : > { %v3268_v25 = vpop.f32.mrf.mxu1  ;;  %v3332_v51 = vpop.f32.mrf.mxu0 }
 0x187   : > { %v4376_v26 = vadd.f32 %v3330_v22, %v2164_v40  ;;  %v3269_v38 = vadd.f32 %v3268_v25, %v3267_v27  ;;  %v3333_v28 = vadd.f32 %v3332_v51, %v3331_v21 }
 0x188   : > { %v3270_v33 = vpop.f32.mrf.mxu1  ;;  %v3334_v32 = vpop.f32.mrf.mxu0 }
 0x189   : > { %v2169_v53 = vadd.f32 %v3269_v38, %v4332_v11 }
 0x18a   : > { %v3271_v35 = vpop.f32.mrf.mxu1  ;;  %v3335_v10 = vpop.f32.mrf.mxu0 }
 0x18b   : > { %v4379_v36 = vadd.f32 %v3333_v28, %v2169_v53  ;;  %v3272_v57 = vadd.f32 %v3271_v35, %v3270_v33  ;;  %v3336_v43 = vadd.f32 %v3335_v10, %v3334_v32 }
 0x18c   : > { %v3353_v49 = vpop.f32.mrf.mxu1  ;;  %v2403_v39 = vpop.f32.mrf.mxu0 }
 0x18d   : > { %v2172_v62 = vadd.f32 %v3272_v57, %v4334_v20  ;;  %v2516_v57 = vpop.permute.xlu1 %2515 }
 0x18e   : > { %v3354_v45 = vpop.f32.mrf.mxu1  ;;  %v2405_v47 = vpop.f32.mrf.mxu0 }
 0x18f   : > { %v4382_v18 = vadd.f32 %v3336_v43, %v2172_v62  ;;  %v3355_v5 = vadd.f32 %v3354_v45, %v3353_v49 }
 0x190   : > { %v3356_v46 = vpop.f32.mrf.mxu1  ;;  %v2406_v48 = vpop.f32.mrf.mxu0 }
 0x191   : > { %v2307_v11 = vadd.f32 %v3355_v5, %v4337_v29 }
 0x192   : > { %v3357_v59 = vpop.f32.mrf.mxu1  ;;  %v2408_v55 = vpop.f32.mrf.mxu0 }
 0x193   : > { %v3358_v56 = vadd.f32 %v3357_v59, %v3356_v46  ;;  %v2404_v24 = vadd.f32 %v2403_v39, %v2307_v11  ;;  %v2521_v11 = vpop.permute.xlu0 %2520 }
 0x194   : > { %v3359_v7 = vpop.f32.mrf.mxu1  ;;  %v2411_v9 = vpop.f32.mrf.mxu0 }
 0x195   : > { %v2310_v20 = vadd.f32 %v3358_v56, %v4340_v37  ;;  %v2466_v60 = vmax.f32 %v2404_v24, 0.0 }
 0x196   : > { %v3360_v63 = vpop.f32.mrf.mxu1  ;;  %v2413_v4 = vpop.f32.mrf.mxu0 }
 0x197   : > { %v2578_v52 = vmul.f32 %v2501_v50, %v2466_v60  ;;  %v3361_v19 = vadd.f32 %v3360_v63, %v3359_v7  ;;  %v2407_v1 = vadd.f32 %v2406_v48, %v2310_v20  ;;  %v2526_v20 = vpop.permute.xlu1 %2525 }
 0x198   : > { %v3362_v29 = vpop.f32.mrf.mxu1  ;;  %v2414_v17 = vpop.f32.mrf.mxu0 }
 0x199   : > { %v3001_v15 = vpack.c.bf16 %v2578_v52, %v2578_v52  ;;  %v2315_v37 = vadd.f32 %v3361_v19, %v4343_v2  ;;  %v2467_v8 = vmax.f32 %v2407_v1, 0.0 }
 0x19a   : > { %v3363_v12 = vpop.f32.mrf.mxu1  ;;  %v2416_v58 = vpop.f32.mrf.mxu0 }
 0x19b   : > { %2659 = vst.msk [vmem:[%s4390_s12] sm:$0xf] %vm2658_vm1, %v3001_v15  ;;  %v2579_v31 = vmul.f32 %v2506_v0, %v2467_v8  ;;  %v3364_v41 = vadd.f32 %v3363_v12, %v3362_v29  ;;  %v2412_v16 = vadd.f32 %v2411_v9, %v2315_v37  ;;  %v2531_v37 = vpop.permute.xlu0 %2530 }
 0x19c   : > { %v3365_v27 = vpop.f32.mrf.mxu1  ;;  %v2419_v21 = vpop.f32.mrf.mxu0 }
 0x19d   : > { %v3002_v40 = vpack.c.bf16 %v2579_v31, %v2579_v31  ;;  %v2318_v22 = vadd.f32 %v3364_v41, %v4346_v42  ;;  %v2468_v25 = vmax.f32 %v2412_v16, 0.0 }
 0x19e   : > { %v3366_v51 = vpop.f32.mrf.mxu1  ;;  %v2421_v38 = vpop.f32.mrf.mxu0 }
 0x19f   : > { %2660 = vst.msk [vmem:[%s4390_s12 + $0x4] sm:$0xf] %vm2658_vm1, %v3002_v40  ;;  %v2580_v2 = vmul.f32 %v2511_v14, %v2468_v25  ;;  %v3367_v28 = vadd.f32 %v3366_v51, %v3365_v27  ;;  %v2415_v33 = vadd.f32 %v2414_v17, %v2318_v22 }
 0x1a0   : > { %v3368_v32 = vpop.f32.mrf.mxu1  ;;  %v2422_v53 = vpop.f32.mrf.mxu0 }
 0x1a1   : > { %v3003_v35 = vpack.c.bf16 %v2580_v2, %v2580_v2  ;;  %v2323_v10 = vadd.f32 %v3367_v28, %v4349_v30  ;;  %v2469_v49 = vmax.f32 %v2415_v33, 0.0 }
 0x1a2   : > { %v3369_v39 = vpop.f32.mrf.mxu1  ;;  %v2424_v62 = vpop.f32.mrf.mxu0 }
 0x1a3   : > { %2661 = vst.msk [vmem:[%s4390_s12 + $0x8] sm:$0xf] %vm2658_vm1, %v3003_v35  ;;  %v2581_v42 = vmul.f32 %v2516_v57, %v2469_v49  ;;  %v3370_v43 = vadd.f32 %v3369_v39, %v3368_v32  ;;  %v2420_v45 = vadd.f32 %v2419_v21, %v2323_v10  ;;  %v2536_v21 = vpop.permute.xlu1 %2535  ;;  %v2541_v35 = vpop.permute.xlu0 %2540 }
 0x1a4   : > { %v3371_v47 = vpop.f32.mrf.mxu1  ;;  %v2427_v5 = vpop.f32.mrf.mxu0 }
 0x1a5   : > { %v3004_v46 = vpack.c.bf16 %v2581_v42, %v2581_v42  ;;  %v2326_v48 = vadd.f32 %v3370_v43, %v4352_v13  ;;  %v2470_v50 = vmax.f32 %v2420_v45, 0.0 }
 0x1a6   : > { %v3372_v59 = vpop.f32.mrf.mxu1  ;;  %v2429_v30 = vpop.f32.mrf.mxu0 }
 0x1a7   : > { %2662 = vst.msk [vmem:[%s4390_s12 + $0xc] sm:$0xf] %vm2658_vm1, %v3004_v46  ;;  %v2423_v55 = vadd.f32 %v2422_v53, %v2326_v48  ;;  %v2582_v56 = vmul.f32 %v2521_v11, %v2470_v50  ;;  %v3373_v24 = vadd.f32 %v3372_v59, %v3371_v47  ;;  %v2546_v47 = vpop.permute.xlu1 %2545 }
 0x1a8   : > { %v3374_v7 = vpop.f32.mrf.mxu1  ;;  %v2430_v9 = vpop.f32.mrf.mxu0 }
 0x1a9   : > { %v2471_v60 = vmax.f32 %v2423_v55, 0.0  ;;  %v3005_v63 = vpack.c.bf16 %v2582_v56, %v2582_v56  ;;  %v2331_v4 = vadd.f32 %v3373_v24, %v4355_v3  ;;  %v2551_v24 = vpop.permute.xlu0 %2550 }
 0x1aa   : > { %v3375_v52 = vpop.f32.mrf.mxu1  ;;  %v2432_v13 = vpop.f32.mrf.mxu0 }
 0x1ab   : > { %v2583_v19 = vmul.f32 %v2526_v20, %v2471_v60  ;;  %2663 = vst.msk [vmem:[%s4390_s12 + $0x10] sm:$0xf] %vm2658_vm1, %v3005_v63  ;;  %v2428_v0 = vadd.f32 %v2427_v5, %v2331_v4  ;;  %v3376_v1 = vadd.f32 %v3375_v52, %v3374_v7 }
 0x1ac   : > { %v3377_v29 = vpop.f32.mrf.mxu1  ;;  %v2435_v17 = vpop.f32.mrf.mxu0 }
 0x1ad   : > { %v3006_v15 = vpack.c.bf16 %v2583_v19, %v2583_v19  ;;  %v2472_v8 = vmax.f32 %v2428_v0, 0.0  ;;  %v2334_v12 = vadd.f32 %v3376_v1, %v4358_v34  ;;  %v2556_v0 = vpop.permute.xlu1 %2555 }
 0x1ae   : > { %v3378_v58 = vpop.f32.mrf.mxu1  ;;  %v2437_v31 = vpop.f32.mrf.mxu0 }
 0x1af   : > { %2664 = vst.msk [vmem:[%s4390_s12 + $0x14] sm:$0xf] %vm2658_vm1, %v3006_v15  ;;  %v2584_v3 = vmul.f32 %v2531_v37, %v2472_v8  ;;  %v2431_v41 = vadd.f32 %v2430_v9, %v2334_v12  ;;  %v3379_v14 = vadd.f32 %v3378_v58, %v3377_v29 }
 0x1b0   : > { %v3380_v16 = vpop.f32.mrf.mxu1  ;;  %v2438_v27 = vpop.f32.mrf.mxu0 }
 0x1b1   : > { %v3007_v40 = vpack.c.bf16 %v2584_v3, %v2584_v3  ;;  %v2473_v22 = vmax.f32 %v2431_v41, 0.0  ;;  %v2339_v25 = vadd.f32 %v3379_v14, %v4361_v44  ;;  %v2561_v3 = vpop.permute.xlu0 %2560 }
 0x1b2   : > { %v3381_v51 = vpop.f32.mrf.mxu1  ;;  %v2440_v38 = vpop.f32.mrf.mxu0 }
 0x1b3   : > { %2665 = vst.msk [vmem:[%s4390_s12 + $0x18] sm:$0xf] %vm2658_vm1, %v3007_v40  ;;  %v2585_v34 = vmul.f32 %v2536_v21, %v2473_v22  ;;  %v2436_v2 = vadd.f32 %v2435_v17, %v2339_v25  ;;  %v3382_v28 = vadd.f32 %v3381_v51, %v3380_v16  ;;  %v2566_v38 = vpop.permute.xlu1 %2565 }
 0x1b4   : > { %v3383_v33 = vpop.f32.mrf.mxu1  ;;  %v2443_v32 = vpop.f32.mrf.mxu0 }
 0x1b5   : > { %v3008_v53 = vpack.c.bf16 %v2585_v34, %v2585_v34  ;;  %v2474_v10 = vmax.f32 %v2436_v2, 0.0  ;;  %v2342_v57 = vadd.f32 %v3382_v28, %v4364_v54 }
 0x1b6   : > { %v3384_v49 = vpop.f32.mrf.mxu1  ;;  %v2445_v39 = vpop.f32.mrf.mxu0 }
 0x1b7   : > { %2666 = vst.msk [vmem:[%s4390_s12 + $0x1c] sm:$0xf] %vm2658_vm1, %v3008_v53  ;;  %v2586_v44 = vmul.f32 %v2541_v35, %v2474_v10  ;;  %v2439_v62 = vadd.f32 %v2438_v27, %v2342_v57  ;;  %v3385_v42 = vadd.f32 %v3384_v49, %v3383_v33  ;;  %v2571_v39 = vpop.permute.xlu0 %2570 }
 0x1b8   : > { %v3386_v43 = vpop.f32.mrf.mxu1  ;;  %v2446_v45 = vpop.f32.mrf.mxu0 }
 0x1b9   : > { %v3009_v5 = vpack.c.bf16 %v2586_v44, %v2586_v44  ;;  %v2475_v46 = vmax.f32 %v2439_v62, 0.0  ;;  %v2347_v48 = vadd.f32 %v3385_v42, %v4367_v61 }
 0x1ba   : > { %v3387_v11 = vpop.f32.mrf.mxu1  ;;  %v2448_v50 = vpop.f32.mrf.mxu0 }
 0x1bb   : > { %2667 = vst.msk [vmem:[%s4390_s12 + $0x20] sm:$0xf] %vm2658_vm1, %v3009_v5  ;;  %v2587_v54 = vmul.f32 %v2546_v47, %v2475_v46  ;;  %v2444_v59 = vadd.f32 %v2443_v32, %v2347_v48  ;;  %v3388_v30 = vadd.f32 %v3387_v11, %v3386_v43  ;;  %v2576_v43 = vpop.permute.xlu1 %2575 }
 0x1bc   : > { %v3389_v55 = vpop.f32.mrf.mxu1  ;;  %v2451_v56 = vpop.f32.mrf.mxu0 }
 0x1bd   : > { %v3010_v7 = vpack.c.bf16 %v2587_v54, %v2587_v54  ;;  %v2476_v9 = vmax.f32 %v2444_v59, 0.0  ;;  %v2350_v20 = vadd.f32 %v3388_v30, %v4370_v6 }
 0x1be   : > { %v3390_v60 = vpop.f32.mrf.mxu1  ;;  %v2453_v63 = vpop.f32.mrf.mxu0 }
 0x1bf   : > { %2668 = vst.msk [vmem:[%s4390_s12 + $0x24] sm:$0xf] %vm2658_vm1, %v3010_v7  ;;  %v2588_v61 = vmul.f32 %v2551_v24, %v2476_v9  ;;  %v2447_v4 = vadd.f32 %v2446_v45, %v2350_v20  ;;  %v3391_v52 = vadd.f32 %v3390_v60, %v3389_v55 }
 0x1c0   : > { %v3392_v13 = vpop.f32.mrf.mxu1  ;;  %v2454_v19 = vpop.f32.mrf.mxu0 }
 0x1c1   : > { %v3011_v1 = vpack.c.bf16 %v2588_v61, %v2588_v61  ;;  %v2477_v29 = vmax.f32 %v2447_v4, 0.0  ;;  %v2355_v17 = vadd.f32 %v3391_v52, %v4373_v23 }
 0x1c2   : > { %v3393_v15 = vpop.f32.mrf.mxu1  ;;  %v2456_v37 = vpop.f32.mrf.mxu0 }
 0x1c3   : > { %2669 = vst.msk [vmem:[%s4390_s12 + $0x28] sm:$0xf] %vm2658_vm1, %v3011_v1  ;;  %v2589_v6 = vmul.f32 %v2556_v0, %v2477_v29  ;;  %v2452_v8 = vadd.f32 %v2451_v56, %v2355_v17  ;;  %v3394_v12 = vadd.f32 %v3393_v15, %v3392_v13 }
 0x1c4   : > { %v3395_v58 = vpop.f32.mrf.mxu1  ;;  %v2459_v31 = vpop.f32.mrf.mxu0 }
 0x1c5   : > { %v3012_v41 = vpack.c.bf16 %v2589_v6, %v2589_v6  ;;  %v2478_v14 = vmax.f32 %v2452_v8, 0.0  ;;  %v2358_v16 = vadd.f32 %v3394_v12, %v4376_v26 }
 0x1c6   : > { %v3396_v27 = vpop.f32.mrf.mxu1  ;;  %v2461_v21 = vpop.f32.mrf.mxu0 }
 0x1c7   : > { %2670 = vst.msk [vmem:[%s4390_s12 + $0x2c] sm:$0xf] %vm2658_vm1, %v3012_v41  ;;  %v2590_v23 = vmul.f32 %v2561_v3, %v2478_v14  ;;  %v2455_v40 = vadd.f32 %v2454_v19, %v2358_v16  ;;  %v3397_v22 = vadd.f32 %v3396_v27, %v3395_v58 }
 0x1c8   : > { %v3398_v25 = vpop.f32.mrf.mxu1  ;;  %v2462_v51 = vpop.f32.mrf.mxu0 }
 0x1c9   : > { %v3013_v34 = vpack.c.bf16 %v2590_v23, %v2590_v23  ;;  %v2479_v2 = vmax.f32 %v2455_v40, 0.0  ;;  %v2363_v28 = vadd.f32 %v3397_v22, %v4379_v36 }
 0x1ca   : > { %v3399_v33 = vpop.f32.mrf.mxu1  ;;  %v2464_v32 = vpop.f32.mrf.mxu0 }
 0x1cb   : > { %2671 = vst.msk [vmem:[%s4390_s12 + $0x30] sm:$0xf] %vm2658_vm1, %v3013_v34  ;;  %v2591_v26 = vmul.f32 %v2566_v38, %v2479_v2  ;;  %v2460_v53 = vadd.f32 %v2459_v31, %v2363_v28  ;;  %v3400_v35 = vadd.f32 %v3399_v33, %v3398_v25 }
 0x1cd   : > { %v3014_v10 = vpack.c.bf16 %v2591_v26, %v2591_v26  ;;  %v2480_v57 = vmax.f32 %v2460_v53, 0.0  ;;  %v2366_v49 = vadd.f32 %v3400_v35, %v4382_v18 }
 0x1cf   : > { %2672 = vst.msk [vmem:[%s4390_s12 + $0x34] sm:$0xf] %vm2658_vm1, %v3014_v10  ;;  %v2592_v44 = vmul.f32 %v2571_v39, %v2480_v57  ;;  %v2463_v62 = vadd.f32 %v2462_v51, %v2366_v49 }
 0x1d1   : > { %v3015_v42 = vpack.c.bf16 %v2592_v44, %v2592_v44  ;;  %v2481_v36 = vmax.f32 %v2463_v62, 0.0 }
 0x1d3   : > { %2673 = vst.msk [vmem:[%s4390_s12 + $0x38] sm:$0xf] %vm2658_vm1, %v3015_v42  ;;  %v2593_v45 = vmul.f32 %v2576_v43, %v2481_v36 }
 0x1d5   : > { %v3016_v47 = vpack.c.bf16 %v2593_v45, %v2593_v45 }
 0x1d7   : > { %2674 = vst.msk [vmem:[%s4390_s12 + $0x3c] sm:$0xf] %vm2658_vm1, %v3016_v47 }
 0x1d8 PF: > { %s14_s15 = sadd.s32 1, %s3711_s15  }
 0x1d9   : > { %p11_p4 = scmp.ge.s32.totalorder %s14_s15, 4  }
 0x1db   :  { %13 = sbr.rel (!%p11_p4) target bundleno = 1 (0x1), region = 69 }

// kernel: custom-call.14
= control target key start
LH: loop header
LB: loop body
LE: loop exit
PB: predicated region body
PF: predicated region fallthrough
CT: control target
= control target key end

     0   :  { %s6_s0 = inlined_call_operand.vmem [shape: u32[384], index: 0, kind: output, shape index: {}]  }

// kernel: _forward_jit.20
= control target key start
LH: loop header
LB: loop body
LE: loop exit
PB: predicated region body
PF: predicated region fallthrough
CT: control target
= control target key end

     0   :  { %v3410_v5 = vmov 0   ;;  %vm1553_vm0 = vcmask 523264   ;;  %vm2449_vm1 = vcmask 519168   ;;  %s4395_s1 = inlined_call_operand.vmem [shape: bf16[1728,64], index: 1, kind: input, shape index: {}]   ;;  %s4396_s0 = inlined_call_operand.vmem [shape: bf16[128,1728], index: 0, kind: input, shape index: {}]   ;;  %s4397_s3 = inlined_call_operand.vmem [shape: f32[128,1], index: 3, kind: input, shape index: {}]   ;;  %s4398_s2 = inlined_call_operand.vmem [shape: f32[1,64], index: 2, kind: input, shape index: {}]   ;;  %s4399_s4 = inlined_call_operand.vmem [shape: bf16[128,64], index: 4, kind: output, shape index: {}]  }
   0x1   :  { %v3134_v0 = vld [vmem:[%s4395_s1 + $0x78] sm:$0xff]   ;;  %v3136_v2 = vld [vmem:[%s4395_s1 + $0x70] sm:$0xff]   ;;  %v3138_v4 = vld [vmem:[%s4395_s1 + $0x68] sm:$0xff]   ;;  %3132 = vset.pattern.permute.xlu0 %v3410_v5  ;;  %3133 = vset.pattern.permute.xlu1 %v3410_v5 }
   0x2   :  { %v3135_v1 = vld [vmem:[%s4395_s1 + $0x38] sm:$0xff]   ;;  %3115 = vmatprep.subr.bf16.mxu1 %v3134_v0  ;;  %2731 = vmatprep.subr.bf16.mxu0 %v3134_v0  ;;  %v3137_v3 = vld [vmem:[%s4395_s1 + $0x30] sm:$0xff]   ;;  %v3139_v6 = vld [vmem:[%s4395_s1 + $0x28] sm:$0xff]  }
   0x3   :  { %3123 = vmatpush3.bf16.msra.mxu1 %v3135_v1  ;;  %2732 = vmatpush3.bf16.msra.mxu0 %v3135_v1  ;;  %v3140_v7 = vld [vmem:[%s4395_s1 + $0x60] sm:$0xff]   ;;  %v3142_v9 = vld [vmem:[%s4395_s1 + $0x58] sm:$0xff]   ;;  %v3144_v11 = vld [vmem:[%s4395_s1 + $0x50] sm:$0xff]  }
   0x4   :  { %3116 = vmatprep.subr.bf16.mxu1 %v3136_v2  ;;  %2733 = vmatprep.subr.bf16.mxu0 %v3136_v2  ;;  %v3141_v8 = vld [vmem:[%s4395_s1 + $0x20] sm:$0xff]   ;;  %v3143_v10 = vld [vmem:[%s4395_s1 + $0x18] sm:$0xff]   ;;  %v3145_v14 = vld [vmem:[%s4395_s1 + $0x10] sm:$0xff]  }
   0x5   :  { %v3152_v12 = vld [vmem:[%s4396_s0 + $0x1c4] ss:$56 sps:$4 sm:$0xff]   ;;  %v3146_v15 = vld [vmem:[%s4395_s1 + $0x48] sm:$0xff]   ;;  %v3150_v19 = vld [vmem:[%s4396_s0 + $0x1c0] ss:$56 sps:$4 sm:$0xff]  }
   0x6   :  { %v3155_v13 = vld [vmem:[%s4396_s0 + $0x4] ss:$56 sps:$4 sm:$0xff]   ;;  %1642 = vmatprep.mubr.bf16.mxu1 %v3152_v12  ;;  %v3147_v16 = vld [vmem:[%s4395_s1 + $0x8] sm:$0xff]   ;;  %v3153_v20 = vld [vmem:[%s4396_s0] ss:$56 sps:$4 sm:$0xff]  }
   0x7   :  { %3124 = vmatpush3.bf16.msra.mxu1 %v3137_v3  ;;  %2734 = vmatpush3.bf16.msra.mxu0 %v3137_v3  ;;  %v3148_v17 = vld [vmem:[%s4395_s1 + $0x40] sm:$0xff]   ;;  %v3156_v21 = vld [vmem:[%s4395_s1 + $0xf8] sm:$0xff]   ;;  %v3160_v25 = vld [vmem:[%s4395_s1 + $0xf0] sm:$0xff]  }
   0x8   :  { %3117 = vmatprep.subr.bf16.mxu1 %v3138_v4  ;;  %2735 = vmatprep.subr.bf16.mxu0 %v3138_v4  ;;  %v3149_v18 = vld [vmem:[%s4395_s1] sm:$0xff]   ;;  %v3158_v22 = vld [vmem:[%s4395_s1 + $0x178] sm:$0xff]   ;;  %v3162_v26 = vld [vmem:[%s4395_s1 + $0x170] sm:$0xff]  }
   0x9   :  { %1610 = vmatprep.mubr.bf16.mxu0 %v3155_v13  ;;  %v3157_v23 = vld [vmem:[%s4395_s1 + $0xb8] sm:$0xff]   ;;  %v3164_v27 = vld [vmem:[%s4396_s0 + $0x234] ss:$56 sps:$4 sm:$0xff]   ;;  %v3168_v32 = vld [vmem:[%s4396_s0 + $0x230] ss:$56 sps:$4 sm:$0xff]  }
   0xa   :  { %v3159_v24 = vld [vmem:[%s4395_s1 + $0x138] sm:$0xff]   ;;  %v3161_v28 = vld [vmem:[%s4395_s1 + $0xb0] sm:$0xff]   ;;  %v3169_v31 = vld [vmem:[%s4395_s1 + $0xe8] sm:$0xff]  }
   0xb   :  { %3125 = vmatpush3.bf16.msra.mxu1 %v3139_v6  ;;  %2736 = vmatpush3.bf16.msra.mxu0 %v3139_v6  ;;  %v3166_v29 = vld [vmem:[%s4396_s0 + $0x74] ss:$56 sps:$4 sm:$0xff]   ;;  %v3170_v34 = vld [vmem:[%s4396_s0 + $0x70] ss:$56 sps:$4 sm:$0xff]   ;;  %v3174_v37 = vld [vmem:[%s4395_s1 + $0xe0] sm:$0xff]  }
   0xc   :  { %3118 = vmatprep.subr.bf16.mxu1 %v3140_v7  ;;  %2737 = vmatprep.subr.bf16.mxu0 %v3140_v7  ;;  %v3163_v30 = vld [vmem:[%s4395_s1 + $0x130] sm:$0xff]   ;;  %v3172_v33 = vld [vmem:[%s4395_s1 + $0x168] sm:$0xff]   ;;  %v3176_v38 = vld [vmem:[%s4395_s1 + $0x160] sm:$0xff]  }
   0xd   :  { %v3171_v35 = vld [vmem:[%s4395_s1 + $0xa8] sm:$0xff]   ;;  %v3178_v39 = vld [vmem:[%s4396_s0 + $0x2a4] ss:$56 sps:$4 sm:$0xff]   ;;  %v3182_v44 = vld [vmem:[%s4396_s0 + $0x2a0] ss:$56 sps:$4 sm:$0xff]  }
   0xe   :  { %v3173_v36 = vld [vmem:[%s4395_s1 + $0x128] sm:$0xff]   ;;  %v3175_v40 = vld [vmem:[%s4395_s1 + $0xa0] sm:$0xff]   ;;  %v3183_v43 = vld [vmem:[%s4395_s1 + $0xd8] sm:$0xff]  }
   0xf   :  { %3126 = vmatpush3.bf16.msra.mxu1 %v3141_v8  ;;  %2738 = vmatpush3.bf16.msra.mxu0 %v3141_v8  ;;  %v3180_v41 = vld [vmem:[%s4396_s0 + $0xe4] ss:$56 sps:$4 sm:$0xff]   ;;  %v3184_v45 = vld [vmem:[%s4396_s0 + $0xe0] ss:$56 sps:$4 sm:$0xff]   ;;  %v3188_v49 = vld [vmem:[%s4395_s1 + $0xd0] sm:$0xff]  }
  0x10   :  { %3119 = vmatprep.subr.bf16.mxu1 %v3142_v9  ;;  %2739 = vmatprep.subr.bf16.mxu0 %v3142_v9  ;;  %v3177_v42 = vld [vmem:[%s4395_s1 + $0x120] sm:$0xff]   ;;  %v3186_v46 = vld [vmem:[%s4395_s1 + $0x158] sm:$0xff]   ;;  %v3190_v50 = vld [vmem:[%s4395_s1 + $0x150] sm:$0xff]  }
  0x11   :  { %v3185_v47 = vld [vmem:[%s4395_s1 + $0x98] sm:$0xff]   ;;  %v3192_v51 = vld [vmem:[%s4396_s0 + $0x314] ss:$56 sps:$4 sm:$0xff]   ;;  %v3196_v56 = vld [vmem:[%s4396_s0 + $0x310] ss:$56 sps:$4 sm:$0xff]  }
  0x12   :  { %v3187_v48 = vld [vmem:[%s4395_s1 + $0x118] sm:$0xff]   ;;  %v3194_v52 = vld [vmem:[%s4396_s0 + $0x154] ss:$56 sps:$4 sm:$0xff]   ;;  %v3198_v57 = vld [vmem:[%s4396_s0 + $0x150] ss:$56 sps:$4 sm:$0xff]  }
  0x13   :  { %3127 = vmatpush3.bf16.msra.mxu1 %v3143_v10  ;;  %2740 = vmatpush3.bf16.msra.mxu0 %v3143_v10  ;;  %v3189_v53 = vld [vmem:[%s4395_s1 + $0x90] sm:$0xff]   ;;  %v3197_v55 = vld [vmem:[%s4395_s1 + $0xc8] sm:$0xff]   ;;  %v3202_v61 = vld [vmem:[%s4395_s1 + $0xc0] sm:$0xff]  }
  0x14   :  { %3120 = vmatprep.subr.bf16.mxu1 %v3144_v11  ;;  %2741 = vmatprep.subr.bf16.mxu0 %v3144_v11  ;;  %v3191_v54 = vld [vmem:[%s4395_s1 + $0x110] sm:$0xff]   ;;  %v3200_v58 = vld [vmem:[%s4395_s1 + $0x148] sm:$0xff]   ;;  %v3204_v62 = vld [vmem:[%s4395_s1 + $0x140] sm:$0xff]  }
  0x15   :  { %v3199_v59 = vld [vmem:[%s4395_s1 + $0x88] sm:$0xff]   ;;  %v3203_v63 = vld [vmem:[%s4395_s1 + $0x80] sm:$0xff]   ;;  %v3212_v6 = vld [vmem:[%s4395_s1 + $0x1f8] sm:$0xff]  }
  0x16   :  { %v3201_v60 = vld [vmem:[%s4395_s1 + $0x108] sm:$0xff]   ;;  %v3205_v0 = vld [vmem:[%s4395_s1 + $0x100] sm:$0xff]   ;;  %v3213_v7 = vld [vmem:[%s4395_s1 + $0x1b8] sm:$0xff]  }
  0x17   :  { %3128 = vmatpush3.bf16.msra.mxu1 %v3145_v14  ;;  %2742 = vmatpush3.bf16.msra.mxu0 %v3145_v14  ;;  %v3208_v1 = vld [vmem:[%s4396_s0 + $0xc] ss:$56 sps:$4 sm:$0xff]   ;;  %v3206_v2 = vld [vmem:[%s4396_s0 + $0x8] ss:$56 sps:$4 sm:$0xff]   ;;  %v3214_v8 = vld [vmem:[%s4395_s1 + $0x278] sm:$0xff]  }
  0x18   :  { %3121 = vmatprep.subr.bf16.mxu1 %v3146_v15  ;;  %2743 = vmatprep.subr.bf16.mxu0 %v3146_v15  ;;  %v3209_v3 = vld [vmem:[%s4396_s0 + $0x10] ss:$56 sps:$4 sm:$0xff]   ;;  %v3211_v4 = vld [vmem:[%s4396_s0 + $0x14] ss:$56 sps:$4 sm:$0xff]   ;;  %v3217_v10 = vld [vmem:[%s4395_s1 + $0x238] sm:$0xff]  }
  0x19   :  { %v3215_v9 = vld [vmem:[%s4396_s0 + $0x7c] ss:$56 sps:$4 sm:$0xff]   ;;  %v3218_v12 = vld [vmem:[%s4396_s0 + $0x78] ss:$56 sps:$4 sm:$0xff]  }
  0x1a   :  { %v3219_v11 = vld [vmem:[%s4396_s0 + $0x84] ss:$56 sps:$4 sm:$0xff]   ;;  %v3221_v13 = vld [vmem:[%s4395_s1 + $0x1f0] sm:$0xff]   ;;  %v3222_v14 = vld [vmem:[%s4396_s0 + $0x80] ss:$56 sps:$4 sm:$0xff]  }
  0x1b   :  { %3129 = vmatpush3.bf16.msra.mxu1 %v3147_v16  ;;  %2744 = vmatpush3.bf16.msra.mxu0 %v3147_v16  ;;  %v3223_v15 = vld [vmem:[%s4395_s1 + $0x1b0] sm:$0xff]  }
  0x1c   :  { %3122 = vmatprep.subr.bf16.mxu1 %v3148_v17  ;;  %2745 = vmatprep.subr.bf16.mxu0 %v3148_v17  ;;  %v3224_v16 = vld [vmem:[%s4395_s1 + $0x270] sm:$0xff]   ;;  %v3225_v17 = vld [vmem:[%s4396_s0 + $0xec] ss:$56 sps:$4 sm:$0xff]  }
  0x1f   :  { %3130 = vmatpush3.bf16.msra.mxu1 %v3149_v18  ;;  %2746 = vmatpush3.bf16.msra.mxu0 %v3149_v18  ;;  %v3227_v18 = vld [vmem:[%s4395_s1 + $0x230] sm:$0xff]  }
  0x20   :  { %2795 = vmatprep.subr.bf16.mxu1 %v3156_v21  ;;  %2859 = vmatprep.subr.bf16.mxu0 %v3158_v22  ;;  %v3228_v21 = vld [vmem:[%s4396_s0 + $0xe8] ss:$56 sps:$4 sm:$0xff]  }
  0x21   :  { %v3233_v22 = vld [vmem:[%s4395_s1 + $0x1a8] sm:$0xff]  }
  0x22   :  { %1643 = vmatmul.mubr.bf16.vlgmr.msra.gmra.mxu1 %v3150_v19  ;;  %1611 = vmatmul.mubr.bf16.vlgmr.msra.gmra.mxu0 %v3153_v20  ;;  %v3229_v19 = vld [vmem:[%s4396_s0 + $0xf4] ss:$56 sps:$4 sm:$0xff]  }
  0x23   :  { %2796 = vmatpush3.bf16.msra.mxu1 %v3157_v23  ;;  %2860 = vmatpush3.bf16.msra.mxu0 %v3159_v24  ;;  %v3231_v20 = vld [vmem:[%s4395_s1 + $0x1e8] sm:$0xff]  }
  0x24   :  { %2797 = vmatprep.subr.bf16.mxu1 %v3160_v25  ;;  %2861 = vmatprep.subr.bf16.mxu0 %v3162_v26  ;;  %v3234_v23 = vld [vmem:[%s4395_s1 + $0x268] sm:$0xff]   ;;  %v3235_v25 = vld [vmem:[%s4396_s0 + $0x15c] ss:$56 sps:$4 sm:$0xff]  }
  0x25   :  { %1650 = vmatprep.mubr.bf16.mxu1 %v3164_v27  ;;  %1618 = vmatprep.mubr.bf16.mxu0 %v3166_v29  ;;  %v3232_v24 = vld [vmem:[%s4396_s0 + $0xf0] ss:$56 sps:$4 sm:$0xff]   ;;  %v3239_v27 = vld [vmem:[%s4396_s0 + $0x164] ss:$56 sps:$4 sm:$0xff]  }
  0x26   :  { %v3237_v26 = vld [vmem:[%s4395_s1 + $0x228] sm:$0xff]   ;;  %v3243_v29 = vld [vmem:[%s4395_s1 + $0x1a0] sm:$0xff]  }
  0x27   :  { %2798 = vmatpush3.bf16.msra.mxu1 %v3161_v28  ;;  %2862 = vmatpush3.bf16.msra.mxu0 %v3163_v30  ;;  %v3241_v28 = vld [vmem:[%s4395_s1 + $0x1e0] sm:$0xff]   ;;  %v3238_v30 = vld [vmem:[%s4396_s0 + $0x158] ss:$56 sps:$4 sm:$0xff]  }
  0x28   :  { %2799 = vmatprep.subr.bf16.mxu1 %v3169_v31  ;;  %2863 = vmatprep.subr.bf16.mxu0 %v3172_v33  ;;  %v3244_v31 = vld [vmem:[%s4395_s1 + $0x260] sm:$0xff]  }
  0x29   :  { %v3245_v33 = vld [vmem:[%s4396_s0 + $0x1cc] ss:$56 sps:$4 sm:$0xff]  }
  0x2a   :  { %1651 = vmatmul.mubr.bf16.gmra.mxu1 %v3168_v32  ;;  %1619 = vmatmul.mubr.bf16.gmra.mxu0 %v3170_v34  ;;  %v3242_v32 = vld [vmem:[%s4396_s0 + $0x160] ss:$56 sps:$4 sm:$0xff]  }
  0x2b   :  { %2800 = vmatpush3.bf16.msra.mxu1 %v3171_v35  ;;  %2864 = vmatpush3.bf16.msra.mxu0 %v3173_v36  ;;  %v3247_v34 = vld [vmem:[%s4395_s1 + $0x220] sm:$0xff]   ;;  %v3249_v35 = vld [vmem:[%s4396_s0 + $0x1d4] ss:$56 sps:$4 sm:$0xff]   ;;  %v3251_v36 = vld [vmem:[%s4395_s1 + $0x1d8] sm:$0xff]  }
  0x2c   :  { %2801 = vmatprep.subr.bf16.mxu1 %v3174_v37  ;;  %2865 = vmatprep.subr.bf16.mxu0 %v3176_v38  ;;  %v3253_v37 = vld [vmem:[%s4395_s1 + $0x198] sm:$0xff]  }
  0x2d   :  { %1658 = vmatprep.mubr.bf16.mxu1 %v3178_v39  ;;  %1626 = vmatprep.mubr.bf16.mxu0 %v3180_v41  ;;  %v3254_v38 = vld [vmem:[%s4395_s1 + $0x258] sm:$0xff]   ;;  %v3248_v39 = vld [vmem:[%s4396_s0 + $0x1c8] ss:$56 sps:$4 sm:$0xff]  }
  0x2e   :  { %v3252_v41 = vld [vmem:[%s4396_s0 + $0x1d0] ss:$56 sps:$4 sm:$0xff]  }
  0x2f   :  { %2802 = vmatpush3.bf16.msra.mxu1 %v3175_v40  ;;  %2866 = vmatpush3.bf16.msra.mxu0 %v3177_v42  ;;  %v3257_v40 = vld [vmem:[%s4395_s1 + $0x218] sm:$0xff]  }
  0x30   :  { %2803 = vmatprep.subr.bf16.mxu1 %v3183_v43  ;;  %2867 = vmatprep.subr.bf16.mxu0 %v3186_v46  ;;  %v3255_v42 = vld [vmem:[%s4396_s0 + $0x23c] ss:$56 sps:$4 sm:$0xff]  }
  0x31   :  { %v3259_v43 = vld [vmem:[%s4396_s0 + $0x244] ss:$56 sps:$4 sm:$0xff]   ;;  %v3264_v46 = vld [vmem:[%s4395_s1 + $0x250] sm:$0xff]  }
  0x32   :  { %1659 = vmatmul.mubr.bf16.gmra.mxu1 %v3182_v44  ;;  %1627 = vmatmul.mubr.bf16.gmra.mxu0 %v3184_v45  ;;  %v3261_v44 = vld [vmem:[%s4395_s1 + $0x1d0] sm:$0xff]  }
  0x33   :  { %2804 = vmatpush3.bf16.msra.mxu1 %v3185_v47  ;;  %2868 = vmatpush3.bf16.msra.mxu0 %v3187_v48  ;;  %v3263_v45 = vld [vmem:[%s4395_s1 + $0x190] sm:$0xff]  }
  0x34   :  { %2805 = vmatprep.subr.bf16.mxu1 %v3188_v49  ;;  %2869 = vmatprep.subr.bf16.mxu0 %v3190_v50  ;;  %v3267_v47 = vld [vmem:[%s4395_s1 + $0x210] sm:$0xff]   ;;  %v3262_v49 = vld [vmem:[%s4396_s0 + $0x240] ss:$56 sps:$4 sm:$0xff]   ;;  %v3265_v50 = vld [vmem:[%s4396_s0 + $0x2ac] ss:$56 sps:$4 sm:$0xff]  }
  0x35   :  { %1666 = vmatprep.mubr.bf16.mxu1 %v3192_v51  ;;  %1634 = vmatprep.mubr.bf16.mxu0 %v3194_v52  ;;  %v3258_v48 = vld [vmem:[%s4396_s0 + $0x238] ss:$56 sps:$4 sm:$0xff]   ;;  %v3271_v51 = vld [vmem:[%s4395_s1 + $0x1c8] sm:$0xff]  }
  0x36   :  { %v3269_v52 = vld [vmem:[%s4396_s0 + $0x2b4] ss:$56 sps:$4 sm:$0xff]  }
  0x37   :  { %2806 = vmatpush3.bf16.msra.mxu1 %v3189_v53  ;;  %2870 = vmatpush3.bf16.msra.mxu0 %v3191_v54  ;;  %v3273_v53 = vld [vmem:[%s4395_s1 + $0x188] sm:$0xff]  }
  0x38   :  { %2807 = vmatprep.subr.bf16.mxu1 %v3197_v55  ;;  %2871 = vmatprep.subr.bf16.mxu0 %v3200_v58  ;;  %v3274_v54 = vld [vmem:[%s4395_s1 + $0x248] sm:$0xff]   ;;  %v3281_v58 = vld [vmem:[%s4395_s1 + $0x1c0] sm:$0xff]  }
  0x39   :  { %v3277_v55 = vld [vmem:[%s4395_s1 + $0x208] sm:$0xff]  }
  0x3a   :  { %1667 = vmatmul.mubr.bf16.gmra.mxu1 %v3196_v56  ;;  %1635 = vmatmul.mubr.bf16.gmra.mxu0 %v3198_v57  ;;  %v3268_v56 = vld [vmem:[%s4396_s0 + $0x2a8] ss:$56 sps:$4 sm:$0xff]  }
  0x3b   :  { %2808 = vmatpush3.bf16.msra.mxu1 %v3199_v59  ;;  %2872 = vmatpush3.bf16.msra.mxu0 %v3201_v60  ;;  %v3272_v57 = vld [vmem:[%s4396_s0 + $0x2b0] ss:$56 sps:$4 sm:$0xff]   ;;  %v3275_v59 = vld [vmem:[%s4396_s0 + $0x31c] ss:$56 sps:$4 sm:$0xff]  }
  0x3c   :  { %2809 = vmatprep.subr.bf16.mxu1 %v3202_v61  ;;  %2873 = vmatprep.subr.bf16.mxu0 %v3204_v62  ;;  %v3279_v60 = vld [vmem:[%s4396_s0 + $0x324] ss:$56 sps:$4 sm:$0xff]  }
  0x3d   :  { %1707 = vmatprep.mubr.bf16.mxu1 %v3208_v1  ;;  %1804 = vmatprep.mubr.bf16.mxu0 %v3211_v4  ;;  %v3283_v61 = vld [vmem:[%s4395_s1 + $0x180] sm:$0xff]   ;;  %v3278_v1 = vld [vmem:[%s4396_s0 + $0x318] ss:$56 sps:$4 sm:$0xff]  }
  0x3e   :  { %v3284_v62 = vld [vmem:[%s4395_s1 + $0x240] sm:$0xff]  }
  0x3f   :  { %2810 = vmatpush3.bf16.msra.mxu1 %v3203_v63  ;;  %2874 = vmatpush3.bf16.msra.mxu0 %v3205_v0  ;;  %v3285_v63 = vld [vmem:[%s4395_s1 + $0x200] sm:$0xff]   ;;  %v3292_v0 = vld [vmem:[%s4395_s1 + $0x2f8] sm:$0xff]  }
  0x40   :  { %2923 = vmatprep.subr.bf16.mxu1 %v3212_v6  ;;  %2987 = vmatprep.subr.bf16.mxu0 %v3214_v8  ;;  %v3291_v4 = vld [vmem:[%s4396_s0 + $0x24] ss:$56 sps:$4 sm:$0xff]   ;;  %v3286_v6 = vld [vmem:[%s4396_s0 + $0x18] ss:$56 sps:$4 sm:$0xff]  }
  0x41   :  { %v3293_v8 = vld [vmem:[%s4395_s1 + $0x2b8] sm:$0xff]  }
  0x42   :  { %1708 = vmatmul.mubr.bf16.vlgmr.msra.gmra.mxu1 %v3206_v2  ;;  %1805 = vmatmul.mubr.bf16.vlgmr.msra.gmra.mxu0 %v3209_v3  ;;  %v3282_v2 = vld [vmem:[%s4396_s0 + $0x320] ss:$56 sps:$4 sm:$0xff]   ;;  %v3288_v3 = vld [vmem:[%s4396_s0 + $0x1c] ss:$56 sps:$4 sm:$0xff]  }
  0x43   :  { %2924 = vmatpush3.bf16.msra.mxu1 %v3213_v7  ;;  %1715 = vmatprep.mubr.bf16.mxu1 %v3215_v9  ;;  %v3289_v7 = vld [vmem:[%s4396_s0 + $0x20] ss:$56 sps:$4 sm:$0xff]   ;;  %v3294_v9 = vld [vmem:[%s4396_s0 + $0x8c] ss:$56 sps:$4 sm:$0xff]  }
  0x44   :  { %2988 = vmatpush3.bf16.msra.mxu0 %v3217_v10  ;;  %1812 = vmatprep.mubr.bf16.mxu0 %v3219_v11  ;;  %v3296_v10 = vld [vmem:[%s4395_s1 + $0x338] sm:$0xff]   ;;  %v3298_v11 = vld [vmem:[%s4396_s0 + $0x94] ss:$56 sps:$4 sm:$0xff]  }
  0x45   :  { %2925 = vmatprep.subr.bf16.mxu1 %v3221_v13  ;;  %2989 = vmatprep.subr.bf16.mxu0 %v3224_v16  ;;  %v3302_v13 = vld [vmem:[%s4395_s1 + $0x2b0] sm:$0xff]   ;;  %v3297_v16 = vld [vmem:[%s4396_s0 + $0x88] ss:$56 sps:$4 sm:$0xff]  }
  0x47   :  { %2926 = vmatpush3.bf16.msra.mxu1 %v3223_v15  ;;  %v3309_v15 = vld [vmem:[%s4395_s1 + $0x2e8] sm:$0xff]  }
  0x48   :  { %2990 = vmatpush3.bf16.msra.mxu0 %v3227_v18  ;;  %2927 = vmatprep.subr.bf16.mxu1 %v3231_v20  ;;  %v3304_v18 = vld [vmem:[%s4396_s0 + $0xfc] ss:$56 sps:$4 sm:$0xff]   ;;  %v3311_v20 = vld [vmem:[%s4395_s1 + $0x2a8] sm:$0xff]  }
  0x49   :  { %2991 = vmatprep.subr.bf16.mxu0 %v3234_v23  ;;  %v3315_v23 = vld [vmem:[%s4395_s1 + $0x320] sm:$0xff]  }
  0x4a   :  { %1716 = vmatmul.mubr.bf16.gmra.mxu1 %v3218_v12  ;;  %1813 = vmatmul.mubr.bf16.gmra.mxu0 %v3222_v14  ;;  %v3300_v12 = vld [vmem:[%s4395_s1 + $0x2f0] sm:$0xff]  }
  0x4b   :  { %1723 = vmatprep.mubr.bf16.mxu1 %v3225_v17  ;;  %1820 = vmatprep.mubr.bf16.mxu0 %v3229_v19  ;;  %v3303_v14 = vld [vmem:[%s4395_s1 + $0x330] sm:$0xff]   ;;  %v3307_v19 = vld [vmem:[%s4396_s0 + $0x104] ss:$56 sps:$4 sm:$0xff]  }
  0x4c   :  { %2928 = vmatpush3.bf16.msra.mxu1 %v3233_v22  ;;  %2992 = vmatpush3.bf16.msra.mxu0 %v3237_v26  ;;  %v3301_v17 = vld [vmem:[%s4396_s0 + $0x90] ss:$56 sps:$4 sm:$0xff]   ;;  %v3319_v22 = vld [vmem:[%s4395_s1 + $0x2e0] sm:$0xff]  }
  0x4d   :  { %2929 = vmatprep.subr.bf16.mxu1 %v3241_v28  ;;  %2993 = vmatprep.subr.bf16.mxu0 %v3244_v31  ;;  %v3321_v26 = vld [vmem:[%s4395_s1 + $0x2a0] sm:$0xff]   ;;  %v3330_v31 = vld [vmem:[%s4395_s1 + $0x298] sm:$0xff]  }
  0x4e   :  { %v3313_v28 = vld [vmem:[%s4396_s0 + $0x16c] ss:$56 sps:$4 sm:$0xff]  }
  0x50   :  { %2930 = vmatpush3.bf16.msra.mxu1 %v3243_v29  ;;  %2994 = vmatpush3.bf16.msra.mxu0 %v3247_v34  ;;  %v3317_v29 = vld [vmem:[%s4396_s0 + $0x174] ss:$56 sps:$4 sm:$0xff]   ;;  %v3316_v34 = vld [vmem:[%s4396_s0 + $0x168] ss:$56 sps:$4 sm:$0xff]  }
  0x51   :  { %2931 = vmatprep.subr.bf16.mxu1 %v3251_v36  ;;  %2995 = vmatprep.subr.bf16.mxu0 %v3254_v38  ;;  %v3340_v36 = vld [vmem:[%s4395_s1 + $0x290] sm:$0xff]   ;;  %v3326_v38 = vld [vmem:[%s4396_s0 + $0x1e4] ss:$56 sps:$4 sm:$0xff]  }
  0x52   :  { %1724 = vmatmul.mubr.bf16.gmra.mxu1 %v3228_v21  ;;  %1821 = vmatmul.mubr.bf16.gmra.mxu0 %v3232_v24  ;;  %v3312_v21 = vld [vmem:[%s4395_s1 + $0x328] sm:$0xff]   ;;  %v3306_v24 = vld [vmem:[%s4396_s0 + $0xf8] ss:$56 sps:$4 sm:$0xff]  }
  0x53   :  { %1731 = vmatprep.mubr.bf16.mxu1 %v3235_v25  ;;  %1828 = vmatprep.mubr.bf16.mxu0 %v3239_v27  ;;  %v3310_v25 = vld [vmem:[%s4396_s0 + $0x100] ss:$56 sps:$4 sm:$0xff]  }
  0x54   :  { %2932 = vmatpush3.bf16.msra.mxu1 %v3253_v37  ;;  %2996 = vmatpush3.bf16.msra.mxu0 %v3257_v40  ;;  %v3328_v27 = vld [vmem:[%s4395_s1 + $0x2d8] sm:$0xff]   ;;  %v3347_v40 = vld [vmem:[%s4395_s1 + $0x2c8] sm:$0xff]  }
  0x55   :  { %2933 = vmatprep.subr.bf16.mxu1 %v3261_v44  ;;  %2997 = vmatprep.subr.bf16.mxu0 %v3264_v46  ;;  %v3323_v37 = vld [vmem:[%s4396_s0 + $0x1dc] ss:$56 sps:$4 sm:$0xff]   ;;  %v3341_v44 = vld [vmem:[%s4395_s1 + $0x300] sm:$0xff]  }
  0x56   :  { %v3357_v46 = vld [vmem:[%s4395_s1 + $0x2c0] sm:$0xff]  }
  0x58   :  { %2934 = vmatpush3.bf16.msra.mxu1 %v3263_v45  ;;  %2998 = vmatpush3.bf16.msra.mxu0 %v3267_v47  ;;  %v3332_v45 = vld [vmem:[%s4396_s0 + $0x24c] ss:$56 sps:$4 sm:$0xff]  }
  0x59   :  { %2935 = vmatprep.subr.bf16.mxu1 %v3271_v51  ;;  %2999 = vmatprep.subr.bf16.mxu0 %v3274_v54  ;;  %v3336_v47 = vld [vmem:[%s4396_s0 + $0x254] ss:$56 sps:$4 sm:$0xff]   ;;  %v3335_v51 = vld [vmem:[%s4396_s0 + $0x248] ss:$56 sps:$4 sm:$0xff]   ;;  %v3345_v54 = vld [vmem:[%s4396_s0 + $0x2c4] ss:$56 sps:$4 sm:$0xff]  }
  0x5a   :  { %1732 = vmatmul.mubr.bf16.gmra.mxu1 %v3238_v30  ;;  %1829 = vmatmul.mubr.bf16.gmra.mxu0 %v3242_v32  ;;  %v3322_v30 = vld [vmem:[%s4395_s1 + $0x318] sm:$0xff]   ;;  %v3338_v32 = vld [vmem:[%s4395_s1 + $0x2d0] sm:$0xff]  }
  0x5b   :  { %1739 = vmatprep.mubr.bf16.mxu1 %v3245_v33  ;;  %1836 = vmatprep.mubr.bf16.mxu0 %v3249_v35  ;;  %v3331_v33 = vld [vmem:[%s4395_s1 + $0x310] sm:$0xff]  }
  0x5c   :  { %2936 = vmatpush3.bf16.msra.mxu1 %v3273_v53  ;;  %3000 = vmatpush3.bf16.msra.mxu0 %v3277_v55  ;;  %v3320_v35 = vld [vmem:[%s4396_s0 + $0x170] ss:$56 sps:$4 sm:$0xff]   ;;  %v3342_v53 = vld [vmem:[%s4396_s0 + $0x2bc] ss:$56 sps:$4 sm:$0xff]  }
  0x5d   :  { %2937 = vmatprep.subr.bf16.mxu1 %v3281_v58  ;;  %3001 = vmatprep.subr.bf16.mxu0 %v3284_v62  ;;  %v3360_v55 = vld [vmem:[%s4395_s1 + $0x348] sm:$0xff]   ;;  %v3348_v58 = vld [vmem:[%s4396_s0 + $0x2c0] ss:$56 sps:$4 sm:$0xff]  }
  0x5e   :  { %v3364_v62 = vld [vmem:[%s4396_s0 + $0x2c] ss:$56 sps:$4 sm:$0xff]  }
  0x60   :  { %2938 = vmatpush3.bf16.msra.mxu1 %v3283_v61  ;;  %3002 = vmatpush3.bf16.msra.mxu0 %v3285_v63  ;;  %v3358_v61 = vld [vmem:[%s4396_s0 + $0x330] ss:$56 sps:$4 sm:$0xff]   ;;  %v3367_v63 = vld [vmem:[%s4396_s0 + $0x34] ss:$56 sps:$4 sm:$0xff]  }
  0x61   :  { %2160 = vmatprep.subr.bf16.mxu0 %v3410_v5  ;;  %3051 = vmatprep.subr.bf16.mxu1 %v3292_v0  ;;  %v2273_v0 = vld [vmem:[%s4397_s3] sm:$0xff] }
  0x62   :  { %1740 = vmatmul.mubr.bf16.gmra.mxu1 %v3248_v39  ;;  %1837 = vmatmul.mubr.bf16.gmra.mxu0 %v3252_v41  ;;  %v3334_v39 = vld [vmem:[%s4395_s1 + $0x308] sm:$0xff]  }
  0x63   :  { %1747 = vmatprep.mubr.bf16.mxu1 %v3255_v42  ;;  %1844 = vmatprep.mubr.bf16.mxu0 %v3259_v43  ;;  %v3349_v41 = vld [vmem:[%s4395_s1 + $0x288] sm:$0xff]   ;;  %v3325_v42 = vld [vmem:[%s4396_s0 + $0x1d8] ss:$56 sps:$4 sm:$0xff]  }
  0x64   :  { %v3329_v43 = vld [vmem:[%s4396_s0 + $0x1e0] ss:$56 sps:$4 sm:$0xff]   ;;  %2291 = vperm.xlu0 %3132, %v2273_v0  }
  0x6a   :  { %1748 = vmatmul.mubr.bf16.gmra.mxu1 %v3258_v48  ;;  %1845 = vmatmul.mubr.bf16.gmra.mxu0 %v3262_v49  ;;  %v3359_v48 = vld [vmem:[%s4395_s1 + $0x280] sm:$0xff]   ;;  %v3350_v49 = vld [vmem:[%s4395_s1 + $0x358] sm:$0xff]  }
  0x6b   :  { %1755 = vmatprep.mubr.bf16.mxu1 %v3265_v50  ;;  %1852 = vmatprep.mubr.bf16.mxu0 %v3269_v52  ;;  %v3351_v50 = vld [vmem:[%s4395_s1 + $0x350] sm:$0xff]  }
  0x6c   :  { %v3339_v52 = vld [vmem:[%s4396_s0 + $0x250] ss:$56 sps:$4 sm:$0xff]  }
  0x72   :  { %1756 = vmatmul.mubr.bf16.gmra.mxu1 %v3268_v56  ;;  %1853 = vmatmul.mubr.bf16.gmra.mxu0 %v3272_v57  ;;  %v3361_v56 = vld [vmem:[%s4395_s1 + $0x340] sm:$0xff]   ;;  %v3344_v57 = vld [vmem:[%s4396_s0 + $0x2b8] ss:$56 sps:$4 sm:$0xff]  }
  0x73   :  { %1763 = vmatprep.mubr.bf16.mxu1 %v3275_v59  ;;  %1860 = vmatprep.mubr.bf16.mxu0 %v3279_v60  ;;  %v3352_v59 = vld [vmem:[%s4396_s0 + $0x32c] ss:$56 sps:$4 sm:$0xff]  }
  0x74   :  { %v3355_v60 = vld [vmem:[%s4396_s0 + $0x334] ss:$56 sps:$4 sm:$0xff]  }
  0x7a   :  { %1764 = vmatmul.mubr.bf16.gmra.mxu1 %v3278_v1  ;;  %1861 = vmatmul.mubr.bf16.gmra.mxu0 %v3282_v2  ;;  %v2275_v1 = vld [vmem:[%s4397_s3 + $0x10] sm:$0xff]  ;;  %v2274_v2 = vld [vmem:[%s4397_s3 + $0x8] sm:$0xff] }
  0x7b   :  { %1901 = vmatprep.mubr.bf16.mxu1 %v3288_v3  ;;  %1998 = vmatprep.mubr.bf16.mxu0 %v3291_v4  ;;  %v2276_v3 = vld [vmem:[%s4397_s3 + $0x18] sm:$0xff]  ;;  %v2278_v4 = vld [vmem:[%s4397_s3 + $0x28] sm:$0xff] }
  0x7c   :  { %2301 = vperm.xlu1 %3133, %v2275_v1   ;;  %2296 = vperm.xlu0 %3132, %v2274_v2  }
  0x80   :  { %2306 = vperm.xlu1 %3133, %v2276_v3  }
  0x82   :  { %1902 = vmatmul.mubr.bf16.vlgmr.msra.gmra.mxu1 %v3286_v6  ;;  %1999 = vmatmul.mubr.bf16.vlgmr.msra.gmra.mxu0 %v3289_v7  ;;  %v2277_v6 = vld [vmem:[%s4397_s3 + $0x20] sm:$0xff] }
  0x83   :  { %3052 = vmatpush3.bf16.msra.mxu1 %v3293_v8  ;;  %1909 = vmatprep.mubr.bf16.mxu1 %v3294_v9  ;;  %v3362_v7 = vld [vmem:[%s4396_s0 + $0x28] ss:$56 sps:$4 sm:$0xff]   ;;  %v3368_v9 = vld [vmem:[%s4396_s0 + $0x9c] ss:$56 sps:$4 sm:$0xff]  }
  0x84   :  { %2161 = vmatpush1.bf16.msra.mxu0 %v3296_v10  ;;  %2006 = vmatprep.mubr.bf16.mxu0 %v3298_v11  ;;  %v3365_v8 = vld [vmem:[%s4396_s0 + $0x30] ss:$56 sps:$4 sm:$0xff]   ;;  %v3371_v10 = vld [vmem:[%s4396_s0 + $0xa4] ss:$56 sps:$4 sm:$0xff]  }
  0x85   :  { %3053 = vmatprep.subr.bf16.mxu1 %v3300_v12  ;;  %2162 = vmatprep.subr.bf16.mxu0 %v3410_v5  ;;  %v2280_v11 = vld [vmem:[%s4397_s3 + $0x38] sm:$0xff]  ;;  %v2279_v12 = vld [vmem:[%s4397_s3 + $0x30] sm:$0xff] }
  0x86   :  { %2316 = vperm.xlu1 %3133, %v2278_v4   ;;  %2311 = vperm.xlu0 %3132, %v2277_v6  }
  0x87   :  { %3054 = vmatpush3.bf16.msra.mxu1 %v3302_v13  ;;  %v2282_v13 = vld [vmem:[%s4397_s3 + $0x48] sm:$0xff] }
  0x88   :  { %2163 = vmatpush1.bf16.msra.mxu0 %v3303_v14  ;;  %3055 = vmatprep.subr.bf16.mxu1 %v3309_v15  ;;  %v2281_v14 = vld [vmem:[%s4397_s3 + $0x40] sm:$0xff]  ;;  %v3370_v15 = vld [vmem:[%s4396_s0 + $0x98] ss:$56 sps:$4 sm:$0xff]  }
  0x89   :  { %2164 = vmatprep.subr.bf16.mxu0 %v3410_v5 }
  0x8a   :  { %1910 = vmatmul.mubr.bf16.gmra.mxu1 %v3297_v16  ;;  %2007 = vmatmul.mubr.bf16.gmra.mxu0 %v3301_v17  ;;  %v3373_v16 = vld [vmem:[%s4396_s0 + $0xa0] ss:$56 sps:$4 sm:$0xff]   ;;  %v3374_v17 = vld [vmem:[%s4396_s0 + $0x10c] ss:$56 sps:$4 sm:$0xff]  }
  0x8b   :  { %1917 = vmatprep.mubr.bf16.mxu1 %v3304_v18  ;;  %2014 = vmatprep.mubr.bf16.mxu0 %v3307_v19  ;;  %v3377_v18 = vld [vmem:[%s4396_s0 + $0x114] ss:$56 sps:$4 sm:$0xff]   ;;  %v2284_v19 = vld [vmem:[%s4397_s3 + $0x58] sm:$0xff] }
  0x8c   :  { %3056 = vmatpush3.bf16.msra.mxu1 %v3311_v20  ;;  %2165 = vmatpush1.bf16.msra.mxu0 %v3312_v21  ;;  %v2283_v20 = vld [vmem:[%s4397_s3 + $0x50] sm:$0xff]  ;;  %v2286_v21 = vld [vmem:[%s4397_s3 + $0x68] sm:$0xff] }
  0x8d   :  { %2166 = vmatprep.subr.bf16.mxu0 %v3410_v5  ;;  %3057 = vmatprep.subr.bf16.mxu1 %v3319_v22  ;;  %v2285_v22 = vld [vmem:[%s4397_s3 + $0x60] sm:$0xff] }
  0x8e   :  { %2326 = vperm.xlu1 %3133, %v2280_v11   ;;  %2321 = vperm.xlu0 %3132, %v2279_v12  }
  0x90   :  { %2167 = vmatpush1.bf16.msra.mxu0 %v3315_v23  ;;  %3058 = vmatpush3.bf16.msra.mxu1 %v3321_v26  ;;  %v3376_v23 = vld [vmem:[%s4396_s0 + $0x108] ss:$56 sps:$4 sm:$0xff]   ;;  %v3383_v26 = vld [vmem:[%s4396_s0 + $0x184] ss:$56 sps:$4 sm:$0xff]  }
  0x91   :  { %2168 = vmatprep.subr.bf16.mxu0 %v3410_v5  ;;  %3059 = vmatprep.subr.bf16.mxu1 %v3328_v27  ;;  %v2288_v27 = vld [vmem:[%s4397_s3 + $0x78] sm:$0xff] }
  0x92   :  { %1918 = vmatmul.mubr.bf16.gmra.mxu1 %v3306_v24  ;;  %2015 = vmatmul.mubr.bf16.gmra.mxu0 %v3310_v25  ;;  %v3379_v24 = vld [vmem:[%s4396_s0 + $0x110] ss:$56 sps:$4 sm:$0xff]   ;;  %v3380_v25 = vld [vmem:[%s4396_s0 + $0x17c] ss:$56 sps:$4 sm:$0xff]  }
  0x93   :  { %1925 = vmatprep.mubr.bf16.mxu1 %v3313_v28  ;;  %2022 = vmatprep.mubr.bf16.mxu0 %v3317_v29  ;;  %v2287_v28 = vld [vmem:[%s4397_s3 + $0x70] sm:$0xff] }
  0x94   :  { %2169 = vmatpush1.bf16.msra.mxu0 %v3322_v30  ;;  %3060 = vmatpush3.bf16.msra.mxu1 %v3330_v31  ;;  %v3382_v29 = vld [vmem:[%s4396_s0 + $0x178] ss:$56 sps:$4 sm:$0xff]   ;;  %v3386_v31 = vld [vmem:[%s4396_s0 + $0x1ec] ss:$56 sps:$4 sm:$0xff]  }
  0x95   :  { %2170 = vmatprep.subr.bf16.mxu0 %v3410_v5  ;;  %3061 = vmatprep.subr.bf16.mxu1 %v3338_v32  ;;  %v3385_v30 = vld [vmem:[%s4396_s0 + $0x180] ss:$56 sps:$4 sm:$0xff]   ;;  %v3389_v32 = vld [vmem:[%s4396_s0 + $0x1f4] ss:$56 sps:$4 sm:$0xff]  }
  0x96   :  { %2336 = vperm.xlu1 %3133, %v2282_v13   ;;  %2331 = vperm.xlu0 %3132, %v2281_v14   ;;  %v3406_v13 = vld [vmem:[%s4396_s0 + $0x338] ss:$56 sps:$4 sm:$0xff]  }
  0x97   :  { %v3409_v14 = vld [vmem:[%s4396_s0 + $0x340] ss:$56 sps:$4 sm:$0xff]  }
  0x98   :  { %2171 = vmatpush1.bf16.msra.mxu0 %v3331_v33  ;;  %3062 = vmatpush3.bf16.msra.mxu1 %v3340_v36  ;;  %v3388_v33 = vld [vmem:[%s4396_s0 + $0x1e8] ss:$56 sps:$4 sm:$0xff]   ;;  %v3395_v36 = vld [vmem:[%s4396_s0 + $0x264] ss:$56 sps:$4 sm:$0xff]  }
  0x99   :  { %2172 = vmatprep.subr.bf16.mxu0 %v3410_v5  ;;  %3063 = vmatprep.subr.bf16.mxu1 %v3347_v40 }
  0x9a   :  { %1926 = vmatmul.mubr.bf16.gmra.mxu1 %v3316_v34  ;;  %2023 = vmatmul.mubr.bf16.gmra.mxu0 %v3320_v35  ;;  %v3391_v34 = vld [vmem:[%s4396_s0 + $0x1f0] ss:$56 sps:$4 sm:$0xff]   ;;  %v3392_v35 = vld [vmem:[%s4396_s0 + $0x25c] ss:$56 sps:$4 sm:$0xff]  }
  0x9b   :  { %1933 = vmatprep.mubr.bf16.mxu1 %v3323_v37  ;;  %2030 = vmatprep.mubr.bf16.mxu0 %v3326_v38 }
  0x9c   :  { %2173 = vmatpush1.bf16.msra.mxu0 %v3334_v39  ;;  %3064 = vmatpush3.bf16.msra.mxu1 %v3349_v41 }
  0x9d   :  { %2174 = vmatprep.subr.bf16.mxu0 %v3410_v5  ;;  %3065 = vmatprep.subr.bf16.mxu1 %v3357_v46  ;;  %v3397_v46 = vld [vmem:[%s4396_s0 + $0x260] ss:$56 sps:$4 sm:$0xff]  }
  0x9e   :  { %2346 = vperm.xlu1 %3133, %v2284_v19   ;;  %2341 = vperm.xlu0 %3132, %v2283_v20  }
  0xa0   :  { %2175 = vmatpush1.bf16.msra.mxu0 %v3341_v44  ;;  %3066 = vmatpush3.bf16.msra.mxu1 %v3359_v48  ;;  %v3401_v48 = vld [vmem:[%s4396_s0 + $0x2d4] ss:$56 sps:$4 sm:$0xff]  }
  0xa1   :  { %2184 = vmatprep.subr.bf16.mxu0 %v3410_v5 }
  0xa2   :  { %1934 = vmatmul.mubr.bf16.gmra.mxu1 %v3325_v42  ;;  %2031 = vmatmul.mubr.bf16.gmra.mxu0 %v3329_v43 }
  0xa3   :  { %1941 = vmatprep.mubr.bf16.mxu1 %v3332_v45  ;;  %2038 = vmatprep.mubr.bf16.mxu0 %v3336_v47  ;;  %v3394_v45 = vld [vmem:[%s4396_s0 + $0x258] ss:$56 sps:$4 sm:$0xff]   ;;  %v3398_v47 = vld [vmem:[%s4396_s0 + $0x2cc] ss:$56 sps:$4 sm:$0xff]  }
  0xa4   :  { %2185 = vmatpush2.bf16.msra.mxu0 %v3350_v49  ;;  %2356 = vperm.xlu1 %3133, %v2286_v21  }
  0xa5   :  { %2186 = vmatprep.subr.bf16.mxu0 %v3410_v5  ;;  %2351 = vperm.xlu0 %3132, %v2285_v22  }
  0xa8   :  { %2187 = vmatpush2.bf16.msra.mxu0 %v3351_v50  ;;  %2366 = vperm.xlu1 %3133, %v2288_v27  }
  0xa9   :  { %2188 = vmatprep.subr.bf16.mxu0 %v3410_v5  ;;  %2361 = vperm.xlu0 %3132, %v2287_v28  }
  0xaa   :  { %1942 = vmatmul.mubr.bf16.gmra.mxu1 %v3335_v51  ;;  %2039 = vmatmul.mubr.bf16.gmra.mxu0 %v3339_v52 }
  0xab   :  { %1949 = vmatprep.mubr.bf16.mxu1 %v3342_v53  ;;  %2046 = vmatprep.mubr.bf16.mxu0 %v3345_v54 }
  0xac   :  { %2189 = vmatpush2.bf16.msra.mxu0 %v3360_v55 }
  0xad   :  { %2190 = vmatprep.subr.bf16.mxu0 %v3410_v5  ;;  %v3354_v5 = vld [vmem:[%s4396_s0 + $0x328] ss:$56 sps:$4 sm:$0xff]  }
  0xb0   :  { %2191 = vmatpush2.bf16.msra.mxu0 %v3361_v56 }
  0xb2   :  { %1950 = vmatmul.mubr.bf16.gmra.mxu1 %v3344_v57  ;;  %2047 = vmatmul.mubr.bf16.gmra.mxu0 %v3348_v58 }
  0xb3   :  { %1957 = vmatprep.mubr.bf16.mxu1 %v3352_v59  ;;  %2054 = vmatprep.mubr.bf16.mxu0 %v3355_v60 }
  0xba   :  { %1958 = vmatmul.mubr.bf16.gmra.mxu1 %v3354_v5  ;;  %2055 = vmatmul.mubr.bf16.gmra.mxu0 %v3358_v61  ;;  %v3400_v5 = vld [vmem:[%s4396_s0 + $0x2c8] ss:$56 sps:$4 sm:$0xff]  }
  0xbb   :  { %2095 = vmatprep.mubr.bf16.mxu1 %v3364_v62  ;;  %2691 = vmatprep.mubr.msk.bf16.mxu0 %vm1553_vm0, %v3367_v63  ;;  %v3403_v61 = vld [vmem:[%s4396_s0 + $0x2d0] ss:$56 sps:$4 sm:$0xff]   ;;  %v3404_v62 = vld [vmem:[%s4396_s0 + $0x33c] ss:$56 sps:$4 sm:$0xff]  }
  0xbc   :  { %v3407_v63 = vld [vmem:[%s4396_s0 + $0x344] ss:$56 sps:$4 sm:$0xff]  }
  0xc2   :  { %2096 = vmatmul.mubr.bf16.vlgmr.msra.gmra.mxu1 %v3362_v7  ;;  %2193 = vmatmul.mubr.bf16.vlgmr.msra.gmra.mxu0 %v3365_v8 }
  0xc3   :  { %2103 = vmatprep.mubr.bf16.mxu1 %v3368_v9  ;;  %2692 = vmatprep.mubr.msk.bf16.mxu0 %vm1553_vm0, %v3371_v10 }
  0xca   :  { %2104 = vmatmul.mubr.bf16.gmra.mxu1 %v3370_v15  ;;  %2201 = vmatmul.mubr.bf16.gmra.mxu0 %v3373_v16 }
  0xcb   :  { %2111 = vmatprep.mubr.bf16.mxu1 %v3374_v17  ;;  %2693 = vmatprep.mubr.msk.bf16.mxu0 %vm1553_vm0, %v3377_v18 }
  0xd2   :  { %2112 = vmatmul.mubr.bf16.gmra.mxu1 %v3376_v23  ;;  %2209 = vmatmul.mubr.bf16.gmra.mxu0 %v3379_v24 }
  0xd3   :  { %2119 = vmatprep.mubr.bf16.mxu1 %v3380_v25  ;;  %2694 = vmatprep.mubr.msk.bf16.mxu0 %vm1553_vm0, %v3383_v26 }
  0xda   :  { %2120 = vmatmul.mubr.bf16.gmra.mxu1 %v3382_v29  ;;  %2217 = vmatmul.mubr.bf16.gmra.mxu0 %v3385_v30 }
  0xdb   :  { %2127 = vmatprep.mubr.bf16.mxu1 %v3386_v31  ;;  %2695 = vmatprep.mubr.msk.bf16.mxu0 %vm1553_vm0, %v3389_v32 }
  0xe2   :  { %v2771_v37 = vpop.f32.mrf.mxu1  ;;  %2128 = vmatmul.mubr.bf16.gmra.mxu1 %v3388_v33  ;;  %v2747_v38 = vpop.f32.mrf.mxu0  ;;  %2225 = vmatmul.mubr.bf16.gmra.mxu0 %v3391_v34  ;;  %v4201_v33 = vld [vmem:[%s4398_s2] ss:$0 sm:$0xff] }
  0xe3   :  { %2135 = vmatprep.mubr.bf16.mxu1 %v3392_v35  ;;  %2696 = vmatprep.mubr.msk.bf16.mxu0 %vm1553_vm0, %v3395_v36 }
  0xe4   :  { %v2772_v39 = vpop.f32.mrf.mxu1  ;;  %v2748_v40 = vpop.f32.mrf.mxu0 }
  0xe5   :  { %v4134_v41 = vadd.f32 %v2772_v39, %v2771_v37  ;;  %v4136_v42 = vadd.f32 %v2748_v40, %v2747_v38 }
  0xe6   :  { %v2774_v43 = vpop.f32.mrf.mxu1  ;;  %v2750_v44 = vpop.f32.mrf.mxu0 }
  0xe7   :  { %v1613_v36 = vadd.f32 %v4136_v42, %v4201_v33 }
  0xe8   :  { %v2775_v49 = vpop.f32.mrf.mxu1  ;;  %v2751_v50 = vpop.f32.mrf.mxu0 }
  0xe9   :  { %v4150_v51 = vadd.f32 %v2775_v49, %v2774_v43  ;;  %v4152_v52 = vadd.f32 %v2751_v50, %v2750_v44 }
  0xea   :  { %v2777_v53 = vpop.f32.mrf.mxu1  ;;  %2136 = vmatmul.mubr.bf16.gmra.mxu1 %v3394_v45  ;;  %v2753_v54 = vpop.f32.mrf.mxu0  ;;  %2233 = vmatmul.mubr.bf16.gmra.mxu0 %v3397_v46 }
  0xeb   :  { %2143 = vmatprep.mubr.bf16.mxu1 %v3398_v47  ;;  %2697 = vmatprep.mubr.msk.bf16.mxu0 %vm1553_vm0, %v3401_v48  ;;  %v1616_v46 = vadd.f32 %v4152_v52, %v4201_v33 }
  0xec   :  { %v2778_v55 = vpop.f32.mrf.mxu1  ;;  %v2754_v56 = vpop.f32.mrf.mxu0 }
  0xed   :  { %v4155_v57 = vadd.f32 %v2778_v55, %v2777_v53  ;;  %v4157_v58 = vadd.f32 %v2754_v56, %v2753_v54 }
  0xee   :  { %v2780_v59 = vpop.f32.mrf.mxu1  ;;  %v2756_v60 = vpop.f32.mrf.mxu0 }
  0xef   :  { %v1621_v42 = vadd.f32 %v4157_v58, %v4201_v33 }
  0xf0   :  { %v2781_v0 = vpop.f32.mrf.mxu1  ;;  %v2757_v1 = vpop.f32.mrf.mxu0 }
  0xf1   :  { %v4171_v2 = vadd.f32 %v2781_v0, %v2780_v59  ;;  %v4173_v3 = vadd.f32 %v2757_v1, %v2756_v60 }
  0xf2   :  { %v2783_v4 = vpop.f32.mrf.mxu1  ;;  %2144 = vmatmul.mubr.bf16.gmra.mxu1 %v3400_v5  ;;  %v2759_v6 = vpop.f32.mrf.mxu0  ;;  %2241 = vmatmul.mubr.bf16.gmra.mxu0 %v3403_v61 }
  0xf3   :  { %2151 = vmatprep.mubr.bf16.mxu1 %v3404_v62  ;;  %2698 = vmatprep.mubr.msk.bf16.mxu0 %vm1553_vm0, %v3407_v63  ;;  %v1624_v1 = vadd.f32 %v4173_v3, %v4201_v33 }
  0xf4   :  { %v2784_v7 = vpop.f32.mrf.mxu1  ;;  %v2760_v8 = vpop.f32.mrf.mxu0 }
  0xf5   :  { %v4176_v9 = vadd.f32 %v2784_v7, %v2783_v4  ;;  %v4178_v10 = vadd.f32 %v2760_v8, %v2759_v6 }
  0xf6   :  { %v2786_v11 = vpop.f32.mrf.mxu1  ;;  %v2762_v12 = vpop.f32.mrf.mxu0 }
  0xf8   :  { %v2787_v15 = vpop.f32.mrf.mxu1  ;;  %v2763_v16 = vpop.f32.mrf.mxu0 }
  0xf9   :  { %v4186_v17 = vadd.f32 %v2787_v15, %v2786_v11  ;;  %v4188_v18 = vadd.f32 %v2763_v16, %v2762_v12 }
  0xfa   :  { %v2789_v19 = vpop.f32.mrf.mxu1  ;;  %2152 = vmatmul.mubr.bf16.gmra.mxu1 %v3406_v13  ;;  %v2765_v20 = vpop.f32.mrf.mxu0  ;;  %2249 = vmatmul.mubr.bf16.gmra.mxu0 %v3409_v14  ;;  %v1629_v14 = vadd.f32 %v4178_v10, %v4201_v33 }
  0xfc   :  { %v2790_v21 = vpop.f32.mrf.mxu1  ;;  %v2766_v22 = vpop.f32.mrf.mxu0 }
  0xfd   :  { %v4190_v23 = vadd.f32 %v2790_v21, %v2789_v19  ;;  %v4192_v24 = vadd.f32 %v2766_v22, %v2765_v20 }
  0xfe   :  { %v2792_v25 = vpop.f32.mrf.mxu1  ;;  %v2768_v26 = vpop.f32.mrf.mxu0 }
 0x100   :  { %v2793_v27 = vpop.f32.mrf.mxu1  ;;  %v2769_v28 = vpop.f32.mrf.mxu0 }
 0x101   :  { %v4194_v29 = vadd.f32 %v2793_v27, %v2792_v25  ;;  %v4196_v30 = vadd.f32 %v2769_v28, %v2768_v26  ;;  %v1632_v26 = vadd.f32 %v4188_v18, %v4201_v33 }
 0x102   :  { %v2811_v31 = vpop.f32.mrf.mxu1  ;;  %v2875_v32 = vpop.f32.mrf.mxu0 }
 0x104   :  { %v2812_v34 = vpop.f32.mrf.mxu1  ;;  %v2876_v35 = vpop.f32.mrf.mxu0 }
 0x105   :  { %v2813_v37 = vadd.f32 %v2812_v34, %v2811_v31  ;;  %v2877_v38 = vadd.f32 %v2876_v35, %v2875_v32 }
 0x106   :  { %v2814_v39 = vpop.f32.mrf.mxu1  ;;  %v2878_v40 = vpop.f32.mrf.mxu0 }
 0x107   :  { %v1710_v43 = vadd.f32 %v2813_v37, %v1613_v36  ;;  %v1637_v37 = vadd.f32 %v4192_v24, %v4201_v33 }
 0x108   :  { %v2815_v44 = vpop.f32.mrf.mxu1  ;;  %v2879_v45 = vpop.f32.mrf.mxu0 }
 0x109   :  { %v4207_v47 = vadd.f32 %v2877_v38, %v1710_v43  ;;  %v2816_v48 = vadd.f32 %v2815_v44, %v2814_v39  ;;  %v2880_v49 = vadd.f32 %v2879_v45, %v2878_v40 }
 0x10a   :  { %v2817_v50 = vpop.f32.mrf.mxu1  ;;  %v2881_v53 = vpop.f32.mrf.mxu0 }
 0x10b   :  { %v1713_v54 = vadd.f32 %v2816_v48, %v1616_v46  ;;  %v1640_v48 = vadd.f32 %v4196_v30, %v4201_v33 }
 0x10c   :  { %v2818_v55 = vpop.f32.mrf.mxu1  ;;  %v2882_v56 = vpop.f32.mrf.mxu0 }
 0x10d   :  { %v4211_v59 = vadd.f32 %v2880_v49, %v1713_v54  ;;  %v2819_v60 = vadd.f32 %v2818_v55, %v2817_v50  ;;  %v2883_v5 = vadd.f32 %v2882_v56, %v2881_v53 }
 0x10e   :  { %v2820_v61 = vpop.f32.mrf.mxu1  ;;  %v2884_v62 = vpop.f32.mrf.mxu0 }
 0x10f   :  { %v1718_v63 = vadd.f32 %v2819_v60, %v1621_v42  ;;  %v1645_v60 = vadd.f32 %v4134_v41, %v4201_v33 }
 0x110   :  { %v2821_v52 = vpop.f32.mrf.mxu1  ;;  %v2885_v0 = vpop.f32.mrf.mxu0 }
 0x111   :  { %v4215_v4 = vadd.f32 %v2883_v5, %v1718_v63  ;;  %v2822_v6 = vadd.f32 %v2821_v52, %v2820_v61  ;;  %v2886_v7 = vadd.f32 %v2885_v0, %v2884_v62 }
 0x112   :  { %v2823_v8 = vpop.f32.mrf.mxu1  ;;  %v2887_v11 = vpop.f32.mrf.mxu0 }
 0x113   :  { %v1721_v12 = vadd.f32 %v2822_v6, %v1624_v1  ;;  %v1648_v6 = vadd.f32 %v4150_v51, %v4201_v33 }
 0x114   :  { %v2824_v58 = vpop.f32.mrf.mxu1  ;;  %v2888_v13 = vpop.f32.mrf.mxu0 }
 0x115   :  { %v4219_v15 = vadd.f32 %v2886_v7, %v1721_v12  ;;  %v2825_v16 = vadd.f32 %v2824_v58, %v2823_v8  ;;  %v2889_v19 = vadd.f32 %v2888_v13, %v2887_v11 }
 0x116   :  { %v2826_v20 = vpop.f32.mrf.mxu1  ;;  %v2890_v21 = vpop.f32.mrf.mxu0 }
 0x117   :  { %v1726_v22 = vadd.f32 %v2825_v16, %v1629_v14  ;;  %v1653_v16 = vadd.f32 %v4155_v57, %v4201_v33 }
 0x118   :  { %v2827_v3 = vpop.f32.mrf.mxu1  ;;  %v2891_v25 = vpop.f32.mrf.mxu0 }
 0x119   :  { %v4223_v27 = vadd.f32 %v2889_v19, %v1726_v22  ;;  %v2828_v28 = vadd.f32 %v2827_v3, %v2826_v20  ;;  %v2892_v31 = vadd.f32 %v2891_v25, %v2890_v21 }
 0x11a   :  { %v2829_v32 = vpop.f32.mrf.mxu1  ;;  %v2893_v34 = vpop.f32.mrf.mxu0 }
 0x11b   :  { %v1729_v35 = vadd.f32 %v2828_v28, %v1632_v26  ;;  %v1656_v28 = vadd.f32 %v4171_v2, %v4201_v33 }
 0x11c   :  { %v2830_v10 = vpop.f32.mrf.mxu1  ;;  %v2894_v36 = vpop.f32.mrf.mxu0 }
 0x11d   :  { %v4227_v38 = vadd.f32 %v2892_v31, %v1729_v35  ;;  %v2831_v39 = vadd.f32 %v2830_v10, %v2829_v32  ;;  %v2895_v40 = vadd.f32 %v2894_v36, %v2893_v34 }
 0x11e   :  { %v2832_v43 = vpop.f32.mrf.mxu1  ;;  %v2896_v44 = vpop.f32.mrf.mxu0 }
 0x11f   :  { %v1734_v45 = vadd.f32 %v2831_v39, %v1637_v37  ;;  %v1661_v39 = vadd.f32 %v4176_v9, %v4201_v33 }
 0x120   :  { %v2833_v18 = vpop.f32.mrf.mxu1  ;;  %v2897_v46 = vpop.f32.mrf.mxu0 }
 0x121   :  { %v4231_v49 = vadd.f32 %v2895_v40, %v1734_v45  ;;  %v2834_v50 = vadd.f32 %v2833_v18, %v2832_v43  ;;  %v2898_v53 = vadd.f32 %v2897_v46, %v2896_v44 }
 0x122   :  { %v2835_v54 = vpop.f32.mrf.mxu1  ;;  %v2899_v55 = vpop.f32.mrf.mxu0 }
 0x123   :  { %v1737_v56 = vadd.f32 %v2834_v50, %v1640_v48  ;;  %v1664_v50 = vadd.f32 %v4186_v17, %v4201_v33 }
 0x124   :  { %v2836_v24 = vpop.f32.mrf.mxu1  ;;  %v2900_v42 = vpop.f32.mrf.mxu0 }
 0x125   :  { %v4235_v5 = vadd.f32 %v2898_v53, %v1737_v56  ;;  %v2837_v61 = vadd.f32 %v2836_v24, %v2835_v54  ;;  %v2901_v62 = vadd.f32 %v2900_v42, %v2899_v55 }
 0x126   :  { %v2838_v63 = vpop.f32.mrf.mxu1  ;;  %v2902_v52 = vpop.f32.mrf.mxu0 }
 0x127   :  { %v1742_v0 = vadd.f32 %v2837_v61, %v1645_v60  ;;  %v1669_v61 = vadd.f32 %v4190_v23, %v4201_v33 }
 0x128   :  { %v2839_v30 = vpop.f32.mrf.mxu1  ;;  %v2903_v1 = vpop.f32.mrf.mxu0 }
 0x129   :  { %v4239_v7 = vadd.f32 %v2901_v62, %v1742_v0  ;;  %v2840_v8 = vadd.f32 %v2839_v30, %v2838_v63  ;;  %v2904_v11 = vadd.f32 %v2903_v1, %v2902_v52 }
 0x12a   :  { %v2841_v12 = vpop.f32.mrf.mxu1  ;;  %v2905_v58 = vpop.f32.mrf.mxu0 }
 0x12b   :  { %v1745_v13 = vadd.f32 %v2840_v8, %v1648_v6  ;;  %v1672_v8 = vadd.f32 %v4194_v29, %v4201_v33 }
 0x12c   :  { %v2842_v41 = vpop.f32.mrf.mxu1  ;;  %v2906_v14 = vpop.f32.mrf.mxu0 }
 0x12d   :  { %v4243_v19 = vadd.f32 %v2904_v11, %v1745_v13  ;;  %v2843_v20 = vadd.f32 %v2842_v41, %v2841_v12  ;;  %v2907_v21 = vadd.f32 %v2906_v14, %v2905_v58 }
 0x12e   :  { %v2844_v22 = vpop.f32.mrf.mxu1  ;;  %v2908_v3 = vpop.f32.mrf.mxu0 }
 0x12f   :  { %v1750_v25 = vadd.f32 %v2843_v20, %v1653_v16 }
 0x130   :  { %v2845_v51 = vpop.f32.mrf.mxu1  ;;  %v2909_v26 = vpop.f32.mrf.mxu0 }
 0x131   :  { %v4247_v31 = vadd.f32 %v2907_v21, %v1750_v25  ;;  %v2846_v32 = vadd.f32 %v2845_v51, %v2844_v22  ;;  %v2910_v34 = vadd.f32 %v2909_v26, %v2908_v3 }
 0x132   :  { %v2847_v35 = vpop.f32.mrf.mxu1  ;;  %v2911_v10 = vpop.f32.mrf.mxu0 }
 0x133   :  { %v1753_v36 = vadd.f32 %v2846_v32, %v1656_v28 }
 0x134   :  { %v2848_v57 = vpop.f32.mrf.mxu1  ;;  %v2912_v37 = vpop.f32.mrf.mxu0 }
 0x135   :  { %v4251_v40 = vadd.f32 %v2910_v34, %v1753_v36  ;;  %v2849_v43 = vadd.f32 %v2848_v57, %v2847_v35  ;;  %v2913_v44 = vadd.f32 %v2912_v37, %v2911_v10 }
 0x136   :  { %v2850_v45 = vpop.f32.mrf.mxu1  ;;  %v2914_v18 = vpop.f32.mrf.mxu0 }
 0x137   :  { %v1758_v46 = vadd.f32 %v2849_v43, %v1661_v39 }
 0x138   :  { %v2851_v2 = vpop.f32.mrf.mxu1  ;;  %v2915_v48 = vpop.f32.mrf.mxu0 }
 0x139   :  { %v4255_v53 = vadd.f32 %v2913_v44, %v1758_v46  ;;  %v2852_v54 = vadd.f32 %v2851_v2, %v2850_v45  ;;  %v2916_v55 = vadd.f32 %v2915_v48, %v2914_v18 }
 0x13a   :  { %v2853_v56 = vpop.f32.mrf.mxu1  ;;  %v2917_v24 = vpop.f32.mrf.mxu0 }
 0x13b   :  { %v1761_v42 = vadd.f32 %v2852_v54, %v1664_v50 }
 0x13c   :  { %v2854_v9 = vpop.f32.mrf.mxu1  ;;  %v2918_v60 = vpop.f32.mrf.mxu0 }
 0x13d   :  { %v4259_v62 = vadd.f32 %v2916_v55, %v1761_v42  ;;  %v2855_v63 = vadd.f32 %v2854_v9, %v2853_v56  ;;  %v2919_v52 = vadd.f32 %v2918_v60, %v2917_v24 }
 0x13e   :  { %v2856_v0 = vpop.f32.mrf.mxu1  ;;  %v2920_v30 = vpop.f32.mrf.mxu0 }
 0x13f   :  { %v1766_v1 = vadd.f32 %v2855_v63, %v1669_v61 }
 0x140   :  { %v2857_v17 = vpop.f32.mrf.mxu1  ;;  %v2921_v6 = vpop.f32.mrf.mxu0 }
 0x141   :  { %v4263_v11 = vadd.f32 %v2919_v52, %v1766_v1  ;;  %v2858_v12 = vadd.f32 %v2857_v17, %v2856_v0  ;;  %v2922_v58 = vadd.f32 %v2921_v6, %v2920_v30 }
 0x142   :  { %v2939_v13 = vpop.f32.mrf.mxu1  ;;  %v3003_v41 = vpop.f32.mrf.mxu0 }
 0x143   :  { %v1769_v14 = vadd.f32 %v2858_v12, %v1672_v8 }
 0x144   :  { %v2940_v23 = vpop.f32.mrf.mxu1  ;;  %v3004_v16 = vpop.f32.mrf.mxu0 }
 0x145   :  { %v4265_v20 = vadd.f32 %v2922_v58, %v1769_v14  ;;  %v2941_v21 = vadd.f32 %v2940_v23, %v2939_v13  ;;  %v3005_v22 = vadd.f32 %v3004_v16, %v3003_v41 }
 0x146   :  { %v2942_v3 = vpop.f32.mrf.mxu1  ;;  %v3006_v25 = vpop.f32.mrf.mxu0 }
 0x147   :  { %v1904_v51 = vadd.f32 %v2941_v21, %v4207_v47 }
 0x148   :  { %v2943_v26 = vpop.f32.mrf.mxu1  ;;  %v3007_v28 = vpop.f32.mrf.mxu0 }
 0x149   :  { %v4268_v29 = vadd.f32 %v3005_v22, %v1904_v51  ;;  %v2944_v33 = vadd.f32 %v2943_v26, %v2942_v3  ;;  %v3008_v10 = vadd.f32 %v3007_v28, %v3006_v25 }
 0x14a   :  { %v2945_v32 = vpop.f32.mrf.mxu1  ;;  %v3009_v34 = vpop.f32.mrf.mxu0 }
 0x14b   :  { %v1907_v35 = vadd.f32 %v2944_v33, %v4211_v59 }
 0x14c   :  { %v2946_v36 = vpop.f32.mrf.mxu1  ;;  %v3010_v57 = vpop.f32.mrf.mxu0 }
 0x14d   :  { %v4271_v37 = vadd.f32 %v3008_v10, %v1907_v35  ;;  %v2947_v39 = vadd.f32 %v2946_v36, %v2945_v32  ;;  %v3011_v43 = vadd.f32 %v3010_v57, %v3009_v34 }
 0x14e   :  { %v2948_v44 = vpop.f32.mrf.mxu1  ;;  %v3012_v45 = vpop.f32.mrf.mxu0 }
 0x14f   :  { %v1912_v47 = vadd.f32 %v2947_v39, %v4215_v4 }
 0x150   :  { %v2949_v18 = vpop.f32.mrf.mxu1  ;;  %v3013_v46 = vpop.f32.mrf.mxu0 }
 0x151   :  { %v4274_v2 = vadd.f32 %v3011_v43, %v1912_v47  ;;  %v2950_v48 = vadd.f32 %v2949_v18, %v2948_v44  ;;  %v3014_v55 = vadd.f32 %v3013_v46, %v3012_v45 }
 0x152   :  { %v2951_v50 = vpop.f32.mrf.mxu1  ;;  %v3015_v54 = vpop.f32.mrf.mxu0 }
 0x153   :  { %v1915_v59 = vadd.f32 %v2950_v48, %v4219_v15 }
 0x154   :  { %v2952_v56 = vpop.f32.mrf.mxu1  ;;  %v3016_v24 = vpop.f32.mrf.mxu0 }
 0x155   :  { %v4277_v42 = vadd.f32 %v3014_v55, %v1915_v59  ;;  %v2953_v9 = vadd.f32 %v2952_v56, %v2951_v50  ;;  %v3017_v60 = vadd.f32 %v3016_v24, %v3015_v54 }
 0x156   :  { %v2954_v61 = vpop.f32.mrf.mxu1  ;;  %v3018_v63 = vpop.f32.mrf.mxu0 }
 0x157   :  { %v1920_v4 = vadd.f32 %v2953_v9, %v4223_v27 }
 0x158   :  { %v2955_v52 = vpop.f32.mrf.mxu1  ;;  %v3019_v0 = vpop.f32.mrf.mxu0 }
 0x159   :  { %v4280_v30 = vadd.f32 %v3017_v60, %v1920_v4  ;;  %v2956_v1 = vadd.f32 %v2955_v52, %v2954_v61  ;;  %v3020_v8 = vadd.f32 %v3019_v0, %v3018_v63 }
 0x15a   :  { %v2957_v17 = vpop.f32.mrf.mxu1  ;;  %v3021_v6 = vpop.f32.mrf.mxu0 }
 0x15b   :  { %v1923_v15 = vadd.f32 %v2956_v1, %v4227_v38 }
 0x15c   :  { %v2958_v12 = vpop.f32.mrf.mxu1  ;;  %v3022_v58 = vpop.f32.mrf.mxu0 }
 0x15d   :  { %v4283_v13 = vadd.f32 %v3020_v8, %v1923_v15  ;;  %v2959_v41 = vadd.f32 %v2958_v12, %v2957_v17  ;;  %v3023_v14 = vadd.f32 %v3022_v58, %v3021_v6 }
 0x15e   :  { %v2960_v23 = vpop.f32.mrf.mxu1  ;;  %v3024_v16 = vpop.f32.mrf.mxu0 }
 0x15f   :  { %v1928_v27 = vadd.f32 %v2959_v41, %v4231_v49 }
 0x160   :  { %v2961_v21 = vpop.f32.mrf.mxu1  ;;  %v3025_v22 = vpop.f32.mrf.mxu0 }
 0x161   :  { %v4286_v3 = vadd.f32 %v3023_v14, %v1928_v27  ;;  %v2962_v25 = vadd.f32 %v2961_v21, %v2960_v23  ;;  %v3026_v28 = vadd.f32 %v3025_v22, %v3024_v16 }
 0x162   :  { %v2963_v51 = vpop.f32.mrf.mxu1  ;;  %v3027_v26 = vpop.f32.mrf.mxu0 }
 0x163   :  { %v1931_v38 = vadd.f32 %v2962_v25, %v4235_v5 }
 0x164   :  { %v2964_v33 = vpop.f32.mrf.mxu1  ;;  %v3028_v32 = vpop.f32.mrf.mxu0 }
 0x165   :  { %v4289_v34 = vadd.f32 %v3026_v28, %v1931_v38  ;;  %v2965_v35 = vadd.f32 %v2964_v33, %v2963_v51  ;;  %v3029_v10 = vadd.f32 %v3028_v32, %v3027_v26 }
 0x166   :  { %v2966_v36 = vpop.f32.mrf.mxu1  ;;  %v3030_v57 = vpop.f32.mrf.mxu0 }
 0x167   :  { %v1936_v49 = vadd.f32 %v2965_v35, %v4239_v7 }
 0x168   :  { %v2967_v39 = vpop.f32.mrf.mxu1  ;;  %v3031_v43 = vpop.f32.mrf.mxu0 }
 0x169   :  { %v4292_v44 = vadd.f32 %v3029_v10, %v1936_v49  ;;  %v2968_v45 = vadd.f32 %v2967_v39, %v2966_v36  ;;  %v3032_v46 = vadd.f32 %v3031_v43, %v3030_v57 }
 0x16a   :  { %v2969_v47 = vpop.f32.mrf.mxu1  ;;  %v3033_v18 = vpop.f32.mrf.mxu0 }
 0x16b   :  { %v1939_v5 = vadd.f32 %v2968_v45, %v4243_v19 }
 0x16c   :  { %v2970_v48 = vpop.f32.mrf.mxu1  ;;  %v3034_v50 = vpop.f32.mrf.mxu0 }
 0x16d   :  { %v4295_v54 = vadd.f32 %v3032_v46, %v1939_v5  ;;  %v2971_v59 = vadd.f32 %v2970_v48, %v2969_v47  ;;  %v3035_v55 = vadd.f32 %v3034_v50, %v3033_v18 }
 0x16e   :  { %v2972_v56 = vpop.f32.mrf.mxu1  ;;  %v3036_v24 = vpop.f32.mrf.mxu0 }
 0x16f   :  { %v1944_v7 = vadd.f32 %v2971_v59, %v4247_v31 }
 0x170   :  { %v2973_v9 = vpop.f32.mrf.mxu1  ;;  %v3037_v60 = vpop.f32.mrf.mxu0 }
 0x171   :  { %v4298_v61 = vadd.f32 %v3035_v55, %v1944_v7  ;;  %v2974_v63 = vadd.f32 %v2973_v9, %v2972_v56  ;;  %v3038_v0 = vadd.f32 %v3037_v60, %v3036_v24 }
 0x172   :  { %v2975_v4 = vpop.f32.mrf.mxu1  ;;  %v3039_v52 = vpop.f32.mrf.mxu0 }
 0x173   :  { %v1947_v19 = vadd.f32 %v2974_v63, %v4251_v40 }
 0x174   :  { %v2976_v1 = vpop.f32.mrf.mxu1  ;;  %v3040_v17 = vpop.f32.mrf.mxu0 }
 0x175   :  { %v4301_v6 = vadd.f32 %v3038_v0, %v1947_v19  ;;  %v2977_v15 = vadd.f32 %v2976_v1, %v2975_v4  ;;  %v3041_v8 = vadd.f32 %v3040_v17, %v3039_v52 }
 0x176   :  { %v2978_v12 = vpop.f32.mrf.mxu1  ;;  %v3042_v58 = vpop.f32.mrf.mxu0 }
 0x177   :  { %v1952_v31 = vadd.f32 %v2977_v15, %v4255_v53 }
 0x178   :  { %v2979_v41 = vpop.f32.mrf.mxu1  ;;  %v3043_v14 = vpop.f32.mrf.mxu0 }
 0x179   :  { %v4304_v23 = vadd.f32 %v3041_v8, %v1952_v31  ;;  %v2980_v16 = vadd.f32 %v2979_v41, %v2978_v12  ;;  %v3044_v22 = vadd.f32 %v3043_v14, %v3042_v58  ;;  %v2302_v14 = vpop.permute.xlu1 %2301 }
 0x17a   :  { %v2981_v27 = vpop.f32.mrf.mxu1  ;;  %v3045_v21 = vpop.f32.mrf.mxu0 }
 0x17b   :  { %v1955_v40 = vadd.f32 %v2980_v16, %v4259_v62 }
 0x17c   :  { %v2982_v25 = vpop.f32.mrf.mxu1  ;;  %v3046_v51 = vpop.f32.mrf.mxu0 }
 0x17d   :  { %v4307_v26 = vadd.f32 %v3044_v22, %v1955_v40  ;;  %v2983_v38 = vadd.f32 %v2982_v25, %v2981_v27  ;;  %v3047_v28 = vadd.f32 %v3046_v51, %v3045_v21 }
 0x17e   :  { %v2984_v33 = vpop.f32.mrf.mxu1  ;;  %v3048_v32 = vpop.f32.mrf.mxu0 }
 0x17f   :  { %v1960_v53 = vadd.f32 %v2983_v38, %v4263_v11  ;;  %v2292_v11 = vpop.permute.xlu0 %2291 }
 0x180   :  { %v2985_v35 = vpop.f32.mrf.mxu1  ;;  %v3049_v10 = vpop.f32.mrf.mxu0 }
 0x181   :  { %v4310_v36 = vadd.f32 %v3047_v28, %v1960_v53  ;;  %v2986_v57 = vadd.f32 %v2985_v35, %v2984_v33  ;;  %v3050_v43 = vadd.f32 %v3049_v10, %v3048_v32 }
 0x182   :  { %v3067_v49 = vpop.f32.mrf.mxu1  ;;  %v2194_v39 = vpop.f32.mrf.mxu0 }
 0x183   :  { %v1963_v62 = vadd.f32 %v2986_v57, %v4265_v20  ;;  %v2297_v0 = vpop.permute.xlu0 %2296  ;;  %v2307_v57 = vpop.permute.xlu1 %2306 }
 0x184   :  { %v3068_v45 = vpop.f32.mrf.mxu1  ;;  %v2196_v47 = vpop.f32.mrf.mxu0 }
 0x185   :  { %v4313_v18 = vadd.f32 %v3050_v43, %v1963_v62  ;;  %v3069_v5 = vadd.f32 %v3068_v45, %v3067_v49 }
 0x186   :  { %v3070_v46 = vpop.f32.mrf.mxu1  ;;  %v2197_v48 = vpop.f32.mrf.mxu0 }
 0x187   :  { %v2098_v50 = vadd.f32 %v3069_v5, %v4268_v29 }
 0x188   :  { %v3071_v59 = vpop.f32.mrf.mxu1  ;;  %v2199_v55 = vpop.f32.mrf.mxu0 }
 0x189   :  { %v3072_v56 = vadd.f32 %v3071_v59, %v3070_v46  ;;  %v2195_v24 = vadd.f32 %v2194_v39, %v2098_v50  ;;  %v2312_v50 = vpop.permute.xlu0 %2311 }
 0x18a   :  { %v3073_v7 = vpop.f32.mrf.mxu1  ;;  %v2202_v9 = vpop.f32.mrf.mxu0 }
 0x18b   :  { %v2101_v60 = vadd.f32 %v3072_v56, %v4271_v37  ;;  %v2257_v20 = vmax.f32 %v2195_v24, 0.0 }
 0x18c   :  { %v3074_v63 = vpop.f32.mrf.mxu1  ;;  %v2204_v4 = vpop.f32.mrf.mxu0 }
 0x18d   :  { %v2369_v52 = vmul.f32 %v2292_v11, %v2257_v20  ;;  %v3075_v19 = vadd.f32 %v3074_v63, %v3073_v7  ;;  %v2198_v1 = vadd.f32 %v2197_v48, %v2101_v60  ;;  %v2317_v60 = vpop.permute.xlu1 %2316 }
 0x18e   :  { %v3076_v17 = vpop.f32.mrf.mxu1  ;;  %v2205_v15 = vpop.f32.mrf.mxu0 }
 0x18f   :  { %v2715_v29 = vpack.c.bf16 %v2369_v52, %v2369_v52  ;;  %v2106_v8 = vadd.f32 %v3075_v19, %v4274_v2  ;;  %v2258_v12 = vmax.f32 %v2198_v1, 0.0 }
 0x190   :  { %v3077_v58 = vpop.f32.mrf.mxu1  ;;  %v2207_v31 = vpop.f32.mrf.mxu0 }
 0x191   :  { %2450 = vst.msk [vmem:[%s4399_s4] sm:$0xf] %vm2449_vm1, %v2715_v29  ;;  %v2370_v37 = vmul.f32 %v2297_v0, %v2258_v12  ;;  %v3078_v41 = vadd.f32 %v3077_v58, %v3076_v17  ;;  %v2203_v16 = vadd.f32 %v2202_v9, %v2106_v8  ;;  %v2322_v8 = vpop.permute.xlu0 %2321 }
 0x192   :  { %v3079_v27 = vpop.f32.mrf.mxu1  ;;  %v2210_v21 = vpop.f32.mrf.mxu0 }
 0x193   :  { %v2716_v40 = vpack.c.bf16 %v2370_v37, %v2370_v37  ;;  %v2109_v22 = vadd.f32 %v3078_v41, %v4277_v42  ;;  %v2259_v25 = vmax.f32 %v2203_v16, 0.0 }
 0x194   :  { %v3080_v51 = vpop.f32.mrf.mxu1  ;;  %v2212_v2 = vpop.f32.mrf.mxu0 }
 0x195   :  { %2451 = vst.msk [vmem:[%s4399_s4 + $0x4] sm:$0xf] %vm2449_vm1, %v2716_v40  ;;  %v2371_v38 = vmul.f32 %v2302_v14, %v2259_v25  ;;  %v3081_v28 = vadd.f32 %v3080_v51, %v3079_v27  ;;  %v2206_v33 = vadd.f32 %v2205_v15, %v2109_v22 }
 0x196   :  { %v3082_v32 = vpop.f32.mrf.mxu1  ;;  %v2213_v53 = vpop.f32.mrf.mxu0 }
 0x197   :  { %v2717_v35 = vpack.c.bf16 %v2371_v38, %v2371_v38  ;;  %v2114_v10 = vadd.f32 %v3081_v28, %v4280_v30  ;;  %v2260_v49 = vmax.f32 %v2206_v33, 0.0 }
 0x198   :  { %v3083_v39 = vpop.f32.mrf.mxu1  ;;  %v2215_v42 = vpop.f32.mrf.mxu0 }
 0x199   :  { %2452 = vst.msk [vmem:[%s4399_s4 + $0x8] sm:$0xf] %vm2449_vm1, %v2717_v35  ;;  %v2372_v62 = vmul.f32 %v2307_v57, %v2260_v49  ;;  %v3084_v43 = vadd.f32 %v3083_v39, %v3082_v32  ;;  %v2211_v45 = vadd.f32 %v2210_v21, %v2114_v10  ;;  %v2327_v21 = vpop.permute.xlu1 %2326  ;;  %v2332_v35 = vpop.permute.xlu0 %2331 }
 0x19a   :  { %v3085_v47 = vpop.f32.mrf.mxu1  ;;  %v2218_v5 = vpop.f32.mrf.mxu0 }
 0x19b   :  { %v2718_v46 = vpack.c.bf16 %v2372_v62, %v2372_v62  ;;  %v2117_v48 = vadd.f32 %v3084_v43, %v4283_v13  ;;  %v2261_v11 = vmax.f32 %v2211_v45, 0.0 }
 0x19c   :  { %v3086_v30 = vpop.f32.mrf.mxu1  ;;  %v2220_v59 = vpop.f32.mrf.mxu0 }
 0x19d   :  { %2453 = vst.msk [vmem:[%s4399_s4 + $0xc] sm:$0xf] %vm2449_vm1, %v2718_v46  ;;  %v2214_v55 = vadd.f32 %v2213_v53, %v2117_v48  ;;  %v2373_v56 = vmul.f32 %v2312_v50, %v2261_v11  ;;  %v3087_v24 = vadd.f32 %v3086_v30, %v3085_v47  ;;  %v2337_v47 = vpop.permute.xlu1 %2336 }
 0x19e   :  { %v3088_v7 = vpop.f32.mrf.mxu1  ;;  %v2221_v9 = vpop.f32.mrf.mxu0 }
 0x19f   :  { %v2262_v20 = vmax.f32 %v2214_v55, 0.0  ;;  %v2719_v63 = vpack.c.bf16 %v2373_v56, %v2373_v56  ;;  %v2122_v4 = vadd.f32 %v3087_v24, %v4286_v3  ;;  %v2342_v24 = vpop.permute.xlu0 %2341 }
 0x1a0   :  { %v3089_v13 = vpop.f32.mrf.mxu1  ;;  %v2223_v52 = vpop.f32.mrf.mxu0 }
 0x1a1   :  { %v2374_v19 = vmul.f32 %v2317_v60, %v2262_v20  ;;  %2454 = vst.msk [vmem:[%s4399_s4 + $0x10] sm:$0xf] %vm2449_vm1, %v2719_v63  ;;  %v2219_v0 = vadd.f32 %v2218_v5, %v2122_v4  ;;  %v3090_v1 = vadd.f32 %v3089_v13, %v3088_v7 }
 0x1a2   :  { %v3091_v17 = vpop.f32.mrf.mxu1  ;;  %v2226_v15 = vpop.f32.mrf.mxu0 }
 0x1a3   :  { %v2720_v29 = vpack.c.bf16 %v2374_v19, %v2374_v19  ;;  %v2263_v12 = vmax.f32 %v2219_v0, 0.0  ;;  %v2125_v58 = vadd.f32 %v3090_v1, %v4289_v34  ;;  %v2347_v0 = vpop.permute.xlu1 %2346 }
 0x1a4   :  { %v3092_v31 = vpop.f32.mrf.mxu1  ;;  %v2228_v37 = vpop.f32.mrf.mxu0 }
 0x1a5   :  { %2455 = vst.msk [vmem:[%s4399_s4 + $0x14] sm:$0xf] %vm2449_vm1, %v2720_v29  ;;  %v2375_v3 = vmul.f32 %v2322_v8, %v2263_v12  ;;  %v2222_v41 = vadd.f32 %v2221_v9, %v2125_v58  ;;  %v3093_v14 = vadd.f32 %v3092_v31, %v3091_v17 }
 0x1a6   :  { %v3094_v16 = vpop.f32.mrf.mxu1  ;;  %v2229_v27 = vpop.f32.mrf.mxu0 }
 0x1a7   :  { %v2721_v40 = vpack.c.bf16 %v2375_v3, %v2375_v3  ;;  %v2264_v22 = vmax.f32 %v2222_v41, 0.0  ;;  %v2130_v25 = vadd.f32 %v3093_v14, %v4292_v44  ;;  %v2352_v3 = vpop.permute.xlu0 %2351 }
 0x1a8   :  { %v3095_v51 = vpop.f32.mrf.mxu1  ;;  %v2231_v2 = vpop.f32.mrf.mxu0 }
 0x1a9   :  { %2456 = vst.msk [vmem:[%s4399_s4 + $0x18] sm:$0xf] %vm2449_vm1, %v2721_v40  ;;  %v2376_v34 = vmul.f32 %v2327_v21, %v2264_v22  ;;  %v2227_v38 = vadd.f32 %v2226_v15, %v2130_v25  ;;  %v3096_v28 = vadd.f32 %v3095_v51, %v3094_v16  ;;  %v2357_v2 = vpop.permute.xlu1 %2356 }
 0x1aa   :  { %v3097_v33 = vpop.f32.mrf.mxu1  ;;  %v2234_v32 = vpop.f32.mrf.mxu0 }
 0x1ab   :  { %v2722_v53 = vpack.c.bf16 %v2376_v34, %v2376_v34  ;;  %v2265_v10 = vmax.f32 %v2227_v38, 0.0  ;;  %v2133_v57 = vadd.f32 %v3096_v28, %v4295_v54 }
 0x1ac   :  { %v3098_v49 = vpop.f32.mrf.mxu1  ;;  %v2236_v39 = vpop.f32.mrf.mxu0 }
 0x1ad   :  { %2457 = vst.msk [vmem:[%s4399_s4 + $0x1c] sm:$0xf] %vm2449_vm1, %v2722_v53  ;;  %v2377_v44 = vmul.f32 %v2332_v35, %v2265_v10  ;;  %v2230_v42 = vadd.f32 %v2229_v27, %v2133_v57  ;;  %v3099_v62 = vadd.f32 %v3098_v49, %v3097_v33  ;;  %v2362_v39 = vpop.permute.xlu0 %2361 }
 0x1ae   :  { %v3100_v43 = vpop.f32.mrf.mxu1  ;;  %v2237_v45 = vpop.f32.mrf.mxu0 }
 0x1af   :  { %v2723_v5 = vpack.c.bf16 %v2377_v44, %v2377_v44  ;;  %v2266_v46 = vmax.f32 %v2230_v42, 0.0  ;;  %v2138_v48 = vadd.f32 %v3099_v62, %v4298_v61 }
 0x1b0   :  { %v3101_v50 = vpop.f32.mrf.mxu1  ;;  %v2239_v11 = vpop.f32.mrf.mxu0 }
 0x1b1   :  { %2458 = vst.msk [vmem:[%s4399_s4 + $0x20] sm:$0xf] %vm2449_vm1, %v2723_v5  ;;  %v2378_v54 = vmul.f32 %v2337_v47, %v2266_v46  ;;  %v2235_v30 = vadd.f32 %v2234_v32, %v2138_v48  ;;  %v3102_v59 = vadd.f32 %v3101_v50, %v3100_v43  ;;  %v2367_v43 = vpop.permute.xlu1 %2366 }
 0x1b2   :  { %v3103_v55 = vpop.f32.mrf.mxu1  ;;  %v2242_v56 = vpop.f32.mrf.mxu0 }
 0x1b3   :  { %v2724_v7 = vpack.c.bf16 %v2378_v54, %v2378_v54  ;;  %v2267_v9 = vmax.f32 %v2235_v30, 0.0  ;;  %v2141_v60 = vadd.f32 %v3102_v59, %v4301_v6 }
 0x1b4   :  { %v3104_v20 = vpop.f32.mrf.mxu1  ;;  %v2244_v63 = vpop.f32.mrf.mxu0 }
 0x1b5   :  { %2459 = vst.msk [vmem:[%s4399_s4 + $0x24] sm:$0xf] %vm2449_vm1, %v2724_v7  ;;  %v2379_v61 = vmul.f32 %v2342_v24, %v2267_v9  ;;  %v2238_v4 = vadd.f32 %v2237_v45, %v2141_v60  ;;  %v3105_v13 = vadd.f32 %v3104_v20, %v3103_v55 }
 0x1b6   :  { %v3106_v52 = vpop.f32.mrf.mxu1  ;;  %v2245_v19 = vpop.f32.mrf.mxu0 }
 0x1b7   :  { %v2725_v1 = vpack.c.bf16 %v2379_v61, %v2379_v61  ;;  %v2268_v17 = vmax.f32 %v2238_v4, 0.0  ;;  %v2146_v15 = vadd.f32 %v3105_v13, %v4304_v23 }
 0x1b8   :  { %v3107_v29 = vpop.f32.mrf.mxu1  ;;  %v2247_v8 = vpop.f32.mrf.mxu0 }
 0x1b9   :  { %2460 = vst.msk [vmem:[%s4399_s4 + $0x28] sm:$0xf] %vm2449_vm1, %v2725_v1  ;;  %v2380_v6 = vmul.f32 %v2347_v0, %v2268_v17  ;;  %v2243_v12 = vadd.f32 %v2242_v56, %v2146_v15  ;;  %v3108_v58 = vadd.f32 %v3107_v29, %v3106_v52 }
 0x1ba   :  { %v3109_v31 = vpop.f32.mrf.mxu1  ;;  %v2250_v37 = vpop.f32.mrf.mxu0 }
 0x1bb   :  { %v2726_v41 = vpack.c.bf16 %v2380_v6, %v2380_v6  ;;  %v2269_v14 = vmax.f32 %v2243_v12, 0.0  ;;  %v2149_v16 = vadd.f32 %v3108_v58, %v4307_v26 }
 0x1bc   :  { %v3110_v27 = vpop.f32.mrf.mxu1  ;;  %v2252_v21 = vpop.f32.mrf.mxu0 }
 0x1bd   :  { %2461 = vst.msk [vmem:[%s4399_s4 + $0x2c] sm:$0xf] %vm2449_vm1, %v2726_v41  ;;  %v2381_v23 = vmul.f32 %v2352_v3, %v2269_v14  ;;  %v2246_v40 = vadd.f32 %v2245_v19, %v2149_v16  ;;  %v3111_v22 = vadd.f32 %v3110_v27, %v3109_v31 }
 0x1be   :  { %v3112_v25 = vpop.f32.mrf.mxu1  ;;  %v2253_v51 = vpop.f32.mrf.mxu0 }
 0x1bf   :  { %v2727_v34 = vpack.c.bf16 %v2381_v23, %v2381_v23  ;;  %v2270_v38 = vmax.f32 %v2246_v40, 0.0  ;;  %v2154_v28 = vadd.f32 %v3111_v22, %v4310_v36 }
 0x1c0   :  { %v3113_v33 = vpop.f32.mrf.mxu1  ;;  %v2255_v32 = vpop.f32.mrf.mxu0 }
 0x1c1   :  { %2462 = vst.msk [vmem:[%s4399_s4 + $0x30] sm:$0xf] %vm2449_vm1, %v2727_v34  ;;  %v2382_v26 = vmul.f32 %v2357_v2, %v2270_v38  ;;  %v2251_v53 = vadd.f32 %v2250_v37, %v2154_v28  ;;  %v3114_v35 = vadd.f32 %v3113_v33, %v3112_v25 }
 0x1c3   :  { %v2728_v10 = vpack.c.bf16 %v2382_v26, %v2382_v26  ;;  %v2271_v57 = vmax.f32 %v2251_v53, 0.0  ;;  %v2157_v49 = vadd.f32 %v3114_v35, %v4313_v18 }
 0x1c5   :  { %2463 = vst.msk [vmem:[%s4399_s4 + $0x34] sm:$0xf] %vm2449_vm1, %v2728_v10  ;;  %v2383_v36 = vmul.f32 %v2362_v39, %v2271_v57  ;;  %v2254_v44 = vadd.f32 %v2253_v51, %v2157_v49 }
 0x1c7   :  { %v2729_v42 = vpack.c.bf16 %v2383_v36, %v2383_v36  ;;  %v2272_v62 = vmax.f32 %v2254_v44, 0.0 }
 0x1c9   :  { %2464 = vst.msk [vmem:[%s4399_s4 + $0x38] sm:$0xf] %vm2449_vm1, %v2729_v42  ;;  %v2384_v45 = vmul.f32 %v2367_v43, %v2272_v62 }
 0x1cb   :  { %v2730_v47 = vpack.c.bf16 %v2384_v45, %v2384_v45 }
 0x1cd   :  { %2465 = vst.msk [vmem:[%s4399_s4 + $0x3c] sm:$0xf] %vm2449_vm1, %v2730_v47 }

// kernel: _forward_jit.23
= control target key start
LH: loop header
LB: loop body
LE: loop exit
PB: predicated region body
PF: predicated region fallthrough
CT: control target
= control target key end

     0   :  { %v760_v1 = vmov 0   ;;  %vm210_vm0 = vcmask 523264   ;;  %s991_s0 = inlined_call_operand.vmem [shape: bf16[128,192], index: 0, kind: input, shape index: {}]   ;;  %s992_s1 = inlined_call_operand.vmem [shape: bf16[192,128], index: 1, kind: input, shape index: {}]   ;;  %s993_s2 = inlined_call_operand.vmem [shape: f32[1,128], index: 2, kind: input, shape index: {}]   ;;  %s994_s3 = inlined_call_operand.vmem [shape: f32[128,1], index: 3, kind: input, shape index: {}]   ;;  %s995_s4 = inlined_call_operand.hbm [shape: bf16[128,128], index: 4, kind: output, shape index: {}]  }
   0x1   :  { %v702_v0 = vld [vmem:[%s992_s1 + $0x38] sm:$0xff]   ;;  %235 = vmatprep.subr.bf16.mxu0 %v760_v1  ;;  %672 = vmatprep.subr.bf16.mxu1 %v760_v1  ;;  %v703_v2 = vld [vmem:[%s992_s1 + $0x30] sm:$0xff]   ;;  %v704_v3 = vld [vmem:[%s992_s1 + $0x28] sm:$0xff]  }
   0x2   :  { %236 = vmatpush1.bf16.msra.mxu0 %v702_v0  ;;  %684 = vmatpush1.bf16.msra.mxu1 %v702_v0  ;;  %v705_v4 = vld [vmem:[%s992_s1 + $0x20] sm:$0xff]   ;;  %v706_v6 = vld [vmem:[%s992_s1 + $0x18] sm:$0xff]   ;;  %v707_v8 = vld [vmem:[%s992_s1 + $0x10] sm:$0xff]  }
   0x3   :  { %237 = vmatprep.subr.bf16.mxu0 %v760_v1  ;;  %673 = vmatprep.subr.bf16.mxu1 %v760_v1  ;;  %v716_v5 = vld [vmem:[%s991_s0 + $0x4] ss:$8 sps:$4 sm:$0xff]   ;;  %v350_v10 = vld [vmem:[%s994_s3 + $0x10] sm:$0xff]  ;;  %v351_v12 = vld [vmem:[%s994_s3 + $0x18] sm:$0xff] }
   0x4   :  { %701 = vset.pattern.permute.xlu1 %v760_v1  ;;  %700 = vset.pattern.permute.xlu0 %v760_v1  ;;  %v719_v7 = vld [vmem:[%s991_s0 + $0x44] ss:$8 sps:$4 sm:$0xff]  }
   0x5   :  { %585 = vmatprep.mubr.msk.bf16.mxu0 %vm210_vm0, %v716_v5  ;;  %589 = vmatprep.mubr.msk.bf16.mxu1 %vm210_vm0, %v719_v7  ;;  %v708_v9 = vld [vmem:[%s992_s1 + $0x8] sm:$0xff]   ;;  %v348_v11 = vld [vmem:[%s994_s3] sm:$0xff] }
   0x6   :  { %238 = vmatpush1.bf16.msra.mxu0 %v703_v2  ;;  %685 = vmatpush1.bf16.msra.mxu1 %v703_v2  ;;  %v349_v13 = vld [vmem:[%s994_s3 + $0x8] sm:$0xff]  ;;  %v709_v14 = vld [vmem:[%s992_s1] sm:$0xff]  }
   0x7   :  { %239 = vmatprep.subr.bf16.mxu0 %v760_v1  ;;  %674 = vmatprep.subr.bf16.mxu1 %v760_v1 }
   0x8   :  { %376 = vperm.xlu1 %701, %v350_v10   ;;  %366 = vperm.xlu0 %700, %v348_v11  }
   0xa   :  { %240 = vmatpush1.bf16.msra.mxu0 %v704_v3  ;;  %686 = vmatpush1.bf16.msra.mxu1 %v704_v3 }
   0xb   :  { %241 = vmatprep.subr.bf16.mxu0 %v760_v1  ;;  %675 = vmatprep.subr.bf16.mxu1 %v760_v1 }
   0xc   :  { %381 = vperm.xlu1 %701, %v351_v12   ;;  %371 = vperm.xlu0 %700, %v349_v13  }
   0xe   :  { %242 = vmatpush1.bf16.msra.mxu0 %v705_v4  ;;  %687 = vmatpush1.bf16.msra.mxu1 %v705_v4 }
   0xf   :  { %243 = vmatprep.subr.bf16.mxu0 %v760_v1  ;;  %676 = vmatprep.subr.bf16.mxu1 %v760_v1 }
  0x12   :  { %244 = vmatpush1.bf16.msra.mxu0 %v706_v6  ;;  %688 = vmatpush1.bf16.msra.mxu1 %v706_v6 }
  0x13   :  { %245 = vmatprep.subr.bf16.mxu0 %v760_v1  ;;  %677 = vmatprep.subr.bf16.mxu1 %v760_v1 }
  0x16   :  { %246 = vmatpush1.bf16.msra.mxu0 %v707_v8  ;;  %689 = vmatpush1.bf16.msra.mxu1 %v707_v8 }
  0x17   :  { %247 = vmatprep.subr.bf16.mxu0 %v760_v1  ;;  %678 = vmatprep.subr.bf16.mxu1 %v760_v1 }
  0x1a   :  { %248 = vmatpush1.bf16.msra.mxu0 %v708_v9  ;;  %690 = vmatpush1.bf16.msra.mxu1 %v708_v9 }
  0x1b   :  { %249 = vmatprep.subr.bf16.mxu0 %v760_v1  ;;  %679 = vmatprep.subr.bf16.mxu1 %v760_v1 }
  0x1c   :  { %9 = vsyncpa [#allocation3], 0  ;;  %v353_v15 = vld [vmem:[%s994_s3 + $0x28] sm:$0xff]  ;;  %v352_v16 = vld [vmem:[%s994_s3 + $0x20] sm:$0xff] }
  0x1d   :  { %v710_v17 = vld [vmem:[%s992_s1 + $0x58] sm:$0xff]   ;;  %391 = vperm.xlu1 %701, %v353_v15   ;;  %386 = vperm.xlu0 %700, %v352_v16   ;;  %v354_v19 = vld [vmem:[%s994_s3 + $0x30] sm:$0xff]  ;;  %v357_v21 = vld [vmem:[%s994_s3 + $0x48] sm:$0xff] }
  0x1e   :  { %250 = vmatpush1.bf16.msra.mxu0 %v709_v14  ;;  %691 = vmatpush1.bf16.msra.mxu1 %v709_v14  ;;  %v355_v18 = vld [vmem:[%s994_s3 + $0x38] sm:$0xff]  ;;  %v711_v20 = vld [vmem:[%s992_s1 + $0x50] sm:$0xff]   ;;  %v356_v22 = vld [vmem:[%s994_s3 + $0x40] sm:$0xff] }
  0x1f   :  { %259 = vmatprep.subr.bf16.mxu0 %v760_v1  ;;  %680 = vmatprep.subr.bf16.mxu1 %v760_v1  ;;  %v712_v23 = vld [vmem:[%s992_s1 + $0x48] sm:$0xff]   ;;  %v359_v24 = vld [vmem:[%s994_s3 + $0x58] sm:$0xff]  ;;  %v358_v25 = vld [vmem:[%s994_s3 + $0x50] sm:$0xff] }
  0x20   :  { %v713_v26 = vld [vmem:[%s992_s1 + $0x40] sm:$0xff]   ;;  %v361_v29 = vld [vmem:[%s994_s3 + $0x68] sm:$0xff]  ;;  %v720_v31 = vld [vmem:[%s991_s0 + $0x14] ss:$8 sps:$4 sm:$0xff]  }
  0x21   :  { %401 = vperm.xlu1 %701, %v355_v18   ;;  %396 = vperm.xlu0 %700, %v354_v19   ;;  %v714_v27 = vld [vmem:[%s991_s0] ss:$8 sps:$4 sm:$0xff]   ;;  %v722_v32 = vld [vmem:[%s991_s0 + $0x54] ss:$8 sps:$4 sm:$0xff]   ;;  %v724_v35 = vld [vmem:[%s991_s0 + $0x10] ss:$8 sps:$4 sm:$0xff]  }
  0x22   :  { %260 = vmatpush2.bf16.msra.mxu0 %v710_v17  ;;  %692 = vmatpush2.bf16.msra.mxu1 %v710_v17  ;;  %v717_v28 = vld [vmem:[%s991_s0 + $0x40] ss:$8 sps:$4 sm:$0xff]   ;;  %v363_v33 = vld [vmem:[%s994_s3 + $0x78] sm:$0xff]  ;;  %v362_v34 = vld [vmem:[%s994_s3 + $0x70] sm:$0xff] }
  0x23   :  { %261 = vmatprep.subr.bf16.mxu0 %v760_v1  ;;  %681 = vmatprep.subr.bf16.mxu1 %v760_v1  ;;  %v360_v30 = vld [vmem:[%s994_s3 + $0x60] sm:$0xff]  ;;  %v725_v36 = vld [vmem:[%s991_s0 + $0x50] ss:$8 sps:$4 sm:$0xff]   ;;  %v732_v41 = vld [vmem:[%s991_s0 + $0x34] ss:$8 sps:$4 sm:$0xff]  }
  0x24   :  { %v726_v37 = vld [vmem:[%s991_s0 + $0x24] ss:$8 sps:$4 sm:$0xff]   ;;  %v730_v39 = vld [vmem:[%s991_s0 + $0x20] ss:$8 sps:$4 sm:$0xff]   ;;  %v734_v42 = vld [vmem:[%s991_s0 + $0x74] ss:$8 sps:$4 sm:$0xff]  }
  0x25   :  { %411 = vperm.xlu1 %701, %v357_v21   ;;  %406 = vperm.xlu0 %700, %v356_v22   ;;  %v728_v38 = vld [vmem:[%s991_s0 + $0x64] ss:$8 sps:$4 sm:$0xff]   ;;  %v731_v40 = vld [vmem:[%s991_s0 + $0x60] ss:$8 sps:$4 sm:$0xff]   ;;  %v736_v43 = vld [vmem:[%s991_s0 + $0x30] ss:$8 sps:$4 sm:$0xff]  }
  0x26   :  { %262 = vmatpush2.bf16.msra.mxu0 %v711_v20  ;;  %693 = vmatpush2.bf16.msra.mxu1 %v711_v20  ;;  %v737_v44 = vld [vmem:[%s991_s0 + $0x70] ss:$8 sps:$4 sm:$0xff]   ;;  %v962_v51 = vld [vmem:[%s993_s2] ss:$0 sm:$0xff]  ;;  %s761_s0 = smov [#allocation2]  }
  0x27   :  { %263 = vmatprep.subr.bf16.mxu0 %v760_v1  ;;  %682 = vmatprep.subr.bf16.mxu1 %v760_v1  ;;  %s545_s2 = sshll.u32 %s761_s0, 4  ;;  %s546_s2 = int_to_ptr.vmem [resolvable:$true] %s545_s2 }
  0x28   :  { %s738_s24 = scalar_lea.vmem %s546_s2, 1024  ;;  %p743_p1 = scmp.lt.s32.totalorder %s546_s2, %s546_s2 }
  0x29   :  { %421 = vperm.xlu1 %701, %v359_v24   ;;  %416 = vperm.xlu0 %700, %v358_v25   ;;  %p739_p0 = scmp.ne.s32.totalorder %s546_s2, %s738_s24  ;;  %p744_p2 = scmp.lt.s32.totalorder %s738_s24, %s738_s24 }
  0x2a   :  { %264 = vmatpush2.bf16.msra.mxu0 %v712_v23  ;;  %694 = vmatpush2.bf16.msra.mxu1 %v712_v23 }
  0x2b   :  { %265 = vmatprep.subr.bf16.mxu0 %v760_v1  ;;  %683 = vmatprep.subr.bf16.mxu1 %v760_v1  ;;  %p745_p3 = por %p744_p2, %p743_p1 }
  0x2d   :  { %431 = vperm.xlu1 %701, %v361_v29   ;;  %426 = vperm.xlu0 %700, %v360_v30   ;;  %p746_p4 = pnand %p745_p3, %p739_p0 }
  0x2e   :  { %266 = vmatpush2.bf16.msra.mxu0 %v713_v26  ;;  %695 = vmatpush2.bf16.msra.mxu1 %v713_v26 }
  0x31   :  { %268 = vmatmul.mubr.bf16.vlgmr.msra.gmra.mxu0 %v714_v27  ;;  %300 = vmatmul.mubr.bf16.vlgmr.msra.gmra.mxu1 %v717_v28 }
  0x32   :  { %586 = vmatprep.mubr.msk.bf16.mxu0 %vm210_vm0, %v720_v31  ;;  %590 = vmatprep.mubr.msk.bf16.mxu1 %vm210_vm0, %v722_v32 }
  0x33   :  { %441 = vperm.xlu1 %701, %v363_v33   ;;  %436 = vperm.xlu0 %700, %v362_v34  }
  0x39   :  { %276 = vmatmul.mubr.bf16.gmra.mxu0 %v724_v35  ;;  %308 = vmatmul.mubr.bf16.gmra.mxu1 %v725_v36 }
  0x3a   :  { %587 = vmatprep.mubr.msk.bf16.mxu0 %vm210_vm0, %v726_v37  ;;  %591 = vmatprep.mubr.msk.bf16.mxu1 %vm210_vm0, %v728_v38 }
  0x41   :  { %284 = vmatmul.mubr.bf16.gmra.mxu0 %v730_v39  ;;  %316 = vmatmul.mubr.bf16.gmra.mxu1 %v731_v40 }
  0x42   :  { %588 = vmatprep.mubr.msk.bf16.mxu0 %vm210_vm0, %v732_v41  ;;  %592 = vmatprep.mubr.msk.bf16.mxu1 %vm210_vm0, %v734_v42 }
  0x49   :  { %292 = vmatmul.mubr.bf16.gmra.mxu0 %v736_v43  ;;  %324 = vmatmul.mubr.bf16.gmra.mxu1 %v737_v44 }
  0x83   :  { %v377_v45 = vpop.permute.xlu1 %376  ;;  %v367_v46 = vpop.permute.xlu0 %366 }
  0x87   :  { %v382_v47 = vpop.permute.xlu1 %381  ;;  %v372_v48 = vpop.permute.xlu0 %371 }
  0x98   :  { %v955_v49 = vpop.permute.xlu1 %391  ;;  %v957_v50 = vpop.permute.xlu0 %386 }
  0x9c   :  { %v964_v54 = vpop.permute.xlu1 %401  ;;  %v966_v55 = vpop.permute.xlu0 %396 }
  0xa0   :  { %v412_v4 = vpop.permute.xlu1 %411  ;;  %v407_v5 = vpop.permute.xlu0 %406 }
  0xa4   :  { %v422_v28 = vpop.permute.xlu1 %421  ;;  %v417_v29 = vpop.permute.xlu0 %416 }
  0xf1   :  { %v269_v52 = vpop.f32.mrf.mxu0  ;;  %v301_v53 = vpop.f32.mrf.mxu1 }
  0xf2   :  { %v270_v56 = vadd.f32 %v962_v51, %v269_v52  ;;  %v302_v57 = vadd.f32 %v962_v51, %v301_v53 }
  0xf3   :  { %v271_v58 = vpop.f32.mrf.mxu0  ;;  %v303_v59 = vpop.f32.mrf.mxu1 }
  0xf4   :  { %v332_v60 = vmax.f32 %v270_v56, 0.0  ;;  %v340_v61 = vmax.f32 %v302_v57, 0.0  ;;  %v432_v57 = vpop.permute.xlu1 %431  ;;  %v427_v58 = vpop.permute.xlu0 %426 }
  0xf5   :  { %v272_v62 = vpop.f32.mrf.mxu0  ;;  %v304_v63 = vpop.f32.mrf.mxu1 }
  0xf6   :  { %v273_v0 = vadd.f32 %v962_v51, %v272_v62  ;;  %v305_v1 = vadd.f32 %v962_v51, %v304_v63  ;;  %v444_v8 = vmul.f32 %v367_v46, %v332_v60  ;;  %v452_v9 = vmul.f32 %v407_v5, %v340_v61 }
  0xf7   :  { %v274_v2 = vpop.f32.mrf.mxu0  ;;  %v306_v3 = vpop.f32.mrf.mxu1 }
  0xf8   :  { %v333_v6 = vmax.f32 %v273_v0, 0.0  ;;  %v341_v7 = vmax.f32 %v305_v1, 0.0 }
  0xf9   :  { %v277_v10 = vpop.f32.mrf.mxu0  ;;  %v309_v11 = vpop.f32.mrf.mxu1 }
  0xfa   :  { %v445_v12 = vmul.f32 %v372_v48, %v333_v6  ;;  %v453_v13 = vmul.f32 %v412_v4, %v341_v7  ;;  %v278_v14 = vadd.f32 %v962_v51, %v277_v10  ;;  %v310_v15 = vadd.f32 %v962_v51, %v309_v11 }
  0xfb   :  { %v279_v16 = vpop.f32.mrf.mxu0  ;;  %v311_v17 = vpop.f32.mrf.mxu1 }
  0xfc   :  { %v628_v18 = vpack.c.bf16 %v445_v12, %v444_v8  ;;  %v648_v19 = vpack.c.bf16 %v453_v13, %v452_v9  ;;  %v334_v20 = vmax.f32 %v278_v14, 0.0  ;;  %v342_v21 = vmax.f32 %v310_v15, 0.0  ;;  %v442_v17 = vpop.permute.xlu1 %441 }
  0xfd   :  { %v280_v22 = vpop.f32.mrf.mxu0  ;;  %v312_v23 = vpop.f32.mrf.mxu1 }
  0xfe   :  { %629 = vst [vmem:[#allocation2] sm:$0xff] %v628_v18   ;;  %668 = vst [vmem:[#allocation2 + $0x20] sm:$0xff] %v648_v19   ;;  %v281_v24 = vadd.f32 %v962_v51, %v280_v22  ;;  %v313_v25 = vadd.f32 %v962_v51, %v312_v23  ;;  %v446_v32 = vmul.f32 %v377_v45, %v334_v20  ;;  %v437_v18 = vpop.permute.xlu0 %436 }
  0xff   :  { %v282_v26 = vpop.f32.mrf.mxu0  ;;  %v314_v27 = vpop.f32.mrf.mxu1  ;;  %v454_v33 = vmul.f32 %v417_v29, %v342_v21 }
 0x100   :  { %v335_v30 = vmax.f32 %v281_v24, 0.0  ;;  %v343_v31 = vmax.f32 %v313_v25, 0.0 }
 0x101   :  { %v285_v34 = vpop.f32.mrf.mxu0  ;;  %v317_v35 = vpop.f32.mrf.mxu1 }
 0x102   :  { %v447_v36 = vmul.f32 %v382_v47, %v335_v30  ;;  %v455_v37 = vmul.f32 %v422_v28, %v343_v31  ;;  %v286_v38 = vadd.f32 %v962_v51, %v285_v34  ;;  %v318_v39 = vadd.f32 %v962_v51, %v317_v35 }
 0x103   :  { %v287_v40 = vpop.f32.mrf.mxu0  ;;  %v319_v41 = vpop.f32.mrf.mxu1 }
 0x104   :  { %v633_v42 = vpack.c.bf16 %v447_v36, %v446_v32  ;;  %v653_v43 = vpack.c.bf16 %v455_v37, %v454_v33  ;;  %v336_v44 = vmax.f32 %v286_v38, 0.0  ;;  %v344_v46 = vmax.f32 %v318_v39, 0.0 }
 0x105   :  { %v288_v48 = vpop.f32.mrf.mxu0  ;;  %v320_v52 = vpop.f32.mrf.mxu1 }
 0x106   :  { %665 = vst [vmem:[#allocation2 + $0x8] sm:$0xff] %v633_v42   ;;  %669 = vst [vmem:[#allocation2 + $0x28] sm:$0xff] %v653_v43   ;;  %v289_v45 = vadd.f32 %v962_v51, %v288_v48  ;;  %v321_v53 = vadd.f32 %v962_v51, %v320_v52  ;;  %v448_v61 = vmul.f32 %v957_v50, %v336_v44 }
 0x107   :  { %v290_v47 = vpop.f32.mrf.mxu0  ;;  %v322_v56 = vpop.f32.mrf.mxu1  ;;  %v456_v62 = vmul.f32 %v427_v58, %v344_v46 }
 0x108   :  { %v337_v59 = vmax.f32 %v289_v45, 0.0  ;;  %v345_v60 = vmax.f32 %v321_v53, 0.0 }
 0x109   :  { %v293_v63 = vpop.f32.mrf.mxu0  ;;  %v325_v0 = vpop.f32.mrf.mxu1 }
 0x10a   :  { %v449_v1 = vmul.f32 %v955_v49, %v337_v59  ;;  %v457_v2 = vmul.f32 %v432_v57, %v345_v60  ;;  %v294_v3 = vadd.f32 %v962_v51, %v293_v63  ;;  %v326_v4 = vadd.f32 %v962_v51, %v325_v0 }
 0x10b   :  { %v295_v5 = vpop.f32.mrf.mxu0  ;;  %v327_v6 = vpop.f32.mrf.mxu1 }
 0x10c   :  { %v638_v7 = vpack.c.bf16 %v449_v1, %v448_v61  ;;  %v658_v8 = vpack.c.bf16 %v457_v2, %v456_v62  ;;  %v338_v11 = vmax.f32 %v294_v3, 0.0  ;;  %v346_v50 = vmax.f32 %v326_v4, 0.0 }
 0x10d   :  { %v296_v9 = vpop.f32.mrf.mxu0  ;;  %v328_v10 = vpop.f32.mrf.mxu1 }
 0x10e   :  { %666 = vst [vmem:[#allocation2 + $0x10] sm:$0xff] %v638_v7   ;;  %670 = vst [vmem:[#allocation2 + $0x30] sm:$0xff] %v658_v8   ;;  %v297_v12 = vadd.f32 %v962_v51, %v296_v9  ;;  %v329_v13 = vadd.f32 %v962_v51, %v328_v10  ;;  %v450_v19 = vmul.f32 %v966_v55, %v338_v11 }
 0x10f   :  { %v298_v49 = vpop.f32.mrf.mxu0  ;;  %v330_v14 = vpop.f32.mrf.mxu1  ;;  %v458_v20 = vmul.f32 %v437_v18, %v346_v50 }
 0x110   :  { %v339_v15 = vmax.f32 %v297_v12, 0.0  ;;  %v347_v16 = vmax.f32 %v329_v13, 0.0 }
 0x112   :  { %v451_v21 = vmul.f32 %v964_v54, %v339_v15  ;;  %v459_v22 = vmul.f32 %v442_v17, %v347_v16 }
 0x114   :  { %v643_v23 = vpack.c.bf16 %v451_v21, %v450_v19  ;;  %v663_v24 = vpack.c.bf16 %v459_v22, %v458_v20 }
 0x116   :  { %667 = vst [vmem:[#allocation2 + $0x18] sm:$0xff] %v643_v23   ;;  %671 = vst [vmem:[#allocation2 + $0x38] sm:$0xff] %v663_v24  }
 0x117   :  { %749 = shalt.err (!%p746_p4)
}
 0x118   :  { %s762_s25 = smov 64   ;;  %s763_s26 = smov 4  }
 0x119   :  { %551 = dma.vmem_to_hbm [thread:$0]  %s546_s2, 1024, %s995_s4, [#allocation3], %s762_s25, %s762_s25, %s763_s26  }
 0x11a   :  { %758 = dma.done.wait [#allocation3], 1024  }
 0x11b   :  { %759 = vsyncadd [#allocation3], 4294966272 }
 0x11c   :  { %555 = vsyncpa [#allocation3], 1 }

</bundles_post_ra>
